<compile_context>
chip_gen: v5e
topology: v5e:2x2
jax: 0.10.0
libtpu: 0.0.40
codegen_flags: <defaults>
</compile_context>

<pallas_src>
import functools
import math

import jax
import jax.numpy as jnp
from jax.experimental import pallas as pl
from jax.experimental.pallas import tpu as pltpu


def _round_up(x, mult):
    return ((x + mult - 1) // mult) * mult


def _adaface_kernel(nemb_ref, w_ref, mp_ref, scaled_ref, mmax_ref, sexp_ref,
                    *, tc, c_real, mask_tail):
    """One (batch-tile, class-tile) step of the AdaFace hot path.

    nemb_ref : (tb, E)  bf16 L2-normalized embeddings (resident across class tiles)
    w_ref    : (tc, E)  f32 raw weight tile (row-normalized in-kernel)
    mp_ref   : (tb, 4)  f32 per-row margin constants
                        [s*cos(m*ms), s*sin(m*ms), s*(m + m*ms), 0]
    scaled_ref : (tb, tc) f32 scaled_cosine_m output tile
    mmax_ref   : (tb, 1)  f32 running row max          (accumulator output)
    sexp_ref   : (tb, 1)  f32 running sum exp(x - max) (accumulator output)
    """
    k = pl.program_id(1)  # class-tile index (last, "arbitrary" grid axis)

    @pl.when(k == 0)
    def _():
        mmax_ref[...] = jnp.full_like(mmax_ref, -jnp.inf)
        sexp_ref[...] = jnp.zeros_like(sexp_ref)

    # Row-wise L2 normalize this weight tile (torch F.normalize, eps=1e-12),
    # using rsqrt (EUP slot) instead of a divide, then cast to bf16 for MXU.
    w = w_ref[...]
    inv_norm = jax.lax.rsqrt(
        jnp.maximum(jnp.sum(w * w, axis=1, keepdims=True), 1e-24))
    wn = (w * inv_norm).astype(jnp.bfloat16)

    # cosine = <norm_emb, norm_w>: contract dim 1 of BOTH operands so the
    # (tc, E) tile is consumed in its native layout (no transpose).
    cosine = jax.lax.dot_general(
        nemb_ref[...], wn,
        dimension_numbers=(((1,), (1,)), ((), ())),
        preferred_element_type=jnp.float32)
    cosine = jnp.clip(cosine, -1.0, 1.0)

    # AdaFace margin: cos(arccos(c) - m*ms) = c*cos(m*ms) + sqrt(1-c^2)*sin(m*ms)
    # All per-row constants were precomputed in the wrapper (mp_ref).
    mp = mp_ref[...]
    sin_theta = jnp.sqrt(jnp.maximum(1.0 - cosine * cosine, 0.0))
    scaled = cosine * mp[:, 0:1] + sin_theta * mp[:, 1:2] - mp[:, 2:3]

    if mask_tail:
        # Padded class columns (beyond the real class count) get a huge
        # negative logit so they contribute 0 to the softmax statistics.
        col = k * tc + jax.lax.broadcasted_iota(jnp.int32, scaled.shape, 1)
        scaled = jnp.where(col < c_real, scaled, -1e30)

    scaled_ref[...] = scaled

    # Online (numerically stabilized) softmax statistics, accumulated directly
    # in the resident output refs (revisited across the class axis).
    m_prev = mmax_ref[...]
    m_new = jnp.maximum(m_prev, jnp.max(scaled, axis=1, keepdims=True))
    corr = jnp.exp(m_prev - m_new)              # exp(-inf - finite) = 0 at k==0
    sexp_ref[...] = sexp_ref[...] * corr + jnp.sum(
        jnp.exp(scaled - m_new), axis=1, keepdims=True)
    mmax_ref[...] = m_new


def adaface_scaled_logits(norm_emb_bf16, weights_f32, mparams, *,
                          num_classes, tc=None, tb=None):
    """Returns (scaled_cosine_m (B, C_pad), row_max (B,1), row_sumexp (B,1))."""
    B, E = norm_emb_bf16.shape
    C = num_classes
    assert weights_f32.shape[0] == C and weights_f32.shape[1] == E

    if tc is None:
        tc = min(1024, _round_up(C, 128))
    c_pad = _round_up(C, tc)
    if c_pad != C:
        # TODO(synk): in production pad the class-weight parameter once at init
        # instead of per forward call.
        weights_f32 = jnp.pad(weights_f32, ((0, c_pad - C), (0, 0)))

    if tb is None:
        tb = B
        for cand in (256, 128):
            if B > cand and B % cand == 0:
                tb = cand
                break

    grid = (B // tb, c_pad // tc)

    kernel = functools.partial(_adaface_kernel, tc=tc, c_real=C,
                               mask_tail=(c_pad != C))

    # Rough double-buffered VMEM budget -> scoped limit (kept < v7x 64 MiB).
    vmem_need = 2 * (tb * E * 2 + tc * E * 4 + tb * 4 * 4 + tb * tc * 4
                     + 2 * tb * 4)
    vmem_limit = int(min(max(3 * vmem_need, 16 * 2**20), 48 * 2**20))

    return pl.pallas_call(
        kernel,
        out_shape=(jax.ShapeDtypeStruct((B, c_pad), jnp.float32),
                   jax.ShapeDtypeStruct((B, 1), jnp.float32),
                   jax.ShapeDtypeStruct((B, 1), jnp.float32)),
        grid_spec=pltpu.PrefetchScalarGridSpec(
            num_scalar_prefetch=0,
            grid=grid,
            in_specs=[
                pl.BlockSpec((tb, E), lambda bi, k: (bi, 0)),   # norm embeddings
                pl.BlockSpec((tc, E), lambda bi, k: (k, 0)),    # weight class tile
                pl.BlockSpec((tb, 4), lambda bi, k: (bi, 0)),   # margin constants
            ],
            out_specs=[
                pl.BlockSpec((tb, tc), lambda bi, k: (bi, k)),  # scaled_cosine_m
                pl.BlockSpec((tb, 1), lambda bi, k: (bi, 0)),   # running row max
                pl.BlockSpec((tb, 1), lambda bi, k: (bi, 0)),   # running sum exp
            ]),
        compiler_params=pltpu.CompilerParams(
            dimension_semantics=("parallel", "arbitrary"),
            vmem_limit_bytes=vmem_limit),
    )(norm_emb_bf16, weights_f32, mparams)


def partial_fc_adaface_forward(x, labels, weights, batch_mean, batch_std, *,
                               class_start, local_num,
                               m=0.4, h=0.333, s=64.0, t_alpha=1.0, eps=1e-3):
    """Mirrors PartialFC_AdaFace.forward for world_size == 1.

    Returns (loss, (new_batch_mean, new_batch_std))  — the second element is
    the updated registered-buffer state (torch updates it in place).
    """
    B, E = x.shape
    C = weights.shape[0]

    x_norm_full = jnp.linalg.norm(x, axis=1, keepdims=True)
    x_norms = jnp.maximum(x_norm_full, 1e-8)                       # (B, 1)
    labels = labels.reshape(-1, 1)
    index_positive = ((class_start <= labels) &
                      (labels < class_start + local_num))[:, 0]    # (B,)

    # torch.nn.functional.normalize (eps = 1e-12)
    norm_emb = x / jnp.maximum(x_norm_full, 1e-12)

    safe_norms = jnp.clip(x_norms, 0.001, 100.0)

    # torch: mean / unbiased std of safe_norms; all_reduce(SUM)/world_size is
    # an identity for world_size == 1.
    # TODO(synk): cross-device dist.all_reduce omitted (world_size == 1).
    mean = jnp.mean(safe_norms)
    std = jnp.std(safe_norms, ddof=1) if B > 1 else jnp.float32(0.0)  # guard B==1
    new_batch_mean = mean * t_alpha + (1.0 - t_alpha) * batch_mean
    new_batch_std = std * t_alpha + (1.0 - t_alpha) * batch_std

    margin_scaler = (safe_norms - new_batch_mean) / (new_batch_std + eps)
    margin_scaler = jnp.clip(margin_scaler * h, -1.0, 1.0)          # (B, 1)

    # Hoisted per-row margin constants (review item): recomputing cos/sin per
    # class tile inside the kernel is redundant across the whole class axis.
    a = m * margin_scaler
    mparams = jnp.concatenate(
        [s * jnp.cos(a), s * jnp.sin(a), s * (m + a), jnp.zeros_like(a)],
        axis=1).astype(jnp.float32)                                 # (B, 4)

    scaled, row_max, row_sumexp = adaface_scaled_logits(
        norm_emb.astype(jnp.bfloat16),
        weights.astype(jnp.float32),
        mparams,
        num_classes=C)

    # world_size == 1 -> all_reduce(sum_logits_exp) is an identity.
    scaled = scaled[:, :C]                                          # drop padding
    lse = row_max + jnp.log(row_sumexp)                             # (B, 1)
    # torch: prob.clamp_min(1e-30).log()  ==  max(scaled - lse, log(1e-30))
    log_prob = jnp.maximum(scaled - lse, math.log(1e-30))

    num_pos = jnp.sum(index_positive)
    masked_sum = jnp.sum(jnp.where(index_positive[:, None], log_prob, 0.0))
    ce_loss = -(masked_sum /
                (jnp.maximum(num_pos, 1).astype(jnp.float32) * C))
    fallback = jnp.mean(scaled) * 1e-30
    loss = jnp.where(num_pos > 0, ce_loss, fallback)
    return loss, (new_batch_mean, new_batch_std)


if __name__ == "__main__":
    # Small shapes consistent with the module (embedding / classnum scaled
    # down).  C is deliberately NOT a multiple of 128 to exercise the
    # pad-and-mask path used for the real classnum (e.g. 70722).
    B, E, C = 32, 256, 2000
    rank, world_size = 0, 1
    num_classes = int(math.ceil(C / world_size) * world_size)
    local_num = num_classes // world_size
    class_start = local_num * rank

    key = jax.random.PRNGKey(0)
    kx, kw, kl = jax.random.split(key, 3)
    x = jax.random.normal(kx, (B, E), dtype=jnp.float32)
    weights = 0.01 * jax.random.normal(kw, (local_num, E), dtype=jnp.float32)
    labels = jax.random.randint(kl, (B,), 0, num_classes, dtype=jnp.int32)

    batch_mean = jnp.ones((1,), jnp.float32) * 20.0   # registered buffer init
    batch_std = jnp.ones((1,), jnp.float32) * 100.0   # registered buffer init

    loss, (new_bm, new_bs) = partial_fc_adaface_forward(
        x, labels, weights, batch_mean, batch_std,
        class_start=class_start, local_num=local_num,
        m=0.4, h=0.333, s=64.0, t_alpha=1.0)

    jax.block_until_ready((loss, new_bm, new_bs))
    assert bool(jnp.isfinite(loss)), "loss is not finite"
    print("KERNEL_OK")
</pallas_src>

<mosaic_0001>
module attributes {stable_mosaic.version = 11 : i64} {
  func.func @_adaface_kernel(%arg0: i32, %arg1: i32, %arg2: memref<32x256xbf16, #tpu.memory_space<vmem>>, %arg3: memref<1024x256xf32, #tpu.memory_space<vmem>>, %arg4: memref<32x4xf32, #tpu.memory_space<vmem>>, %arg5: memref<32x1024xf32, #tpu.memory_space<vmem>>, %arg6: memref<32x1xf32, #tpu.memory_space<vmem>>, %arg7: memref<32x1xf32, #tpu.memory_space<vmem>>) attributes {dimension_semantics = [#tpu.dimension_semantics<parallel>, #tpu.dimension_semantics<arbitrary>], iteration_bounds = array<i64: 1, 2>, scalar_prefetch = 0 : i64, scratch_operands = 0 : i64, tpu.core_type = #tpu.core_type<tc>, window_params = [{transform_indices = @transform_0, window_bounds = array<i64: 32, 256>}, {transform_indices = @transform_1, window_bounds = array<i64: 1024, 256>}, {transform_indices = @transform_2, window_bounds = array<i64: 32, 4>}, {transform_indices = @transform_3, window_bounds = array<i64: 32, 1024>}, {transform_indices = @transform_4, window_bounds = array<i64: 32, 1>}, {transform_indices = @transform_5, window_bounds = array<i64: 32, 1>}]} {
    %c0_i32 = arith.constant 0 : i32
    %0 = arith.cmpi eq, %arg1, %c0_i32 : i32
    %1 = arith.extui %0 : i1 to i32
    %c0_i32_0 = arith.constant 0 : i32
    %2 = arith.cmpi ne, %1, %c0_i32_0 : i32
    scf.if %2 {
      %cst_25 = arith.constant 0xFF800000 : f32
      %61 = vector.broadcast %cst_25 : f32 to vector<32x1xf32>
      %c0_26 = arith.constant 0 : index
      %c0_27 = arith.constant 0 : index
      %62 = vector.load %arg6[%c0_26, %c0_27] : memref<32x1xf32, #tpu.memory_space<vmem>>, vector<32x1xf32>
      tpu.vector_store %arg6[%c0_26, %c0_27], %61 {strides = array<i32>} : memref<32x1xf32, #tpu.memory_space<vmem>>, vector<32x1xf32>,
      %cst_28 = arith.constant 0.000000e+00 : f32
      %63 = vector.broadcast %cst_28 : f32 to vector<32x1xf32>
      %c0_29 = arith.constant 0 : index
      %c0_30 = arith.constant 0 : index
      %64 = vector.load %arg7[%c0_29, %c0_30] : memref<32x1xf32, #tpu.memory_space<vmem>>, vector<32x1xf32>
      tpu.vector_store %arg7[%c0_29, %c0_30], %63 {strides = array<i32>} : memref<32x1xf32, #tpu.memory_space<vmem>>, vector<32x1xf32>,
    } else {
    }
    %c0 = arith.constant 0 : index
    %c0_1 = arith.constant 0 : index
    %3 = vector.load %arg3[%c0, %c0_1] : memref<1024x256xf32, #tpu.memory_space<vmem>>, vector<1024x256xf32>
    %4 = arith.mulf %3, %3 : vector<1024x256xf32>
    %cst = arith.constant dense<0.000000e+00> : vector<1024xf32>
    %5 = vector.multi_reduction <add>, %4, %cst [1] : vector<1024x256xf32> to vector<1024xf32>
    %6 = vector.shape_cast %5 : vector<1024xf32> to vector<1024x1xf32>
    %cst_2 = arith.constant 1.000000e-24 : f32
    %7 = vector.broadcast %cst_2 : f32 to vector<1024x1xf32>
    %8 = arith.maximumf %6, %7 : vector<1024x1xf32>
    %9 = math.rsqrt %8 : vector<1024x1xf32>
    %10 = vector.broadcast %9 : vector<1024x1xf32> to vector<1024x256xf32>
    %11 = arith.mulf %3, %10 : vector<1024x256xf32>
    %12 = arith.truncf %11 : vector<1024x256xf32> to vector<1024x256xbf16>
    %c0_3 = arith.constant 0 : index
    %c0_4 = arith.constant 0 : index
    %13 = vector.load %arg2[%c0_3, %c0_4] : memref<32x256xbf16, #tpu.memory_space<vmem>>, vector<32x256xbf16>
    %cst_5 = arith.constant dense<0.000000e+00> : vector<32x1024xf32>
    %14 = tpu.matmul %13, %12, %cst_5 {dimension_numbers = #tpu.dot_dimension_numbers<[1], [1], [0], [0], [0, 0, 1, 0], [], []>} : vector<32x256xbf16>, vector<1024x256xbf16>, vector<32x1024xf32> -> vector<32x1024xf32>
    %cst_6 = arith.constant -1.000000e+00 : f32
    %cst_7 = arith.constant 1.000000e+00 : f32
    %15 = vector.broadcast %cst_6 : f32 to vector<32x1024xf32>
    %16 = arith.maximumf %15, %14 : vector<32x1024xf32>
    %17 = vector.broadcast %cst_7 : f32 to vector<32x1024xf32>
    %18 = arith.minimumf %17, %16 : vector<32x1024xf32>
    %c0_8 = arith.constant 0 : index
    %c0_9 = arith.constant 0 : index
    %19 = vector.load %arg4[%c0_8, %c0_9] : memref<32x4xf32, #tpu.memory_space<vmem>>, vector<32x4xf32>
    %20 = arith.mulf %18, %18 : vector<32x1024xf32>
    %cst_10 = arith.constant 1.000000e+00 : f32
    %21 = vector.broadcast %cst_10 : f32 to vector<32x1024xf32>
    %22 = arith.subf %21, %20 : vector<32x1024xf32>
    %cst_11 = arith.constant 0.000000e+00 : f32
    %23 = vector.broadcast %cst_11 : f32 to vector<32x1024xf32>
    %24 = arith.maximumf %22, %23 : vector<32x1024xf32>
    %25 = math.sqrt %24 : vector<32x1024xf32>
    %26 = vector.extract_strided_slice %19 {offsets = [0, 0], sizes = [32, 1], strides = [1, 1]} : vector<32x4xf32> to vector<32x1xf32>
    %27 = vector.broadcast %26 : vector<32x1xf32> to vector<32x1024xf32>
    %28 = arith.mulf %18, %27 : vector<32x1024xf32>
    %29 = vector.extract_strided_slice %19 {offsets = [0, 1], sizes = [32, 1], strides = [1, 1]} : vector<32x4xf32> to vector<32x1xf32>
    %30 = vector.broadcast %29 : vector<32x1xf32> to vector<32x1024xf32>
    %31 = arith.mulf %25, %30 : vector<32x1024xf32>
    %32 = arith.addf %28, %31 : vector<32x1024xf32>
    %33 = vector.extract_strided_slice %19 {offsets = [0, 2], sizes = [32, 1], strides = [1, 1]} : vector<32x4xf32> to vector<32x1xf32>
    %34 = vector.broadcast %33 : vector<32x1xf32> to vector<32x1024xf32>
    %35 = arith.subf %32, %34 : vector<32x1024xf32>
    %c1024_i32 = arith.constant 1024 : i32
    %36 = arith.muli %arg1, %c1024_i32 : i32
    %37 = tpu.iota {dimensions = array<i32: 1>} : vector<32x1024xi32>
    %38 = vector.broadcast %36 : i32 to vector<32x1024xi32>
    %39 = arith.addi %38, %37 : vector<32x1024xi32>
    %c2000_i32 = arith.constant 2000 : i32
    %40 = vector.broadcast %c2000_i32 : i32 to vector<32x1024xi32>
    %41 = arith.cmpi slt, %39, %40 : vector<32x1024xi32>
    %cst_12 = arith.constant -1.000000e+30 : f32
    %42 = vector.broadcast %cst_12 : f32 to vector<32x1024xf32>
    %43 = arith.select %41, %35, %42 : vector<32x1024xi1>, vector<32x1024xf32>
    %c0_13 = arith.constant 0 : index
    %c0_14 = arith.constant 0 : index
    %44 = vector.load %arg5[%c0_13, %c0_14] : memref<32x1024xf32, #tpu.memory_space<vmem>>, vector<32x1024xf32>
    tpu.vector_store %arg5[%c0_13, %c0_14], %43 {strides = array<i32>} : memref<32x1024xf32, #tpu.memory_space<vmem>>, vector<32x1024xf32>,
    %c0_15 = arith.constant 0 : index
    %c0_16 = arith.constant 0 : index
    %45 = vector.load %arg6[%c0_15, %c0_16] : memref<32x1xf32, #tpu.memory_space<vmem>>, vector<32x1xf32>
    %cst_17 = arith.constant dense<0xFF800000> : vector<32xf32>
    %46 = vector.multi_reduction <maximumf>, %43, %cst_17 [1] : vector<32x1024xf32> to vector<32xf32>
    %47 = vector.shape_cast %46 : vector<32xf32> to vector<32x1xf32>
    %48 = arith.maximumf %45, %47 : vector<32x1xf32>
    %49 = arith.subf %45, %48 : vector<32x1xf32>
    %50 = math.exp %49 : vector<32x1xf32>
    %c0_18 = arith.constant 0 : index
    %c0_19 = arith.constant 0 : index
    %51 = vector.load %arg7[%c0_18, %c0_19] : memref<32x1xf32, #tpu.memory_space<vmem>>, vector<32x1xf32>
    %52 = arith.mulf %51, %50 : vector<32x1xf32>
    %53 = vector.broadcast %48 : vector<32x1xf32> to vector<32x1024xf32>
    %54 = arith.subf %43, %53 : vector<32x1024xf32>
    %55 = math.exp %54 : vector<32x1024xf32>
    %cst_20 = arith.constant dense<0.000000e+00> : vector<32xf32>
    %56 = vector.multi_reduction <add>, %55, %cst_20 [1] : vector<32x1024xf32> to vector<32xf32>
    %57 = vector.shape_cast %56 : vector<32xf32> to vector<32x1xf32>
    %58 = arith.addf %52, %57 : vector<32x1xf32>
    %c0_21 = arith.constant 0 : index
    %c0_22 = arith.constant 0 : index
    %59 = vector.load %arg7[%c0_21, %c0_22] : memref<32x1xf32, #tpu.memory_space<vmem>>, vector<32x1xf32>
    tpu.vector_store %arg7[%c0_21, %c0_22], %58 {strides = array<i32>} : memref<32x1xf32, #tpu.memory_space<vmem>>, vector<32x1xf32>,
    %c0_23 = arith.constant 0 : index
    %c0_24 = arith.constant 0 : index
    %60 = vector.load %arg6[%c0_23, %c0_24] : memref<32x1xf32, #tpu.memory_space<vmem>>, vector<32x1xf32>
    tpu.vector_store %arg6[%c0_23, %c0_24], %48 {strides = array<i32>} : memref<32x1xf32, #tpu.memory_space<vmem>>, vector<32x1xf32>,
    return
  }
  func.func @transform_0(%arg0: i32, %arg1: i32) -> (i32, i32) {
    %c0_i32 = arith.constant 0 : i32
    %c0_i32_0 = arith.constant 0 : i32
    return %arg0, %c0_i32 : i32, i32
  }
  func.func @transform_1(%arg0: i32, %arg1: i32) -> (i32, i32) {
    %c0_i32 = arith.constant 0 : i32
    %c0_i32_0 = arith.constant 0 : i32
    return %arg1, %c0_i32 : i32, i32
  }
  func.func @transform_2(%arg0: i32, %arg1: i32) -> (i32, i32) {
    %c0_i32 = arith.constant 0 : i32
    %c0_i32_0 = arith.constant 0 : i32
    return %arg0, %c0_i32 : i32, i32
  }
  func.func @transform_3(%arg0: i32, %arg1: i32) -> (i32, i32) {
    %c0_i32 = arith.constant 0 : i32
    return %arg0, %arg1 : i32, i32
  }
  func.func @transform_4(%arg0: i32, %arg1: i32) -> (i32, i32) {
    %c0_i32 = arith.constant 0 : i32
    %c0_i32_0 = arith.constant 0 : i32
    return %arg0, %c0_i32 : i32, i32
  }
  func.func @transform_5(%arg0: i32, %arg1: i32) -> (i32, i32) {
    %c0_i32 = arith.constant 0 : i32
    %c0_i32_0 = arith.constant 0 : i32
    return %arg0, %c0_i32 : i32, i32
  }
}

</mosaic_0001>

<bundles_post_ra>
// kernel: tpu_custom_call.1
= control target key start
LH: loop header
LB: loop body
LE: loop exit
PB: predicated region body
PF: predicated region fallthrough
CT: control target
= control target key end

     0   :  { %s10308_s0 = inlined_call_operand.hbm [shape: bf16[32,256], index: 0, kind: input, shape index: {}]   ;;  %s10309_s1 = inlined_call_operand.hbm [shape: f32[2048,256], index: 1, kind: input, shape index: {}]   ;;  %s10310_s2 = inlined_call_operand.vmem [shape: f32[32,4], index: 2, kind: input, shape index: {}]   ;;  %s10311_s3 = inlined_call_operand.hbm [shape: f32[32,2048], index: 3, kind: output, shape index: {0}]   ;;  %s10312_s4 = inlined_call_operand.vmem [shape: f32[32,1], index: 4, kind: output, shape index: {1}]   ;;  %s10313_s5 = inlined_call_operand.vmem [shape: f32[32,1], index: 5, kind: output, shape index: {2}]  }
   0x1   :  { %10336 = sst [smem:[#allocation21_spill]] %s10308_s0 }
   0x2   :  { %11 = vsyncpa [#allocation3], 0 }
   0x3   :  { %12 = vsyncpa [#allocation6], 0 }
   0x4   :  { %14 = vsyncpa [#allocation6 + $0x1], 0 }
   0x5   :  { %15 = vsyncpa [#allocation4], 0 }
   0x6   :  { %17 = vsyncpa [#allocation4 + $0x1], 0  ;;  %s5624_s18 = smov 0   ;;  %s5626_s19 = smov 0  }
   0x7   :  { %s5628_s20 = smov 0   ;;  %s5630_s21 = smov 0  }
   0x8   :  { %s5632_s22 = smov 0   ;;  %s5634_s23 = smov 0  }
   0x9 LB: > { %10337 = sst [smem:[#allocation11_spill]] %s5579_s23  ;;  %s4610_s24 = sadd.s32 4294967295, %s5579_s23   ;;  %s5579_s23 = sphi %s5634_s23, %s23_s23   ;;  %s5575_s22 = sphi %s5632_s22, %s10440_s22   ;;  %s5571_s21 = sphi %s5630_s21, %s10439_s21   ;;  %s5567_s20 = sphi %s5628_s20, %s10438_s20   ;;  %s5563_s19 = sphi %s5626_s19, %s10437_s19   ;;  %s5559_s18 = sphi %s5624_s18, %s10436_s18  }
   0xa   : > { %s4611_s25 = sadd.s32 4294967294, %s5579_s23   ;;  %p81_p0 = scmp.ne.s32.totalorder %s5563_s19, %s5559_s18 }
   0xb   : > { %p5658_p1 = scmp.eq.s32.totalorder %s4610_s24, 0  ;;  %p5662_p2 = scmp.eq.s32.totalorder %s4610_s24, 1 }
   0xc   : > { %p139_p3 = scmp.eq.s32.totalorder %s4611_s25, 1  ;;  %p4612_p5 = scmp.ge.s32.totalorder %s5579_s23, 1 }
   0xd   : > { %p5668_p4 = por %p5658_p1, %p81_p0  ;;  %p198_p7 = scmp.lt.s32.totalorder %s5579_s23, 3 }
   0xe   : > { %p5673_p6 = por %p139_p3, %p81_p0  ;;  %s10342_s0 = sld [smem:[#allocation21_spill]] }
   0xf   : > { %p5681_p8 = pnand %p4612_p5, %p198_p7  ;;  %s5581_s9 = smov [#allocation2]  }
  0x10   : > { %s215_s10 = sshll.u32 %s5581_s9, 4  ;;  %p4615_p11 = scmp.ge.s32.totalorder %s5579_s23, 2  ;;  %s216_s10 = int_to_ptr.vmem [resolvable:$true] %s215_s10 }
  0x11   : > { %p4698_p9 = pneg %p5681_p8  ;;  %s5582_s11 = smov 128  }
  0x12   : > { %s5583_s12 = smov 8   ;;  %s32_s13 = sadd.s32 1, %s5575_s22 }
  0x13   : > { %p4699_p10 = pnand %p4698_p9, %p5658_p1  ;;  %p33_p12 = scmp.ge.s32.totalorder %s32_s13, 2 }
  0x14   : > { %s213_s7 = sshll.u32 %s10342_s0, 4  ;;  %s68_s14 = sadd.s32 1, %s5567_s20  ;;  %s214_s7 = int_to_ptr.hbm [resolvable:$true] %s213_s7 }
  0x15   : > { %4701 = dma.hbm_to_vmem [thread:$0]  (!%p4699_p10), %s214_s7, 512, %s216_s10, [#allocation3], %s5582_s11, %s5582_s11, %s5583_s12  }
  0x16   : > { %p75_p13 = scmp.ne.s32.totalorder %s5567_s20, %s5563_s19  ;;  %p76_p0 = scmp.eq.s32.totalorder %s5579_s23, 0 }
  0x17   : > { %s10442_s13 = smov (%p33_p12, %s32_s13), 0  ;;  %p4711_p7 = scmp.lt.s32.totalorder %s5579_s23, 2 }
  0x18   : > { %10344 = sst [smem:[#allocation12_spill]] %s10442_s13  ;;  %p5697_p3 = por %p76_p0, %p75_p13 }
  0x19   : > { %p5703_p5 = por %p5662_p2, %p75_p13  ;;  %s65_s17 = ssub.s32 %s5575_s22, %s10442_s13 }
  0x1a   : > { %p66_p9 = scmp.eq.s32.totalorder %s65_s17, 0  ;;  %s238_s24 = sand.u32 1, %s5567_s20  }
  0x1b   : > { %s4616_s25 = sshll.u32 %s238_s24, 11  ;;  %s4684_s6 = sshll.u32 %s5575_s22, 11 }
  0x1c   : > { %s5712_s30 = scalar_select %p66_p9, %s5567_s20, %s68_s14  }
  0x1d   : > { %s248_s10 = scalar_lea.hbm %s10309_s1, %s4684_s6  ;;  %s242_s11 = scalar_lea.vmem [#allocation5], %s4616_s25 }
  0x1e   : > { %s251_s12 = sshll.u32 %s242_s11, 4  ;;  %s249_s27 = sshll.u32 %s248_s10, 4  ;;  %s252_s12 = int_to_ptr.vmem [resolvable:$true] %s251_s12  ;;  %s250_s27 = int_to_ptr.hbm [resolvable:$true] %s249_s27 }
  0x1f   : > { %p4703_p2 = pnand %p4711_p7, %p5697_p3  ;;  %s239_s0 = scalar_lea.sflag [#allocation6], %s238_s24 }
  0x20   : > { %s5584_s13 = smov 256   ;;  %s5585_s23 = smov 16  }
  0x21   : > { %4705 = dma.hbm_to_vmem [thread:$0]  (!%p4703_p2), %s250_s27, 32768, %s252_s12, %s239_s0, %s5584_s13, %s5584_s13, %s5585_s23  }
  0x22   : > { %263 = sbr.rel (%p5681_p8) target bundleno = 1250 (0x4e2), region = 32 }
  0x27   : > { %5546 = dma.done.wait (%p5658_p1), [#allocation3], 512  }
  0x28   : > { %5548 = vsyncadd (%p5658_p1), [#allocation3], 4294966784  ;;  %s5727_s14 = sand.u32 1, %s5563_s19  }
  0x29   : > { %s4622_s15 = sshll.u32 %s5727_s14, 11  ;;  %s271_s17 = scalar_lea.sflag [#allocation6], %s5727_s14 }
  0x2a   : > { %s5731_s24 = scalar_lea.vmem [#allocation5], %s4622_s15 }
  0x2b   : > { %5550 = dma.done.wait (%p5668_p4), %s271_s17, 32768  }
  0x2c   : > { %5552 = vsyncadd (%p5668_p4), %s271_s17, 4294934528  ;;  %s4623_s0 = sshll.u32 %s5727_s14, 8  ;;  %p4624_p1 = scmp.ne.s32.totalorder %s5571_s21, 0 }
  0x2d   : > { %s5738_s23 = scalar_lea.vmem [#allocation7], %s4623_s0 }
  0x2e   : > { %342 = sbr.rel (%p4624_p1) target bundleno = 60 (0x3c), region = 44 }
  0x33   : > { %vm343_vm0 = vcmask 7168   ;;  %v5586_v0 = vmov -inf   ;;  %v5587_v1 = vmov 0.0  }
  0x34   : > { %344 = vst.msk [vmem:[%s10312_s4] sm:$0xff] %vm343_vm0, %v5586_v0 }
  0x35   : > { %345 = vst.msk [vmem:[%s10312_s4 + $0x8] sm:$0xff] %vm343_vm0, %v5586_v0 }
  0x36   : > { %346 = vst.msk [vmem:[%s10312_s4 + $0x10] sm:$0xff] %vm343_vm0, %v5586_v0 }
  0x37   : > { %347 = vst.msk [vmem:[%s10312_s4 + $0x18] sm:$0xff] %vm343_vm0, %v5586_v0 }
  0x38   : > { %348 = vst.msk [vmem:[%s10313_s5] sm:$0xff] %vm343_vm0, %v5587_v1 }
  0x39   : > { %349 = vst.msk [vmem:[%s10313_s5 + $0x8] sm:$0xff] %vm343_vm0, %v5587_v1 }
  0x3a   : > { %350 = vst.msk [vmem:[%s10313_s5 + $0x10] sm:$0xff] %vm343_vm0, %v5587_v1 }
  0x3b   : > { %351 = vst.msk [vmem:[%s10313_s5 + $0x18] sm:$0xff] %vm343_vm0, %v5587_v1 }
  0x3c PF: > { %v5766_v2 = vld [vmem:[%s5731_s24 + $0x1e0] sm:$0xff]  ;;  %v5769_v3 = vld [vmem:[%s5731_s24 + $0x1e8] sm:$0xff]  ;;  %v5788_v14 = vld [vmem:[%s5731_s24 + $0x1f0] sm:$0xff]  ;;  %s4689_s11 = sshll.u32 %s5571_s21, 6  ;;  %s4442_s17 = sshll.u32 %s5738_s23, 4  ;;  %s4443_s17 = int_to_ptr.vmem [resolvable:$true] %s4442_s17 }
  0x3d   : > { %v408_v4 = vld [vmem:[%s5731_s24 + $0x1c0] sm:$0xff]  ;;  %v668_v5 = vmul.f32 %v5766_v2, %v5766_v2  ;;  %v669_v6 = vmul.f32 %v5769_v3, %v5769_v3  ;;  %v409_v7 = vld [vmem:[%s5731_s24 + $0x1c8] sm:$0xff]  ;;  %v5791_v15 = vld [vmem:[%s5731_s24 + $0x1f8] sm:$0xff]  ;;  %v670_v23 = vmul.f32 %v5788_v14, %v5788_v14  ;;  %s4441_s15 = scalar_lea.hbm %s10311_s3, %s4689_s11  ;;  %s4417_s26 = scalar_lea.sflag [#allocation4], %s5727_s14 }
  0x3e   : > { %v664_v8 = vmul.f32 %v408_v4, %v408_v4  ;;  %v5778_v9 = vld [vmem:[%s5731_s24 + $0xe0] sm:$0xff]  ;;  %v5781_v10 = vld [vmem:[%s5731_s24 + $0xe8] sm:$0xff]  ;;  %v665_v11 = vmul.f32 %v409_v7, %v409_v7  ;;  %v5794_v16 = vld [vmem:[%s5731_s24 + $0x1d0] sm:$0xff]  ;;  %v671_v24 = vmul.f32 %v5791_v15, %v5791_v15  ;;  %s4444_s0 = sshll.u32 %s4441_s15, 4  ;;  %s5513_s6 = scalar_lea.hbm %s10311_s3, 512  ;;  %s4445_s0 = int_to_ptr.hbm [resolvable:$true] %s4444_s0 }
  0x3f   : > { %v636_v12 = vmul.f32 %v5778_v9, %v5778_v9  ;;  %v637_v13 = vmul.f32 %v5781_v10, %v5781_v10  ;;  %v954_v17 = vadd.f32 %v669_v6, %v668_v5  ;;  %v411_v18 = vld [vmem:[%s5731_s24 + $0x1d8] sm:$0xff]  ;;  %v5798_v19 = vld [vmem:[%s5731_s24 + $0xf0] sm:$0xff]  ;;  %v666_v25 = vmul.f32 %v5794_v16, %v5794_v16  ;;  %v404_v32 = vld [vmem:[%s5731_s24 + $0x1a0] sm:$0xff]  ;;  %s5507_s8 = sshra.s32 %s4445_s0, 4  ;;  %s5508_s8 = int_to_ptr.hbm [resolvable:$true] %s5507_s8 }
  0x40   : > { %v5801_v20 = vld [vmem:[%s5731_s24 + $0xf8] sm:$0xff]  ;;  %v948_v21 = vadd.f32 %v665_v11, %v664_v8  ;;  %v667_v26 = vmul.f32 %v411_v18, %v411_v18  ;;  %v638_v27 = vmul.f32 %v5798_v19, %v5798_v19  ;;  %v957_v29 = vadd.f32 %v671_v24, %v670_v23  ;;  %v5815_v33 = vld [vmem:[%s5731_s24 + $0xc0] sm:$0xff]  ;;  %v5818_v34 = vld [vmem:[%s5731_s24 + $0xc8] sm:$0xff]  ;;  %s5509_s13 = scalar_lea.hbm %s5508_s8, 256  ;;  %p5514_p12 = scmp.lt.s32.totalorder %s5508_s8, %s10311_s3 }
  0x41   : > { %v906_v22 = vadd.f32 %v637_v13, %v636_v12  ;;  %955 = vadd.xlane.f32.xlu0 %v954_v17  ;;  %v639_v28 = vmul.f32 %v5801_v20, %v5801_v20  ;;  %v405_v35 = vld [vmem:[%s5731_s24 + $0x1a8] sm:$0xff]  ;;  %v5822_v36 = vld [vmem:[%s5731_s24 + $0xd0] sm:$0xff]  ;;  %v5825_v37 = vld [vmem:[%s5731_s24 + $0xd8] sm:$0xff]  ;;  %v660_v38 = vmul.f32 %v404_v32, %v404_v32  ;;  %v632_v39 = vmul.f32 %v5815_v33, %v5815_v33  ;;  %p5510_p4 = scmp.ne.s32.totalorder %s5508_s8, %s5509_s13  ;;  %p5515_p13 = scmp.lt.s32.totalorder %s5513_s6, %s5509_s13 }
  0x42   : > { %949 = vadd.xlane.f32.xlu2 %v948_v21  ;;  %v951_v30 = vadd.f32 %v667_v26, %v666_v25  ;;  %v633_v40 = vmul.f32 %v5818_v34, %v5818_v34  ;;  %v661_v41 = vmul.f32 %v405_v35, %v405_v35  ;;  %v634_v42 = vmul.f32 %v5822_v36, %v5822_v36  ;;  %v406_v47 = vld [vmem:[%s5731_s24 + $0x1b0] sm:$0xff]  ;;  %v407_v48 = vld [vmem:[%s5731_s24 + $0x1b8] sm:$0xff]  ;;  %v372_v51 = vld [vmem:[%s5731_s24 + $0xa0] sm:$0xff] }
  0x43   : > { %907 = vadd.xlane.f32.xlu1 %v906_v22  ;;  %v909_v31 = vadd.f32 %v639_v28, %v638_v27  ;;  %v635_v43 = vmul.f32 %v5825_v37, %v5825_v37  ;;  %v374_v49 = vld [vmem:[%s5731_s24 + $0xb0] sm:$0xff]  ;;  %v375_v50 = vld [vmem:[%s5731_s24 + $0xb8] sm:$0xff]  ;;  %v373_v52 = vld [vmem:[%s5731_s24 + $0xa8] sm:$0xff]  ;;  %v662_v53 = vmul.f32 %v406_v47, %v406_v47  ;;  %v663_v54 = vmul.f32 %v407_v48, %v407_v48  ;;  %p5511_p8 = pnand %p5510_p4, %p5703_p5  ;;  %p5516_p0 = por %p5515_p13, %p5514_p12 }
  0x44   : > { %v900_v44 = vadd.f32 %v633_v40, %v632_v39  ;;  %v942_v45 = vadd.f32 %v661_v41, %v660_v38  ;;  %v630_v55 = vmul.f32 %v374_v49, %v374_v49  ;;  %v631_v56 = vmul.f32 %v375_v50, %v375_v50  ;;  %v400_v62 = vld [vmem:[%s5731_s24 + $0x180] sm:$0xff]  ;;  %v401_v63 = vld [vmem:[%s5731_s24 + $0x188] sm:$0xff]  ;;  %v402_v0 = vld [vmem:[%s5731_s24 + $0x190] sm:$0xff] }
  0x45   : > { %v903_v46 = vadd.f32 %v635_v43, %v634_v42  ;;  %v628_v57 = vmul.f32 %v372_v51, %v372_v51  ;;  %v629_v58 = vmul.f32 %v373_v52, %v373_v52  ;;  %v945_v59 = vadd.f32 %v663_v54, %v662_v53  ;;  %v403_v1 = vld [vmem:[%s5731_s24 + $0x198] sm:$0xff]  ;;  %v368_v4 = vld [vmem:[%s5731_s24 + $0x80] sm:$0xff]  ;;  %v369_v5 = vld [vmem:[%s5731_s24 + $0x88] sm:$0xff]  ;;  %p5512_p10 = pneg %p5511_p8 }
  0x46   : > { %v897_v60 = vadd.f32 %v631_v56, %v630_v55  ;;  %v656_v6 = vmul.f32 %v400_v62, %v400_v62  ;;  %v657_v7 = vmul.f32 %v401_v63, %v401_v63  ;;  %v658_v8 = vmul.f32 %v402_v0, %v402_v0  ;;  %v396_v22 = vld [vmem:[%s5731_s24 + $0x160] sm:$0xff]  ;;  %v370_v23 = vld [vmem:[%s5731_s24 + $0x90] sm:$0xff]  ;;  %v371_v24 = vld [vmem:[%s5731_s24 + $0x98] sm:$0xff] }
  0x47   : > { %v894_v61 = vadd.f32 %v629_v58, %v628_v57  ;;  %v659_v11 = vmul.f32 %v403_v1, %v403_v1  ;;  %v624_v12 = vmul.f32 %v368_v4, %v368_v4  ;;  %v625_v13 = vmul.f32 %v369_v5, %v369_v5  ;;  %v397_v25 = vld [vmem:[%s5731_s24 + $0x168] sm:$0xff]  ;;  %v398_v26 = vld [vmem:[%s5731_s24 + $0x170] sm:$0xff]  ;;  %v399_v27 = vld [vmem:[%s5731_s24 + $0x178] sm:$0xff]  ;;  %p5517_p3 = pnand %p5516_p0, %p5512_p10 }
  0x48   : > { %v936_v17 = vadd.f32 %v657_v7, %v656_v6  ;;  %v652_v28 = vmul.f32 %v396_v22, %v396_v22  ;;  %v654_v32 = vmul.f32 %v398_v26, %v398_v26  ;;  %v655_v35 = vmul.f32 %v399_v27, %v399_v27  ;;  %v478_v41 = vld [vmem:[%s5731_s24 + $0x3f0] sm:$0xff]  ;;  %v476_v42 = vld [vmem:[%s5731_s24 + $0x3e0] sm:$0xff]  ;;  %v477_v43 = vld [vmem:[%s5731_s24 + $0x3e8] sm:$0xff] }
  0x49   : > { %958 = vadd.xlane.f32.xlu0 %v957_v29  ;;  %v939_v18 = vadd.f32 %v659_v11, %v658_v8  ;;  %v888_v21 = vadd.f32 %v625_v13, %v624_v12  ;;  %v626_v29 = vmul.f32 %v370_v23, %v370_v23  ;;  %v734_v47 = vmul.f32 %v478_v41, %v478_v41  ;;  %v444_v56 = vld [vmem:[%s5731_s24 + $0x2e0] sm:$0xff]  ;;  %v366_v57 = vld [vmem:[%s5731_s24 + $0x70] sm:$0xff]  ;;  %v367_v58 = vld [vmem:[%s5731_s24 + $0x78] sm:$0xff] }
  0x4a   : > { %952 = vadd.xlane.f32.xlu2 %v951_v30  ;;  %v627_v30 = vmul.f32 %v371_v24, %v371_v24  ;;  %v933_v40 = vadd.f32 %v655_v35, %v654_v32  ;;  %v732_v48 = vmul.f32 %v476_v42, %v476_v42  ;;  %v733_v49 = vmul.f32 %v477_v43, %v477_v43  ;;  %v394_v11 = vld [vmem:[%s5731_s24 + $0x150] sm:$0xff]  ;;  %v392_v12 = vld [vmem:[%s5731_s24 + $0x140] sm:$0xff]  ;;  %v393_v13 = vld [vmem:[%s5731_s24 + $0x148] sm:$0xff] }
  0x4b   : > { %910 = vadd.xlane.f32.xlu1 %v909_v31  ;;  %v653_v31 = vmul.f32 %v397_v25, %v397_v25  ;;  %v700_v62 = vmul.f32 %v444_v56, %v444_v56  ;;  %v622_v63 = vmul.f32 %v366_v57, %v366_v57  ;;  %v623_v0 = vmul.f32 %v367_v58, %v367_v58  ;;  %v475_v32 = vld [vmem:[%s5731_s24 + $0x3d8] sm:$0xff]  ;;  %v362_v35 = vld [vmem:[%s5731_s24 + $0x50] sm:$0xff] }
  0x4c   : > { %v891_v38 = vadd.f32 %v627_v30, %v626_v29  ;;  %v1050_v53 = vadd.f32 %v733_v49, %v732_v48  ;;  %v650_v22 = vmul.f32 %v394_v11, %v394_v11  ;;  %v648_v23 = vmul.f32 %v392_v12, %v392_v12 }
  0x4d   : > { %v930_v39 = vadd.f32 %v653_v31, %v652_v28  ;;  %v885_v6 = vadd.f32 %v623_v0, %v622_v63  ;;  %v649_v24 = vmul.f32 %v393_v13, %v393_v13  ;;  %v474_v31 = vld [vmem:[%s5731_s24 + $0x3d0] sm:$0xff]  ;;  %v731_v42 = vmul.f32 %v475_v32, %v475_v32 }
  0x4e   : > { %v730_v41 = vmul.f32 %v474_v31, %v474_v31  ;;  %v618_v43 = vmul.f32 %v362_v35, %v362_v35 }
  0x4f   : > { %v924_v28 = vadd.f32 %v649_v24, %v648_v23 }
  0x51   : > { %901 = vadd.xlane.f32.xlu0 %v900_v44  ;;  %v479_v44 = vld [vmem:[%s5731_s24 + $0x3f8] sm:$0xff] }
  0x52   : > { %943 = vadd.xlane.f32.xlu2 %v942_v45  ;;  %v364_v45 = vld [vmem:[%s5731_s24 + $0x60] sm:$0xff]  ;;  %v735_v50 = vmul.f32 %v479_v44, %v479_v44 }
  0x53   : > { %904 = vadd.xlane.f32.xlu1 %v903_v46  ;;  %v365_v46 = vld [vmem:[%s5731_s24 + $0x68] sm:$0xff]  ;;  %v620_v51 = vmul.f32 %v364_v45, %v364_v45 }
  0x54   : > { %v621_v52 = vmul.f32 %v365_v46, %v365_v46  ;;  %v1053_v54 = vadd.f32 %v735_v50, %v734_v47  ;;  %v1047_v47 = vadd.f32 %v731_v42, %v730_v41  ;;  %v440_v50 = vld [vmem:[%s5731_s24 + $0x2c0] sm:$0xff] }
  0x55   : > { %v696_v56 = vmul.f32 %v440_v50, %v440_v50 }
  0x56   : > { %v882_v55 = vadd.f32 %v621_v52, %v620_v51  ;;  %v441_v51 = vld [vmem:[%s5731_s24 + $0x2c8] sm:$0xff]  ;;  %v388_v52 = vld [vmem:[%s5731_s24 + $0x120] sm:$0xff] }
  0x57   : > { %v697_v57 = vmul.f32 %v441_v51, %v441_v51  ;;  %v644_v58 = vmul.f32 %v388_v52, %v388_v52 }
  0x59   : > { %946 = vadd.xlane.f32.xlu0 %v945_v59  ;;  %v445_v59 = vld [vmem:[%s5731_s24 + $0x2e8] sm:$0xff] }
  0x5a   : > { %898 = vadd.xlane.f32.xlu2 %v897_v60  ;;  %v446_v60 = vld [vmem:[%s5731_s24 + $0x2f0] sm:$0xff]  ;;  %v701_v1 = vmul.f32 %v445_v59, %v445_v59 }
  0x5b   : > { %895 = vadd.xlane.f32.xlu1 %v894_v61  ;;  %v447_v61 = vld [vmem:[%s5731_s24 + $0x2f8] sm:$0xff]  ;;  %v702_v4 = vmul.f32 %v446_v60, %v446_v60 }
  0x5c   : > { %v703_v5 = vmul.f32 %v447_v61, %v447_v61  ;;  %v1002_v7 = vadd.f32 %v701_v1, %v700_v62  ;;  %v996_v62 = vadd.f32 %v697_v57, %v696_v56  ;;  %v390_v1 = vld [vmem:[%s5731_s24 + $0x130] sm:$0xff] }
  0x5d   : > { %v646_v11 = vmul.f32 %v390_v1, %v390_v1 }
  0x5e   : > { %v1005_v8 = vadd.f32 %v703_v5, %v702_v4  ;;  %v391_v4 = vld [vmem:[%s5731_s24 + $0x138] sm:$0xff]  ;;  %v470_v5 = vld [vmem:[%s5731_s24 + $0x3b0] sm:$0xff] }
  0x5f   : > { %v647_v12 = vmul.f32 %v391_v4, %v391_v4  ;;  %v726_v13 = vmul.f32 %v470_v5, %v470_v5 }
  0x61   : > { %937 = vadd.xlane.f32.xlu0 %v936_v17  ;;  %v395_v17 = vld [vmem:[%s5731_s24 + $0x158] sm:$0xff] }
  0x62   : > { %889 = vadd.xlane.f32.xlu2 %v888_v21  ;;  %v473_v21 = vld [vmem:[%s5731_s24 + $0x3c8] sm:$0xff]  ;;  %v651_v25 = vmul.f32 %v395_v17, %v395_v17 }
  0x63   : > { %940 = vadd.xlane.f32.xlu1 %v939_v18  ;;  %v472_v18 = vld [vmem:[%s5731_s24 + $0x3c0] sm:$0xff]  ;;  %v729_v27 = vmul.f32 %v473_v21, %v473_v21 }
  0x64   : > { %v728_v26 = vmul.f32 %v472_v18, %v472_v18  ;;  %v927_v29 = vadd.f32 %v651_v25, %v650_v22  ;;  %v921_v22 = vadd.f32 %v647_v12, %v646_v11  ;;  %v436_v25 = vld [vmem:[%s5731_s24 + $0x2a0] sm:$0xff] }
  0x65   : > { %v692_v31 = vmul.f32 %v436_v25, %v436_v25 }
  0x66   : > { %v1044_v30 = vadd.f32 %v729_v27, %v728_v26  ;;  %v356_v26 = vld [vmem:[%s5731_s24 + $0x20] sm:$0xff]  ;;  %v357_v27 = vld [vmem:[%s5731_s24 + $0x28] sm:$0xff] }
  0x67   : > { %v612_v32 = vmul.f32 %v356_v26, %v356_v26  ;;  %v613_v35 = vmul.f32 %v357_v27, %v357_v27 }
  0x69   : > { %892 = vadd.xlane.f32.xlu0 %v891_v38  ;;  %v363_v38 = vld [vmem:[%s5731_s24 + $0x58] sm:$0xff]  ;;  %v870_v41 = vadd.f32 %v613_v35, %v612_v32 }
  0x6a   : > { %934 = vadd.xlane.f32.xlu2 %v933_v40  ;;  %v361_v40 = vld [vmem:[%s5731_s24 + $0x48] sm:$0xff]  ;;  %v619_v44 = vmul.f32 %v363_v38, %v363_v38 }
  0x6b   : > { %931 = vadd.xlane.f32.xlu1 %v930_v39  ;;  %v360_v39 = vld [vmem:[%s5731_s24 + $0x40] sm:$0xff]  ;;  %v617_v46 = vmul.f32 %v361_v40, %v361_v40 }
  0x6c   : > { %v616_v45 = vmul.f32 %v360_v39, %v360_v39  ;;  %v879_v48 = vadd.f32 %v619_v44, %v618_v43  ;;  %v386_v44 = vld [vmem:[%s5731_s24 + $0x110] sm:$0xff] }
  0x6d   : > { %v642_v50 = vmul.f32 %v386_v44, %v386_v44 }
  0x6e   : > { %v876_v49 = vadd.f32 %v617_v46, %v616_v45  ;;  %v438_v45 = vld [vmem:[%s5731_s24 + $0x2b0] sm:$0xff]  ;;  %v439_v46 = vld [vmem:[%s5731_s24 + $0x2b8] sm:$0xff] }
  0x6f   : > { %v694_v51 = vmul.f32 %v438_v45, %v438_v45  ;;  %v695_v52 = vmul.f32 %v439_v46, %v439_v46  ;;  %v461_v46 = vld [vmem:[%s5731_s24 + $0x368] sm:$0xff] }
  0x71   : > { %1051 = vadd.xlane.f32.xlu0 %v1050_v53  ;;  %v389_v53 = vld [vmem:[%s5731_s24 + $0x128] sm:$0xff]  ;;  %v993_v56 = vadd.f32 %v695_v52, %v694_v51  ;;  %v717_v52 = vmul.f32 %v461_v46, %v461_v46 }
  0x72   : > { %883 = vadd.xlane.f32.xlu2 %v882_v55  ;;  %v443_v55 = vld [vmem:[%s5731_s24 + $0x2d8] sm:$0xff]  ;;  %v645_v59 = vmul.f32 %v389_v53, %v389_v53 }
  0x73   : > { %1054 = vadd.xlane.f32.xlu1 %v1053_v54  ;;  %v442_v54 = vld [vmem:[%s5731_s24 + $0x2d0] sm:$0xff]  ;;  %v699_v61 = vmul.f32 %v443_v55, %v443_v55 }
  0x74   : > { %v698_v60 = vmul.f32 %v442_v54, %v442_v54  ;;  %v918_v63 = vadd.f32 %v645_v59, %v644_v58  ;;  %v466_v59 = vld [vmem:[%s5731_s24 + $0x390] sm:$0xff] }
  0x75   : > { %v722_v1 = vmul.f32 %v466_v59, %v466_v59 }
  0x76   : > { %v999_v0 = vadd.f32 %v699_v61, %v698_v60  ;;  %v464_v60 = vld [vmem:[%s5731_s24 + $0x380] sm:$0xff]  ;;  %v465_v61 = vld [vmem:[%s5731_s24 + $0x388] sm:$0xff] }
  0x77   : > { %v720_v4 = vmul.f32 %v464_v60, %v464_v60  ;;  %v721_v5 = vmul.f32 %v465_v61, %v465_v61  ;;  %v543_v61 = vld [vmem:[%s5731_s24 + $0x5f8] sm:$0xff] }
  0x79   : > { %886 = vadd.xlane.f32.xlu0 %v885_v6  ;;  %v471_v6 = vld [vmem:[%s5731_s24 + $0x3b8] sm:$0xff]  ;;  %v1032_v11 = vadd.f32 %v721_v5, %v720_v4 }
  0x7a   : > { %1006 = vadd.xlane.f32.xlu2 %v1005_v8  ;;  %v469_v8 = vld [vmem:[%s5731_s24 + $0x3a8] sm:$0xff]  ;;  %v727_v17 = vmul.f32 %v471_v6, %v471_v6 }
  0x7b   : > { %1003 = vadd.xlane.f32.xlu1 %v1002_v7  ;;  %v468_v7 = vld [vmem:[%s5731_s24 + $0x3a0] sm:$0xff]  ;;  %v725_v21 = vmul.f32 %v469_v8, %v469_v8 }
  0x7c   : > { %v724_v18 = vmul.f32 %v468_v7, %v468_v7  ;;  %v1041_v23 = vadd.f32 %v727_v17, %v726_v13  ;;  %v432_v17 = vld [vmem:[%s5731_s24 + $0x280] sm:$0xff] }
  0x7d   : > { %v688_v25 = vmul.f32 %v432_v17, %v432_v17 }
  0x7e   : > { %v1038_v24 = vadd.f32 %v725_v21, %v724_v18  ;;  %v354_v18 = vld [vmem:[%s5731_s24 + $0x10] sm:$0xff]  ;;  %v355_v21 = vld [vmem:[%s5731_s24 + $0x18] sm:$0xff] }
  0x7f   : > { %v610_v26 = vmul.f32 %v354_v18, %v354_v18  ;;  %v611_v27 = vmul.f32 %v355_v21, %v355_v21  ;;  %v799_v18 = vmul.f32 %v543_v61, %v543_v61 }
  0x81   : > { %925 = vadd.xlane.f32.xlu0 %v924_v28  ;;  %v437_v28 = vld [vmem:[%s5731_s24 + $0x2a8] sm:$0xff] }
  0x82   : > { %1045 = vadd.xlane.f32.xlu2 %v1044_v30  ;;  %v359_v30 = vld [vmem:[%s5731_s24 + $0x38] sm:$0xff]  ;;  %v693_v38 = vmul.f32 %v437_v28, %v437_v28 }
  0x83   : > { %928 = vadd.xlane.f32.xlu1 %v927_v29  ;;  %v358_v29 = vld [vmem:[%s5731_s24 + $0x30] sm:$0xff]  ;;  %v615_v40 = vmul.f32 %v359_v30, %v359_v30 }
  0x84   : > { %v614_v39 = vmul.f32 %v358_v29, %v358_v29  ;;  %v990_v42 = vadd.f32 %v693_v38, %v692_v31 }
  0x86   : > { %v873_v43 = vadd.f32 %v615_v40, %v614_v39  ;;  %v867_v39 = vadd.f32 %v611_v27, %v610_v26  ;;  %v462_v40 = vld [vmem:[%s5731_s24 + $0x370] sm:$0xff]  ;;  %v511_v26 = vld [vmem:[%s5731_s24 + $0x4f8] sm:$0xff]  ;;  %v508_v27 = vld [vmem:[%s5731_s24 + $0x4e0] sm:$0xff] }
  0x87   : > { %v764_v46 = vmul.f32 %v508_v27, %v508_v27 }
  0x89   : > { %1048 = vadd.xlane.f32.xlu0 %v1047_v47  ;;  %v387_v47 = vld [vmem:[%s5731_s24 + $0x118] sm:$0xff] }
  0x8a   : > { %880 = vadd.xlane.f32.xlu2 %v879_v48  ;;  %v384_v48 = vld [vmem:[%s5731_s24 + $0x100] sm:$0xff]  ;;  %v643_v53 = vmul.f32 %v387_v47, %v387_v47 }
  0x8b   : > { %877 = vadd.xlane.f32.xlu1 %v876_v49  ;;  %v385_v49 = vld [vmem:[%s5731_s24 + $0x108] sm:$0xff]  ;;  %v640_v54 = vmul.f32 %v384_v48, %v384_v48  ;;  %v540_v47 = vld [vmem:[%s5731_s24 + $0x5e0] sm:$0xff] }
  0x8c   : > { %v641_v55 = vmul.f32 %v385_v49, %v385_v49  ;;  %v915_v57 = vadd.f32 %v643_v53, %v642_v50  ;;  %v541_v48 = vld [vmem:[%s5731_s24 + $0x5e8] sm:$0xff]  ;;  %v718_v49 = vmul.f32 %v462_v40, %v462_v40  ;;  %v796_v53 = vmul.f32 %v540_v47, %v540_v47 }
  0x8e   : > { %v912_v58 = vadd.f32 %v641_v55, %v640_v54  ;;  %v797_v54 = vmul.f32 %v541_v48, %v541_v48 }
  0x91   : > { %997 = vadd.xlane.f32.xlu0 %v996_v62  ;;  %v467_v62 = vld [vmem:[%s5731_s24 + $0x398] sm:$0xff] }
  0x92   : > { %919 = vadd.xlane.f32.xlu2 %v918_v63  ;;  %v352_v63 = vld [vmem:[%s5731_s24] sm:$0xff]  ;;  %v723_v6 = vmul.f32 %v467_v62, %v467_v62  ;;  %v430_v62 = vld [vmem:[%s5731_s24 + $0x270] sm:$0xff] }
  0x93   : > { %1000 = vadd.xlane.f32.xlu1 %v999_v0  ;;  %v353_v0 = vld [vmem:[%s5731_s24 + $0x8] sm:$0xff]  ;;  %v608_v7 = vmul.f32 %v352_v63, %v352_v63  ;;  %v431_v63 = vld [vmem:[%s5731_s24 + $0x278] sm:$0xff]  ;;  %v686_v21 = vmul.f32 %v430_v62, %v430_v62 }
  0x94   : > { %v609_v8 = vmul.f32 %v353_v0, %v353_v0  ;;  %v1035_v12 = vadd.f32 %v723_v6, %v722_v1  ;;  %v1146_v6 = vadd.f32 %v797_v54, %v796_v53 }
  0x96   : > { %v864_v13 = vadd.f32 %v609_v8, %v608_v7 }
  0x99   : > { %922 = vadd.xlane.f32.xlu0 %v921_v22  ;;  %v433_v22 = vld [vmem:[%s5731_s24 + $0x288] sm:$0xff] }
  0x9a   : > { %1042 = vadd.xlane.f32.xlu2 %v1041_v23  ;;  %v434_v23 = vld [vmem:[%s5731_s24 + $0x290] sm:$0xff]  ;;  %v689_v28 = vmul.f32 %v433_v22, %v433_v22  ;;  %v687_v22 = vmul.f32 %v431_v63, %v431_v63 }
  0x9b   : > { %1039 = vadd.xlane.f32.xlu1 %v1038_v24  ;;  %v435_v24 = vld [vmem:[%s5731_s24 + $0x298] sm:$0xff]  ;;  %v690_v29 = vmul.f32 %v434_v23, %v434_v23 }
  0x9c   : > { %v691_v30 = vmul.f32 %v435_v24, %v435_v24  ;;  %v984_v44 = vadd.f32 %v689_v28, %v688_v25  ;;  %v510_v25 = vld [vmem:[%s5731_s24 + $0x4f0] sm:$0xff] }
  0x9e   : > { %v987_v45 = vadd.f32 %v691_v30, %v690_v29  ;;  %v509_v29 = vld [vmem:[%s5731_s24 + $0x4e8] sm:$0xff]  ;;  %v456_v30 = vld [vmem:[%s5731_s24 + $0x340] sm:$0xff] }
  0xa1   : > { %871 = vadd.xlane.f32.xlu0 %v870_v41  ;;  %v463_v41 = vld [vmem:[%s5731_s24 + $0x378] sm:$0xff] }
  0xa2   : > { %991 = vadd.xlane.f32.xlu2 %v990_v42  ;;  %v460_v42 = vld [vmem:[%s5731_s24 + $0x360] sm:$0xff]  ;;  %v719_v50 = vmul.f32 %v463_v41, %v463_v41 }
  0xa3   : > { %874 = vadd.xlane.f32.xlu1 %v873_v43  ;;  %v716_v51 = vmul.f32 %v460_v42, %v460_v42 }
  0xa4   : > { %v1029_v60 = vadd.f32 %v719_v50, %v718_v49  ;;  %v765_v50 = vmul.f32 %v509_v29, %v509_v29 }
  0xa5   : > { %v1026_v5 = vadd.f32 %v717_v52, %v716_v51  ;;  %v712_v51 = vmul.f32 %v456_v30, %v456_v30 }
  0xa9   : > { %994 = vadd.xlane.f32.xlu0 %v993_v56  ;;  %v428_v56 = vld [vmem:[%s5731_s24 + $0x260] sm:$0xff] }
  0xaa   : > { %916 = vadd.xlane.f32.xlu2 %v915_v57  ;;  %v429_v57 = vld [vmem:[%s5731_s24 + $0x268] sm:$0xff]  ;;  %v684_v7 = vmul.f32 %v428_v56, %v428_v56 }
  0xab   : > { %913 = vadd.xlane.f32.xlu1 %v912_v58  ;;  %v542_v58 = vld [vmem:[%s5731_s24 + $0x5f0] sm:$0xff] }
  0xb1   : > { %1033 = vadd.xlane.f32.xlu0 %v1032_v11 }
  0xb2   : > { %865 = vadd.xlane.f32.xlu2 %v864_v13  ;;  %v798_v13 = vmul.f32 %v542_v58, %v542_v58 }
  0xb3   : > { %1036 = vadd.xlane.f32.xlu1 %v1035_v12  ;;  %v685_v12 = vmul.f32 %v429_v57, %v429_v57 }
  0xb4   : > { %v956_v31 = vpop.xlane.xlu0 %955 }
  0xb5   : > { %v5913_v32 = vmax.f32 %v956_v31, 1e-24  ;;  %v950_v35 = vpop.xlane.xlu2 %949  ;;  %v978_v31 = vadd.f32 %v685_v12, %v684_v7  ;;  %v537_v12 = vld [vmem:[%s5731_s24 + $0x5c8] sm:$0xff] }
  0xb6   : > { %v908_v38 = vpop.xlane.xlu1 %907  ;;  %v5925_v55 = vmax.f32 %v950_v35, 1e-24  ;;  %v1149_v35 = vadd.f32 %v799_v18, %v798_v13  ;;  %v458_v13 = vld [vmem:[%s5731_s24 + $0x350] sm:$0xff] }
  0xb7   : > { %v5918_v43 = vmax.f32 %v908_v38, 1e-24  ;;  %4786 = vrsqrt.f32 %v5913_v32  ;;  %v981_v38 = vadd.f32 %v687_v22, %v686_v21  ;;  %vm1682_vm2 = vweird.f32 %v5913_v32 }
  0xb8   : > { %vm1662_vm9 = vweird.f32 %v5925_v55 }
  0xb9   : > { %4788 = vrsqrt.f32 %v5918_v43  ;;  %868 = vadd.xlane.f32.xlu0 %v867_v39  ;;  %v457_v39 = vld [vmem:[%s5731_s24 + $0x348] sm:$0xff]  ;;  %vm1522_vm1 = vweird.f32 %v5918_v43 }
  0xba   : > { %988 = vadd.xlane.f32.xlu2 %v987_v45  ;;  %4790 = vrsqrt.f32 %v5925_v55  ;;  %v767_v45 = vmul.f32 %v511_v26, %v511_v26  ;;  %v713_v57 = vmul.f32 %v457_v39, %v457_v39 }
  0xbb   : > { %985 = vadd.xlane.f32.xlu1 %v984_v44  ;;  %v766_v44 = vmul.f32 %v510_v25, %v510_v25 }
  0xbc   : > { %v959_v59 = vpop.xlane.xlu0 %958  ;;  %v1020_v7 = vadd.f32 %v713_v57, %v712_v51 }
  0xbd   : > { %v5933_v0 = vmax.f32 %v959_v59, 1e-24  ;;  %v953_v1 = vpop.xlane.xlu2 %952  ;;  %v5935_v8 = vpop.eup %4786  ;;  %v1101_v63 = vadd.f32 %v767_v45, %v766_v44  ;;  %v538_v45 = vld [vmem:[%s5731_s24 + $0x5d0] sm:$0xff] }
  0xbe   : > { %v911_v4 = vpop.xlane.xlu1 %910  ;;  %v5945_v24 = vmax.f32 %v953_v1, 1e-24  ;;  %v1677_v28 = vmul.f32 %v5935_v8, %v5913_v32  ;;  %v536_v1 = vld [vmem:[%s5731_s24 + $0x5c0] sm:$0xff]  ;;  %vm1683_vm3 = vweird.f32 %v5935_v8 }
  0xbf   : > { %v5938_v11 = vmax.f32 %v911_v4, 1e-24  ;;  %v5940_v17 = vpop.eup %4788  ;;  %4792 = vrsqrt.f32 %v5933_v0  ;;  %v792_v27 = vmul.f32 %v536_v1, %v536_v1  ;;  %vm1692_vm4 = vweird.f32 %v5933_v0  ;;  %vm1684_vm12 = vmor %vm1682_vm2, %vm1683_vm3 }
  0xc0   : > { %v1517_v23 = vmul.f32 %v5940_v17, %v5918_v43  ;;  %v5956_v40 = vpop.eup %4790  ;;  %v1678_v52 = vmul.f32 %v5935_v8, %v1677_v28  ;;  %vm1523_vm5 = vweird.f32 %v5940_v17  ;;  %vm1672_vm14 = vweird.f32 %v5945_v24 }
  0xc1   : > { %4794 = vrsqrt.f32 %v5938_v11  ;;  %1027 = vadd.xlane.f32.xlu0 %v1026_v5  ;;  %v1657_v59 = vmul.f32 %v5956_v40, %v5925_v55  ;;  %vm1532_vm6 = vweird.f32 %v5938_v11  ;;  %vm1524_vm10 = vmor %vm1522_vm1, %vm1523_vm5  ;;  %vm1663_vm15 = vweird.f32 %v5956_v40 }
  0xc2   : > { %1147 = vadd.xlane.f32.xlu2 %v1146_v6  ;;  %v1518_v41 = vmul.f32 %v5940_v17, %v1517_v23  ;;  %4796 = vrsqrt.f32 %v5945_v24  ;;  %v1679_v4 = vmul.f32 0.5, %v1678_v52  ;;  %v1098_v6 = vadd.f32 %v765_v50, %v764_v46  ;;  %v539_v46 = vld [vmem:[%s5731_s24 + $0x5d8] sm:$0xff]  ;;  %vm1664_vm3 = vmor %vm1662_vm9, %vm1663_vm15 }
  0xc3   : > { %1030 = vadd.xlane.f32.xlu1 %v1029_v60  ;;  %v1658_v21 = vmul.f32 %v5956_v40, %v1657_v59  ;;  %v795_v1 = vmul.f32 %v539_v46, %v539_v46 }
  0xc4   : > { %v902_v42 = vpop.xlane.xlu0 %901  ;;  %v1519_v60 = vmul.f32 0.5, %v1518_v41  ;;  %v1680_v39 = vsub.f32 1.5, %v1679_v4 }
  0xc5   : > { %v5959_v47 = vpop.eup %4792  ;;  %v5962_v49 = vmax.f32 %v902_v42, 1e-24  ;;  %v944_v54 = vpop.xlane.xlu2 %943  ;;  %v6004_v50 = vmul.f32 0.5, %v1658_v21 }
  0xc6   : > { %v905_v48 = vpop.xlane.xlu1 %904  ;;  %v1687_v53 = vmul.f32 %v5959_v47, %v5933_v0  ;;  %v5985_v23 = vmax.f32 %v944_v54, 1e-24  ;;  %v1520_v25 = vsub.f32 1.5, %v1519_v60  ;;  %vm1693_vm11 = vweird.f32 %v5959_v47 }
  0xc7   : > { %v5967_v56 = vmax.f32 %v905_v48, 1e-24  ;;  %v5969_v58 = vpop.eup %4794  ;;  %4798 = vrsqrt.f32 %v5962_v49  ;;  %vm1694_vm13 = vmor %vm1692_vm4, %vm1693_vm11  ;;  %vm1502_vm0 = vweird.f32 %v5962_v49 }
  0xc8   : > { %v1688_v61 = vmul.f32 %v5959_v47, %v1687_v53  ;;  %v1527_v62 = vmul.f32 %v5969_v58, %v5938_v11  ;;  %v5982_v18 = vpop.eup %4796  ;;  %vm1533_vm7 = vweird.f32 %v5969_v58  ;;  %v1521_v57 = vmul.f32 %v5940_v17, %v1520_v25 }
  0xc9   : > { %4800 = vrsqrt.f32 %v5967_v56  ;;  %1150 = vadd.xlane.f32.xlu0 %v1149_v35  ;;  %v459_v35 = vld [vmem:[%s5731_s24 + $0x358] sm:$0xff]  ;;  %v1667_v41 = vmul.f32 %v5982_v18, %v5945_v24  ;;  %vm1534_vm8 = vmor %vm1532_vm6, %vm1533_vm7  ;;  %vm1673_vm4 = vweird.f32 %v5982_v18  ;;  %vm1512_vm5 = vweird.f32 %v5967_v56 }
  0xca   : > { %v1528_v5 = vmul.f32 %v5969_v58, %v1527_v62  ;;  %982 = vadd.xlane.f32.xlu2 %v981_v38  ;;  %v1689_v22 = vmul.f32 0.5, %v1688_v61  ;;  %v714_v38 = vmul.f32 %v458_v13, %v458_v13  ;;  %4802 = vrsqrt.f32 %v5985_v23 }
  0xcb   : > { %979 = vadd.xlane.f32.xlu1 %v978_v31  ;;  %v793_v31 = vmul.f32 %v537_v12, %v537_v12  ;;  %v715_v59 = vmul.f32 %v459_v35, %v459_v35  ;;  %v794_v62 = vmul.f32 %v538_v45, %v538_v45  ;;  %v1668_v4 = vmul.f32 %v5982_v18, %v1667_v41 }
  0xcc   : > { %v1529_v26 = vmul.f32 0.5, %v1528_v5  ;;  %v947_v29 = vpop.xlane.xlu0 %946  ;;  %v1690_v51 = vsub.f32 1.5, %v1689_v22  ;;  %v1681_v13 = vmul.f32 %v5935_v8, %v1680_v39  ;;  %v1525_v11 = vsel %vm1524_vm10, %v5940_v17, %v1521_v57 }
  0xcd   : > { %v5990_v28 = vpop.eup %4798  ;;  %v899_v53 = vpop.xlane.xlu2 %898  ;;  %v6017_v12 = vmax.f32 %v947_v29, 1e-24  ;;  %v1023_v22 = vadd.f32 %v715_v59, %v714_v38  ;;  %v1143_v43 = vadd.f32 %v795_v1, %v794_v62  ;;  %v2684_v32 = vmul.f32 %v1525_v11, %v5778_v9 }
  0xce   : > { %v896_v30 = vpop.xlane.xlu1 %895  ;;  %v1530_v42 = vsub.f32 1.5, %v1529_v26  ;;  %v1497_v44 = vmul.f32 %v5990_v28, %v5962_v49  ;;  %v1685_v17 = vsel %vm1684_vm12, %v5935_v8, %v1681_v13  ;;  %v2685_v8 = vmul.f32 %v1525_v11, %v5781_v10 }
  0xcf   : > { %v6002_v48 = vpop.eup %4800  ;;  %v6010_v54 = vmax.f32 %v896_v30, 1e-24  ;;  %v2716_v41 = vmul.f32 %v1685_v17, %v5766_v2  ;;  %v2717_v46 = vmul.f32 %v1685_v17, %v5769_v3  ;;  %vm1503_vm1 = vweird.f32 %v5990_v28  ;;  %v427_v17 = vld [vmem:[%s5731_s24 + $0x258] sm:$0xff] }
  0xd0   : > { %v1507_v52 = vmul.f32 %v6002_v48, %v5967_v56  ;;  %v1498_v60 = vmul.f32 %v5990_v28, %v1497_v44  ;;  %v1531_v61 = vmul.f32 %v5969_v58, %v1530_v42  ;;  %v6036_v25 = vpop.eup %4802  ;;  %vm1513_vm2 = vweird.f32 %v6002_v48  ;;  %vm1504_vm6 = vmor %vm1502_vm0, %vm1503_vm1 }
  0xd1   : > { %1099 = vadd.xlane.f32.xlu0 %v1098_v6  ;;  %v6025_v6 = vmax.f32 %v899_v53, 1e-24  ;;  %4804 = vrsqrt.f32 %v6010_v54  ;;  %vm1514_vm7 = vmor %vm1512_vm5, %vm1513_vm2  ;;  %vm1642_vm9 = vweird.f32 %v5985_v23  ;;  %vm1652_vm15 = vweird.f32 %v6017_v12 }
  0xd2   : > { %v1508_v5 = vmul.f32 %v6002_v48, %v1507_v52  ;;  %1021 = vadd.xlane.f32.xlu2 %v1020_v7  ;;  %v1535_v21 = vsel %vm1534_vm8, %v5969_v58, %v1531_v61  ;;  %v1140_v7 = vadd.f32 %v793_v31, %v792_v27  ;;  %v1499_v29 = vmul.f32 0.5, %v1498_v60  ;;  %vm1674_vm8 = vmor %vm1672_vm14, %vm1673_vm4 }
  0xd3   : > { %1102 = vadd.xlane.f32.xlu1 %v1101_v63  ;;  %v1691_v63 = vmul.f32 %v5959_v47, %v1690_v51  ;;  %v2686_v30 = vmul.f32 %v1535_v21, %v5798_v19  ;;  %v1669_v58 = vmul.f32 0.5, %v1668_v4  ;;  %4806 = vrsqrt.f32 %v6017_v12 }
  0xd4   : > { %v1509_v26 = vmul.f32 0.5, %v1508_v5  ;;  %v2687_v35 = vmul.f32 %v1535_v21, %v5801_v20  ;;  %v1660_v19 = vsub.f32 1.5, %v6004_v50  ;;  %4808 = vrsqrt.f32 %v6025_v6  ;;  %v938_v27 = vpop.xlane.xlu0 %937 }
  0xd5   : > { %v1695_v31 = vsel %vm1694_vm13, %v5959_v47, %v1691_v63  ;;  %v1637_v20 = vmul.f32 %v6036_v25, %v5985_v23  ;;  %v1500_v38 = vsub.f32 1.5, %v1499_v29  ;;  %v2926_v39 = vpack.c.bf16 %v2686_v30, %v2684_v32  ;;  %v890_v61 = vpop.xlane.xlu2 %889  ;;  %v5178_v30 = vld [vmem:[%s5731_s24 + $0x1c0] sm:$0xff]  ;;  %v425_v32 = vld [vmem:[%s5731_s24 + $0x248] sm:$0xff]  ;;  %v506_v23 = vld [vmem:[%s5731_s24 + $0x4d0] sm:$0xff] }
  0xd6   : > { %v1510_v0 = vsub.f32 1.5, %v1509_v26  ;;  %v1670_v9 = vsub.f32 1.5, %v1669_v58  ;;  %v6062_v44 = vmax.f32 %v938_v27, 1e-24  ;;  %v2927_v47 = vpack.c.bf16 %v2687_v35, %v2685_v8  ;;  %v941_v10 = vpop.xlane.xlu1 %940  ;;  %v426_v58 = vld [vmem:[%s5731_s24 + $0x250] sm:$0xff]  ;;  %v424_v27 = vld [vmem:[%s5731_s24 + $0x240] sm:$0xff] }
  0xd7   : > { %v6060_v42 = vpop.eup %4804  ;;  %v2718_v45 = vmul.f32 %v1695_v31, %v5788_v14  ;;  %3064 = vmatpush.bf16.xpose.msra.mxu0 %v2926_v39  ;;  %v2719_v50 = vmul.f32 %v1695_v31, %v5791_v15  ;;  %v1661_v2 = vmul.f32 %v5956_v40, %v1660_v19  ;;  %v1638_v52 = vmul.f32 %v6036_v25, %v1637_v20  ;;  %v5180_v39 = vld [vmem:[%s5731_s24 + $0x1d8] sm:$0xff] }
  0xd8   : > { %3083 = vmatpush.bf16.xpose.msra.mxu1 %v2927_v47  ;;  %v1477_v57 = vmul.f32 %v6060_v42, %v6010_v54  ;;  %v1501_v15 = vmul.f32 %v5990_v28, %v1500_v38  ;;  %v1511_v59 = vmul.f32 %v6002_v48, %v1510_v0  ;;  %4810 = vrsqrt.f32 %v6062_v44  ;;  %v5179_v0 = vld [vmem:[%s5731_s24 + $0x1c8] sm:$0xff]  ;;  %v504_v47 = vld [vmem:[%s5731_s24 + $0x4c0] sm:$0xff] }
  0xd9   : > { %1024 = vadd.xlane.f32.xlu0 %v1023_v22  ;;  %v6069_v51 = vpop.eup %4806  ;;  %v2942_v14 = vpack.c.bf16 %v2718_v45, %v2716_v41  ;;  %v2943_v3 = vpack.c.bf16 %v2719_v50, %v2717_v46  ;;  %v6081_v60 = vmax.f32 %v941_v10, 1e-24  ;;  %v1671_v62 = vmul.f32 %v5982_v18, %v1670_v9  ;;  %v505_v50 = vld [vmem:[%s5731_s24 + $0x4c8] sm:$0xff] }
  0xda   : > { %1144 = vadd.xlane.f32.xlu2 %v1143_v43  ;;  %v6074_v53 = vpop.eup %4808  ;;  %v1647_v1 = vmul.f32 %v6069_v51, %v6017_v12  ;;  %v1478_v55 = vmul.f32 %v6060_v42, %v1477_v57  ;;  %v1505_v5 = vsel %vm1504_vm6, %v5990_v28, %v1501_v15  ;;  %v1515_v56 = vsel %vm1514_vm7, %v6002_v48, %v1511_v59 }
  0xdb   : > { %1141 = vadd.xlane.f32.xlu1 %v1140_v7  ;;  %3102 = vmatpush.bf16.xpose.msra.mxu2 %v2942_v14  ;;  %v1487_v4 = vmul.f32 %v6074_v53, %v6025_v6  ;;  %v6105_v49 = vmul.f32 0.5, %v1638_v52  ;;  %4812 = vrsqrt.f32 %v6081_v60  ;;  %v1665_v13 = vsel %vm1664_vm3, %v5956_v40, %v1661_v2 }
  0xdc   : > { %3121 = vmatpush.bf16.xpose.msra.mxu3 %v2943_v3  ;;  %v1675_v21 = vsel %vm1674_vm8, %v5982_v18, %v1671_v62  ;;  %v1648_v63 = vmul.f32 %v6069_v51, %v1647_v1  ;;  %v893_v11 = vpop.xlane.xlu0 %892  ;;  %v2680_v28 = vmul.f32 %v1505_v5, %v5815_v33  ;;  %v2682_v48 = vmul.f32 %v1515_v56, %v5822_v36 }
  0xdd   : > { %v1488_v7 = vmul.f32 %v6074_v53, %v1487_v4  ;;  %v6116_v22 = vmax.f32 %v890_v61, 1e-24  ;;  %v2681_v26 = vmul.f32 %v1505_v5, %v5818_v34  ;;  %v2683_v40 = vmul.f32 %v1515_v56, %v5825_v37  ;;  %v935_v8 = vpop.xlane.xlu2 %934 }
  0xde   : > { %v6113_v24 = vpop.eup %4810  ;;  %v1479_v29 = vmul.f32 0.5, %v1478_v55  ;;  %v2924_v18 = vpack.c.bf16 %v2682_v48, %v2680_v28  ;;  %v2712_v43 = vmul.f32 %v5178_v30, %v1665_v13  ;;  %v2714_v33 = vmul.f32 %v1675_v21, %v5794_v16  ;;  %v932_v19 = vpop.xlane.xlu1 %931  ;;  %v453_v48 = vld [vmem:[%s5731_s24 + $0x328] sm:$0xff] }
  0xdf   : > { %v1640_v36 = vsub.f32 1.5, %v6105_v49  ;;  %v2925_v35 = vpack.c.bf16 %v2683_v40, %v2681_v26  ;;  %v6126_v34 = vmul.f32 0.5, %v1648_v63  ;;  %vm1483_vm10 = vweird.f32 %v6060_v42 }
  0xe0   : > { %v1617_v37 = vmul.f32 %v6113_v24, %v6062_v44  ;;  %3065 = vmatpush.bf16.xpose.msra.mxu0 %v2924_v18  ;;  %v2940_v16 = vpack.c.bf16 %v2714_v33, %v2712_v43  ;;  %v1489_v20 = vmul.f32 0.5, %v1488_v7  ;;  %v2713_v38 = vmul.f32 %v5179_v0, %v1665_v13  ;;  %v5181_v18 = vld [vmem:[%s5731_s24 + $0xa0] sm:$0xff]  ;;  %v5182_v43 = vld [vmem:[%s5731_s24 + $0xa8] sm:$0xff] }
  0xe1   : > { %v6133_v31 = vpop.eup %4812  ;;  %3084 = vmatpush.bf16.xpose.msra.mxu1 %v2925_v35  ;;  %v2715_v41 = vmul.f32 %v5180_v39, %v1675_v21  ;;  %v682_v9 = vmul.f32 %v426_v58, %v426_v58  ;;  %v1480_v45 = vsub.f32 1.5, %v1479_v29  ;;  %4814 = vrsqrt.f32 %v6116_v22 }
  0xe2   : > { %v6139_v10 = vmax.f32 %v893_v11, 1e-24  ;;  %v683_v46 = vmul.f32 %v427_v17, %v427_v17  ;;  %v6142_v2 = vmax.f32 %v932_v19, 1e-24  ;;  %v680_v14 = vmul.f32 %v424_v27, %v424_v27  ;;  %v5184_v19 = vld [vmem:[%s5731_s24 + $0xb8] sm:$0xff] }
  0xe3   : > { %3103 = vmatpush.bf16.xpose.msra.mxu2 %v2940_v16  ;;  %v2941_v52 = vpack.c.bf16 %v2715_v41, %v2713_v38  ;;  %v681_v57 = vmul.f32 %v425_v32, %v425_v32  ;;  %v1618_v3 = vmul.f32 %v6113_v24, %v1617_v37  ;;  %v1627_v15 = vmul.f32 %v6133_v31, %v6081_v60  ;;  %v5185_v32 = vld [vmem:[%s5731_s24 + $0x1a0] sm:$0xff]  ;;  %v5187_v38 = vld [vmem:[%s5731_s24 + $0x1a8] sm:$0xff]  ;;  %v5188_v41 = vld [vmem:[%s5731_s24 + $0x1b8] sm:$0xff] }
  0xe4   : > { %v975_v59 = vadd.f32 %v683_v46, %v682_v9  ;;  %v760_v61 = vmul.f32 %v504_v47, %v504_v47  ;;  %v1490_v62 = vsub.f32 1.5, %v1489_v20  ;;  %v6147_v1 = vmax.f32 %v935_v8, 1e-24  ;;  %v6153_v56 = vpop.xlane.xlu0 %1051  ;;  %v5186_v8 = vld [vmem:[%s5731_s24 + $0x1b0] sm:$0xff] }
  0xe5   : > { %3122 = vmatpush.bf16.xpose.msra.mxu3 %v2941_v52  ;;  %v972_v4 = vadd.f32 %v681_v57, %v680_v14  ;;  %v761_v55 = vmul.f32 %v505_v50, %v505_v50  ;;  %v1650_v5 = vsub.f32 1.5, %v6126_v34  ;;  %vm1653_vm11 = vweird.f32 %v6069_v51  ;;  %v5183_v34 = vld [vmem:[%s5731_s24 + $0xb0] sm:$0xff]  ;;  %v507_v50 = vld [vmem:[%s5731_s24 + $0x4d8] sm:$0xff] }
  0xe6   : > { %vm1492_vm12 = vweird.f32 %v6025_v6  ;;  %4816 = vrsqrt.f32 %v6139_v10  ;;  %976 = vadd.xlane.f32.xlu1 %v975_v59  ;;  %vm1493_vm13 = vweird.f32 %v6074_v53  ;;  %vm1482_vm14 = vweird.f32 %v6010_v54  ;;  %v452_v54 = vld [vmem:[%s5731_s24 + $0x320] sm:$0xff]  ;;  %vm6171_vm1 = vmor %vm1652_vm15, %vm1653_vm11  ;;  %v6185_v29 = vpop.xlane.xlu1 %1054  ;;  %v884_v6 = vpop.xlane.xlu2 %883  ;;  %v454_v52 = vld [vmem:[%s5731_s24 + $0x330] sm:$0xff] }
  0xe7   : > { %973 = vadd.xlane.f32.xlu0 %v972_v4  ;;  %v1092_v13 = vadd.f32 %v761_v55, %v760_v61  ;;  %v1481_v21 = vmul.f32 %v6060_v42, %v1480_v45  ;;  %v6158_v63 = vpop.eup %4814  ;;  %vm1484_vm0 = vmor %vm1482_vm14, %vm1483_vm10  ;;  %v6163_v11 = vmul.f32 0.5, %v1618_v3  ;;  %v1628_v28 = vmul.f32 %v6133_v31, %v1627_v15  ;;  %v455_v59 = vld [vmem:[%s5731_s24 + $0x338] sm:$0xff] }
  0xe8   : > { %4818 = vrsqrt.f32 %v6142_v2  ;;  %v1491_v26 = vmul.f32 %v6074_v53, %v1490_v62  ;;  %v1641_v40 = vmul.f32 %v6036_v25, %v1640_v36  ;;  %vm1494_vm2 = vmor %vm1492_vm12, %vm1493_vm13  ;;  %vm1643_vm3 = vweird.f32 %v6036_v25 }
  0xe9   : > { %4820 = vrsqrt.f32 %v6147_v1  ;;  %1093 = vadd.xlane.f32.xlu2 %v1092_v13  ;;  %v1485_v12 = vsel %vm1484_vm0, %v6060_v42, %v1481_v21  ;;  %v1651_v42 = vmul.f32 %v6069_v51, %v1650_v5  ;;  %v1457_v49 = vmul.f32 %v6158_v63, %v6116_v22  ;;  %vm1644_vm4 = vmor %vm1642_vm9, %vm1643_vm3 }
  0xea   : > { %v2676_v30 = vmul.f32 %v5181_v18, %v1485_v12  ;;  %v2677_v33 = vmul.f32 %v5182_v43, %v1485_v12  ;;  %v1495_v58 = vsel %vm1494_vm2, %v6074_v53, %v1491_v26  ;;  %v708_v36 = vmul.f32 %v452_v54, %v452_v54  ;;  %v535_v18 = vld [vmem:[%s5731_s24 + $0x5b8] sm:$0xff] }
  0xeb   : > { %v709_v35 = vmul.f32 %v453_v48, %v453_v48  ;;  %v2678_v37 = vmul.f32 %v5183_v34, %v1495_v58  ;;  %v2679_v16 = vmul.f32 %v5184_v19, %v1495_v58  ;;  %v1645_v27 = vsel %vm1644_vm4, %v6036_v25, %v1641_v40  ;;  %v534_v40 = vld [vmem:[%s5731_s24 + $0x5b0] sm:$0xff]  ;;  %v420_v19 = vld [vmem:[%s5731_s24 + $0x220] sm:$0xff] }
  0xec   : > { %v6196_v17 = vpop.eup %4816  ;;  %v1655_v53 = vsel %vm6171_vm1, %v6069_v51, %v1651_v42  ;;  %v2708_v20 = vmul.f32 %v5185_v32, %v1645_v27  ;;  %v2709_v39 = vmul.f32 %v5187_v38, %v1645_v27  ;;  %v1629_v45 = vmul.f32 0.5, %v1628_v28  ;;  %v887_v55 = vpop.xlane.xlu0 %886 }
  0xed   : > { %v2710_v0 = vmul.f32 %v5186_v8, %v1655_v53  ;;  %v2711_v9 = vmul.f32 %v5188_v41, %v1655_v53  ;;  %v2922_v46 = vpack.c.bf16 %v2678_v37, %v2676_v30  ;;  %v2923_v25 = vpack.c.bf16 %v2679_v16, %v2677_v33  ;;  %v532_v33 = vld [vmem:[%s5731_s24 + $0x5a0] sm:$0xff]  ;;  %v533_v37 = vld [vmem:[%s5731_s24 + $0x5a8] sm:$0xff]  ;;  %v5191_v41 = vld [vmem:[%s5731_s24 + $0x190] sm:$0xff] }
  0xee   : > { %v6209_v47 = vpop.eup %4818  ;;  %v1467_v51 = vmul.f32 %v6196_v17, %v6139_v10  ;;  %v762_v15 = vmul.f32 %v506_v23, %v506_v23  ;;  %v1620_v61 = vsub.f32 1.5, %v6163_v11  ;;  %v1458_v62 = vmul.f32 %v6158_v63, %v1457_v49  ;;  %v6235_v43 = vpop.xlane.xlu1 %1003  ;;  %v421_v23 = vld [vmem:[%s5731_s24 + $0x228] sm:$0xff] }
  0xef   : > { %v6213_v14 = vpop.eup %4820  ;;  %v2938_v57 = vpack.c.bf16 %v2710_v0, %v2708_v20  ;;  %v2939_v3 = vpack.c.bf16 %v2711_v9, %v2709_v39  ;;  %3066 = vmatpush.bf16.xpose.msra.mxu0 %v2922_v46  ;;  %3085 = vmatpush.bf16.xpose.msra.mxu1 %v2923_v25  ;;  %v1014_v4 = vadd.f32 %v709_v35, %v708_v36  ;;  %v6222_v13 = vmax.f32 %v884_v6, 1e-24  ;;  %v6240_v6 = vpop.xlane.xlu2 %1006  ;;  %v5189_v20 = vld [vmem:[%s5731_s24 + $0x180] sm:$0xff]  ;;  %v5190_v0 = vld [vmem:[%s5731_s24 + $0x188] sm:$0xff] }
  0xf0   : > { %v1597_v5 = vmul.f32 %v6209_v47, %v6142_v2  ;;  %v763_v21 = vmul.f32 %v507_v50, %v507_v50  ;;  %v710_v28 = vmul.f32 %v454_v52, %v454_v52  ;;  %v1630_v54 = vsub.f32 1.5, %v1629_v45  ;;  %v5192_v45 = vld [vmem:[%s5731_s24 + $0x198] sm:$0xff] }
  0xf1   : > { %3104 = vmatpush.bf16.xpose.msra.mxu2 %v2938_v57  ;;  %3123 = vmatpush.bf16.xpose.msra.mxu3 %v2939_v3  ;;  %v1607_v11 = vmul.f32 %v6213_v14, %v6147_v1  ;;  %v711_v48 = vmul.f32 %v455_v59, %v455_v59  ;;  %vm1623_vm5 = vweird.f32 %v6113_v24  ;;  %v1468_v7 = vmul.f32 %v6196_v17, %v1467_v51 }
  0xf2   : > { %1015 = vadd.xlane.f32.xlu1 %v1014_v4  ;;  %v1095_v12 = vadd.f32 %v763_v21, %v762_v15  ;;  %v6228_v26 = vmax.f32 %v887_v55, 1e-24  ;;  %vm1622_vm6 = vweird.f32 %v6062_v44  ;;  %vm1632_vm7 = vweird.f32 %v6081_v60 }
  0xf3   : > { %vm1633_vm8 = vweird.f32 %v6133_v31  ;;  %v1017_v30 = vadd.f32 %v711_v48, %v710_v28  ;;  %v1459_v42 = vmul.f32 0.5, %v1458_v62  ;;  %v1598_v49 = vmul.f32 %v6209_v47, %v1597_v5  ;;  %vm1624_vm9 = vmor %vm1622_vm6, %vm1623_vm5 }
  0xf4   : > { %4822 = vrsqrt.f32 %v6222_v13  ;;  %1096 = vadd.xlane.f32.xlu0 %v1095_v12  ;;  %v1621_v44 = vmul.f32 %v6113_v24, %v1620_v61  ;;  %v1608_v58 = vmul.f32 %v6213_v14, %v1607_v11  ;;  %v1631_v36 = vmul.f32 %v6133_v31, %v1630_v54  ;;  %vm1634_vm10 = vmor %vm1632_vm7, %vm1633_vm8  ;;  %v926_v61 = vpop.xlane.xlu0 %925 }
  0xf5   : > { %1018 = vadd.xlane.f32.xlu2 %v1017_v30  ;;  %v790_v35 = vmul.f32 %v534_v40, %v534_v40  ;;  %v791_v34 = vmul.f32 %v535_v18, %v535_v18  ;;  %v1469_v16 = vmul.f32 0.5, %v1468_v7  ;;  %4824 = vrsqrt.f32 %v6228_v26  ;;  %v500_v7 = vld [vmem:[%s5731_s24 + $0x4a0] sm:$0xff]  ;;  %v501_v40 = vld [vmem:[%s5731_s24 + $0x4a8] sm:$0xff] }
  0xf6   : > { %v1625_v27 = vsel %vm1624_vm9, %v6113_v24, %v1621_v44  ;;  %v788_v53 = vmul.f32 %v532_v33, %v532_v33  ;;  %v1635_v32 = vsel %vm1634_vm10, %v6133_v31, %v1631_v36  ;;  %v789_v60 = vmul.f32 %v533_v37, %v533_v37  ;;  %v929_v28 = vpop.xlane.xlu1 %928 }
  0xf7   : > { %v2704_v8 = vmul.f32 %v5189_v20, %v1625_v27  ;;  %v2705_v38 = vmul.f32 %v5190_v0, %v1625_v27  ;;  %v1137_v39 = vadd.f32 %v791_v34, %v790_v35  ;;  %v2706_v9 = vmul.f32 %v5191_v41, %v1635_v32  ;;  %v6276_v11 = vpop.xlane.xlu2 %1045  ;;  %v5195_v34 = vld [vmem:[%s5731_s24 + $0x90] sm:$0xff] }
  0xf8   : > { %v2707_v46 = vmul.f32 %v5192_v45, %v1635_v32  ;;  %v676_v25 = vmul.f32 %v420_v19, %v420_v19  ;;  %v1460_v50 = vsub.f32 1.5, %v1459_v42  ;;  %v1599_v52 = vmul.f32 0.5, %v1598_v49  ;;  %v5193_v49 = vld [vmem:[%s5731_s24 + $0x80] sm:$0xff]  ;;  %v502_v45 = vld [vmem:[%s5731_s24 + $0x4b0] sm:$0xff] }
  0xf9   : > { %v1609_v51 = vmul.f32 0.5, %v1608_v58  ;;  %v677_v24 = vmul.f32 %v421_v23, %v421_v23  ;;  %v2936_v3 = vpack.c.bf16 %v2706_v9, %v2704_v8  ;;  %vm1462_vm11 = vweird.f32 %v6116_v22  ;;  %v5194_v58 = vld [vmem:[%s5731_s24 + $0x88] sm:$0xff]  ;;  %v423_v9 = vld [vmem:[%s5731_s24 + $0x238] sm:$0xff] }
  0xfa   : > { %1138 = vadd.xlane.f32.xlu1 %v1137_v39  ;;  %v6261_v57 = vpop.eup %4822  ;;  %v2937_v31 = vpack.c.bf16 %v2707_v46, %v2705_v38  ;;  %vm1463_vm12 = vweird.f32 %v6158_v63  ;;  %v1134_v15 = vadd.f32 %v789_v60, %v788_v53  ;;  %v1470_v4 = vsub.f32 1.5, %v1469_v16  ;;  %v5198_v8 = vld [vmem:[%s5731_s24 + $0x168] sm:$0xff]  ;;  %v422_v38 = vld [vmem:[%s5731_s24 + $0x230] sm:$0xff] }
  0xfb   : > { %v966_v59 = vadd.f32 %v677_v24, %v676_v25  ;;  %v6265_v62 = vpop.eup %4824  ;;  %3105 = vmatpush.bf16.xpose.msra.mxu2 %v2936_v3  ;;  %v1600_v55 = vsub.f32 1.5, %v1599_v52  ;;  %v1610_v5 = vsub.f32 1.5, %v1609_v51  ;;  %v1437_v21 = vmul.f32 %v6261_v57, %v6222_v13  ;;  %vm1464_vm13 = vmor %vm1462_vm11, %vm1463_vm12 }
  0xfc   : > { %3124 = vmatpush.bf16.xpose.msra.mxu3 %v2937_v31  ;;  %1135 = vadd.xlane.f32.xlu0 %v1134_v15  ;;  %v1461_v54 = vmul.f32 %v6158_v63, %v1460_v50  ;;  %vm1472_vm14 = vweird.f32 %v6139_v10  ;;  %vm1473_vm15 = vweird.f32 %v6196_v17  ;;  %vm1602_vm0 = vweird.f32 %v6142_v2  ;;  %v5196_v2 = vld [vmem:[%s5731_s24 + $0x98] sm:$0xff]  ;;  %v6313_v39 = vpop.xlane.xlu0 %1048 }
  0xfd   : > { %967 = vadd.xlane.f32.xlu2 %v966_v59  ;;  %vm1603_vm1 = vweird.f32 %v6209_v47  ;;  %vm1612_vm2 = vweird.f32 %v6147_v1  ;;  %vm1613_vm3 = vweird.f32 %v6213_v14  ;;  %v1447_v22 = vmul.f32 %v6265_v62, %v6228_v26  ;;  %vm1474_vm4 = vmor %vm1472_vm14, %vm1473_vm15  ;;  %v5197_v1 = vld [vmem:[%s5731_s24 + $0x160] sm:$0xff]  ;;  %v503_v50 = vld [vmem:[%s5731_s24 + $0x4b8] sm:$0xff] }
  0xfe   : > { %v1465_v48 = vsel %vm1464_vm13, %v6158_v63, %v1461_v54  ;;  %v6286_v10 = vmax.f32 %v926_v61, 1e-24  ;;  %v1471_v12 = vmul.f32 %v6196_v17, %v1470_v4  ;;  %v1438_v18 = vmul.f32 %v6261_v57, %v1437_v21  ;;  %vm1604_vm5 = vmor %vm1602_vm0, %vm1603_vm1  ;;  %v878_v52 = vpop.xlane.xlu1 %877  ;;  %v450_v4 = vld [vmem:[%s5731_s24 + $0x310] sm:$0xff]  ;;  %v449_v54 = vld [vmem:[%s5731_s24 + $0x308] sm:$0xff] }
  0xff   : > { %v6291_v30 = vmax.f32 %v929_v28, 1e-24  ;;  %v1601_v63 = vmul.f32 %v6209_v47, %v1600_v55  ;;  %v1611_v33 = vmul.f32 %v6213_v14, %v1610_v5  ;;  %v2672_v44 = vmul.f32 %v5193_v49, %v1465_v48  ;;  %vm1614_vm6 = vmor %vm1612_vm2, %vm1613_vm3  ;;  %v881_v31 = vpop.xlane.xlu2 %880  ;;  %v451_v55 = vld [vmem:[%s5731_s24 + $0x318] sm:$0xff]  ;;  %v448_v28 = vld [vmem:[%s5731_s24 + $0x300] sm:$0xff] }
 0x100   : > { %v1475_v42 = vsel %vm1474_vm4, %v6196_v17, %v1471_v12  ;;  %v2673_v36 = vmul.f32 %v5194_v58, %v1465_v48  ;;  %v756_v35 = vmul.f32 %v500_v7, %v500_v7  ;;  %v757_v16 = vmul.f32 %v501_v40, %v501_v40  ;;  %v528_v40 = vld [vmem:[%s5731_s24 + $0x580] sm:$0xff]  ;;  %v529_v49 = vld [vmem:[%s5731_s24 + $0x588] sm:$0xff] }
 0x101   : > { %v2674_v37 = vmul.f32 %v5195_v34, %v1475_v42  ;;  %v2675_v19 = vmul.f32 %v5196_v2, %v1475_v42  ;;  %v1605_v17 = vsel %vm1604_vm5, %v6209_v47, %v1601_v63  ;;  %v1448_v27 = vmul.f32 %v6265_v62, %v1447_v22  ;;  %v5199_v47 = vld [vmem:[%s5731_s24 + $0x170] sm:$0xff] }
 0x102   : > { %4826 = vrsqrt.f32 %v6286_v10  ;;  %v1615_v53 = vsel %vm1614_vm6, %v6213_v14, %v1611_v33  ;;  %v2700_v23 = vmul.f32 %v5197_v1, %v1605_v17  ;;  %v2701_v0 = vmul.f32 %v5198_v8, %v1605_v17  ;;  %v5200_v14 = vld [vmem:[%s5731_s24 + $0x178] sm:$0xff] }
 0x103   : > { %v2920_v32 = vpack.c.bf16 %v2674_v37, %v2672_v44  ;;  %v2921_v20 = vpack.c.bf16 %v2675_v19, %v2673_v36  ;;  %v2702_v41 = vmul.f32 %v5199_v47, %v1615_v53  ;;  %v1439_v46 = vmul.f32 0.5, %v1438_v18  ;;  %v5201_v47 = vld [vmem:[%s5731_s24 + $0x60] sm:$0xff] }
 0x104   : > { %v2703_v60 = vmul.f32 %v5200_v14, %v1615_v53  ;;  %v1086_v25 = vadd.f32 %v757_v16, %v756_v35  ;;  %v1449_v51 = vmul.f32 0.5, %v1448_v27  ;;  %4828 = vrsqrt.f32 %v6291_v30  ;;  %v6342_v19 = vpop.xlane.xlu0 %997  ;;  %v531_v14 = vld [vmem:[%s5731_s24 + $0x598] sm:$0xff] }
 0x105   : > { %3067 = vmatpush.bf16.xpose.msra.mxu0 %v2920_v32  ;;  %3086 = vmatpush.bf16.xpose.msra.mxu1 %v2921_v20  ;;  %v2934_v24 = vpack.c.bf16 %v2702_v41, %v2700_v23  ;;  %v678_v3 = vmul.f32 %v422_v38, %v422_v38  ;;  %v679_v59 = vmul.f32 %v423_v9, %v423_v9  ;;  %v1440_v48 = vsub.f32 1.5, %v1439_v46  ;;  %v5202_v9 = vld [vmem:[%s5731_s24 + $0x70] sm:$0xff] }
 0x106   : > { %v2935_v15 = vpack.c.bf16 %v2703_v60, %v2701_v0  ;;  %1087 = vadd.xlane.f32.xlu1 %v1086_v25  ;;  %v758_v61 = vmul.f32 %v502_v45, %v502_v45  ;;  %v759_v21 = vmul.f32 %v503_v50, %v503_v50  ;;  %v6327_v22 = vmax.f32 %v881_v31, 1e-24  ;;  %v6354_v23 = vpop.xlane.xlu1 %1000  ;;  %v417_v0 = vld [vmem:[%s5731_s24 + $0x208] sm:$0xff]  ;;  %v530_v46 = vld [vmem:[%s5731_s24 + $0x590] sm:$0xff] }
 0x107   : > { %3106 = vmatpush.bf16.xpose.msra.mxu2 %v2934_v24  ;;  %v969_v7 = vadd.f32 %v679_v59, %v678_v3  ;;  %v6329_v12 = vmax.f32 %v878_v52, 1e-24  ;;  %v1450_v18 = vsub.f32 1.5, %v1449_v51  ;;  %v706_v33 = vmul.f32 %v450_v4, %v450_v4  ;;  %v920_v20 = vpop.xlane.xlu2 %919  ;;  %v5203_v52 = vld [vmem:[%s5731_s24 + $0x68] sm:$0xff]  ;;  %v5204_v24 = vld [vmem:[%s5731_s24 + $0x78] sm:$0xff] }
 0x108   : > { %v6323_v5 = vpop.eup %4826  ;;  %3125 = vmatpush.bf16.xpose.msra.mxu3 %v2935_v15  ;;  %v1089_v63 = vadd.f32 %v759_v21, %v758_v61  ;;  %v707_v42 = vmul.f32 %v451_v55, %v451_v55  ;;  %vm1442_vm7 = vweird.f32 %v6222_v13  ;;  %vm1443_vm8 = vweird.f32 %v6261_v57  ;;  %v416_v13 = vld [vmem:[%s5731_s24 + $0x200] sm:$0xff]  ;;  %v418_v21 = vld [vmem:[%s5731_s24 + $0x210] sm:$0xff] }
 0x109   : > { %v1577_v44 = vmul.f32 %v6323_v5, %v6286_v10  ;;  %970 = vadd.xlane.f32.xlu0 %v969_v7  ;;  %v704_v58 = vmul.f32 %v448_v28, %v448_v28  ;;  %4830 = vrsqrt.f32 %v6327_v22  ;;  %v705_v34 = vmul.f32 %v449_v54, %v449_v54  ;;  %vm1444_vm10 = vmor %vm1442_vm7, %vm1443_vm8  ;;  %v419_v7 = vld [vmem:[%s5731_s24 + $0x218] sm:$0xff] }
 0x10a   : > { %v6337_v36 = vpop.eup %4828  ;;  %1090 = vadd.xlane.f32.xlu2 %v1089_v63  ;;  %v1011_v35 = vadd.f32 %v707_v42, %v706_v33  ;;  %v784_v37 = vmul.f32 %v528_v40, %v528_v40  ;;  %vm1453_vm9 = vweird.f32 %v6265_v62  ;;  %4832 = vrsqrt.f32 %v6329_v12 }
 0x10b   : > { %v785_v2 = vmul.f32 %v529_v49, %v529_v49  ;;  %v1441_v17 = vmul.f32 %v6261_v57, %v1440_v48  ;;  %v1451_v16 = vmul.f32 %v6265_v62, %v1450_v18  ;;  %vm1452_vm11 = vweird.f32 %v6228_v26 }
 0x10c   : > { %v1587_v27 = vmul.f32 %v6337_v36, %v6291_v30  ;;  %v1578_v53 = vmul.f32 %v6323_v5, %v1577_v44  ;;  %v1008_v1 = vadd.f32 %v705_v34, %v704_v58  ;;  %vm1454_vm12 = vmor %vm1452_vm11, %vm1453_vm9  ;;  %v673_v31 = vmul.f32 %v417_v0, %v417_v0  ;;  %v923_v40 = vpop.xlane.xlu0 %922  ;;  %v5205_v0 = vld [vmem:[%s5731_s24 + $0x140] sm:$0xff] }
 0x10d   : > { %v1128_v32 = vadd.f32 %v785_v2, %v784_v37  ;;  %v1445_v8 = vsel %vm1444_vm10, %v6261_v57, %v1441_v17  ;;  %v1455_v26 = vsel %vm1454_vm12, %v6265_v62, %v1451_v16  ;;  %v672_v57 = vmul.f32 %v416_v13, %v416_v13  ;;  %v498_v16 = vld [vmem:[%s5731_s24 + $0x490] sm:$0xff] }
 0x10e   : > { %1012 = vadd.xlane.f32.xlu1 %v1011_v35  ;;  %v2668_v41 = vmul.f32 %v5201_v47, %v1445_v8  ;;  %v2670_v45 = vmul.f32 %v5202_v9, %v1455_v26  ;;  %v1588_v25 = vmul.f32 %v6337_v36, %v1587_v27  ;;  %v1579_v50 = vmul.f32 0.5, %v1578_v53  ;;  %v6380_v42 = vpop.xlane.xlu1 %1039  ;;  %v499_v27 = vld [vmem:[%s5731_s24 + $0x498] sm:$0xff]  ;;  %v496_v53 = vld [vmem:[%s5731_s24 + $0x480] sm:$0xff] }
 0x10f   : > { %v6360_v38 = vpop.eup %4830  ;;  %v2669_v51 = vmul.f32 %v5203_v52, %v1445_v8  ;;  %v2671_v3 = vmul.f32 %v5204_v24, %v1455_v26  ;;  %v786_v15 = vmul.f32 %v530_v46, %v530_v46  ;;  %v787_v59 = vmul.f32 %v531_v14, %v531_v14  ;;  %v6386_v34 = vpop.xlane.xlu2 %1042  ;;  %v525_v8 = vld [vmem:[%s5731_s24 + $0x568] sm:$0xff]  ;;  %v5207_v52 = vld [vmem:[%s5731_s24 + $0x150] sm:$0xff]  ;;  %v5208_v24 = vld [vmem:[%s5731_s24 + $0x158] sm:$0xff] }
 0x110   : > { %v6366_v60 = vpop.eup %4832  ;;  %v2918_v62 = vpack.c.bf16 %v2670_v45, %v2668_v41  ;;  %v1427_v61 = vmul.f32 %v6360_v38, %v6327_v22  ;;  %v1589_v28 = vmul.f32 0.5, %v1588_v25  ;;  %v1580_v54 = vsub.f32 1.5, %v1579_v50  ;;  %v5206_v41 = vld [vmem:[%s5731_s24 + $0x148] sm:$0xff] }
 0x111   : > { %1009 = vadd.xlane.f32.xlu0 %v1008_v1  ;;  %v1417_v4 = vmul.f32 %v6366_v60, %v6329_v12  ;;  %v2919_v55 = vpack.c.bf16 %v2671_v3, %v2669_v51  ;;  %v960_v48 = vadd.f32 %v673_v31, %v672_v57  ;;  %v6377_v18 = vmax.f32 %v920_v20, 1e-24  ;;  %v497_v1 = vld [vmem:[%s5731_s24 + $0x488] sm:$0xff] }
 0x112   : > { %1129 = vadd.xlane.f32.xlu2 %v1128_v32  ;;  %3068 = vmatpush.bf16.xpose.msra.mxu0 %v2918_v62  ;;  %vm1583_vm13 = vweird.f32 %v6323_v5  ;;  %v1131_v63 = vadd.f32 %v787_v59, %v786_v15  ;;  %v674_v33 = vmul.f32 %v418_v21, %v418_v21  ;;  %v1428_v49 = vmul.f32 %v6360_v38, %v1427_v61  ;;  %v524_v32 = vld [vmem:[%s5731_s24 + $0x560] sm:$0xff] }
 0x113   : > { %3087 = vmatpush.bf16.xpose.msra.mxu1 %v2919_v55  ;;  %v1418_v44 = vmul.f32 %v6366_v60, %v1417_v4  ;;  %v675_v58 = vmul.f32 %v419_v7, %v419_v7  ;;  %v6384_v35 = vmax.f32 %v923_v40, 1e-24  ;;  %v1590_v37 = vsub.f32 1.5, %v1589_v28 }
 0x114   : > { %vm1582_vm14 = vweird.f32 %v6286_v10  ;;  %v1581_v2 = vmul.f32 %v6323_v5, %v1580_v54  ;;  %4834 = vrsqrt.f32 %v6377_v18  ;;  %vm1592_vm0 = vweird.f32 %v6291_v30 }
 0x115   : > { %vm1584_vm15 = vmor %vm1582_vm14, %vm1583_vm13  ;;  %v963_v17 = vadd.f32 %v675_v58, %v674_v33  ;;  %vm1593_vm1 = vweird.f32 %v6337_v36  ;;  %v1429_v10 = vmul.f32 0.5, %v1428_v49  ;;  %v1419_v20 = vmul.f32 0.5, %v1418_v44 }
 0x116   : > { %961 = vadd.xlane.f32.xlu1 %v960_v48  ;;  %4836 = vrsqrt.f32 %v6384_v35  ;;  %v1585_v13 = vsel %vm1584_vm15, %v6323_v5, %v1581_v2  ;;  %v1591_v26 = vmul.f32 %v6337_v36, %v1590_v37  ;;  %v754_v45 = vmul.f32 %v498_v16, %v498_v16  ;;  %vm1594_vm2 = vmor %vm1592_vm0, %vm1593_vm1  ;;  %v875_v30 = vpop.xlane.xlu1 %874  ;;  %v872_v48 = vpop.xlane.xlu0 %871  ;;  %v605_v37 = vld [vmem:[%s5731_s24 + $0x7e8] sm:$0xff]  ;;  %v526_v2 = vld [vmem:[%s5731_s24 + $0x570] sm:$0xff] }
 0x117   : > { %v2696_v47 = vmul.f32 %v5205_v0, %v1585_v13  ;;  %v2697_v9 = vmul.f32 %v5206_v41, %v1585_v13  ;;  %v755_v46 = vmul.f32 %v499_v27, %v499_v27  ;;  %v752_v14 = vmul.f32 %v496_v53, %v496_v53  ;;  %v6417_v28 = vpop.xlane.xlu2 %991  ;;  %v5209_v27 = vld [vmem:[%s5731_s24 + $0x40] sm:$0xff]  ;;  %v5212_v13 = vld [vmem:[%s5731_s24 + $0x58] sm:$0xff] }
 0x118   : > { %v753_v25 = vmul.f32 %v497_v1, %v497_v1  ;;  %v780_v50 = vmul.f32 %v524_v32, %v524_v32  ;;  %v1595_v5 = vsel %vm1594_vm2, %v6337_v36, %v1591_v26  ;;  %v781_v57 = vmul.f32 %v525_v8, %v525_v8  ;;  %v606_v26 = vld [vmem:[%s5731_s24 + $0x7f0] sm:$0xff] }
 0x119   : > { %1132 = vadd.xlane.f32.xlu0 %v1131_v63  ;;  %v2698_v51 = vmul.f32 %v5207_v52, %v1595_v5  ;;  %v2699_v3 = vmul.f32 %v5208_v24, %v1595_v5  ;;  %v1083_v31 = vadd.f32 %v755_v46, %v754_v45  ;;  %v1430_v59 = vsub.f32 1.5, %v1429_v10  ;;  %v604_v63 = vld [vmem:[%s5731_s24 + $0x7e0] sm:$0xff]  ;;  %v5210_v10 = vld [vmem:[%s5731_s24 + $0x50] sm:$0xff] }
 0x11a   : > { %964 = vadd.xlane.f32.xlu2 %v963_v17  ;;  %v6409_v62 = vpop.eup %4834  ;;  %v1080_v15 = vadd.f32 %v753_v25, %v752_v14  ;;  %v1420_v61 = vsub.f32 1.5, %v1419_v20  ;;  %v1122_v4 = vadd.f32 %v781_v57, %v780_v50  ;;  %vm1432_vm3 = vweird.f32 %v6327_v22  ;;  %v527_v17 = vld [vmem:[%s5731_s24 + $0x578] sm:$0xff]  ;;  %v494_v50 = vld [vmem:[%s5731_s24 + $0x470] sm:$0xff] }
 0x11b   : > { %vm1433_vm4 = vweird.f32 %v6360_v38  ;;  %v2932_v36 = vpack.c.bf16 %v2698_v51, %v2696_v47  ;;  %v2933_v21 = vpack.c.bf16 %v2699_v3, %v2697_v9  ;;  %vm1423_vm5 = vweird.f32 %v6366_v60  ;;  %v607_v9 = vld [vmem:[%s5731_s24 + $0x7f8] sm:$0xff] }
 0x11c   : > { %v6413_v55 = vpop.eup %4836  ;;  %v1557_v54 = vmul.f32 %v6409_v62, %v6377_v18  ;;  %vm1434_vm6 = vmor %vm1432_vm3, %vm1433_vm4  ;;  %vm1422_vm7 = vweird.f32 %v6329_v12  ;;  %v1421_v7 = vmul.f32 %v6366_v60, %v1420_v61  ;;  %v1431_v40 = vmul.f32 %v6360_v38, %v1430_v59  ;;  %v495_v3 = vld [vmem:[%s5731_s24 + $0x478] sm:$0xff] }
 0x11d   : > { %3107 = vmatpush.bf16.xpose.msra.mxu2 %v2932_v36  ;;  %3126 = vmatpush.bf16.xpose.msra.mxu3 %v2933_v21  ;;  %v1567_v22 = vmul.f32 %v6413_v55, %v6384_v35  ;;  %v6429_v33 = vmax.f32 %v6185_v29, 1e-24  ;;  %vm1424_vm8 = vmor %vm1422_vm7, %vm1423_vm5  ;;  %v6432_v44 = vmax.f32 %v872_v48, 1e-24  ;;  %v6440_v16 = vmax.f32 %v6153_v56, 1e-24 }
 0x11e   : > { %1084 = vadd.xlane.f32.xlu1 %v1083_v31  ;;  %v1558_v49 = vmul.f32 %v6409_v62, %v1557_v54  ;;  %v1425_v12 = vsel %vm1424_vm8, %v6366_v60, %v1421_v7  ;;  %v1435_v58 = vsel %vm1434_vm6, %v6360_v38, %v1431_v40  ;;  %v6442_v29 = vmax.f32 %v875_v30, 1e-24  ;;  %v5211_v60 = vld [vmem:[%s5731_s24 + $0x48] sm:$0xff]  ;;  %v914_v25 = vpop.xlane.xlu1 %913  ;;  %v572_v54 = vld [vmem:[%s5731_s24 + $0x6e0] sm:$0xff] }
 0x11f   : > { %v2664_v53 = vmul.f32 %v5209_v27, %v1425_v12  ;;  %v860_v1 = vmul.f32 %v604_v63, %v604_v63  ;;  %v1568_v32 = vmul.f32 %v6413_v55, %v1567_v22  ;;  %v2666_v20 = vmul.f32 %v5210_v10, %v1435_v58  ;;  %v493_v30 = vld [vmem:[%s5731_s24 + $0x468] sm:$0xff] }
 0x120   : > { %v2665_v38 = vmul.f32 %v5211_v60, %v1425_v12  ;;  %v2667_v8 = vmul.f32 %v5212_v13, %v1435_v58  ;;  %v6451_v0 = vmax.f32 %v6235_v43, 1e-24  ;;  %v861_v56 = vmul.f32 %v605_v37, %v605_v37  ;;  %v917_v43 = vpop.xlane.xlu2 %916  ;;  %v573_v48 = vld [vmem:[%s5731_s24 + $0x6e8] sm:$0xff] }
 0x121   : > { %1081 = vadd.xlane.f32.xlu0 %v1080_v15  ;;  %v782_v47 = vmul.f32 %v526_v2, %v526_v2  ;;  %v783_v41 = vmul.f32 %v527_v17, %v527_v17  ;;  %v1559_v45 = vmul.f32 0.5, %v1558_v49  ;;  %4838 = vrsqrt.f32 %v6432_v44 }
 0x122   : > { %1123 = vadd.xlane.f32.xlu2 %v1122_v4  ;;  %v2916_v46 = vpack.c.bf16 %v2666_v20, %v2664_v53  ;;  %v2917_v14 = vpack.c.bf16 %v2667_v8, %v2665_v38  ;;  %4840 = vrsqrt.f32 %v6442_v29  ;;  %v1242_v5 = vadd.f32 %v861_v56, %v860_v1  ;;  %v492_v4 = vld [vmem:[%s5731_s24 + $0x460] sm:$0xff]  ;;  %v6485_v53 = vpop.xlane.xlu0 %994 }
 0x123   : > { %v1125_v57 = vadd.f32 %v783_v41, %v782_v47  ;;  %v862_v52 = vmul.f32 %v606_v26, %v606_v26  ;;  %v1569_v51 = vmul.f32 0.5, %v1568_v32  ;;  %v863_v24 = vmul.f32 %v607_v9, %v607_v9  ;;  %v5213_v47 = vld [vmem:[%s5731_s24 + $0x120] sm:$0xff]  ;;  %v5214_v41 = vld [vmem:[%s5731_s24 + $0x130] sm:$0xff] }
 0x124   : > { %3069 = vmatpush.bf16.xpose.msra.mxu0 %v2916_v46  ;;  %3088 = vmatpush.bf16.xpose.msra.mxu1 %v2917_v14  ;;  %4842 = vrsqrt.f32 %v6429_v33  ;;  %v6459_v31 = vmax.f32 %v914_v25, 1e-24  ;;  %v750_v15 = vmul.f32 %v494_v50, %v494_v50  ;;  %v6462_v61 = vmax.f32 %v917_v43, 1e-24  ;;  %v521_v46 = vld [vmem:[%s5731_s24 + $0x548] sm:$0xff] }
 0x125   : > { %4844 = vrsqrt.f32 %v6440_v16  ;;  %v1245_v59 = vadd.f32 %v863_v24, %v862_v52  ;;  %v1560_v36 = vsub.f32 1.5, %v1559_v45  ;;  %v751_v21 = vmul.f32 %v495_v3, %v495_v3  ;;  %v520_v45 = vld [vmem:[%s5731_s24 + $0x540] sm:$0xff]  ;;  %v5216_v52 = vld [vmem:[%s5731_s24 + $0x138] sm:$0xff] }
 0x126   : > { %1243 = vadd.xlane.f32.xlu1 %v1242_v5  ;;  %4846 = vrsqrt.f32 %v6451_v0  ;;  %vm1562_vm9 = vweird.f32 %v6377_v18  ;;  %v1570_v7 = vsub.f32 1.5, %v1569_v51  ;;  %vm1563_vm10 = vweird.f32 %v6409_v62  ;;  %v5215_v5 = vld [vmem:[%s5731_s24 + $0x128] sm:$0xff]  ;;  %v574_v51 = vld [vmem:[%s5731_s24 + $0x6f0] sm:$0xff] }
 0x127   : > { %v6469_v22 = vpop.eup %4838  ;;  %4848 = vrsqrt.f32 %v6459_v31  ;;  %v1077_v63 = vadd.f32 %v751_v21, %v750_v15  ;;  %v748_v49 = vmul.f32 %v492_v4, %v492_v4  ;;  %v749_v12 = vmul.f32 %v493_v30, %v493_v30  ;;  %vm1564_vm12 = vmor %vm1562_vm9, %vm1563_vm10 }
 0x128   : > { %v6473_v40 = vpop.eup %4840  ;;  %vm1573_vm11 = vweird.f32 %v6413_v55  ;;  %4850 = vrsqrt.f32 %v6462_v61  ;;  %v828_v58 = vmul.f32 %v572_v54, %v572_v54  ;;  %v829_v37 = vmul.f32 %v573_v48, %v573_v48 }
 0x129   : > { %1126 = vadd.xlane.f32.xlu0 %v1125_v57  ;;  %v6481_v17 = vmax.f32 %v6276_v11, 1e-24  ;;  %v1397_v27 = vmul.f32 %v6469_v22, %v6432_v44  ;;  %v1074_v1 = vadd.f32 %v749_v12, %v748_v49  ;;  %v1561_v32 = vmul.f32 %v6409_v62, %v1560_v36  ;;  %v575_v36 = vld [vmem:[%s5731_s24 + $0x6f8] sm:$0xff] }
 0x12a   : > { %1246 = vadd.xlane.f32.xlu2 %v1245_v59  ;;  %v6478_v2 = vpop.eup %4842  ;;  %vm1572_vm13 = vweird.f32 %v6384_v35  ;;  %v1407_v11 = vmul.f32 %v6473_v40, %v6442_v29  ;;  %v1194_v20 = vadd.f32 %v829_v37, %v828_v58  ;;  %v1571_v60 = vmul.f32 %v6413_v55, %v1570_v7  ;;  %v523_v49 = vld [vmem:[%s5731_s24 + $0x558] sm:$0xff]  ;;  %v6541_v37 = vpop.xlane.xlu0 %1033 }
 0x12b   : > { %v6488_v10 = vpop.eup %4844  ;;  %v6501_v13 = vmax.f32 %v6313_v39, 1e-24  ;;  %vm1574_vm14 = vmor %vm1572_vm13, %vm1573_vm11  ;;  %v1565_v18 = vsel %vm1564_vm12, %v6409_v62, %v1561_v32  ;;  %v2007_v8 = vmul.f32 %v6478_v2, %v6429_v33  ;;  %v1398_v56 = vmul.f32 %v6469_v22, %v1397_v27 }
 0x12c   : > { %v6498_v38 = vpop.eup %4846  ;;  %v1575_v26 = vsel %vm1574_vm14, %v6413_v55, %v1571_v60  ;;  %v2692_v39 = vmul.f32 %v5213_v47, %v1565_v18  ;;  %v1997_v62 = vmul.f32 %v6488_v10, %v6440_v16  ;;  %4852 = vrsqrt.f32 %v6481_v17 }
 0x12d   : > { %v6506_v35 = vpop.eup %4848  ;;  %v2694_v9 = vmul.f32 %v5214_v41, %v1575_v26  ;;  %v1408_v55 = vmul.f32 %v6473_v40, %v1407_v11  ;;  %4854 = vrsqrt.f32 %v6501_v13  ;;  %v2693_v57 = vmul.f32 %v5215_v5, %v1565_v18  ;;  %v601_v5 = vld [vmem:[%s5731_s24 + $0x7c8] sm:$0xff] }
 0x12e   : > { %1078 = vadd.xlane.f32.xlu1 %v1077_v63  ;;  %v6516_v14 = vpop.eup %4850  ;;  %v1537_v25 = vmul.f32 %v6506_v35, %v6459_v31  ;;  %v2695_v43 = vmul.f32 %v5216_v52, %v1575_v26  ;;  %v2008_v24 = vmul.f32 %v6478_v2, %v2007_v8  ;;  %v776_v3 = vmul.f32 %v520_v45, %v520_v45  ;;  %v522_v63 = vld [vmem:[%s5731_s24 + $0x550] sm:$0xff] }
 0x12f   : > { %v2930_v50 = vpack.c.bf16 %v2694_v9, %v2692_v39  ;;  %v777_v15 = vmul.f32 %v521_v46, %v521_v46  ;;  %v1399_v59 = vmul.f32 0.5, %v1398_v56  ;;  %v1547_v4 = vmul.f32 %v6516_v14, %v6462_v61  ;;  %v866_v39 = vpop.xlane.xlu2 %865  ;;  %v602_v46 = vld [vmem:[%s5731_s24 + $0x7d0] sm:$0xff] }
 0x130   : > { %v2931_v30 = vpack.c.bf16 %v2695_v43, %v2693_v57  ;;  %v1998_v21 = vmul.f32 %v6488_v10, %v1997_v62  ;;  %v1409_v54 = vmul.f32 0.5, %v1408_v55  ;;  %v1538_v48 = vmul.f32 %v6506_v35, %v1537_v25  ;;  %v603_v62 = vld [vmem:[%s5731_s24 + $0x7d8] sm:$0xff]  ;;  %v488_v57 = vld [vmem:[%s5731_s24 + $0x440] sm:$0xff] }
 0x131   : > { %1075 = vadd.xlane.f32.xlu0 %v1074_v1  ;;  %3108 = vmatpush.bf16.xpose.msra.mxu2 %v2930_v50  ;;  %v830_v7 = vmul.f32 %v574_v51, %v574_v51  ;;  %v1837_v12 = vmul.f32 %v6498_v38, %v6451_v0  ;;  %v6539_v58 = vmax.f32 %v6240_v6, 1e-24  ;;  %v6545_v1 = vmul.f32 0.5, %v2008_v24  ;;  %v600_v50 = vld [vmem:[%s5731_s24 + $0x7c0] sm:$0xff] }
 0x132   : > { %1195 = vadd.xlane.f32.xlu2 %v1194_v20  ;;  %3127 = vmatpush.bf16.xpose.msra.mxu3 %v2931_v30  ;;  %v6543_v27 = vpop.eup %4852  ;;  %v1116_v32 = vadd.f32 %v777_v15, %v776_v3  ;;  %v831_v11 = vmul.f32 %v575_v36, %v575_v36  ;;  %v1400_v60 = vsub.f32 1.5, %v1399_v59  ;;  %v1548_v18 = vmul.f32 %v6516_v14, %v1547_v4  ;;  %v489_v4 = vld [vmem:[%s5731_s24 + $0x448] sm:$0xff] }
 0x133   : > { %v6547_v20 = vpop.eup %4854  ;;  %v778_v8 = vmul.f32 %v522_v63, %v522_v63  ;;  %v779_v26 = vmul.f32 %v523_v49, %v523_v49  ;;  %v6550_v6 = vmul.f32 0.5, %v1998_v21  ;;  %v1410_v56 = vsub.f32 1.5, %v1409_v54  ;;  %v5218_v63 = vld [vmem:[%s5731_s24 + $0x28] sm:$0xff] }
 0x134   : > { %v1539_v47 = vmul.f32 0.5, %v1538_v48  ;;  %v1197_v41 = vadd.f32 %v831_v11, %v830_v7  ;;  %v6553_v9 = vmul.f32 %v6498_v38, %v1837_v12  ;;  %4856 = vrsqrt.f32 %v6539_v58  ;;  %v5217_v48 = vld [vmem:[%s5731_s24 + $0x20] sm:$0xff]  ;;  %v5219_v11 = vld [vmem:[%s5731_s24 + $0x30] sm:$0xff] }
 0x135   : > { %vm1403_vm15 = vweird.f32 %v6469_v22  ;;  %v1119_v45 = vadd.f32 %v779_v26, %v778_v8  ;;  %v1977_v55 = vmul.f32 %v6543_v27, %v6481_v17  ;;  %v1987_v25 = vmul.f32 %v6547_v20, %v6501_v13 }
 0x136   : > { %1117 = vadd.xlane.f32.xlu1 %v1116_v32  ;;  %vm1412_vm0 = vweird.f32 %v6442_v29  ;;  %vm1413_vm1 = vweird.f32 %v6473_v40  ;;  %vm1402_vm2 = vweird.f32 %v6432_v44  ;;  %v6569_v52 = vmul.f32 0.5, %v1548_v18  ;;  %v869_v29 = vpop.xlane.xlu0 %868 }
 0x137   : > { %v6571_v43 = vmax.f32 %v866_v39, 1e-24  ;;  %v1401_v51 = vmul.f32 %v6469_v22, %v1400_v60  ;;  %vm1404_vm3 = vmor %vm1402_vm2, %vm1403_vm15  ;;  %v1540_v24 = vsub.f32 1.5, %v1539_v47  ;;  %v1411_v3 = vmul.f32 %v6473_v40, %v1410_v56  ;;  %v5220_v60 = vld [vmem:[%s5731_s24 + $0x38] sm:$0xff] }
 0x138   : > { %v858_v15 = vmul.f32 %v602_v46, %v602_v46  ;;  %v859_v59 = vmul.f32 %v603_v62, %v603_v62  ;;  %vm2013_vm4 = vweird.f32 %v6478_v2  ;;  %vm1414_vm5 = vmor %vm1412_vm0, %vm1413_vm1  ;;  %v856_v30 = vmul.f32 %v600_v50, %v600_v50 }
 0x139   : > { %1198 = vadd.xlane.f32.xlu0 %v1197_v41  ;;  %v1405_v44 = vsel %vm1404_vm3, %v6469_v22, %v1401_v51  ;;  %v857_v36 = vmul.f32 %v601_v5, %v601_v5  ;;  %v744_v21 = vmul.f32 %v488_v57, %v488_v57  ;;  %vm2003_vm6 = vweird.f32 %v6488_v10  ;;  %v6603_v41 = vpop.xlane.xlu1 %1036 }
 0x13a   : > { %1120 = vadd.xlane.f32.xlu2 %v1119_v45  ;;  %v1415_v54 = vsel %vm1414_vm5, %v6473_v40, %v1411_v3  ;;  %v2660_v7 = vmul.f32 %v5217_v48, %v1405_v44  ;;  %v2661_v49 = vmul.f32 %v5218_v63, %v1405_v44  ;;  %v1239_v12 = vadd.f32 %v859_v59, %v858_v15  ;;  %v6588_v32 = vpop.eup %4856  ;;  %v5222_v44 = vld [vmem:[%s5731_s24 + $0x108] sm:$0xff]  ;;  %v5223_v48 = vld [vmem:[%s5731_s24 + $0x110] sm:$0xff]  ;;  %v5224_v63 = vld [vmem:[%s5731_s24 + $0x118] sm:$0xff] }
 0x13b   : > { %vm2012_vm7 = vweird.f32 %v6429_v33  ;;  %v2662_v22 = vmul.f32 %v5219_v11, %v1415_v54  ;;  %v2663_v18 = vmul.f32 %v5220_v60, %v1415_v54  ;;  %v1236_v8 = vadd.f32 %v857_v36, %v856_v30 }
 0x13c   : > { %v745_v26 = vmul.f32 %v489_v4, %v489_v4  ;;  %vm2002_vm8 = vweird.f32 %v6440_v16  ;;  %v1978_v40 = vmul.f32 %v6543_v27, %v1977_v55  ;;  %v1988_v56 = vmul.f32 %v6547_v20, %v1987_v25  ;;  %vm6654_vm0 = vmor %vm2012_vm7, %vm2013_vm4 }
 0x13d   : > { %v6597_v47 = vmax.f32 %v6342_v19, 1e-24  ;;  %v6600_v39 = vmax.f32 %v6386_v34, 1e-24  ;;  %vm1543_vm9 = vweird.f32 %v6506_v35  ;;  %v2914_v45 = vpack.c.bf16 %v2662_v22, %v2660_v7  ;;  %vm2004_vm1 = vmor %vm2002_vm8, %vm2003_vm6 }
 0x13e   : > { %1240 = vadd.xlane.f32.xlu1 %v1239_v12  ;;  %v2915_v46 = vpack.c.bf16 %v2663_v18, %v2661_v49  ;;  %v1541_v62 = vmul.f32 %v6506_v35, %v1540_v24  ;;  %v1550_v50 = vsub.f32 1.5, %v6569_v52  ;;  %4858 = vrsqrt.f32 %v6571_v43 }
 0x13f   : > { %v6608_v55 = vmax.f32 %v869_v29, 1e-24  ;;  %v1068_v19 = vadd.f32 %v745_v26, %v744_v21  ;;  %v2010_v34 = vsub.f32 1.5, %v6545_v1  ;;  %v2000_v25 = vsub.f32 1.5, %v6550_v6  ;;  %3070 = vmatpush.bf16.xpose.msra.mxu0 %v2914_v45  ;;  %v568_v6 = vld [vmem:[%s5731_s24 + $0x6c0] sm:$0xff] }
 0x140   : > { %v6613_v5 = vmax.f32 %v6380_v42, 1e-24  ;;  %vm1542_vm10 = vweird.f32 %v6459_v31  ;;  %3089 = vmatpush.bf16.xpose.msra.mxu1 %v2915_v46  ;;  %v6617_v57 = vmul.f32 0.5, %v6553_v9  ;;  %4860 = vrsqrt.f32 %v6597_v47  ;;  %v569_v9 = vld [vmem:[%s5731_s24 + $0x6c8] sm:$0xff]  ;;  %v570_v46 = vld [vmem:[%s5731_s24 + $0x6d0] sm:$0xff] }
 0x141   : > { %1237 = vadd.xlane.f32.xlu0 %v1236_v8  ;;  %vm1552_vm11 = vweird.f32 %v6462_v61  ;;  %vm1553_vm12 = vweird.f32 %v6516_v14  ;;  %vm1544_vm13 = vmor %vm1542_vm10, %vm1543_vm9  ;;  %v1847_v42 = vmul.f32 %v6588_v32, %v6539_v58  ;;  %v6626_v31 = vmul.f32 0.5, %v1978_v40  ;;  %v6683_v60 = vpop.xlane.xlu1 %985  ;;  %v491_v8 = vld [vmem:[%s5731_s24 + $0x458] sm:$0xff] }
 0x142   : > { %1069 = vadd.xlane.f32.xlu2 %v1068_v19  ;;  %4862 = vrsqrt.f32 %v6600_v39  ;;  %v1545_v1 = vsel %vm1544_vm13, %v6506_v35, %v1541_v62  ;;  %v6632_v52 = vmul.f32 0.5, %v1988_v56  ;;  %v6635_v51 = vmax.f32 %v6354_v23, 1e-24  ;;  %vm1554_vm15 = vmor %vm1552_vm11, %vm1553_vm12  ;;  %v5221_v35 = vld [vmem:[%s5731_s24 + $0x100] sm:$0xff]  ;;  %v5226_v19 = vld [vmem:[%s5731_s24 + $0x3f0] sm:$0xff] }
 0x143   : > { %4864 = vrsqrt.f32 %v6608_v55  ;;  %v1551_v24 = vmul.f32 %v6516_v14, %v1550_v50  ;;  %vm1982_vm14 = vweird.f32 %v6481_v17  ;;  %v2688_v3 = vmul.f32 %v5221_v35, %v1545_v1  ;;  %v5225_v56 = vld [vmem:[%s5731_s24 + $0x3e0] sm:$0xff] }
 0x144   : > { %4866 = vrsqrt.f32 %v6613_v5  ;;  %v2001_v15 = vmul.f32 %v6488_v10, %v2000_v25  ;;  %v2011_v23 = vmul.f32 %v6478_v2, %v2010_v34  ;;  %v6648_v59 = vpop.eup %4858  ;;  %v2689_v30 = vmul.f32 %v5222_v44, %v1545_v1  ;;  %v5227_v25 = vld [vmem:[%s5731_s24 + $0x3e8] sm:$0xff] }
 0x145   : > { %v1555_v61 = vsel %vm1554_vm15, %v6516_v14, %v1551_v24  ;;  %v824_v36 = vmul.f32 %v568_v6, %v568_v6  ;;  %v825_v21 = vmul.f32 %v569_v9, %v569_v9  ;;  %v1848_v54 = vmul.f32 %v6588_v32, %v1847_v42  ;;  %v5228_v6 = vld [vmem:[%s5731_s24 + $0x3f8] sm:$0xff] }
 0x146   : > { %vm1983_vm2 = vweird.f32 %v6543_v27  ;;  %v6667_v33 = vmax.f32 %v6417_v28, 1e-24  ;;  %v2690_v14 = vmul.f32 %v5223_v48, %v1555_v61  ;;  %v6670_v7 = vpop.eup %4860  ;;  %v2691_v49 = vmul.f32 %v5224_v63, %v1555_v61  ;;  %v6720_v63 = vpop.xlane.xlu2 %988 }
 0x147   : > { %v2005_v12 = vsel %vm2004_vm1, %v6488_v10, %v2001_v15  ;;  %v2015_v16 = vsel %vm6654_vm0, %v6478_v2, %v2011_v23  ;;  %v1188_v29 = vadd.f32 %v825_v21, %v824_v36  ;;  %v1980_v28 = vsub.f32 1.5, %v6626_v31  ;;  %v490_v10 = vld [vmem:[%s5731_s24 + $0x450] sm:$0xff]  ;;  %v571_v31 = vld [vmem:[%s5731_s24 + $0x6d8] sm:$0xff]  ;;  %vm1984_vm4 = vmor %vm1982_vm14, %vm1983_vm2 }
 0x148   : > { %v6677_v11 = vpop.eup %4862  ;;  %4868 = vrsqrt.f32 %v6635_v51  ;;  %v1377_v22 = vmul.f32 %v6648_v59, %v6571_v43  ;;  %v2928_v18 = vpack.c.bf16 %v2690_v14, %v2688_v3  ;;  %v1990_v2 = vsub.f32 1.5, %v6632_v52 }
 0x149   : > { %v6687_v26 = vpop.eup %4864  ;;  %vm1993_vm3 = vweird.f32 %v6547_v20  ;;  %v2929_v40 = vpack.c.bf16 %v2691_v49, %v2689_v30  ;;  %v2780_v45 = vmul.f32 %v5225_v56, %v2005_v12  ;;  %1189 = vadd.xlane.f32.xlu1 %v1188_v29  ;;  %v1817_v50 = vmul.f32 %v6670_v7, %v6597_v47 }
 0x14a   : > { %v6693_v62 = vpop.eup %4866  ;;  %4870 = vrsqrt.f32 %v6667_v33  ;;  %3109 = vmatpush.bf16.xpose.msra.mxu2 %v2928_v18  ;;  %v2782_v34 = vmul.f32 %v5226_v19, %v2015_v16  ;;  %v2781_v42 = vmul.f32 %v5227_v25, %v2005_v12  ;;  %v1967_v1 = vmul.f32 %v6677_v11, %v6600_v39  ;;  %v5230_v19 = vld [vmem:[%s5731_s24 + $0x3d0] sm:$0xff]  ;;  %v517_v25 = vld [vmem:[%s5731_s24 + $0x528] sm:$0xff] }
 0x14b   : > { %3128 = vmatpush.bf16.xpose.msra.mxu3 %v2929_v40  ;;  %v2783_v9 = vmul.f32 %v5228_v6, %v2015_v16  ;;  %v746_v52 = vmul.f32 %v490_v10, %v490_v10  ;;  %v747_v24 = vmul.f32 %v491_v8, %v491_v8  ;;  %v1378_v35 = vmul.f32 %v6648_v59, %v1377_v22  ;;  %v519_v22 = vld [vmem:[%s5731_s24 + $0x538] sm:$0xff]  ;;  %v516_v40 = vld [vmem:[%s5731_s24 + $0x520] sm:$0xff] }
 0x14c   : > { %v1387_v3 = vmul.f32 %v6687_v26, %v6608_v55  ;;  %v2974_v15 = vpack.c.bf16 %v2782_v34, %v2780_v45  ;;  %v826_v23 = vmul.f32 %v570_v46, %v570_v46  ;;  %v1957_v4 = vmul.f32 %v6693_v62, %v6613_v5  ;;  %v1031_v45 = vpop.xlane.xlu1 %1030  ;;  %v5229_v46 = vld [vmem:[%s5731_s24 + $0x3c0] sm:$0xff]  ;;  %v5232_v6 = vld [vmem:[%s5731_s24 + $0x3d8] sm:$0xff] }
 0x14d   : > { %v2975_v61 = vpack.c.bf16 %v2783_v9, %v2781_v42  ;;  %v1071_v44 = vadd.f32 %v747_v24, %v746_v52  ;;  %v827_v30 = vmul.f32 %v571_v31, %v571_v31  ;;  %v1840_v21 = vsub.f32 1.5, %v6617_v57  ;;  %v596_v42 = vld [vmem:[%s5731_s24 + $0x7a0] sm:$0xff]  ;;  %v5231_v31 = vld [vmem:[%s5731_s24 + $0x3c8] sm:$0xff] }
 0x14e   : > { %v6709_v36 = vpop.eup %4868  ;;  %v1981_v48 = vmul.f32 %v6543_v27, %v1980_v28  ;;  %v6713_v14 = vmul.f32 0.5, %v1848_v54  ;;  %vm1992_vm5 = vweird.f32 %v6501_v13  ;;  %v1991_v12 = vmul.f32 %v6547_v20, %v1990_v2  ;;  %v518_v28 = vld [vmem:[%s5731_s24 + $0x530] sm:$0xff]  ;;  %v597_v24 = vld [vmem:[%s5731_s24 + $0x7a8] sm:$0xff] }
 0x14f   : > { %1072 = vadd.xlane.f32.xlu0 %v1071_v44  ;;  %v1191_v49 = vadd.f32 %v827_v30, %v826_v23  ;;  %vm1994_vm6 = vmor %vm1992_vm5, %vm1993_vm3  ;;  %v1818_v54 = vmul.f32 %v6670_v7, %v1817_v50  ;;  %v1379_v17 = vmul.f32 0.5, %v1378_v35  ;;  %v1388_v13 = vmul.f32 %v6687_v26, %v1387_v3 }
 0x150   : > { %v6723_v16 = vpop.eup %4870  ;;  %v1985_v29 = vsel %vm1984_vm4, %v6543_v27, %v1981_v48  ;;  %v1827_v18 = vmul.f32 %v6709_v36, %v6635_v51  ;;  %v1968_v10 = vmul.f32 %v6677_v11, %v1967_v1  ;;  %v1958_v8 = vmul.f32 %v6693_v62, %v1957_v4 }
 0x151   : > { %1192 = vadd.xlane.f32.xlu2 %v1191_v49  ;;  %v1995_v2 = vsel %vm1994_vm6, %v6547_v20, %v1991_v12  ;;  %v6739_v27 = vmax.f32 %v6603_v41, 1e-24  ;;  %v6742_v56 = vmax.f32 %v6541_v37, 1e-24  ;;  %v2776_v50 = vmul.f32 %v5229_v46, %v1985_v29 }
 0x152   : > { %3178 = vmatpush.bf16.xpose.msrb.mxu2 %v2974_v15  ;;  %v2778_v34 = vmul.f32 %v5230_v19, %v1995_v2  ;;  %v2777_v1 = vmul.f32 %v5231_v31, %v1985_v29  ;;  %v2779_v9 = vmul.f32 %v5232_v6, %v1995_v2  ;;  %v774_v20 = vmul.f32 %v518_v28, %v518_v28  ;;  %v1028_v15 = vpop.xlane.xlu0 %1027  ;;  %v5233_v6 = vld [vmem:[%s5731_s24] sm:$0xff] }
 0x153   : > { %3197 = vmatpush.bf16.xpose.msrb.mxu3 %v2975_v61  ;;  %v775_v52 = vmul.f32 %v519_v22, %v519_v22  ;;  %vm1843_vm7 = vweird.f32 %v6498_v38  ;;  %v1380_v41 = vsub.f32 1.5, %v1379_v17  ;;  %v1389_v35 = vmul.f32 0.5, %v1388_v13 }
 0x154   : > { %v2972_v37 = vpack.c.bf16 %v2778_v34, %v2776_v50  ;;  %v772_v3 = vmul.f32 %v516_v40, %v516_v40  ;;  %vm1852_vm8 = vweird.f32 %v6539_v58  ;;  %vm1853_vm9 = vweird.f32 %v6588_v32 }
 0x155   : > { %v2973_v23 = vpack.c.bf16 %v2779_v9, %v2777_v1  ;;  %v1113_v4 = vadd.f32 %v775_v52, %v774_v20  ;;  %v773_v61 = vmul.f32 %v517_v25, %v517_v25  ;;  %v852_v44 = vmul.f32 %v596_v42, %v596_v42  ;;  %v5234_v20 = vld [vmem:[%s5731_s24 + $0x10] sm:$0xff]  ;;  %vm1854_vm4 = vmor %vm1852_vm8, %vm1853_vm9 }
 0x156   : > { %vm1842_vm10 = vweird.f32 %v6451_v0  ;;  %v1797_v30 = vmul.f32 %v6723_v16, %v6667_v33  ;;  %v6758_v48 = vmax.f32 %v6485_v53, 1e-24  ;;  %4872 = vrsqrt.f32 %v6739_v27 }
 0x157   : > { %v853_v49 = vmul.f32 %v597_v24, %v597_v24  ;;  %v1828_v12 = vmul.f32 %v6709_v36, %v1827_v18  ;;  %4874 = vrsqrt.f32 %v6742_v56  ;;  %vm1382_vm11 = vweird.f32 %v6571_v43  ;;  %1114 = vadd.xlane.f32.xlu1 %v1113_v4  ;;  %v6771_v18 = vpop.xlane.xlu2 %1147  ;;  %vm6815_vm3 = vmor %vm1842_vm10, %vm1843_vm7  ;;  %v5235_v24 = vld [vmem:[%s5731_s24 + $0x8] sm:$0xff] }
 0x158   : > { %v1110_v17 = vadd.f32 %v773_v61, %v772_v3  ;;  %vm1383_vm12 = vweird.f32 %v6648_v59  ;;  %v1390_v13 = vsub.f32 1.5, %v1389_v35  ;;  %v1381_v53 = vmul.f32 %v6648_v59, %v1380_v41  ;;  %v5236_v35 = vld [vmem:[%s5731_s24 + $0x18] sm:$0xff] }
 0x159   : > { %v1230_v29 = vadd.f32 %v853_v49, %v852_v44  ;;  %v1850_v28 = vsub.f32 1.5, %v6713_v14  ;;  %v6767_v22 = vmul.f32 0.5, %v1818_v54  ;;  %v1959_v2 = vmul.f32 0.5, %v1958_v8  ;;  %vm1384_vm0 = vmor %vm1382_vm11, %vm1383_vm12  ;;  %v6793_v8 = vpop.xlane.xlu1 %979 }
 0x15a   : > { %3179 = vmatpush.bf16.xpose.msrb.mxu2 %v2972_v37  ;;  %v6769_v40 = vmax.f32 %v1031_v45, 1e-24  ;;  %1111 = vadd.xlane.f32.xlu0 %v1110_v17  ;;  %v1969_v46 = vmul.f32 0.5, %v1968_v10  ;;  %v1798_v50 = vmul.f32 %v6723_v16, %v1797_v30  ;;  %4876 = vrsqrt.f32 %v6758_v48 }
 0x15b   : > { %3198 = vmatpush.bf16.xpose.msrb.mxu3 %v2973_v23  ;;  %vm1393_vm13 = vweird.f32 %v6687_v26  ;;  %1231 = vadd.xlane.f32.xlu2 %v1230_v29  ;;  %v6776_v19 = vmul.f32 0.5, %v1828_v12  ;;  %vm1972_vm14 = vweird.f32 %v6600_v39  ;;  %vm1963_vm15 = vweird.f32 %v6693_v62  ;;  %v5238_v29 = vld [vmem:[%s5731_s24 + $0x2f0] sm:$0xff] }
 0x15c   : > { %v6785_v14 = vmax.f32 %v6683_v60, 1e-24  ;;  %v6787_v54 = vpop.eup %4872  ;;  %vm1392_vm1 = vweird.f32 %v6608_v55  ;;  %v6791_v10 = vmax.f32 %v6720_v63, 1e-24  ;;  %v1385_v45 = vsel %vm1384_vm0, %v6648_v59, %v1381_v53 }
 0x15d   : > { %v1391_v34 = vmul.f32 %v6687_v26, %v1390_v13  ;;  %v6797_v25 = vpop.eup %4874  ;;  %v1960_v43 = vsub.f32 1.5, %v1959_v2  ;;  %vm1394_vm2 = vmor %vm1392_vm1, %vm1393_vm13  ;;  %4878 = vrsqrt.f32 %v6769_v40  ;;  %v1841_v55 = vmul.f32 %v6498_v38, %v1840_v21  ;;  %v6822_v21 = vpop.xlane.xlu0 %1150 }
 0x15e   : > { %v1851_v60 = vmul.f32 %v6588_v32, %v1850_v28  ;;  %v1970_v63 = vsub.f32 1.5, %v1969_v46  ;;  %v6806_v59 = vmul.f32 0.5, %v1798_v50  ;;  %v6808_v42 = vmax.f32 %v1028_v15, 1e-24  ;;  %v5239_v28 = vld [vmem:[%s5731_s24 + $0x2e8] sm:$0xff] }
 0x15f   : > { %v1395_v31 = vsel %vm1394_vm2, %v6687_v26, %v1391_v34  ;;  %v1947_v57 = vmul.f32 %v6787_v54, %v6739_v27  ;;  %4880 = vrsqrt.f32 %v6785_v14  ;;  %v2656_v9 = vmul.f32 %v5233_v6, %v1385_v45  ;;  %v6854_v49 = vpop.xlane.xlu2 %982  ;;  %v5240_v34 = vld [vmem:[%s5731_s24 + $0x2f8] sm:$0xff]  ;;  %v5241_v6 = vld [vmem:[%s5731_s24 + $0x3a0] sm:$0xff] }
 0x160   : > { %v2658_v52 = vmul.f32 %v5234_v20, %v1395_v31  ;;  %v6826_v26 = vpop.eup %4876  ;;  %v1937_v0 = vmul.f32 %v6797_v25, %v6742_v56  ;;  %4882 = vrsqrt.f32 %v6791_v10  ;;  %v2657_v41 = vmul.f32 %v5235_v24, %v1385_v45  ;;  %v485_v20 = vld [vmem:[%s5731_s24 + $0x428] sm:$0xff]  ;;  %v5242_v24 = vld [vmem:[%s5731_s24 + $0x3b0] sm:$0xff] }
 0x161   : > { %v2659_v37 = vmul.f32 %v5236_v35, %v1395_v31  ;;  %v1845_v15 = vsel %vm6815_vm3, %v6498_v38, %v1841_v55  ;;  %v1855_v23 = vsel %vm1854_vm4, %v6588_v32, %v1851_v60  ;;  %v1961_v4 = vmul.f32 %v6693_v62, %v1960_v43  ;;  %v484_v60 = vld [vmem:[%s5731_s24 + $0x420] sm:$0xff]  ;;  %v6885_v1 = vpop.xlane.xlu1 %1102  ;;  %v598_v35 = vld [vmem:[%s5731_s24 + $0x7b0] sm:$0xff] }
 0x162   : > { %v2912_v3 = vpack.c.bf16 %v2658_v52, %v2656_v9  ;;  %vm1823_vm5 = vweird.f32 %v6670_v7  ;;  %vm1973_vm6 = vweird.f32 %v6677_v11  ;;  %4884 = vrsqrt.f32 %v6808_v42 }
 0x163   : > { %v2913_v58 = vpack.c.bf16 %v2659_v37, %v2657_v41  ;;  %v1971_v61 = vmul.f32 %v6677_v11, %v1970_v63  ;;  %v6846_v44 = vpop.eup %4878  ;;  %v1820_v38 = vsub.f32 1.5, %v6767_v22  ;;  %vm1833_vm7 = vweird.f32 %v6709_v36  ;;  %vm1974_vm12 = vmor %vm1972_vm14, %vm1973_vm6 }
 0x164   : > { %vm1962_vm8 = vweird.f32 %v6613_v5  ;;  %v1807_v32 = vmul.f32 %v6826_v26, %v6758_v48  ;;  %v1948_v30 = vmul.f32 %v6787_v54, %v1947_v57  ;;  %3071 = vmatpush.bf16.xpose.msra.mxu0 %v2912_v3  ;;  %vm1822_vm9 = vweird.f32 %v6597_v47  ;;  %v5237_v5 = vld [vmem:[%s5731_s24 + $0x2e0] sm:$0xff]  ;;  %v5252_v47 = vld [vmem:[%s5731_s24 + $0x398] sm:$0xff] }
 0x165   : > { %vm6859_vm10 = vmor %vm1962_vm8, %vm1963_vm15  ;;  %v1938_v17 = vmul.f32 %v6797_v25, %v1937_v0  ;;  %3090 = vmatpush.bf16.xpose.msra.mxu1 %v2913_v58  ;;  %v2748_v13 = vmul.f32 %v5237_v5, %v1845_v15  ;;  %v2750_v53 = vmul.f32 %v5238_v29, %v1855_v23  ;;  %v2749_v2 = vmul.f32 %v5239_v28, %v1845_v15  ;;  %v6867_v46 = vpop.eup %4880  ;;  %v6910_v5 = vpop.xlane.xlu0 %1099  ;;  %v487_v29 = vld [vmem:[%s5731_s24 + $0x438] sm:$0xff] }
 0x166   : > { %v1830_v50 = vsub.f32 1.5, %v6776_v19  ;;  %vm1832_vm11 = vweird.f32 %v6635_v51  ;;  %v1800_v45 = vsub.f32 1.5, %v6806_v59  ;;  %v2751_v43 = vmul.f32 %v5240_v34, %v1855_v23  ;;  %v6881_v63 = vpop.eup %4882  ;;  %v5244_v23 = vld [vmem:[%s5731_s24 + $0x3b8] sm:$0xff]  ;;  %vm6926_vm1 = vmor %vm1822_vm9, %vm1823_vm5  ;;  %v565_v19 = vld [vmem:[%s5731_s24 + $0x6a8] sm:$0xff] }
 0x167   : > { %v1965_v55 = vsel %vm6859_vm10, %v6693_v62, %v1961_v4  ;;  %v1927_v31 = vmul.f32 %v6846_v44, %v6769_v40  ;;  %v2958_v39 = vpack.c.bf16 %v2750_v53, %v2748_v13  ;;  %v1975_v57 = vsel %vm1974_vm12, %v6677_v11, %v1971_v61  ;;  %v5243_v11 = vld [vmem:[%s5731_s24 + $0x3a8] sm:$0xff]  ;;  %v599_v61 = vld [vmem:[%s5731_s24 + $0x7b8] sm:$0xff]  ;;  %vm6939_vm2 = vmor %vm1832_vm11, %vm1833_vm7 }
 0x168   : > { %v2772_v9 = vmul.f32 %v5241_v6, %v1965_v55  ;;  %v1808_v52 = vmul.f32 %v6826_v26, %v1807_v32  ;;  %v6891_v62 = vmul.f32 0.5, %v1948_v30  ;;  %v2959_v0 = vpack.c.bf16 %v2751_v43, %v2749_v2  ;;  %v6895_v37 = vpop.eup %4884  ;;  %v486_v32 = vld [vmem:[%s5731_s24 + $0x430] sm:$0xff] }
 0x169   : > { %v2774_v41 = vmul.f32 %v5242_v24, %v1975_v57  ;;  %vm1952_vm13 = vweird.f32 %v6739_v27  ;;  %v6898_v3 = vmul.f32 0.5, %v1938_v17  ;;  %v2773_v15 = vmul.f32 %v5243_v11, %v1965_v55  ;;  %v567_v11 = vld [vmem:[%s5731_s24 + $0x6b8] sm:$0xff] }
 0x16a   : > { %v2775_v4 = vmul.f32 %v5244_v23, %v1975_v57  ;;  %v740_v58 = vmul.f32 %v484_v60, %v484_v60  ;;  %vm1942_vm14 = vweird.f32 %v6742_v56  ;;  %v1777_v30 = vmul.f32 %v6867_v46, %v6785_v14  ;;  %v6966_v23 = vpop.xlane.xlu1 %1141  ;;  %v5250_v56 = vld [vmem:[%s5731_s24 + $0x390] sm:$0xff] }
 0x16b   : > { %v6908_v12 = vmax.f32 %v6771_v18, 1e-24  ;;  %v2970_v17 = vpack.c.bf16 %v2774_v41, %v2772_v9  ;;  %v741_v13 = vmul.f32 %v485_v20, %v485_v20  ;;  %v1787_v53 = vmul.f32 %v6881_v63, %v6791_v10  ;;  %v1022_v20 = vpop.xlane.xlu2 %1021 }
 0x16c   : > { %3140 = vmatpush.bf16.xpose.msrb.mxu0 %v2958_v39  ;;  %v1928_v28 = vmul.f32 %v6846_v44, %v1927_v31  ;;  %v2971_v2 = vpack.c.bf16 %v2775_v4, %v2773_v15  ;;  %v854_v34 = vmul.f32 %v598_v35, %v598_v35  ;;  %v1917_v43 = vmul.f32 %v6895_v37, %v6808_v42  ;;  %v564_v15 = vld [vmem:[%s5731_s24 + $0x6a0] sm:$0xff] }
 0x16d   : > { %3159 = vmatpush.bf16.xpose.msrb.mxu1 %v2959_v0  ;;  %3180 = vmatpush.bf16.xpose.msrb.mxu2 %v2970_v17  ;;  %v1062_v55 = vadd.f32 %v741_v13, %v740_v58  ;;  %v855_v18 = vmul.f32 %v599_v61, %v599_v61  ;;  %v742_v60 = vmul.f32 %v486_v32, %v486_v32  ;;  %v6918_v39 = vmul.f32 0.5, %v1808_v52  ;;  %v5245_v58 = vld [vmem:[%s5731_s24 + $0x2c0] sm:$0xff]  ;;  %v5246_v32 = vld [vmem:[%s5731_s24 + $0x2c8] sm:$0xff]  ;;  %v5248_v13 = vld [vmem:[%s5731_s24 + $0x2d8] sm:$0xff] }
 0x16e   : > { %vm1953_vm15 = vweird.f32 %v6787_v54  ;;  %vm1943_vm0 = vweird.f32 %v6797_v25  ;;  %3199 = vmatpush.bf16.xpose.msrb.mxu3 %v2971_v2  ;;  %v743_v57 = vmul.f32 %v487_v29, %v487_v29  ;;  %v1950_v6 = vsub.f32 1.5, %v6891_v62  ;;  %v5249_v31 = vld [vmem:[%s5731_s24 + $0x380] sm:$0xff] }
 0x16f   : > { %v1940_v9 = vsub.f32 1.5, %v6898_v3  ;;  %1063 = vadd.xlane.f32.xlu1 %v1062_v55  ;;  %v1233_v52 = vadd.f32 %v855_v18, %v854_v34  ;;  %v1821_v0 = vmul.f32 %v6670_v7, %v1820_v38  ;;  %v6944_v62 = vmul.f32 %v6867_v46, %v1777_v30  ;;  %v566_v38 = vld [vmem:[%s5731_s24 + $0x6b0] sm:$0xff]  ;;  %vm6977_vm3 = vmor %vm1952_vm13, %vm1953_vm15 }
 0x170   : > { %v6947_v24 = vmul.f32 %v6881_v63, %v1787_v53  ;;  %v1065_v41 = vadd.f32 %v743_v57, %v742_v60  ;;  %v1831_v22 = vmul.f32 %v6709_v36, %v1830_v50  ;;  %v6953_v35 = vmul.f32 0.5, %v1928_v28  ;;  %vm1944_vm4 = vmor %vm1942_vm14, %vm1943_vm0 }
 0x171   : > { %v1918_v51 = vmul.f32 %v6895_v37, %v1917_v43  ;;  %4886 = vrsqrt.f32 %v6908_v12  ;;  %1234 = vadd.xlane.f32.xlu0 %v1233_v52  ;;  %v1825_v3 = vsel %vm6926_vm1, %v6670_v7, %v1821_v0  ;;  %v6964_v50 = vmax.f32 %v6793_v8, 1e-24  ;;  %v5247_v8 = vld [vmem:[%s5731_s24 + $0x2d0] sm:$0xff]  ;;  %v1025_v43 = vpop.xlane.xlu0 %1024  ;;  %v5251_v52 = vld [vmem:[%s5731_s24 + $0x388] sm:$0xff] }
 0x172   : > { %1066 = vadd.xlane.f32.xlu2 %v1065_v41  ;;  %v1835_v4 = vsel %vm6939_vm2, %v6709_v36, %v1831_v22  ;;  %v2744_v61 = vmul.f32 %v5245_v58, %v1825_v3  ;;  %v2745_v30 = vmul.f32 %v5246_v32, %v1825_v3  ;;  %v1941_v36 = vmul.f32 %v6797_v25, %v1940_v9  ;;  %v512_v22 = vld [vmem:[%s5731_s24 + $0x500] sm:$0xff] }
 0x173   : > { %v2746_v17 = vmul.f32 %v5247_v8, %v1835_v4  ;;  %v2747_v29 = vmul.f32 %v5248_v13, %v1835_v4  ;;  %v1951_v53 = vmul.f32 %v6787_v54, %v1950_v6  ;;  %v822_v27 = vmul.f32 %v566_v38, %v566_v38 }
 0x174   : > { %v823_v28 = vmul.f32 %v567_v11, %v567_v11  ;;  %v820_v2 = vmul.f32 %v564_v15, %v564_v15  ;;  %v821_v34 = vmul.f32 %v565_v19, %v565_v19  ;;  %v1945_v60 = vsel %vm1944_vm4, %v6797_v25, %v1941_v36 }
 0x175   : > { %v2956_v55 = vpack.c.bf16 %v2746_v17, %v2744_v61  ;;  %v2957_v18 = vpack.c.bf16 %v2747_v29, %v2745_v30  ;;  %v1955_v57 = vsel %vm6977_vm3, %v6787_v54, %v1951_v53  ;;  %v2768_v6 = vmul.f32 %v5249_v31, %v1945_v60  ;;  %v513_v54 = vld [vmem:[%s5731_s24 + $0x508] sm:$0xff]  ;;  %v7008_v61 = vpop.xlane.xlu2 %1144  ;;  %v977_v29 = vpop.xlane.xlu1 %976  ;;  %v5255_v31 = vld [vmem:[%s5731_s24 + $0x2b0] sm:$0xff] }
 0x176   : > { %v2770_v9 = vmul.f32 %v5250_v56, %v1955_v57  ;;  %v2769_v0 = vmul.f32 %v5251_v52, %v1945_v60  ;;  %v2771_v41 = vmul.f32 %v5252_v47, %v1955_v57  ;;  %v1919_v3 = vmul.f32 0.5, %v1918_v51  ;;  %v5256_v56 = vld [vmem:[%s5731_s24 + $0x2b8] sm:$0xff] }
 0x177   : > { %v6998_v38 = vpop.eup %4886  ;;  %v7000_v11 = vmax.f32 %v1022_v20, 1e-24  ;;  %3141 = vmatpush.bf16.xpose.msrb.mxu0 %v2956_v55  ;;  %3160 = vmatpush.bf16.xpose.msrb.mxu1 %v2957_v18  ;;  %v1185_v25 = vadd.f32 %v823_v28, %v822_v27  ;;  %v1182_v15 = vadd.f32 %v821_v34, %v820_v2  ;;  %4888 = vrsqrt.f32 %v6964_v50  ;;  %v593_v27 = vld [vmem:[%s5731_s24 + $0x788] sm:$0xff]  ;;  %v5253_v34 = vld [vmem:[%s5731_s24 + $0x2a0] sm:$0xff] }
 0x178   : > { %v7004_v19 = vmax.f32 %v1025_v43, 1e-24  ;;  %v2968_v4 = vpack.c.bf16 %v2770_v9, %v2768_v6  ;;  %v2969_v58 = vpack.c.bf16 %v2771_v41, %v2769_v0  ;;  %vm1802_vm5 = vweird.f32 %v6667_v33  ;;  %v5254_v55 = vld [vmem:[%s5731_s24 + $0x2a8] sm:$0xff]  ;;  %v5257_v41 = vld [vmem:[%s5731_s24 + $0x360] sm:$0xff] }
 0x179   : > { %vm1803_vm6 = vweird.f32 %v6723_v16  ;;  %1186 = vadd.xlane.f32.xlu1 %v1185_v25  ;;  %1183 = vadd.xlane.f32.xlu0 %v1182_v15  ;;  %v768_v20 = vmul.f32 %v512_v22, %v512_v22  ;;  %v1810_v51 = vsub.f32 1.5, %v6918_v39  ;;  %vm1813_vm7 = vweird.f32 %v6826_v26  ;;  %v974_v57 = vpop.xlane.xlu0 %973 }
 0x17a   : > { %v7013_v32 = vmax.f32 %v6854_v49, 1e-24  ;;  %3181 = vmatpush.bf16.xpose.msrb.mxu2 %v2968_v4  ;;  %3200 = vmatpush.bf16.xpose.msrb.mxu3 %v2969_v58  ;;  %v769_v30 = vmul.f32 %v513_v54, %v513_v54  ;;  %v7016_v7 = vmul.f32 0.5, %v6944_v62  ;;  %v7019_v8 = vmul.f32 0.5, %v6947_v24  ;;  %vm1804_vm8 = vmor %vm1802_vm5, %vm1803_vm6 }
 0x17b   : > { %4890 = vrsqrt.f32 %v7000_v11  ;;  %v1801_v39 = vmul.f32 %v6723_v16, %v1800_v45  ;;  %v1930_v17 = vsub.f32 1.5, %v6953_v35  ;;  %v1920_v13 = vsub.f32 1.5, %v1919_v3  ;;  %v5258_v3 = vld [vmem:[%s5731_s24 + $0x370] sm:$0xff] }
 0x17c   : > { %4892 = vrsqrt.f32 %v7004_v19  ;;  %v1104_v49 = vadd.f32 %v769_v30, %v768_v20  ;;  %vm1812_vm9 = vweird.f32 %v6758_v48  ;;  %vm1933_vm10 = vweird.f32 %v6846_v44 }
 0x17d   : > { %v7033_v62 = vpop.eup %4888  ;;  %vm1932_vm11 = vweird.f32 %v6769_v40  ;;  %vm1923_vm12 = vweird.f32 %v6895_v37  ;;  %4894 = vrsqrt.f32 %v7013_v32  ;;  %v1805_v59 = vsel %vm1804_vm8, %v6723_v16, %v1801_v39  ;;  %vm7041_vm13 = vmor %vm1812_vm9, %vm1813_vm7  ;;  %v7083_v47 = vpop.xlane.xlu2 %1093 }
 0x17e   : > { %1105 = vadd.xlane.f32.xlu2 %v1104_v49  ;;  %v1780_v48 = vsub.f32 1.5, %v7016_v7  ;;  %v1790_v45 = vsub.f32 1.5, %v7019_v8  ;;  %vm1922_vm14 = vweird.f32 %v6808_v42  ;;  %v1811_v40 = vmul.f32 %v6826_v26, %v1810_v51  ;;  %vm7049_vm15 = vmor %vm1932_vm11, %vm1933_vm10  ;;  %v592_v42 = vld [vmem:[%s5731_s24 + $0x780] sm:$0xff]  ;;  %v515_v51 = vld [vmem:[%s5731_s24 + $0x518] sm:$0xff] }
 0x17f   : > { %v2317_v16 = vmul.f32 %v6998_v38, %v6908_v12  ;;  %v7056_v35 = vmax.f32 %v6822_v21, 1e-24  ;;  %v1921_v36 = vmul.f32 %v6895_v37, %v1920_v13  ;;  %v1931_v53 = vmul.f32 %v6846_v44, %v1930_v17  ;;  %vm1924_vm1 = vmor %vm1922_vm14, %vm1923_vm12  ;;  %v594_v49 = vld [vmem:[%s5731_s24 + $0x790] sm:$0xff] }
 0x180   : > { %vm1783_vm0 = vweird.f32 %v6867_v46  ;;  %v1757_v21 = vmul.f32 %v7033_v62, %v6964_v50  ;;  %v1815_v2 = vsel %vm7041_vm13, %v6826_v26, %v1811_v40  ;;  %v2740_v43 = vmul.f32 %v5253_v34, %v1805_v59  ;;  %v514_v26 = vld [vmem:[%s5731_s24 + $0x510] sm:$0xff]  ;;  %v5259_v40 = vld [vmem:[%s5731_s24 + $0x368] sm:$0xff] }
 0x181   : > { %v7062_v28 = vpop.eup %4890  ;;  %v2741_v18 = vmul.f32 %v5254_v55, %v1805_v59  ;;  %v2742_v6 = vmul.f32 %v5255_v31, %v1815_v2  ;;  %v2743_v9 = vmul.f32 %v5256_v56, %v1815_v2  ;;  %v1925_v52 = vsel %vm1924_vm1, %v6895_v37, %v1921_v36  ;;  %v595_v59 = vld [vmem:[%s5731_s24 + $0x798] sm:$0xff]  ;;  %v7133_v7 = vpop.xlane.xlu0 %1096 }
 0x182   : > { %v7074_v60 = vpop.eup %4892  ;;  %v1935_v0 = vsel %vm7049_vm15, %v6846_v44, %v1931_v53  ;;  %v2764_v22 = vmul.f32 %v5257_v41, %v1925_v52  ;;  %v848_v15 = vmul.f32 %v592_v42, %v592_v42  ;;  %v849_v54 = vmul.f32 %v593_v27, %v593_v27  ;;  %v1016_v53 = vpop.xlane.xlu1 %1015  ;;  %v483_v56 = vld [vmem:[%s5731_s24 + $0x418] sm:$0xff] }
 0x183   : > { %v2766_v25 = vmul.f32 %v5258_v3, %v1935_v0  ;;  %v7087_v4 = vpop.eup %4894  ;;  %v2318_v37 = vmul.f32 %v6998_v38, %v2317_v16  ;;  %v1897_v58 = vmul.f32 %v7062_v28, %v7000_v11  ;;  %v2954_v44 = vpack.c.bf16 %v2742_v6, %v2740_v43  ;;  %v5260_v16 = vld [vmem:[%s5731_s24 + $0x378] sm:$0xff]  ;;  %v480_v3 = vld [vmem:[%s5731_s24 + $0x400] sm:$0xff] }
 0x184   : > { %v2955_v20 = vpack.c.bf16 %v2743_v9, %v2741_v18  ;;  %v1907_v30 = vmul.f32 %v7074_v60, %v7004_v19  ;;  %v7095_v39 = vmax.f32 %v977_v29, 1e-24  ;;  %v770_v13 = vmul.f32 %v514_v26, %v514_v26 }
 0x185   : > { %v2966_v17 = vpack.c.bf16 %v2766_v25, %v2764_v22  ;;  %4896 = vrsqrt.f32 %v7056_v35  ;;  %v7100_v33 = vmax.f32 %v974_v57, 1e-24  ;;  %3142 = vmatpush.bf16.xpose.msrb.mxu0 %v2954_v44  ;;  %v2765_v24 = vmul.f32 %v5259_v40, %v1925_v52  ;;  %v561_v44 = vld [vmem:[%s5731_s24 + $0x688] sm:$0xff] }
 0x186   : > { %3161 = vmatpush.bf16.xpose.msrb.mxu1 %v2955_v20  ;;  %v2767_v36 = vmul.f32 %v5260_v16, %v1935_v0  ;;  %v1758_v29 = vmul.f32 %v7033_v62, %v1757_v21  ;;  %v1767_v42 = vmul.f32 %v7087_v4, %v7013_v32  ;;  %v1224_v27 = vadd.f32 %v849_v54, %v848_v15  ;;  %v482_v21 = vld [vmem:[%s5731_s24 + $0x410] sm:$0xff]  ;;  %v1019_v54 = vpop.xlane.xlu2 %1018 }
 0x187   : > { %3182 = vmatpush.bf16.xpose.msrb.mxu2 %v2966_v17  ;;  %v771_v2 = vmul.f32 %v515_v51, %v515_v51  ;;  %v1898_v34 = vmul.f32 %v7062_v28, %v1897_v58  ;;  %v850_v55 = vmul.f32 %v594_v49, %v594_v49  ;;  %v851_v18 = vmul.f32 %v595_v59, %v595_v59  ;;  %v560_v58 = vld [vmem:[%s5731_s24 + $0x680] sm:$0xff]  ;;  %v5262_v17 = vld [vmem:[%s5731_s24 + $0x288] sm:$0xff]  ;;  %v5263_v59 = vld [vmem:[%s5731_s24 + $0x290] sm:$0xff] }
 0x188   : > { %v2967_v43 = vpack.c.bf16 %v2767_v36, %v2765_v24  ;;  %v1908_v57 = vmul.f32 %v7074_v60, %v1907_v30  ;;  %4898 = vrsqrt.f32 %v7095_v39  ;;  %1225 = vadd.xlane.f32.xlu1 %v1224_v27  ;;  %v7110_v6 = vmax.f32 %v1016_v53, 1e-24  ;;  %v5261_v51 = vld [vmem:[%s5731_s24 + $0x280] sm:$0xff]  ;;  %v5264_v24 = vld [vmem:[%s5731_s24 + $0x298] sm:$0xff] }
 0x189   : > { %v1107_v31 = vadd.f32 %v771_v2, %v770_v13  ;;  %vm1792_vm2 = vweird.f32 %v6791_v10  ;;  %vm1793_vm3 = vweird.f32 %v6881_v63  ;;  %4900 = vrsqrt.f32 %v7100_v33 }
 0x18a   : > { %3201 = vmatpush.bf16.xpose.msrb.mxu3 %v2967_v43  ;;  %v1227_v9 = vadd.f32 %v851_v18, %v850_v55  ;;  %vm1782_vm4 = vweird.f32 %v6785_v14  ;;  %v7118_v52 = vmul.f32 0.5, %v2318_v37  ;;  %v1781_v0 = vmul.f32 %v6867_v46, %v1780_v48  ;;  %vm1794_vm6 = vmor %vm1792_vm2, %vm1793_vm3 }
 0x18b   : > { %1108 = vadd.xlane.f32.xlu0 %v1107_v31  ;;  %v1791_v26 = vmul.f32 %v6881_v63, %v1790_v45  ;;  %v7126_v41 = vpop.eup %4896  ;;  %vm1784_vm5 = vmor %vm1782_vm4, %vm1783_vm0  ;;  %v7130_v22 = vmul.f32 0.5, %v1758_v29  ;;  %v1768_v14 = vmul.f32 %v7087_v4, %v1767_v42  ;;  %v738_v48 = vmul.f32 %v482_v21, %v482_v21  ;;  %v481_v45 = vld [vmem:[%s5731_s24 + $0x408] sm:$0xff] }
 0x18c   : > { %1228 = vadd.xlane.f32.xlu2 %v1227_v9  ;;  %v739_v8 = vmul.f32 %v483_v56, %v483_v56  ;;  %v1899_v25 = vmul.f32 0.5, %v1898_v34  ;;  %v1909_v15 = vmul.f32 0.5, %v1908_v57  ;;  %4902 = vrsqrt.f32 %v7110_v6 }
 0x18d   : > { %v1785_v37 = vsel %vm1784_vm5, %v6867_v46, %v1781_v0  ;;  %v1795_v20 = vsel %vm1794_vm6, %v6881_v63, %v1791_v26  ;;  %v736_v36 = vmul.f32 %v480_v3, %v480_v3  ;;  %v737_v53 = vmul.f32 %v481_v45, %v481_v45  ;;  %v588_v3 = vld [vmem:[%s5731_s24 + $0x760] sm:$0xff]  ;;  %v589_v45 = vld [vmem:[%s5731_s24 + $0x768] sm:$0xff] }
 0x18e   : > { %v2736_v30 = vmul.f32 %v5261_v51, %v1785_v37  ;;  %v2737_v13 = vmul.f32 %v5262_v17, %v1785_v37  ;;  %v1059_v49 = vadd.f32 %v739_v8, %v738_v48  ;;  %v7148_v10 = vpop.eup %4898  ;;  %v2738_v40 = vmul.f32 %v5263_v59, %v1795_v20  ;;  %v7187_v8 = vpop.xlane.xlu0 %1135  ;;  %v5265_v51 = vld [vmem:[%s5731_s24 + $0x340] sm:$0xff]  ;;  %v5266_v17 = vld [vmem:[%s5731_s24 + $0x350] sm:$0xff] }
 0x18f   : > { %v2739_v16 = vmul.f32 %v5264_v24, %v1795_v20  ;;  %v7152_v29 = vpop.eup %4900  ;;  %v1769_v46 = vmul.f32 0.5, %v1768_v14  ;;  %v7154_v42 = vmax.f32 %v1019_v54, 1e-24  ;;  %v816_v27 = vmul.f32 %v560_v58, %v560_v58  ;;  %v968_v20 = vpop.xlane.xlu2 %967  ;;  %v5267_v24 = vld [vmem:[%s5731_s24 + $0x348] sm:$0xff] }
 0x190   : > { %v817_v63 = vmul.f32 %v561_v44, %v561_v44  ;;  %v2320_v2 = vsub.f32 1.5, %v7118_v52  ;;  %v2952_v34 = vpack.c.bf16 %v2738_v40, %v2736_v30  ;;  %1060 = vadd.xlane.f32.xlu1 %v1059_v49  ;;  %v1056_v55 = vadd.f32 %v737_v53, %v736_v36 }
 0x191   : > { %v2953_v43 = vpack.c.bf16 %v2739_v16, %v2737_v13  ;;  %vm1762_vm7 = vweird.f32 %v6964_v50  ;;  %v1900_v18 = vsub.f32 1.5, %v1899_v25  ;;  %v1910_v57 = vsub.f32 1.5, %v1909_v15  ;;  %v7200_v15 = vpop.xlane.xlu1 %1138  ;;  %v5268_v16 = vld [vmem:[%s5731_s24 + $0x358] sm:$0xff] }
 0x192   : > { %v1747_v31 = vmul.f32 %v7148_v10, %v7095_v39  ;;  %v1176_v21 = vadd.f32 %v817_v63, %v816_v27  ;;  %v7160_v56 = vpop.eup %4902  ;;  %v2327_v9 = vmul.f32 %v7126_v41, %v7056_v35  ;;  %vm1902_vm8 = vweird.f32 %v7000_v11  ;;  %3143 = vmatpush.bf16.xpose.msrb.mxu0 %v2952_v34  ;;  %v562_v34 = vld [vmem:[%s5731_s24 + $0x690] sm:$0xff] }
 0x193   : > { %vm1903_vm9 = vweird.f32 %v7062_v28  ;;  %v1737_v52 = vmul.f32 %v7152_v29, %v7100_v33  ;;  %3162 = vmatpush.bf16.xpose.msrb.mxu1 %v2953_v43  ;;  %v1760_v0 = vsub.f32 1.5, %v7130_v22  ;;  %v1770_v26 = vsub.f32 1.5, %v1769_v46  ;;  %1057 = vadd.xlane.f32.xlu0 %v1056_v55 }
 0x194   : > { %vm1913_vm10 = vweird.f32 %v7074_v60  ;;  %4904 = vrsqrt.f32 %v7154_v42  ;;  %1177 = vadd.xlane.f32.xlu2 %v1176_v21  ;;  %vm1763_vm11 = vweird.f32 %v7033_v62  ;;  %vm1772_vm12 = vweird.f32 %v7013_v32  ;;  %vm1904_vm15 = vmor %vm1902_vm8, %vm1903_vm9  ;;  %v5269_v21 = vld [vmem:[%s5731_s24 + $0x260] sm:$0xff] }
 0x195   : > { %v7174_v14 = vmax.f32 %v6885_v1, 1e-24  ;;  %v7177_v48 = vmax.f32 %v6910_v5, 1e-24  ;;  %vm2322_vm13 = vweird.f32 %v6908_v12  ;;  %vm2323_vm14 = vweird.f32 %v6998_v38  ;;  %vm1764_vm3 = vmor %vm1762_vm7, %vm1763_vm11 }
 0x196   : > { %vm1912_vm0 = vweird.f32 %v7004_v19  ;;  %v1748_v22 = vmul.f32 %v7148_v10, %v1747_v31  ;;  %v1901_v1 = vmul.f32 %v7062_v28, %v1900_v18  ;;  %v1911_v5 = vmul.f32 %v7074_v60, %v1910_v57  ;;  %v563_v57 = vld [vmem:[%s5731_s24 + $0x698] sm:$0xff]  ;;  %vm2324_vm7 = vmor %vm2322_vm13, %vm2323_vm14 }
 0x197   : > { %v2328_v25 = vmul.f32 %v7126_v41, %v2327_v9  ;;  %vm1773_vm1 = vweird.f32 %v7087_v4  ;;  %vm1914_vm2 = vmor %vm1912_vm0, %vm1913_vm10  ;;  %v1738_v11 = vmul.f32 %v7152_v29, %v1737_v52  ;;  %v1877_v19 = vmul.f32 %v7160_v56, %v7110_v6  ;;  %v5270_v52 = vld [vmem:[%s5731_s24 + $0x270] sm:$0xff] }
 0x198   : > { %v1905_v54 = vsel %vm1904_vm15, %v7062_v28, %v1901_v1  ;;  %v1915_v37 = vsel %vm1914_vm2, %v7074_v60, %v1911_v5  ;;  %v1761_v58 = vmul.f32 %v7033_v62, %v1760_v0  ;;  %v1771_v44 = vmul.f32 %v7087_v4, %v1770_v26  ;;  %vm1774_vm4 = vmor %vm1772_vm12, %vm1773_vm1  ;;  %v590_v26 = vld [vmem:[%s5731_s24 + $0x770] sm:$0xff]  ;;  %v5271_v5 = vld [vmem:[%s5731_s24 + $0x268] sm:$0xff] }
 0x199   : > { %v2760_v30 = vmul.f32 %v5265_v51, %v1905_v54  ;;  %v2762_v13 = vmul.f32 %v5266_v17, %v1915_v37  ;;  %v844_v49 = vmul.f32 %v588_v3, %v588_v3  ;;  %v845_v59 = vmul.f32 %v589_v45, %v589_v45 }
 0x19a   : > { %v7208_v40 = vpop.eup %4904  ;;  %4906 = vrsqrt.f32 %v7174_v14  ;;  %v7211_v28 = vmul.f32 0.5, %v1748_v22  ;;  %v2761_v60 = vmul.f32 %v5267_v24, %v1905_v54  ;;  %v2763_v36 = vmul.f32 %v5268_v16, %v1915_v37  ;;  %v591_v22 = vld [vmem:[%s5731_s24 + $0x778] sm:$0xff]  ;;  %v558_v24 = vld [vmem:[%s5731_s24 + $0x670] sm:$0xff] }
 0x19b   : > { %v2321_v53 = vmul.f32 %v6998_v38, %v2320_v2  ;;  %4908 = vrsqrt.f32 %v7177_v48  ;;  %v1739_v46 = vmul.f32 0.5, %v1738_v11  ;;  %v2964_v27 = vpack.c.bf16 %v2762_v13, %v2760_v30 }
 0x19c   : > { %v7221_v63 = vmul.f32 0.5, %v2328_v25  ;;  %vm1753_vm5 = vweird.f32 %v7148_v10  ;;  %v1878_v2 = vmul.f32 %v7160_v56, %v1877_v19  ;;  %v2965_v50 = vpack.c.bf16 %v2763_v36, %v2761_v60  ;;  %v559_v36 = vld [vmem:[%s5731_s24 + $0x678] sm:$0xff] }
 0x19d   : > { %v1887_v43 = vmul.f32 %v7208_v40, %v7154_v42  ;;  %3183 = vmatpush.bf16.xpose.msrb.mxu2 %v2964_v27  ;;  %v1765_v55 = vsel %vm1764_vm3, %v7033_v62, %v1761_v58  ;;  %v1775_v32 = vsel %vm1774_vm4, %v7087_v4, %v1771_v44  ;;  %v1218_v18 = vadd.f32 %v845_v59, %v844_v49  ;;  %v5272_v62 = vld [vmem:[%s5731_s24 + $0x278] sm:$0xff]  ;;  %v971_v58 = vpop.xlane.xlu0 %970  ;;  %v7256_v49 = vpop.xlane.xlu1 %1087 }
 0x19e   : > { %v1750_v31 = vsub.f32 1.5, %v7211_v28  ;;  %vm1743_vm6 = vweird.f32 %v7152_v29  ;;  %3202 = vmatpush.bf16.xpose.msrb.mxu3 %v2965_v50  ;;  %v2732_v9 = vmul.f32 %v5269_v21, %v1765_v55  ;;  %v2734_v0 = vmul.f32 %v5270_v52, %v1775_v32  ;;  %v556_v50 = vld [vmem:[%s5731_s24 + $0x660] sm:$0xff] }
 0x19f   : > { %v1740_v1 = vsub.f32 1.5, %v1739_v46  ;;  %v2733_v3 = vmul.f32 %v5271_v5, %v1765_v55  ;;  %v2735_v45 = vmul.f32 %v5272_v62, %v1775_v32  ;;  %1219 = vadd.xlane.f32.xlu1 %v1218_v18  ;;  %v818_v4 = vmul.f32 %v562_v34, %v562_v34  ;;  %v557_v34 = vld [vmem:[%s5731_s24 + $0x668] sm:$0xff] }
 0x1a0   : > { %v7243_v25 = vpop.eup %4906  ;;  %v7245_v11 = vmul.f32 0.5, %v1878_v2  ;;  %v7247_v19 = vmax.f32 %v968_v20, 1e-24  ;;  %v2950_v54 = vpack.c.bf16 %v2734_v0, %v2732_v9  ;;  %v819_v37 = vmul.f32 %v563_v57, %v563_v57  ;;  %v585_v57 = vld [vmem:[%s5731_s24 + $0x748] sm:$0xff]  ;;  %v5274_v9 = vld [vmem:[%s5731_s24 + $0x250] sm:$0xff] }
 0x1a1   : > { %v7249_v44 = vpop.eup %4908  ;;  %v1888_v51 = vmul.f32 %v7208_v40, %v1887_v43  ;;  %v2951_v30 = vpack.c.bf16 %v2735_v45, %v2733_v3  ;;  %v846_v17 = vmul.f32 %v590_v26, %v590_v26  ;;  %v847_v13 = vmul.f32 %v591_v22, %v591_v22  ;;  %v584_v43 = vld [vmem:[%s5731_s24 + $0x740] sm:$0xff]  ;;  %v5275_v0 = vld [vmem:[%s5731_s24 + $0x248] sm:$0xff]  ;;  %v5276_v22 = vld [vmem:[%s5731_s24 + $0x258] sm:$0xff] }
 0x1a2   : > { %v7259_v20 = vsel %vm2324_vm7, %v6998_v38, %v2321_v53  ;;  %v2330_v59 = vsub.f32 1.5, %v7221_v63  ;;  %vm1752_vm8 = vweird.f32 %v7095_v39  ;;  %3144 = vmatpush.bf16.xpose.msrb.mxu0 %v2950_v54  ;;  %v1179_v28 = vadd.f32 %v819_v37, %v818_v4  ;;  %v7275_v39 = vpop.xlane.xlu2 %1090 }
 0x1a3   : > { %v2167_v12 = vmul.f32 %v7243_v25, %v7174_v14  ;;  %vm7268_vm9 = vmor %vm1752_vm8, %vm1753_vm5  ;;  %vm1742_vm10 = vweird.f32 %v7100_v33  ;;  %3163 = vmatpush.bf16.xpose.msrb.mxu1 %v2951_v30  ;;  %v1221_v38 = vadd.f32 %v847_v13, %v846_v17  ;;  %v7273_v16 = vmax.f32 %v971_v58, 1e-24 }
 0x1a4   : > { %v2157_v53 = vmul.f32 %v7249_v44, %v7177_v48  ;;  %v7281_v46 = vmax.f32 %v6966_v23, 1e-24  ;;  %vm1744_vm11 = vmor %vm1742_vm10, %vm1743_vm6  ;;  %1180 = vadd.xlane.f32.xlu0 %v1179_v28  ;;  %v1741_v33 = vmul.f32 %v7152_v29, %v1740_v1  ;;  %v1751_v27 = vmul.f32 %v7148_v10, %v1750_v31  ;;  %v5273_v31 = vld [vmem:[%s5731_s24 + $0x240] sm:$0xff] }
 0x1a5   : > { %v1880_v63 = vsub.f32 1.5, %v7245_v11  ;;  %v7288_v2 = vmul.f32 0.5, %v1888_v51  ;;  %4910 = vrsqrt.f32 %v7247_v19  ;;  %1222 = vadd.xlane.f32.xlu2 %v1221_v38  ;;  %v814_v23 = vmul.f32 %v558_v24, %v558_v24  ;;  %v1013_v13 = vpop.xlane.xlu1 %1012  ;;  %v4686_v38 = vld [vmem:[#allocation2 + $0x4] sm:$0xf0] }
 0x1a6   : > { %4912 = vrsqrt.f32 %v7273_v16  ;;  %v1745_v55 = vsel %vm1744_vm11, %v7152_v29, %v1741_v33  ;;  %v1755_v32 = vsel %vm7268_vm9, %v7148_v10, %v1751_v27  ;;  %v815_v18 = vmul.f32 %v559_v36, %v559_v36  ;;  %v4685_v36 = vld [vmem:[#allocation2 + $0x4] sm:$0xf]  ;;  %v4629_v33 = vld [vmem:[#allocation2 + $0x8] sm:$0xf0] }
 0x1a7   : > { %v2728_v21 = vmul.f32 %v5273_v31, %v1745_v55  ;;  %v2730_v52 = vmul.f32 %v5274_v9, %v1755_v32  ;;  %v2729_v26 = vmul.f32 %v5275_v0, %v1745_v55  ;;  %v2731_v1 = vmul.f32 %v5276_v22, %v1755_v32  ;;  %v5277_v27 = vld [vmem:[%s5731_s24 + $0x5e0] sm:$0xff]  ;;  %v5280_v0 = vld [vmem:[%s5731_s24 + $0x330] sm:$0xff]  ;;  %v5281_v22 = vld [vmem:[%s5731_s24 + $0x328] sm:$0xff] }
 0x1a8   : > { %v1173_v5 = vadd.f32 %v815_v18, %v814_v23  ;;  %v812_v3 = vmul.f32 %v556_v50, %v556_v50  ;;  %v813_v62 = vmul.f32 %v557_v34, %v557_v34  ;;  %v840_v45 = vmul.f32 %v584_v43, %v584_v43  ;;  %v5279_v55 = vld [vmem:[%s5731_s24 + $0x320] sm:$0xff] }
 0x1a9   : > { %vm1883_vm12 = vweird.f32 %v7160_v56  ;;  %v2948_v29 = vpack.c.bf16 %v2730_v52, %v2728_v21  ;;  %v2949_v4 = vpack.c.bf16 %v2731_v1, %v2729_v26  ;;  %v841_v11 = vmul.f32 %v585_v57, %v585_v57  ;;  %v553_v21 = vld [vmem:[%s5731_s24 + $0x648] sm:$0xff] }
 0x1aa   : > { %v2331_v10 = vmul.f32 %v7126_v41, %v2330_v59  ;;  %vm2333_vm13 = vweird.f32 %v7126_v41  ;;  %1174 = vadd.xlane.f32.xlu1 %v1173_v5  ;;  %v1170_v54 = vadd.f32 %v813_v62, %v812_v3  ;;  %v1881_v37 = vmul.f32 %v7160_v56, %v1880_v63 }
 0x1ab   : > { %v7308_v58 = vpop.eup %4910  ;;  %v2168_v51 = vmul.f32 %v7243_v25, %v2167_v12  ;;  %vm1882_vm14 = vweird.f32 %v7110_v6  ;;  %v1890_v30 = vsub.f32 1.5, %v7288_v2  ;;  %3145 = vmatpush.bf16.xpose.msrb.mxu0 %v2948_v29  ;;  %3164 = vmatpush.bf16.xpose.msrb.mxu1 %v2949_v4  ;;  %v1212_v17 = vadd.f32 %v841_v11, %v840_v45  ;;  %v1010_v6 = vpop.xlane.xlu0 %1009  ;;  %v4627_v12 = vld [vmem:[#allocation2] sm:$0xf]  ;;  %v5278_v2 = vld [vmem:[%s5731_s24 + $0x5e8] sm:$0xff]  ;;  %v586_v29 = vld [vmem:[%s5731_s24 + $0x750] sm:$0xff] }
 0x1ac   : > { %v7313_v28 = vpop.eup %4912  ;;  %4914 = vrsqrt.f32 %v7281_v46  ;;  %v7317_v59 = vmax.f32 %v7008_v61, 1e-24  ;;  %vm7321_vm15 = vmor %vm1882_vm14, %vm1883_vm12  ;;  %1171 = vadd.xlane.f32.xlu0 %v1170_v54  ;;  %vm2332_vm0 = vweird.f32 %v7056_v35  ;;  %v2158_v60 = vmul.f32 %v7249_v44, %v2157_v53  ;;  %v7329_v61 = vpop.xlane.xlu2 %1129 }
 0x1ad   : > { %vm1892_vm1 = vweird.f32 %v7154_v42  ;;  %vm1893_vm2 = vweird.f32 %v7208_v40  ;;  %1213 = vadd.xlane.f32.xlu2 %v1212_v17  ;;  %v7333_v63 = vmul.f32 %v5277_v27, %v7259_v20  ;;  %v7337_v35 = vmul.f32 %v5278_v2, %v7259_v20  ;;  %vm2334_vm3 = vmor %vm2332_vm0, %vm2333_vm13  ;;  %v552_v20 = vld [vmem:[%s5731_s24 + $0x640] sm:$0xff]  ;;  %v5284_v2 = vld [vmem:[%s5731_s24 + $0x5f8] sm:$0xff] }
 0x1ae   : > { %v1885_v53 = vsel %vm7321_vm15, %v7160_v56, %v1881_v37  ;;  %v2335_v23 = vsel %vm2334_vm3, %v7126_v41, %v2331_v10  ;;  %v7345_v50 = vmul.f32 0.5, %v2168_v51  ;;  %v1717_v34 = vmul.f32 %v7308_v58, %v7247_v19  ;;  %vm1894_vm4 = vmor %vm1892_vm1, %vm1893_vm2  ;;  %v5283_v10 = vld [vmem:[%s5731_s24 + $0x338] sm:$0xff] }
 0x1af   : > { %v1891_v43 = vmul.f32 %v7208_v40, %v1890_v30  ;;  %v1727_v56 = vmul.f32 %v7313_v28, %v7273_v16  ;;  %v2756_v41 = vmul.f32 %v5279_v55, %v1885_v53  ;;  %v7358_v32 = vor.u32 %v4686_v38, %v4627_v12  ;;  %v587_v51 = vld [vmem:[%s5731_s24 + $0x758] sm:$0xff]  ;;  %v554_v30 = vld [vmem:[%s5731_s24 + $0x650] sm:$0xff]  ;;  %v962_v12 = vpop.xlane.xlu1 %961 }
 0x1b0   : > { %v7360_v18 = vor.u32 %v4685_v36, %v4629_v33  ;;  %v2159_v57 = vmul.f32 0.5, %v2158_v60  ;;  %4916 = vrsqrt.f32 %v7317_v59  ;;  %v7364_v31 = vmax.f32 %v7083_v47, 1e-24  ;;  %v5282_v47 = vld [vmem:[%s5731_s24 + $0x5f0] sm:$0xff] }
 0x1b1   : > { %v1895_v42 = vsel %vm1894_vm4, %v7208_v40, %v1891_v43  ;;  %v7370_v52 = vmax.f32 %v1010_v6, 1e-24  ;;  %v2757_v1 = vmul.f32 %v5281_v22, %v1885_v53  ;;  %3110 = vmatmul.bf16.vlgmr.msra.gmra.mxu2 %v7358_v32  ;;  %v808_v5 = vmul.f32 %v552_v20, %v552_v20  ;;  %3072 = vmatmul.bf16.vlgmr.msra.gmra.mxu0 %v7358_v32  ;;  %v555_v6 = vld [vmem:[%s5731_s24 + $0x658] sm:$0xff]  ;;  %v581_v22 = vld [vmem:[%s5731_s24 + $0x728] sm:$0xff] }
 0x1b2   : > { %10369 = vst [vmem:[#allocation13_spill] sm:$0xff] %v7360_v18  ;;  %v7368_v9 = vpop.eup %4914  ;;  %v2758_v26 = vmul.f32 %v5280_v0, %v1895_v42  ;;  %3129 = vmatmul.bf16.vlgmr.msra.gmra.mxu3 %v7360_v18  ;;  %v7377_v40 = vmul.f32 %v5282_v47, %v2335_v23  ;;  %v2170_v3 = vsub.f32 1.5, %v7345_v50  ;;  %vm2173_vm5 = vweird.f32 %v7243_v25  ;;  %3091 = vmatmul.bf16.vlgmr.msra.gmra.mxu1 %v7360_v18  ;;  %v583_v0 = vld [vmem:[%s5731_s24 + $0x738] sm:$0xff] }
 0x1b3   : > { %v1718_v62 = vmul.f32 %v7308_v58, %v1717_v34  ;;  %v7382_v45 = vmax.f32 %v1013_v13, 1e-24  ;;  %vm2163_vm6 = vweird.f32 %v7249_v44  ;;  %v1728_v4 = vmul.f32 %v7313_v28, %v1727_v56  ;;  %v7402_v33 = vpop.xlane.xlu0 %1132 }
 0x1b4   : > { %v2962_v11 = vpack.c.bf16 %v2758_v26, %v2756_v41  ;;  %v2759_v54 = vmul.f32 %v5283_v10, %v1895_v42  ;;  %v809_v37 = vmul.f32 %v553_v21, %v553_v21  ;;  %vm2172_vm7 = vweird.f32 %v7174_v14  ;;  %v965_v43 = vpop.xlane.xlu2 %964  ;;  %v582_v41 = vld [vmem:[%s5731_s24 + $0x730] sm:$0xff]  ;;  %v580_v26 = vld [vmem:[%s5731_s24 + $0x720] sm:$0xff] }
 0x1b5   : > { %v2160_v17 = vsub.f32 1.5, %v2159_v57  ;;  %v2297_v13 = vmul.f32 %v7368_v9, %v7281_v46  ;;  %4918 = vrsqrt.f32 %v7364_v31  ;;  %v7397_v24 = vmax.f32 %v7133_v7, 1e-24  ;;  %vm7442_vm11 = vmor %vm2172_vm7, %vm2173_vm5 }
 0x1b6   : > { %vm2162_vm8 = vweird.f32 %v7177_v48  ;;  %4920 = vrsqrt.f32 %v7370_v52  ;;  %3184 = vmatpush.bf16.xpose.msrb.mxu2 %v2962_v11  ;;  %v2963_v60 = vpack.c.bf16 %v2759_v54, %v2757_v1  ;;  %v1164_v38 = vadd.f32 %v809_v37, %v808_v5  ;;  %v7404_v27 = vpop.eup %4916 }
 0x1b7   : > { %v842_v36 = vmul.f32 %v586_v29, %v586_v29  ;;  %v7407_v53 = vmul.f32 %v5284_v2, %v2335_v23  ;;  %v1719_v7 = vmul.f32 0.5, %v1718_v62  ;;  %v843_v50 = vmul.f32 %v587_v51, %v587_v51  ;;  %v548_v62 = vld [vmem:[%s5731_s24 + $0x620] sm:$0xff]  ;;  %v549_v29 = vld [vmem:[%s5731_s24 + $0x628] sm:$0xff]  ;;  %vm2164_vm13 = vmor %vm2162_vm8, %vm2163_vm6 }
 0x1b8   : > { %v810_v34 = vmul.f32 %v554_v30, %v554_v30  ;;  %v1729_v20 = vmul.f32 0.5, %v1728_v4  ;;  %4922 = vrsqrt.f32 %v7382_v45  ;;  %3203 = vmatpush.bf16.xpose.msrb.mxu3 %v2963_v60  ;;  %1165 = vadd.xlane.f32.xlu1 %v1164_v38  ;;  %v811_v56 = vmul.f32 %v555_v6, %v555_v6 }
 0x1b9   : > { %v7410_v55 = vmax.f32 %v962_v12, 1e-24  ;;  %v2171_v23 = vmul.f32 %v7243_v25, %v2170_v3  ;;  %v2161_v57 = vmul.f32 %v7249_v44, %v2160_v17  ;;  %v2298_v42 = vmul.f32 %v7368_v9, %v2297_v13 }
 0x1ba   : > { %v1215_v21 = vadd.f32 %v843_v50, %v842_v36  ;;  %v2307_v1 = vmul.f32 %v7404_v27, %v7317_v59  ;;  %4924 = vrsqrt.f32 %v7397_v24  ;;  %v1167_v5 = vadd.f32 %v811_v56, %v810_v34 }
 0x1bb   : > { %v7422_v47 = vmax.f32 %v965_v43, 1e-24  ;;  %v7426_v4 = vpop.eup %4918  ;;  %v7429_v3 = vmax.f32 %v7200_v15, 1e-24  ;;  %v1720_v11 = vsub.f32 1.5, %v1719_v7  ;;  %4926 = vrsqrt.f32 %v7410_v55 }
 0x1bc   : > { %1216 = vadd.xlane.f32.xlu0 %v1215_v21  ;;  %v838_v10 = vmul.f32 %v582_v41, %v582_v41  ;;  %v7432_v54 = vpop.eup %4920  ;;  %v1730_v37 = vsub.f32 1.5, %v1729_v20  ;;  %1168 = vadd.xlane.f32.xlu2 %v1167_v5  ;;  %v839_v51 = vmul.f32 %v583_v0, %v583_v0  ;;  %v836_v30 = vmul.f32 %v580_v26, %v580_v26  ;;  %v4635_v41 = vld [vmem:[#allocation2 + $0x10] sm:$0xf]  ;;  %v4688_v21 = vld [vmem:[#allocation2 + $0x14] sm:$0xf0] }
 0x1bd   : > { %10370 = vst [vmem:[#allocation14_spill] sm:$0xff] %v7429_v3  ;;  %v837_v17 = vmul.f32 %v581_v22, %v581_v22  ;;  %vm1722_vm9 = vweird.f32 %v7247_v19  ;;  %vm1723_vm10 = vweird.f32 %v7308_v58  ;;  %v804_v13 = vmul.f32 %v548_v62, %v548_v62  ;;  %v4637_v22 = vld [vmem:[#allocation2 + $0x18] sm:$0xf0]  ;;  %v5286_v62 = vld [vmem:[%s5731_s24 + $0x230] sm:$0xff] }
 0x1be   : > { %v805_v6 = vmul.f32 %v549_v29, %v549_v29  ;;  %v7436_v15 = vpop.eup %4922  ;;  %v2137_v60 = vmul.f32 %v7426_v4, %v7364_v31  ;;  %vm1733_vm12 = vweird.f32 %v7313_v28  ;;  %4928 = vrsqrt.f32 %v7422_v47  ;;  %vm1724_vm14 = vmor %vm1722_vm9, %vm1723_vm10 }
 0x1bf   : > { %v1209_v38 = vadd.f32 %v839_v51, %v838_v10  ;;  %v7455_v36 = vmax.f32 %v7187_v8, 1e-24  ;;  %v1857_v14 = vmul.f32 %v7432_v54, %v7370_v52  ;;  %v1206_v2 = vadd.f32 %v837_v17, %v836_v30  ;;  %v7468_v8 = vpop.xlane.xlu0 %1081  ;;  %v5289_v17 = vld [vmem:[%s5731_s24 + $0x4f0] sm:$0xff] }
 0x1c0   : > { %v1721_v7 = vmul.f32 %v7308_v58, %v1720_v11  ;;  %v7460_v50 = vpop.eup %4924  ;;  %4930 = vrsqrt.f32 %v7429_v3  ;;  %vm1732_vm15 = vweird.f32 %v7273_v16  ;;  %v1158_v48 = vadd.f32 %v805_v6, %v804_v13 }
 0x1c1   : > { %1210 = vadd.xlane.f32.xlu1 %v1209_v38  ;;  %v1731_v34 = vmul.f32 %v7313_v28, %v1730_v37  ;;  %v7471_v43 = vpop.eup %4926  ;;  %v2175_v20 = vsel %vm7442_vm11, %v7243_v25, %v2171_v23  ;;  %v2165_v56 = vsel %vm2164_vm13, %v7249_v44, %v2161_v57  ;;  %vm1734_vm0 = vmor %vm1732_vm15, %vm1733_vm12  ;;  %v1867_v19 = vmul.f32 %v7436_v15, %v7382_v45  ;;  %v7486_v44 = vpop.xlane.xlu1 %1084  ;;  %v4687_v57 = vld [vmem:[#allocation2 + $0x14] sm:$0xf]  ;;  %v5288_v37 = vld [vmem:[%s5731_s24 + $0x238] sm:$0xff] }
 0x1c2   : > { %v1725_v16 = vsel %vm1724_vm14, %v7308_v58, %v1721_v7  ;;  %v7482_v0 = vmul.f32 0.5, %v2298_v42  ;;  %v2308_v26 = vmul.f32 %v7404_v27, %v2307_v1  ;;  %v2138_v25 = vmul.f32 %v7426_v4, %v2137_v60  ;;  %v5285_v42 = vld [vmem:[%s5731_s24 + $0x220] sm:$0xff] }
 0x1c3   : > { %v1735_v23 = vsel %vm1734_vm0, %v7313_v28, %v1731_v34  ;;  %4932 = vrsqrt.f32 %v7455_v36  ;;  %v1858_v58 = vmul.f32 %v7432_v54, %v1857_v14  ;;  %v2724_v5 = vmul.f32 %v5285_v42, %v1725_v16  ;;  %v5287_v28 = vld [vmem:[%s5731_s24 + $0x228] sm:$0xff]  ;;  %v5290_v14 = vld [vmem:[%s5731_s24 + $0x4f8] sm:$0xff]  ;;  %v5291_v7 = vld [vmem:[%s5731_s24 + $0x4e0] sm:$0xff] }
 0x1c4   : > { %1207 = vadd.xlane.f32.xlu0 %v1206_v2  ;;  %v2726_v1 = vmul.f32 %v5286_v62, %v1735_v23  ;;  %v7493_v29 = vpop.eup %4928  ;;  %v1697_v11 = vmul.f32 %v7471_v43, %v7410_v55  ;;  %1159 = vadd.xlane.f32.xlu2 %v1158_v48  ;;  %v2725_v10 = vmul.f32 %v5287_v28, %v1725_v16  ;;  %v7516_v34 = vmax.f32 %v7256_v49, 1e-24  ;;  %v578_v28 = vld [vmem:[%s5731_s24 + $0x710] sm:$0xff] }
 0x1c5   : > { %v2727_v51 = vmul.f32 %v5288_v37, %v1735_v23  ;;  %v7499_v30 = vor.u32 %v4688_v21, %v4635_v41  ;;  %v7502_v13 = vmul.f32 %v5289_v17, %v2175_v20  ;;  %v1868_v6 = vmul.f32 %v7436_v15, %v1867_v19  ;;  %v576_v41 = vld [vmem:[%s5731_s24 + $0x700] sm:$0xff]  ;;  %v577_v19 = vld [vmem:[%s5731_s24 + $0x708] sm:$0xff] }
 0x1c6   : > { %v2946_v12 = vpack.c.bf16 %v2726_v1, %v2724_v5  ;;  %v7505_v60 = vor.u32 %v4687_v57, %v4637_v22  ;;  %v7507_v38 = vpop.eup %4930  ;;  %v7510_v2 = vmul.f32 %v5290_v14, %v2175_v20  ;;  %v7513_v48 = vmul.f32 %v5291_v7, %v2165_v56  ;;  %v5292_v21 = vld [vmem:[%s5731_s24 + $0x4e8] sm:$0xff]  ;;  %v550_v22 = vld [vmem:[%s5731_s24 + $0x630] sm:$0xff]  ;;  %v7537_v1 = vpop.xlane.xlu2 %1123 }
 0x1c7   : > { %10373 = vst [vmem:[#allocation15_spill] sm:$0xff] %v7499_v30  ;;  %v2947_v16 = vpack.c.bf16 %v2727_v51, %v2725_v10  ;;  %3115 = vmatmul.bf16.gmra.mxu2 %v7499_v30  ;;  %3077 = vmatmul.bf16.gmra.mxu0 %v7499_v30  ;;  %v7523_v23 = vmul.f32 %v5292_v21, %v2165_v56  ;;  %v7526_v57 = vmul.f32 0.5, %v2308_v26  ;;  %v7532_v42 = vmul.f32 0.5, %v2138_v25  ;;  %v551_v26 = vld [vmem:[%s5731_s24 + $0x638] sm:$0xff]  ;;  %v7554_v7 = vpop.xlane.xlu0 %1126 }
 0x1c8   : > { %10374 = vst [vmem:[#allocation16_spill] sm:$0xff] %v7505_v60  ;;  %v1707_v49 = vmul.f32 %v7493_v29, %v7422_v47  ;;  %3146 = vmatpush.bf16.xpose.msrb.mxu0 %v2946_v12  ;;  %3134 = vmatmul.bf16.gmra.mxu3 %v7505_v60  ;;  %v2147_v5 = vmul.f32 %v7460_v50, %v7397_v24  ;;  %v1859_v62 = vmul.f32 0.5, %v1858_v58  ;;  %v1869_v51 = vmul.f32 0.5, %v1868_v6  ;;  %v579_v12 = vld [vmem:[%s5731_s24 + $0x718] sm:$0xff] }
 0x1c9   : > { %10375 = vst [vmem:[#allocation17_spill] sm:$0xff] %v7507_v38  ;;  %v1698_v56 = vmul.f32 %v7471_v43, %v1697_v11  ;;  %3165 = vmatpush.bf16.xpose.msrb.mxu1 %v2947_v16  ;;  %v7541_v10 = vpop.eup %4932  ;;  %v2287_v37 = vmul.f32 %v7507_v38, %v7429_v3  ;;  %v832_v17 = vmul.f32 %v576_v41, %v576_v41  ;;  %4934 = vrsqrt.f32 %v7516_v34  ;;  %v7562_v30 = vpop.xlane.xlu1 %1243 }
 0x1ca   : > { %v833_v25 = vmul.f32 %v577_v19, %v577_v19  ;;  %3096 = vmatmul.bf16.gmra.mxu1 %v7505_v60  ;;  %v7549_v58 = vmax.f32 %v7275_v39, 1e-24  ;;  %v7552_v11 = vmax.f32 %v7329_v61, 1e-24  ;;  %v806_v14 = vmul.f32 %v550_v22, %v550_v22  ;;  %10376 = vst [vmem:[#allocation18_spill] sm:$0xff] %v7562_v30  ;;  %v5296_v30 = vld [vmem:[%s5731_s24 + $0x318] sm:$0xff] }
 0x1cb   : > { %v1708_v16 = vmul.f32 %v7493_v29, %v1707_v49  ;;  %v807_v6 = vmul.f32 %v551_v26, %v551_v26  ;;  %v834_v41 = vmul.f32 %v578_v28, %v578_v28  ;;  %v1860_v19 = vsub.f32 1.5, %v1859_v62  ;;  %v547_v28 = vld [vmem:[%s5731_s24 + $0x618] sm:$0xff] }
 0x1cc   : > { %v1200_v21 = vadd.f32 %v833_v25, %v832_v17  ;;  %v7557_v20 = vmul.f32 0.5, %v1698_v56  ;;  %v7560_v60 = vmax.f32 %v7402_v33, 1e-24  ;;  %v835_v39 = vmul.f32 %v579_v12, %v579_v12  ;;  %v546_v56 = vld [vmem:[%s5731_s24 + $0x610] sm:$0xff]  ;;  %v545_v17 = vld [vmem:[%s5731_s24 + $0x608] sm:$0xff] }
 0x1cd   : > { %v2148_v61 = vmul.f32 %v7460_v50, %v2147_v5  ;;  %v2277_v49 = vmul.f32 %v7541_v10, %v7455_v36  ;;  %v1870_v22 = vsub.f32 1.5, %v1869_v51  ;;  %v1161_v26 = vadd.f32 %v807_v6, %v806_v14  ;;  %v544_v51 = vld [vmem:[%s5731_s24 + $0x600] sm:$0xff] }
 0x1ce   : > { %1201 = vadd.xlane.f32.xlu1 %v1200_v21  ;;  %v2288_v62 = vmul.f32 %v7507_v38, %v2287_v37  ;;  %4936 = vrsqrt.f32 %v7549_v58  ;;  %vm1863_vm1 = vweird.f32 %v7432_v54  ;;  %v1203_v33 = vadd.f32 %v835_v39, %v834_v41  ;;  %v7594_v21 = vpop.xlane.xlu2 %1246 }
 0x1cf   : > { %vm1872_vm2 = vweird.f32 %v7382_v45  ;;  %vm1873_vm3 = vweird.f32 %v7436_v15  ;;  %4938 = vrsqrt.f32 %v7552_v11  ;;  %v1709_v5 = vmul.f32 0.5, %v1708_v16  ;;  %1162 = vadd.xlane.f32.xlu0 %v1161_v26  ;;  %v7577_v25 = vpop.eup %4934  ;;  %10377 = vst [vmem:[#allocation19_spill] sm:$0xff] %v7594_v21  ;;  %v7604_v18 = vpop.xlane.xlu0 %1075 }
 0x1d0   : > { %vm1862_vm4 = vweird.f32 %v7370_v52  ;;  %v1700_v37 = vsub.f32 1.5, %v7557_v20  ;;  %4940 = vrsqrt.f32 %v7560_v60  ;;  %1204 = vadd.xlane.f32.xlu2 %v1203_v33  ;;  %v1861_v12 = vmul.f32 %v7432_v54, %v1860_v19  ;;  %vm1874_vm6 = vmor %vm1872_vm2, %vm1873_vm3 }
 0x1d1   : > { %vm1864_vm5 = vmor %vm1862_vm4, %vm1863_vm1  ;;  %v1871_v14 = vmul.f32 %v7436_v15, %v1870_v22  ;;  %v3006_v16 = vpack.c.bf16 %v7377_v40, %v7333_v63  ;;  %v3007_v52 = vpack.c.bf16 %v7407_v53, %v7337_v35  ;;  %v802_v20 = vmul.f32 %v546_v56, %v546_v56  ;;  %v5293_v40 = vld [vmem:[%s5731_s24 + $0x300] sm:$0xff]  ;;  %v5294_v35 = vld [vmem:[%s5731_s24 + $0x308] sm:$0xff] }
 0x1d2   : > { %v1865_v6 = vsel %vm1864_vm5, %v7432_v54, %v1861_v12  ;;  %v803_v41 = vmul.f32 %v547_v28, %v547_v28  ;;  %v800_v19 = vmul.f32 %v544_v51, %v544_v51  ;;  %v801_v39 = vmul.f32 %v545_v17, %v545_v17  ;;  %v5295_v56 = vld [vmem:[%s5731_s24 + $0x310] sm:$0xff] }
 0x1d3   : > { %v1710_v22 = vsub.f32 1.5, %v1709_v5  ;;  %v1875_v63 = vsel %vm1874_vm6, %v7436_v15, %v1871_v14  ;;  %v2752_v26 = vmul.f32 %v5293_v40, %v1865_v6  ;;  %v2753_v53 = vmul.f32 %v5294_v35, %v1865_v6  ;;  %v5298_v40 = vld [vmem:[%s5731_s24 + $0x210] sm:$0xff] }
 0x1d4   : > { %v7600_v33 = vpop.eup %4936  ;;  %v2754_v45 = vmul.f32 %v5295_v56, %v1875_v63  ;;  %v2755_v38 = vmul.f32 %v5296_v30, %v1875_v63  ;;  %v1155_v3 = vadd.f32 %v803_v41, %v802_v20  ;;  %v1152_v21 = vadd.f32 %v801_v39, %v800_v19  ;;  %v7618_v20 = vpop.xlane.xlu1 %1078  ;;  %v5297_v19 = vld [vmem:[%s5731_s24 + $0x200] sm:$0xff]  ;;  %v5300_v56 = vld [vmem:[%s5731_s24 + $0x218] sm:$0xff] }
 0x1d5   : > { %v7606_v54 = vpop.eup %4938  ;;  %v2310_v5 = vsub.f32 1.5, %v7526_v57  ;;  %v2140_v15 = vsub.f32 1.5, %v7532_v42  ;;  %v2278_v28 = vmul.f32 %v7541_v10, %v2277_v49  ;;  %v2117_v51 = vmul.f32 %v7577_v25, %v7516_v34 }
 0x1d6   : > { %v7613_v17 = vpop.eup %4940  ;;  %v7615_v12 = vmul.f32 0.5, %v2148_v61  ;;  %vm1703_vm7 = vweird.f32 %v7471_v43  ;;  %v2960_v30 = vpack.c.bf16 %v2754_v45, %v2752_v26  ;;  %v2961_v14 = vpack.c.bf16 %v2755_v38, %v2753_v53  ;;  %1156 = vadd.xlane.f32.xlu1 %v1155_v3  ;;  %v7669_v63 = vpop.xlane.xlu2 %1195 }
 0x1d7   : > { %vm2303_vm8 = vweird.f32 %v7368_v9  ;;  %vm2312_vm9 = vweird.f32 %v7317_v59  ;;  %v7622_v57 = vmul.f32 0.5, %v2288_v62  ;;  %vm1712_vm10 = vweird.f32 %v7422_v47  ;;  %1153 = vadd.xlane.f32.xlu0 %v1152_v21 }
 0x1d8   : > { %vm1713_vm11 = vweird.f32 %v7493_v29  ;;  %vm2302_vm12 = vweird.f32 %v7281_v46  ;;  %vm2313_vm13 = vweird.f32 %v7404_v27  ;;  %vm1702_vm14 = vweird.f32 %v7410_v55  ;;  %3185 = vmatpush.bf16.xpose.msrb.mxu2 %v2960_v30  ;;  %3204 = vmatpush.bf16.xpose.msrb.mxu3 %v2961_v14 }
 0x1d9   : > { %v1701_v3 = vmul.f32 %v7471_v43, %v1700_v37  ;;  %v1711_v38 = vmul.f32 %v7493_v29, %v1710_v22  ;;  %v10378_v42 = vsub.f32 1.5, %v7482_v0  ;;  %v7637_v49 = vmul.f32 %v7404_v27, %v2310_v5  ;;  %vm1704_vm15 = vmor %vm1702_vm14, %vm1703_vm7 }
 0x1da   : > { %v2279_v62 = vmul.f32 0.5, %v2278_v28  ;;  %v2118_v21 = vmul.f32 %v7577_v25, %v2117_v51  ;;  %v7643_v55 = vmul.f32 %v7426_v4, %v2140_v15  ;;  %v2150_v0 = vsub.f32 1.5, %v7615_v12  ;;  %vm1714_vm0 = vmor %vm1712_vm10, %vm1713_vm11  ;;  %v7683_v51 = vpop.xlane.xlu0 %1198 }
 0x1db   : > { %v7634_v61 = vmul.f32 %v7368_v9, %v10378_v42  ;;  %v2127_v37 = vmul.f32 %v7600_v33, %v7549_v58  ;;  %v1705_v6 = vsel %vm1704_vm15, %v7471_v43, %v1701_v3  ;;  %vm2142_vm1 = vweird.f32 %v7364_v31  ;;  %vm7701_vm6 = vmor %vm2302_vm12, %vm2303_vm8  ;;  %v10383_v3 = vld [vmem:[#allocation17_spill] sm:$0xff] }
 0x1dc   : > { %vm2143_vm2 = vweird.f32 %v7426_v4  ;;  %v1715_v41 = vsel %vm1714_vm0, %v7493_v29, %v1711_v38  ;;  %v2720_v39 = vmul.f32 %v5297_v19, %v1705_v6  ;;  %vm2153_vm3 = vweird.f32 %v7460_v50  ;;  %v5299_v29 = vld [vmem:[%s5731_s24 + $0x208] sm:$0xff]  ;;  %vm2314_vm8 = vmor %vm2312_vm9, %vm2313_vm13 }
 0x1dd   : > { %v2257_v47 = vmul.f32 %v7606_v54, %v7552_v11  ;;  %v2267_v43 = vmul.f32 %v7613_v17, %v7560_v60  ;;  %v7667_v22 = vmax.f32 %v7486_v44, 1e-24  ;;  %v2280_v26 = vsub.f32 1.5, %v2279_v62  ;;  %vm2144_vm9 = vmor %vm2142_vm1, %vm2143_vm2 }
 0x1de   : > { %v7672_v35 = vmul.f32 0.5, %v2118_v21  ;;  %v2721_v53 = vmul.f32 %v5299_v29, %v1705_v6  ;;  %v2723_v45 = vmul.f32 %v5300_v56, %v1715_v41  ;;  %vm2152_vm4 = vweird.f32 %v7397_v24  ;;  %v5301_v6 = vld [vmem:[%s5731_s24 + $0x5c0] sm:$0xff] }
 0x1df   : > { %v2128_v5 = vmul.f32 %v7600_v33, %v2127_v37  ;;  %v7679_v15 = vmax.f32 %v7537_v1, 1e-24  ;;  %v2990_v28 = vpack.c.bf16 %v7502_v13, %v7513_v48  ;;  %v7687_v12 = vmax.f32 %v7554_v7, 1e-24  ;;  %3186 = vmatmul.bf16.vlgmr.msrb.gmra.mxu2 %v7358_v32  ;;  %v10379_v13 = vld [vmem:[#allocation13_spill] sm:$0xff]  ;;  %v1118_v48 = vpop.xlane.xlu1 %1117  ;;  %v10382_v7 = vld [vmem:[#allocation14_spill] sm:$0xff]  ;;  %vm2154_vm15 = vmor %vm2152_vm4, %vm2153_vm3 }
 0x1e0   : > { %3254 = vmatpush.bf16.xpose.msra.mxu2 %v3006_v16  ;;  %3273 = vmatpush.bf16.xpose.msra.mxu3 %v3007_v52  ;;  %v2290_v16 = vsub.f32 1.5, %v7622_v57  ;;  %v7657_v52 = vmax.f32 %v7468_v8, 1e-24  ;;  %v2722_v8 = vmul.f32 %v5298_v40, %v1715_v41  ;;  %v2945_v30 = vpack.c.bf16 %v2723_v45, %v2721_v53  ;;  %v5302_v41 = vld [vmem:[%s5731_s24 + $0x5d0] sm:$0xff] }
 0x1e1   : > { %v2991_v14 = vpack.c.bf16 %v7510_v2, %v7523_v23  ;;  %vm2282_vm5 = vweird.f32 %v7455_v36  ;;  %v2258_v1 = vmul.f32 %v7606_v54, %v2257_v47  ;;  %v2268_v57 = vmul.f32 %v7613_v17, %v2267_v43  ;;  %3205 = vmatmul.bf16.vlgmr.msrb.gmra.mxu3 %v10379_v13  ;;  %v5303_v43 = vld [vmem:[%s5731_s24 + $0x5c8] sm:$0xff]  ;;  %v5305_v36 = vld [vmem:[%s5731_s24 + $0x4c0] sm:$0xff] }
 0x1e2   : > { %v2944_v44 = vpack.c.bf16 %v2722_v8, %v2720_v39  ;;  %4942 = vrsqrt.f32 %v7657_v52  ;;  %v2151_v23 = vmul.f32 %v7460_v50, %v2150_v0  ;;  %vm2292_vm7 = vweird.f32 %v10382_v7  ;;  %3166 = vmatpush.bf16.xpose.msrb.mxu1 %v2945_v30  ;;  %v7774_v45 = vpop.xlane.xlu0 %1237 }
 0x1e3   : > { %4944 = vrsqrt.f32 %v7667_v22  ;;  %vm2293_vm10 = vweird.f32 %v10383_v3  ;;  %vm2283_vm11 = vweird.f32 %v7541_v10  ;;  %v7710_v38 = vmax.f32 %v7618_v20, 1e-24 }
 0x1e4   : > { %3147 = vmatpush.bf16.xpose.msrb.mxu0 %v2944_v44  ;;  %v7717_v46 = vmul.f32 %v10383_v3, %v2290_v16  ;;  %v2281_v42 = vmul.f32 %v7541_v10, %v2280_v26  ;;  %v2120_v62 = vsub.f32 1.5, %v7672_v35  ;;  %4946 = vrsqrt.f32 %v7679_v15  ;;  %vm2284_vm2 = vmor %vm2282_vm5, %vm2283_vm11 }
 0x1e5   : > { %v7722_v20 = vmul.f32 0.5, %v2128_v5  ;;  %4948 = vrsqrt.f32 %v7687_v12  ;;  %v2305_v59 = vsel %vm7701_vm6, %v7368_v9, %v7634_v61  ;;  %v2315_v21 = vsel %vm2314_vm8, %v7404_v27, %v7637_v49  ;;  %v5304_v61 = vld [vmem:[%s5731_s24 + $0x5d8] sm:$0xff]  ;;  %vm2294_vm3 = vmor %vm2292_vm7, %vm2293_vm10 }
 0x1e6   : > { %v7731_v0 = vmul.f32 0.5, %v2258_v1  ;;  %v7733_v37 = vmul.f32 0.5, %v2268_v57  ;;  %v2840_v16 = vmul.f32 %v5301_v6, %v2305_v59  ;;  %v2842_v19 = vmul.f32 %v5302_v41, %v2315_v21 }
 0x1e7   : > { %4950 = vrsqrt.f32 %v7710_v38  ;;  %v7741_v47 = vmax.f32 %v7604_v18, 1e-24  ;;  %v2841_v9 = vmul.f32 %v5303_v43, %v2305_v59  ;;  %v2843_v40 = vmul.f32 %v5304_v61, %v2315_v21  ;;  %v1121_v18 = vpop.xlane.xlu2 %1120  ;;  %v7796_v2 = vpop.xlane.xlu1 %1240  ;;  %v5310_v21 = vld [vmem:[%s5731_s24 + $0x5a8] sm:$0xff] }
 0x1e8   : > { %v7737_v39 = vpop.eup %4942  ;;  %vm2123_vm12 = vweird.f32 %v7577_v25  ;;  %vm2132_vm13 = vweird.f32 %v7549_v58  ;;  %vm2133_vm14 = vweird.f32 %v7600_v33  ;;  %v3004_v49 = vpack.c.bf16 %v2842_v19, %v2840_v16  ;;  %v5311_v19 = vld [vmem:[%s5731_s24 + $0x5b0] sm:$0xff] }
 0x1e9   : > { %v7745_v27 = vpop.eup %4944  ;;  %v7759_v8 = vmul.f32 %v7577_v25, %v2120_v62  ;;  %vm2122_vm0 = vweird.f32 %v7516_v34  ;;  %vm2262_vm1 = vweird.f32 %v7552_v11  ;;  %v3005_v31 = vpack.c.bf16 %v2843_v40, %v2841_v9  ;;  %3167 = vmatmul.bf16.vlgmr.msrb.gmra.mxu1 %v10379_v13  ;;  %v5312_v9 = vld [vmem:[%s5731_s24 + $0x5b8] sm:$0xff]  ;;  %vm2134_vm6 = vmor %vm2132_vm13, %vm2133_vm14 }
 0x1ea   : > { %3235 = vmatpush.bf16.xpose.msra.mxu1 %v2991_v14  ;;  %v2145_v26 = vsel %vm2144_vm9, %v7426_v4, %v7643_v55  ;;  %v7766_v35 = vpop.eup %4946  ;;  %v2130_v29 = vsub.f32 1.5, %v7722_v20  ;;  %v2260_v24 = vsub.f32 1.5, %v7731_v0  ;;  %v2097_v53 = vmul.f32 %v7737_v39, %v7657_v52  ;;  %3255 = vmatpush.bf16.xpose.msra.mxu2 %v3004_v49  ;;  %v5307_v14 = vld [vmem:[%s5731_s24 + $0x4d8] sm:$0xff]  ;;  %v5309_v20 = vld [vmem:[%s5731_s24 + $0x5a0] sm:$0xff]  ;;  %vm7827_vm5 = vmor %vm2122_vm0, %vm2123_vm12 }
 0x1eb   : > { %3148 = vmatmul.bf16.vlgmr.msrb.gmra.mxu0 %v7358_v32  ;;  %v2155_v56 = vsel %vm2154_vm15, %v7460_v50, %v2151_v23  ;;  %v7776_v4 = vpop.eup %4948  ;;  %v2270_v55 = vsub.f32 1.5, %v7733_v37  ;;  %v2107_v5 = vmul.f32 %v7745_v27, %v7667_v22  ;;  %4952 = vrsqrt.f32 %v7741_v47  ;;  %3274 = vmatpush.bf16.xpose.msra.mxu3 %v3005_v31 }
 0x1ec   : > { %3216 = vmatpush.bf16.xpose.msra.mxu0 %v2990_v28  ;;  %v7786_v50 = vmax.f32 %v1118_v48, 1e-24  ;;  %v2808_v44 = vmul.f32 %v5305_v36, %v2145_v26  ;;  %v5306_v28 = vld [vmem:[%s5731_s24 + $0x4d0] sm:$0xff]  ;;  %v2811_v1 = vmul.f32 %v5307_v14, %v2155_v56  ;;  %v2285_v57 = vsel %vm2284_vm2, %v7541_v10, %v2281_v42  ;;  %v5308_v48 = vld [vmem:[%s5731_s24 + $0x4c8] sm:$0xff]  ;;  %v10387_v36 = vld [vmem:[#allocation16_spill] sm:$0xff] }
 0x1ed   : > { %v2810_v30 = vmul.f32 %v5306_v28, %v2155_v56  ;;  %v7798_v23 = vpop.eup %4950  ;;  %v2809_v62 = vmul.f32 %v5308_v48, %v2145_v26  ;;  %v2295_v7 = vsel %vm2294_vm3, %v10383_v3, %v7717_v46  ;;  %v2836_v59 = vmul.f32 %v5309_v20, %v2285_v57 }
 0x1ee   : > { %v2837_v0 = vmul.f32 %v5310_v21, %v2285_v57  ;;  %v2098_v37 = vmul.f32 %v7737_v39, %v2097_v53  ;;  %v2237_v10 = vmul.f32 %v7766_v35, %v7679_v15  ;;  %v2247_v42 = vmul.f32 %v7776_v4, %v7687_v12 }
 0x1ef   : > { %v7810_v6 = vmax.f32 %v1121_v18, 1e-24  ;;  %v2988_v16 = vpack.c.bf16 %v2810_v30, %v2808_v44  ;;  %v2989_v41 = vpack.c.bf16 %v2811_v1, %v2809_v62  ;;  %v2838_v43 = vmul.f32 %v5311_v19, %v2295_v7  ;;  %v1073_v30 = vpop.xlane.xlu0 %1072  ;;  %v5317_v19 = vld [vmem:[%s5731_s24 + $0x580] sm:$0xff] }
 0x1f0   : > { %v2839_v3 = vmul.f32 %v5312_v9, %v2295_v7  ;;  %v2131_v46 = vmul.f32 %v7600_v33, %v2130_v29  ;;  %v2108_v61 = vmul.f32 %v7745_v27, %v2107_v5  ;;  %v2087_v40 = vmul.f32 %v7798_v23, %v7710_v38  ;;  %v10386_v5 = vld [vmem:[#allocation15_spill] sm:$0xff]  ;;  %v5313_v7 = vld [vmem:[%s5731_s24 + $0x4a0] sm:$0xff] }
 0x1f1   : > { %4954 = vrsqrt.f32 %v7786_v50  ;;  %v7819_v49 = vpop.eup %4952  ;;  %v2261_v18 = vmul.f32 %v7606_v54, %v2260_v24  ;;  %vm2263_vm4 = vweird.f32 %v7606_v54  ;;  %v3002_v31 = vpack.c.bf16 %v2838_v43, %v2836_v59  ;;  %v1070_v24 = vpop.xlane.xlu2 %1069  ;;  %3191 = vmatmul.bf16.gmra.mxu2 %v10386_v5  ;;  %3210 = vmatmul.bf16.gmra.mxu3 %v10387_v36  ;;  %v5314_v59 = vld [vmem:[%s5731_s24 + $0x4b0] sm:$0xff] }
 0x1f2   : > { %3236 = vmatpush.bf16.xpose.msra.mxu1 %v2989_v41  ;;  %v3003_v26 = vpack.c.bf16 %v2839_v3, %v2837_v0  ;;  %v2099_v53 = vmul.f32 0.5, %v2098_v37  ;;  %v2238_v56 = vmul.f32 %v7766_v35, %v2237_v10  ;;  %4956 = vrsqrt.f32 %v7810_v6  ;;  %vm2264_vm10 = vmor %vm2262_vm1, %vm2263_vm4  ;;  %v7865_v0 = vpop.xlane.xlu1 %1189  ;;  %v5318_v9 = vld [vmem:[%s5731_s24 + $0x590] sm:$0xff] }
 0x1f3   : > { %v2271_v34 = vmul.f32 %v7613_v17, %v2270_v55  ;;  %vm2273_vm7 = vweird.f32 %v7613_v17  ;;  %v2248_v44 = vmul.f32 %v7776_v4, %v2247_v42  ;;  %3256 = vmatpush.bf16.xpose.msra.mxu2 %v3002_v31  ;;  %vm2272_vm11 = vweird.f32 %v7560_v60 }
 0x1f4   : > { %3217 = vmatpush.bf16.xpose.msra.mxu0 %v2988_v16  ;;  %3275 = vmatpush.bf16.xpose.msra.mxu3 %v3003_v26  ;;  %v2109_v28 = vmul.f32 0.5, %v2108_v61  ;;  %v2088_v58 = vmul.f32 %v7798_v23, %v2087_v40  ;;  %v2077_v55 = vmul.f32 %v7819_v49, %v7741_v47  ;;  %vm2102_vm8 = vweird.f32 %v7657_v52  ;;  %vm2274_vm9 = vmor %vm2272_vm11, %vm2273_vm7 }
 0x1f5   : > { %v7851_v14 = vmax.f32 %v1070_v24, 1e-24  ;;  %v2125_v11 = vsel %vm7827_vm5, %v7577_v25, %v7759_v8  ;;  %v2135_v60 = vsel %vm2134_vm6, %v7600_v33, %v2131_v46  ;;  %v2265_v1 = vsel %vm2264_vm10, %v7606_v54, %v2261_v18  ;;  %v5315_v33 = vld [vmem:[%s5731_s24 + $0x4a8] sm:$0xff]  ;;  %v5316_v8 = vld [vmem:[%s5731_s24 + $0x4b8] sm:$0xff] }
 0x1f6   : > { %v2100_v48 = vsub.f32 1.5, %v2099_v53  ;;  %v2239_v62 = vmul.f32 0.5, %v2238_v56  ;;  %v2804_v20 = vmul.f32 %v5313_v7, %v2125_v11  ;;  %v2806_v21 = vmul.f32 %v5314_v59, %v2135_v60  ;;  %v10388_v18 = vld [vmem:[#allocation18_spill] sm:$0xff] }
 0x1f7   : > { %v7859_v57 = vpop.eup %4954  ;;  %vm2242_vm12 = vweird.f32 %v7679_v15  ;;  %v2249_v25 = vmul.f32 0.5, %v2248_v44  ;;  %v2805_v54 = vmul.f32 %v5315_v33, %v2125_v11  ;;  %v2807_v37 = vmul.f32 %v5316_v8, %v2135_v60  ;;  %v5319_v11 = vld [vmem:[%s5731_s24 + $0x588] sm:$0xff]  ;;  %v5323_v15 = vld [vmem:[%s5731_s24 + $0x490] sm:$0xff] }
 0x1f8   : > { %v2275_v10 = vsel %vm2274_vm9, %v7613_v17, %v2271_v34  ;;  %v7871_v42 = vpop.eup %4956  ;;  %vm2112_vm13 = vweird.f32 %v7667_v22  ;;  %v2078_v16 = vmul.f32 %v7819_v49, %v2077_v55  ;;  %v2986_v41 = vpack.c.bf16 %v2806_v21, %v2804_v20  ;;  %v10389_v34 = vld [vmem:[#allocation19_spill] sm:$0xff]  ;;  %v1112_v21 = vpop.xlane.xlu0 %1111 }
 0x1f9   : > { %v2832_v43 = vmul.f32 %v5317_v19, %v2265_v1  ;;  %v2834_v3 = vmul.f32 %v5318_v9, %v2275_v10  ;;  %v2089_v46 = vmul.f32 0.5, %v2088_v58  ;;  %v2217_v61 = vmul.f32 %v7859_v57, %v7786_v50  ;;  %3172 = vmatmul.bf16.gmra.mxu1 %v10387_v36 }
 0x1fa   : > { %4958 = vrsqrt.f32 %v7851_v14  ;;  %v2987_v40 = vpack.c.bf16 %v2807_v37, %v2805_v54  ;;  %v2110_v17 = vsub.f32 1.5, %v2109_v28  ;;  %vm2113_vm14 = vweird.f32 %v7745_v27 }
 0x1fb   : > { %3153 = vmatmul.bf16.gmra.mxu0 %v10386_v5  ;;  %v7883_v31 = vmax.f32 %v10388_v18, 1e-24  ;;  %v3000_v26 = vpack.c.bf16 %v2834_v3, %v2832_v43  ;;  %v2101_v29 = vmul.f32 %v7737_v39, %v2100_v48  ;;  %vm2103_vm15 = vweird.f32 %v7737_v39  ;;  %v5320_v48 = vld [vmem:[%s5731_s24 + $0x598] sm:$0xff]  ;;  %vm2114_vm4 = vmor %vm2112_vm13, %vm2113_vm14  ;;  %v5322_v43 = vld [vmem:[%s5731_s24 + $0x488] sm:$0xff] }
 0x1fc   : > { %3218 = vmatpush.bf16.xpose.msra.mxu0 %v2986_v41  ;;  %v2240_v53 = vsub.f32 1.5, %v2239_v62  ;;  %v2227_v56 = vmul.f32 %v7871_v42, %v7810_v6  ;;  %3237 = vmatpush.bf16.xpose.msra.mxu1 %v2987_v40  ;;  %vm2243_vm0 = vweird.f32 %v7766_v35  ;;  %v2250_v24 = vsub.f32 1.5, %v2249_v25  ;;  %v7897_v62 = vpop.xlane.xlu2 %1192  ;;  %vm2104_vm1 = vmor %vm2102_vm8, %vm2103_vm15  ;;  %v5321_v41 = vld [vmem:[%s5731_s24 + $0x480] sm:$0xff] }
 0x1fd   : > { %v7892_v44 = vmax.f32 %v10389_v34, 1e-24  ;;  %v2079_v28 = vmul.f32 0.5, %v2078_v16  ;;  %3257 = vmatpush.bf16.xpose.msra.mxu2 %v3000_v26  ;;  %v2090_v58 = vsub.f32 1.5, %v2089_v46  ;;  %v2218_v55 = vmul.f32 %v7859_v57, %v2217_v61  ;;  %vm2244_vm7 = vmor %vm2242_vm12, %vm2243_vm0  ;;  %v5324_v61 = vld [vmem:[%s5731_s24 + $0x498] sm:$0xff] }
 0x1fe   : > { %v2833_v60 = vmul.f32 %v5319_v11, %v2265_v1  ;;  %v2835_v7 = vmul.f32 %v5320_v48, %v2275_v10  ;;  %v2111_v20 = vmul.f32 %v7745_v27, %v2110_v17  ;;  %4960 = vrsqrt.f32 %v7883_v31 }
 0x1ff   : > { %vm2252_vm2 = vweird.f32 %v7687_v12  ;;  %v7906_v59 = vmax.f32 %v1073_v30, 1e-24  ;;  %v2241_v1 = vmul.f32 %v7766_v35, %v2240_v53  ;;  %v2228_v33 = vmul.f32 %v7871_v42, %v2227_v56  ;;  %v1115_v30 = vpop.xlane.xlu1 %1114  ;;  %v5326_v56 = vld [vmem:[%s5731_s24 + $0x568] sm:$0xff] }
 0x200   : > { %v7908_v25 = vpop.eup %4958  ;;  %v3001_v54 = vpack.c.bf16 %v2835_v7, %v2833_v60  ;;  %v2105_v8 = vsel %vm2104_vm1, %v7737_v39, %v2101_v29  ;;  %v2251_v52 = vmul.f32 %v7776_v4, %v2250_v24  ;;  %vm2253_vm3 = vweird.f32 %v7776_v4  ;;  %v5325_v29 = vld [vmem:[%s5731_s24 + $0x560] sm:$0xff] }
 0x201   : > { %v2080_v37 = vsub.f32 1.5, %v2079_v28  ;;  %4962 = vrsqrt.f32 %v7906_v59  ;;  %v2091_v10 = vmul.f32 %v7798_v23, %v2090_v58  ;;  %vm2093_vm5 = vweird.f32 %v7798_v23  ;;  %vm2254_vm10 = vmor %vm2252_vm2, %vm2253_vm3  ;;  %v5327_v28 = vld [vmem:[%s5731_s24 + $0x570] sm:$0xff] }
 0x202   : > { %vm2083_vm6 = vweird.f32 %v7819_v49  ;;  %v2219_v39 = vmul.f32 0.5, %v2218_v55  ;;  %3276 = vmatpush.bf16.xpose.msra.mxu3 %v3001_v54  ;;  %v2057_v16 = vmul.f32 %v7908_v25, %v7851_v14  ;;  %v2115_v22 = vsel %vm2114_vm4, %v7745_v27, %v2111_v20  ;;  %v5328_v55 = vld [vmem:[%s5731_s24 + $0x578] sm:$0xff] }
 0x203   : > { %v2800_v19 = vmul.f32 %v5321_v41, %v2105_v8  ;;  %v2801_v9 = vmul.f32 %v5322_v43, %v2105_v8  ;;  %v2229_v3 = vmul.f32 0.5, %v2228_v33  ;;  %v2802_v46 = vmul.f32 %v5323_v15, %v2115_v22  ;;  %v5329_v41 = vld [vmem:[%s5731_s24 + $0x460] sm:$0xff] }
 0x204   : > { %v2803_v40 = vmul.f32 %v5324_v61, %v2115_v22  ;;  %v2245_v17 = vsel %vm2244_vm7, %v7766_v35, %v2241_v1  ;;  %v7939_v27 = vpop.eup %4960  ;;  %v2081_v18 = vmul.f32 %v7819_v49, %v2080_v37  ;;  %v2255_v26 = vsel %vm2254_vm10, %v7776_v4, %v2251_v52  ;;  %v7971_v52 = vpop.xlane.xlu0 %1234  ;;  %v5332_v61 = vld [vmem:[%s5731_s24 + $0x478] sm:$0xff] }
 0x205   : > { %v2828_v53 = vmul.f32 %v5325_v29, %v2245_v17  ;;  %v2829_v12 = vmul.f32 %v5326_v56, %v2245_v17  ;;  %v2984_v24 = vpack.c.bf16 %v2802_v46, %v2800_v19  ;;  %v2830_v58 = vmul.f32 %v5327_v28, %v2255_v26 }
 0x206   : > { %v2985_v34 = vpack.c.bf16 %v2803_v40, %v2801_v9  ;;  %v2831_v11 = vmul.f32 %v5328_v55, %v2255_v26  ;;  %vm2092_vm11 = vweird.f32 %v7710_v38  ;;  %vm2082_vm8 = vweird.f32 %v7741_v47  ;;  %v7960_v38 = vpop.xlane.xlu2 %1231  ;;  %v5331_v9 = vld [vmem:[%s5731_s24 + $0x468] sm:$0xff] }
 0x207   : > { %v7947_v60 = vpop.eup %4962  ;;  %v2220_v35 = vsub.f32 1.5, %v2219_v39  ;;  %v2058_v48 = vmul.f32 %v7908_v25, %v2057_v16  ;;  %vm7954_vm9 = vmor %vm2092_vm11, %vm2093_vm5  ;;  %v2230_v7 = vsub.f32 1.5, %v2229_v3  ;;  %3219 = vmatpush.bf16.xpose.msra.mxu0 %v2984_v24  ;;  %v2998_v1 = vpack.c.bf16 %v2830_v58, %v2828_v53  ;;  %v1064_v16 = vpop.xlane.xlu1 %1063  ;;  %v5335_v58 = vld [vmem:[%s5731_s24 + $0x548] sm:$0xff] }
 0x208   : > { %v2067_v20 = vmul.f32 %v7947_v60, %v7906_v59  ;;  %3238 = vmatpush.bf16.xpose.msra.mxu1 %v2985_v34  ;;  %v2999_v33 = vpack.c.bf16 %v2831_v11, %v2829_v12  ;;  %v2637_v47 = vmul.f32 %v7939_v27, %v7883_v31  ;;  %4964 = vrsqrt.f32 %v7892_v44  ;;  %vm2084_vm12 = vmor %vm2082_vm8, %vm2083_vm6  ;;  %v5333_v12 = vld [vmem:[%s5731_s24 + $0x540] sm:$0xff]  ;;  %v5334_v34 = vld [vmem:[%s5731_s24 + $0x550] sm:$0xff] }
 0x209   : > { %v7967_v54 = vmax.f32 %v1115_v30, 1e-24  ;;  %v7969_v8 = vmax.f32 %v1112_v21, 1e-24  ;;  %vm2222_vm13 = vweird.f32 %v7786_v50  ;;  %3258 = vmatpush.bf16.xpose.msra.mxu2 %v2998_v1  ;;  %v2085_v39 = vsel %vm2084_vm12, %v7819_v49, %v2081_v18  ;;  %v5336_v11 = vld [vmem:[%s5731_s24 + $0x558] sm:$0xff] }
 0x20a   : > { %v2068_v37 = vmul.f32 %v7947_v60, %v2067_v20  ;;  %3277 = vmatpush.bf16.xpose.msra.mxu3 %v2999_v33  ;;  %v2095_v30 = vsel %vm7954_vm9, %v7798_v23, %v2091_v10  ;;  %v2221_v21 = vmul.f32 %v7859_v57, %v2220_v35  ;;  %vm2223_vm14 = vweird.f32 %v7859_v57  ;;  %v5330_v23 = vld [vmem:[%s5731_s24 + $0x470] sm:$0xff] }
 0x20b   : > { %vm2232_vm15 = vweird.f32 %v7810_v6  ;;  %4966 = vrsqrt.f32 %v7969_v8  ;;  %v2231_v22 = vmul.f32 %v7871_v42, %v2230_v7  ;;  %vm2233_vm0 = vweird.f32 %v7871_v42  ;;  %vm2224_vm1 = vmor %vm2222_vm13, %vm2223_vm14  ;;  %v8020_v35 = vld [vmem:[%s10310_s2 + $0x10] sm:$0xff] }
 0x20c   : > { %v2059_v49 = vmul.f32 0.5, %v2058_v48  ;;  %v2796_v19 = vmul.f32 %v5329_v41, %v2085_v39  ;;  %v2069_v43 = vmul.f32 0.5, %v2068_v37  ;;  %4968 = vrsqrt.f32 %v7967_v54  ;;  %vm2234_vm2 = vmor %vm2232_vm15, %vm2233_vm0  ;;  %v8029_v33 = vpop.xlane.xlu0 %1183 }
 0x20d   : > { %v2798_v10 = vmul.f32 %v5330_v23, %v2095_v30  ;;  %v2797_v3 = vmul.f32 %v5331_v9, %v2085_v39  ;;  %v2638_v15 = vmul.f32 %v7939_v27, %v2637_v47  ;;  %v7991_v46 = vmax.f32 %v7669_v63, 1e-24 }
 0x20e   : > { %v2799_v40 = vmul.f32 %v5332_v61, %v2095_v30  ;;  %v7998_v17 = vpop.eup %4964  ;;  %v2225_v63 = vsel %vm2224_vm1, %v7859_v57, %v2221_v21  ;;  %v2060_v26 = vsub.f32 1.5, %v2059_v49  ;;  %v2235_v50 = vsel %vm2234_vm2, %v7871_v42, %v2231_v22  ;;  %v1067_v48 = vpop.xlane.xlu2 %1066  ;;  %v8045_v30 = vld [vmem:[%s10310_s2 + $0x8] sm:$0xff] }
 0x20f   : > { %v2982_v18 = vpack.c.bf16 %v2798_v10, %v2796_v19  ;;  %v2070_v56 = vsub.f32 1.5, %v2069_v43  ;;  %v2824_v24 = vmul.f32 %v5333_v12, %v2225_v63  ;;  %v2826_v28 = vmul.f32 %v5334_v34, %v2235_v50  ;;  %v8053_v49 = vpop.xlane.xlu1 %1186 }
 0x210   : > { %v2983_v29 = vpack.c.bf16 %v2799_v40, %v2797_v3  ;;  %v2825_v55 = vmul.f32 %v5335_v58, %v2225_v63  ;;  %v8011_v6 = vmul.f32 0.5, %v2638_v15  ;;  %v2647_v57 = vmul.f32 %v7998_v17, %v7892_v44  ;;  %v5337_v63 = vld [vmem:[%s5731_s24 + $0x440] sm:$0xff] }
 0x211   : > { %v8006_v53 = vpop.eup %4966  ;;  %3220 = vmatpush.bf16.xpose.msra.mxu0 %v2982_v18  ;;  %4970 = vrsqrt.f32 %v7991_v46  ;;  %v2827_v42 = vmul.f32 %v5336_v11, %v2235_v50  ;;  %v8025_v7 = vmax.f32 %v7683_v51, 1e-24  ;;  %v2996_v1 = vpack.c.bf16 %v2826_v28, %v2824_v24  ;;  %v8040_v51 = vld [vmem:[%s10310_s2] sm:$0xff]  ;;  %v8092_v24 = vld [vmem:[%s10310_s2 + $0x18] sm:$0xff] }
 0x212   : > { %3239 = vmatpush.bf16.xpose.msra.mxu1 %v2983_v29  ;;  %v8022_v4 = vpop.eup %4968  ;;  %v2197_v20 = vmul.f32 %v8006_v53, %v7969_v8  ;;  %vm2062_vm3 = vweird.f32 %v7851_v14  ;;  %vm2063_vm4 = vweird.f32 %v7908_v25  ;;  %v10327_v37 = vmov 0   ;;  %v5338_v29 = vld [vmem:[%s5731_s24 + $0x450] sm:$0xff] }
 0x213   : > { %v2997_v47 = vpack.c.bf16 %v2827_v42, %v2825_v55  ;;  %4777 = vset.pattern.permute.xlu1 %v10327_v37  ;;  %v8034_v39 = vmax.f32 %v1064_v16, 1e-24  ;;  %4775 = vset.pattern.permute.xlu2 %v10327_v37  ;;  %v2061_v21 = vmul.f32 %v7908_v25, %v2060_v26  ;;  %v2071_v22 = vmul.f32 %v7947_v60, %v2070_v56  ;;  %vm2064_vm6 = vmor %vm2062_vm3, %vm2063_vm4 }
 0x214   : > { %vm2073_vm5 = vweird.f32 %v7947_v60  ;;  %3259 = vmatpush.bf16.xpose.msra.mxu2 %v2996_v1  ;;  %3928 = vperm.xlu1 %4777, %v8020_v35   ;;  %v8051_v16 = vmax.f32 %v1067_v48, 1e-24  ;;  %v2207_v41 = vmul.f32 %v8022_v4, %v7967_v54  ;;  %v2648_v19 = vmul.f32 %v7998_v17, %v2647_v57  ;;  %v1109_v57 = vpop.xlane.xlu0 %1108 }
 0x215   : > { %3278 = vmatpush.bf16.xpose.msra.mxu3 %v2997_v47  ;;  %4972 = vrsqrt.f32 %v8034_v39  ;;  %4776 = vset.pattern.permute.xlu0 %v10327_v37  ;;  %vm2072_vm7 = vweird.f32 %v7906_v59  ;;  %v2198_v43 = vmul.f32 %v8006_v53, %v2197_v20  ;;  %v2640_v14 = vsub.f32 1.5, %v8011_v6 }
 0x216   : > { %4974 = vrsqrt.f32 %v8025_v7  ;;  %3918 = vperm.xlu2 %4775, %v8040_v51   ;;  %3923 = vperm.xlu0 %4776, %v8045_v30   ;;  %vm2074_vm10 = vmor %vm2072_vm7, %vm2073_vm5  ;;  %v2065_v59 = vsel %vm2064_vm6, %v7908_v25, %v2061_v21  ;;  %v2208_v9 = vmul.f32 %v8022_v4, %v2207_v41  ;;  %vm2643_vm11 = vweird.f32 %v7939_v27  ;;  %v1106_v18 = vpop.xlane.xlu2 %1105  ;;  %v5339_v25 = vld [vmem:[%s5731_s24 + $0x448] sm:$0xff] }
 0x217   : > { %v8069_v23 = vpop.eup %4970  ;;  %4976 = vrsqrt.f32 %v8051_v16  ;;  %v2075_v10 = vsel %vm2074_vm10, %v7947_v60, %v2071_v22  ;;  %v8079_v3 = vmul.f32 0.5, %v2648_v19  ;;  %v2199_v61 = vmul.f32 0.5, %v2198_v43  ;;  %v5340_v60 = vld [vmem:[%s5731_s24 + $0x458] sm:$0xff] }
 0x218   : > { %v2477_v15 = vmul.f32 %v8069_v23, %v7991_v46  ;;  %v2792_v26 = vmul.f32 %v5337_v63, %v2065_v59  ;;  %v2794_v50 = vmul.f32 %v5338_v29, %v2075_v10  ;;  %v2793_v56 = vmul.f32 %v5339_v25, %v2065_v59  ;;  %v5341_v25 = vld [vmem:[%s5731_s24 + $0x7e0] sm:$0xff] }
 0x219   : > { %v2795_v12 = vmul.f32 %v5340_v60, %v2075_v10  ;;  %v2641_v28 = vmul.f32 %v7939_v27, %v2640_v14  ;;  %v8098_v58 = vmax.f32 %v7796_v2, 1e-24  ;;  %v5589_v6 = vmov 1   ;;  %v5342_v60 = vld [vmem:[%s5731_s24 + $0x7e8] sm:$0xff] }
 0x21a   : > { %v8105_v42 = vmax.f32 %v7774_v45, 1e-24  ;;  %v2209_v48 = vmul.f32 0.5, %v2208_v9  ;;  %v2980_v20 = vpack.c.bf16 %v2794_v50, %v2792_v26  ;;  %v2478_v47 = vmul.f32 %v8069_v23, %v2477_v15  ;;  %v8116_v45 = vpop.xlane.xlu1 %1225 }
 0x21b   : > { %v8083_v40 = vpop.eup %4972  ;;  %v2981_v1 = vpack.c.bf16 %v2795_v12, %v2793_v56  ;;  %v8112_v22 = vmax.f32 %v1106_v18, 1e-24  ;;  %v5590_v41 = vmov 2   ;;  %vm2642_vm8 = vweird.f32 %v7883_v31 }
 0x21c   : > { %v8094_v34 = vpop.eup %4974  ;;  %v2037_v55 = vmul.f32 %v8083_v40, %v8034_v39  ;;  %4779 = vset.pattern.permute.xlu1 %v5589_v6  ;;  %v2200_v19 = vsub.f32 1.5, %v2199_v61  ;;  %3221 = vmatpush.bf16.xpose.msra.mxu0 %v2980_v20  ;;  %v8119_v43 = vmax.f32 %v1109_v57, 1e-24  ;;  %4978 = vrsqrt.f32 %v8098_v58  ;;  %vm2644_vm9 = vmor %vm2642_vm8, %vm2643_vm11 }
 0x21d   : > { %v8102_v11 = vpop.eup %4976  ;;  %3973 = vperm.xlu1 %4779, %v8045_v30   ;;  %3240 = vmatpush.bf16.xpose.msra.mxu1 %v2981_v1  ;;  %v2487_v14 = vmul.f32 %v8094_v34, %v8025_v7  ;;  %v8125_v59 = vmax.f32 %v7865_v0, 1e-24  ;;  %4980 = vrsqrt.f32 %v8105_v42  ;;  %v2210_v31 = vsub.f32 1.5, %v2209_v48 }
 0x21e   : > { %v2038_v2 = vmul.f32 %v8083_v40, %v2037_v55  ;;  %v2047_v21 = vmul.f32 %v8102_v11, %v8051_v16  ;;  %3933 = vperm.xlu2 %4775, %v8092_v24   ;;  %4780 = vset.pattern.permute.xlu0 %v5590_v41  ;;  %v2645_v15 = vsel %vm2644_vm9, %v7939_v27, %v2641_v28  ;;  %v2650_v61 = vsub.f32 1.5, %v8079_v3 }
 0x21f   : > { %4049 = vperm.xlu0 %4780, %v8040_v51   ;;  %v8134_v18 = vmul.f32 0.5, %v2478_v47  ;;  %4982 = vrsqrt.f32 %v8112_v22  ;;  %v2201_v0 = vmul.f32 %v8006_v53, %v2200_v19  ;;  %vm2203_vm12 = vweird.f32 %v8006_v53 }
 0x220   : > { %v2048_v10 = vmul.f32 %v8102_v11, %v2047_v21  ;;  %v2039_v9 = vmul.f32 0.5, %v2038_v2  ;;  %4984 = vrsqrt.f32 %v8119_v43  ;;  %v2488_v26 = vmul.f32 %v8094_v34, %v2487_v14  ;;  %v5343_v21 = vld [vmem:[%s5731_s24 + $0x520] sm:$0xff]  ;;  %v5344_v14 = vld [vmem:[%s5731_s24 + $0x530] sm:$0xff] }
 0x221   : > { %4986 = vrsqrt.f32 %v8125_v59  ;;  %v8143_v27 = vmax.f32 %v7897_v62, 1e-24  ;;  %vm2652_vm13 = vweird.f32 %v7892_v44  ;;  %v2211_v3 = vmul.f32 %v8022_v4, %v2210_v31  ;;  %v5345_v31 = vld [vmem:[%s5731_s24 + $0x528] sm:$0xff] }
 0x222   : > { %v2049_v63 = vmul.f32 0.5, %v2048_v10  ;;  %vm2213_vm14 = vweird.f32 %v8022_v4  ;;  %vm2202_vm15 = vweird.f32 %v7969_v8  ;;  %v2040_v29 = vsub.f32 1.5, %v2039_v9  ;;  %v8150_v50 = vpop.eup %4978  ;;  %v8164_v8 = vpop.xlane.xlu2 %1228 }
 0x223   : > { %v8153_v56 = vmul.f32 %v5341_v25, %v2645_v15  ;;  %v8156_v12 = vmul.f32 %v5342_v60, %v2645_v15  ;;  %v8159_v62 = vmul.f32 %v7998_v17, %v2650_v61  ;;  %vm2653_vm0 = vweird.f32 %v7998_v17  ;;  %vm2204_vm1 = vmor %vm2202_vm15, %vm2203_vm12  ;;  %v8166_v28 = vpop.eup %4980  ;;  %v5346_v61 = vld [vmem:[%s5731_s24 + $0x538] sm:$0xff] }
 0x224   : > { %v2480_v55 = vsub.f32 1.5, %v8134_v18  ;;  %vm2482_vm2 = vweird.f32 %v7991_v46  ;;  %vm2212_vm3 = vweird.f32 %v7967_v54  ;;  %v2050_v57 = vsub.f32 1.5, %v2049_v63  ;;  %v1061_v54 = vpop.xlane.xlu1 %1060  ;;  %vm2654_vm12 = vmor %vm2652_vm13, %vm2653_vm0 }
 0x225   : > { %3981 = vperm.xlu1 %4779, %v8092_v24   ;;  %v2205_v48 = vsel %vm2204_vm1, %v8006_v53, %v2201_v0  ;;  %v8173_v20 = vpop.eup %4982  ;;  %v8175_v1 = vmul.f32 0.5, %v2488_v26  ;;  %4988 = vrsqrt.f32 %v8143_v27  ;;  %vm2214_vm4 = vmor %vm2212_vm3, %vm2213_vm14  ;;  %vm2042_vm5 = vweird.f32 %v8034_v39  ;;  %v1058_v53 = vpop.xlane.xlu0 %1057 }
 0x226   : > { %4778 = vset.pattern.permute.xlu2 %v5589_v6  ;;  %v8181_v6 = vmax.f32 %v7960_v38, 1e-24  ;;  %v2041_v47 = vmul.f32 %v8083_v40, %v2040_v29  ;;  %vm2043_vm6 = vweird.f32 %v8083_v40  ;;  %v2215_v2 = vsel %vm2214_vm4, %v8022_v4, %v2211_v3 }
 0x227   : > { %3969 = vperm.xlu2 %4778, %v8040_v51   ;;  %4784 = vset.pattern.permute.xlu0 %v10327_v37  ;;  %v8185_v51 = vpop.eup %4984  ;;  %v2820_v19 = vmul.f32 %v5343_v21, %v2205_v48  ;;  %vm2052_vm7 = vweird.f32 %v8051_v16  ;;  %vm2053_vm10 = vweird.f32 %v8102_v11  ;;  %v2822_v10 = vmul.f32 %v5344_v14, %v2215_v2  ;;  %vm2044_vm11 = vmor %vm2042_vm5, %vm2043_vm6  ;;  %v5348_v21 = vld [vmem:[%s5731_s24 + $0x430] sm:$0xff]  ;;  %v5349_v14 = vld [vmem:[%s5731_s24 + $0x428] sm:$0xff] }
 0x228   : > { %v8191_v38 = vpop.eup %4986  ;;  %v2821_v9 = vmul.f32 %v5345_v31, %v2205_v48  ;;  %v2051_v15 = vmul.f32 %v8102_v11, %v2050_v57  ;;  %v2823_v18 = vmul.f32 %v5346_v61, %v2215_v2  ;;  %v8199_v0 = vmax.f32 %v1061_v54, 1e-24  ;;  %vm2054_vm9 = vmor %vm2052_vm7, %vm2053_vm10  ;;  %v5350_v31 = vld [vmem:[%s5731_s24 + $0x438] sm:$0xff] }
 0x229   : > { %v8201_v63 = vmax.f32 %v1058_v53, 1e-24  ;;  %4990 = vrsqrt.f32 %v8181_v6  ;;  %v2177_v4 = vmul.f32 %v8173_v20, %v8112_v22  ;;  %v2187_v26 = vmul.f32 %v8185_v51, %v8119_v43 }
 0x22a   : > { %v2994_v3 = vpack.c.bf16 %v2822_v10, %v2820_v19  ;;  %vm2483_vm8 = vweird.f32 %v8069_v23  ;;  %v2627_v29 = vmul.f32 %v8150_v50, %v8098_v58  ;;  %v2995_v25 = vpack.c.bf16 %v2823_v18, %v2821_v9 }
 0x22b   : > { %v2045_v60 = vsel %vm2044_vm11, %v8083_v40, %v2041_v47  ;;  %v8217_v57 = vpop.eup %4988  ;;  %v2481_v39 = vmul.f32 %v8069_v23, %v2480_v55  ;;  %v2617_v48 = vmul.f32 %v8166_v28, %v8105_v42  ;;  %v2457_v54 = vmul.f32 %v8191_v38, %v8125_v59  ;;  %v8243_v47 = vpop.xlane.xlu2 %1177  ;;  %vm2484_vm13 = vmor %vm2482_vm2, %vm2483_vm8 }
 0x22c   : > { %3260 = vmatpush.bf16.xpose.msra.mxu2 %v2994_v3  ;;  %4992 = vrsqrt.f32 %v8199_v0  ;;  %v2490_v40 = vsub.f32 1.5, %v8175_v1  ;;  %v8232_v55 = vmax.f32 %v7971_v52, 1e-24  ;;  %3279 = vmatpush.bf16.xpose.msra.mxu3 %v2995_v25  ;;  %v2055_v53 = vsel %vm2054_vm9, %v8102_v11, %v2051_v15  ;;  %v5347_v52 = vld [vmem:[%s5731_s24 + $0x420] sm:$0xff] }
 0x22d   : > { %4782 = vset.pattern.permute.xlu1 %v5590_v41  ;;  %4994 = vrsqrt.f32 %v8201_v63  ;;  %v2178_v16 = vmul.f32 %v8173_v20, %v2177_v4  ;;  %v2188_v1 = vmul.f32 %v8185_v51, %v2187_v26  ;;  %v2788_v2 = vmul.f32 %v5347_v52, %v2045_v60 }
 0x22e   : > { %4057 = vperm.xlu1 %4782, %v8020_v35   ;;  %v2790_v19 = vmul.f32 %v5348_v21, %v2055_v53  ;;  %v2655_v11 = vsel %vm2654_vm12, %v7998_v17, %v8159_v62  ;;  %v2789_v10 = vmul.f32 %v5349_v14, %v2045_v60  ;;  %v2791_v44 = vmul.f32 %v5350_v31, %v2055_v53 }
 0x22f   : > { %3977 = vperm.xlu2 %4778, %v8020_v35   ;;  %v2628_v35 = vmul.f32 %v8150_v50, %v2627_v29  ;;  %v8252_v9 = vpop.eup %4990  ;;  %v2618_v15 = vmul.f32 %v8166_v28, %v2617_v48  ;;  %v2458_v61 = vmul.f32 %v8191_v38, %v2457_v54  ;;  %v2467_v17 = vmul.f32 %v8217_v57, %v8143_v27 }
 0x230   : > { %v2978_v62 = vpack.c.bf16 %v2790_v19, %v2788_v2  ;;  %v2485_v18 = vsel %vm2484_vm13, %v8069_v23, %v2481_v39  ;;  %vm2493_vm14 = vweird.f32 %v8094_v34  ;;  %v8265_v4 = vmax.f32 %v8053_v49, 1e-24  ;;  %v5352_v2 = vld [vmem:[%s5731_s24 + $0x7f8] sm:$0xff] }
 0x231   : > { %v2979_v26 = vpack.c.bf16 %v2791_v44, %v2789_v10  ;;  %v2491_v46 = vmul.f32 %v8094_v34, %v2490_v40  ;;  %4996 = vrsqrt.f32 %v8232_v55  ;;  %v2179_v29 = vmul.f32 0.5, %v2178_v16  ;;  %v1220_v10 = vpop.xlane.xlu1 %1219 }
 0x232   : > { %v8267_v3 = vpop.eup %4992  ;;  %v2189_v25 = vmul.f32 0.5, %v2188_v1  ;;  %3222 = vmatpush.bf16.xpose.msra.mxu0 %v2978_v62  ;;  %v2629_v23 = vmul.f32 0.5, %v2628_v35  ;;  %v2597_v39 = vmul.f32 %v8252_v9, %v8181_v6  ;;  %v8276_v49 = vmax.f32 %v8029_v33, 1e-24  ;;  %v5351_v1 = vld [vmem:[%s5731_s24 + $0x7f0] sm:$0xff] }
 0x233   : > { %v8271_v60 = vpop.eup %4994  ;;  %v2027_v48 = vmul.f32 %v8267_v3, %v8199_v0  ;;  %3241 = vmatpush.bf16.xpose.msra.mxu1 %v2979_v26  ;;  %v2619_v54 = vmul.f32 0.5, %v2618_v15  ;;  %v2459_v40 = vmul.f32 0.5, %v2458_v61  ;;  %v2468_v53 = vmul.f32 %v8217_v57, %v2467_v17 }
 0x234   : > { %v2017_v16 = vmul.f32 %v8271_v60, %v8201_v63  ;;  %v8285_v52 = vmul.f32 %v5351_v1, %v2655_v11  ;;  %v8288_v33 = vmul.f32 %v5352_v2, %v2655_v11  ;;  %vm2492_vm15 = vweird.f32 %v8025_v7  ;;  %v5353_v11 = vld [vmem:[%s5731_s24 + $0x6e0] sm:$0xff]  ;;  %v5356_v1 = vld [vmem:[%s5731_s24 + $0x6f8] sm:$0xff] }
 0x235   : > { %4998 = vrsqrt.f32 %v8265_v4  ;;  %vm2494_vm0 = vmor %vm2492_vm15, %vm2493_vm14  ;;  %v2180_v21 = vsub.f32 1.5, %v2179_v29  ;;  %v2190_v19 = vsub.f32 1.5, %v2189_v25  ;;  %v2028_v35 = vmul.f32 %v8267_v3, %v2027_v48  ;;  %v5354_v48 = vld [vmem:[%s5731_s24 + $0x6e8] sm:$0xff] }
 0x236   : > { %4785 = vset.pattern.permute.xlu1 %v10327_v37  ;;  %v2018_v14 = vmul.f32 %v8271_v60, %v2017_v16  ;;  %v8299_v31 = vmul.f32 %v5353_v11, %v2485_v18  ;;  %v2495_v7 = vsel %vm2494_vm0, %v8094_v34, %v2491_v46  ;;  %v2598_v44 = vmul.f32 %v8252_v9, %v2597_v39 }
 0x237   : > { %4781 = vset.pattern.permute.xlu2 %v5590_v41  ;;  %5000 = vrsqrt.f32 %v8276_v49  ;;  %v8304_v41 = vpop.xlane.xlu0 %1180  ;;  %v8306_v15 = vpop.eup %4996  ;;  %v2630_v61 = vsub.f32 1.5, %v2629_v23  ;;  %v2620_v17 = vsub.f32 1.5, %v2619_v54  ;;  %v2460_v62 = vsub.f32 1.5, %v2459_v40  ;;  %v5355_v40 = vld [vmem:[%s5731_s24 + $0x6f0] sm:$0xff] }
 0x238   : > { %4053 = vperm.xlu2 %4781, %v8045_v30   ;;  %v8308_v26 = vmul.f32 0.5, %v2468_v53  ;;  %v8310_v30 = vpop.xlane.xlu2 %1222  ;;  %vm2182_vm1 = vweird.f32 %v8112_v22  ;;  %vm2183_vm2 = vweird.f32 %v8173_v20  ;;  %v8315_v34 = vmax.f32 %v8116_v45, 1e-24 }
 0x239   : > { %v2019_v46 = vmul.f32 0.5, %v2018_v14  ;;  %v2181_v29 = vmul.f32 %v8173_v20, %v2180_v21  ;;  %v2191_v25 = vmul.f32 %v8185_v51, %v2190_v19  ;;  %vm2193_vm3 = vweird.f32 %v8185_v51  ;;  %vm2184_vm5 = vmor %vm2182_vm1, %vm2183_vm2 }
 0x23a   : > { %v2029_v23 = vmul.f32 0.5, %v2028_v35  ;;  %v8323_v54 = vmul.f32 %v5354_v48, %v2485_v18  ;;  %v8326_v53 = vmul.f32 %v5355_v40, %v2495_v7  ;;  %v2599_v16 = vmul.f32 0.5, %v2598_v44  ;;  %v5359_v40 = vld [vmem:[%s5731_s24 + $0x508] sm:$0xff] }
 0x23b   : > { %v8320_v39 = vpop.eup %4998  ;;  %v2607_v45 = vmul.f32 %v8306_v15, %v8232_v55  ;;  %v8331_v2 = vmul.f32 %v5356_v1, %v2495_v7  ;;  %v8334_v21 = vmul.f32 %v8150_v50, %v2630_v61  ;;  %vm2633_vm4 = vweird.f32 %v8150_v50 }
 0x23c   : > { %vm2192_vm6 = vweird.f32 %v8119_v43  ;;  %v8343_v18 = vmax.f32 %v8164_v8, 1e-24  ;;  %v8348_v35 = vmul.f32 %v8166_v28, %v2620_v17  ;;  %vm2623_vm7 = vweird.f32 %v8166_v28 }
 0x23d   : > { %v8345_v19 = vpop.eup %5000  ;;  %v8352_v14 = vmul.f32 %v8191_v38, %v2460_v62  ;;  %5002 = vrsqrt.f32 %v8315_v34  ;;  %vm2194_vm10 = vmor %vm2192_vm6, %vm2193_vm3  ;;  %v2020_v22 = vsub.f32 1.5, %v2019_v46  ;;  %vm2632_vm11 = vweird.f32 %v8098_v58  ;;  %v5357_v46 = vld [vmem:[%s5731_s24 + $0x500] sm:$0xff] }
 0x23e   : > { %v2470_v43 = vsub.f32 1.5, %v8308_v26  ;;  %v2030_v8 = vsub.f32 1.5, %v2029_v23  ;;  %v2185_v11 = vsel %vm2184_vm5, %v8173_v20, %v2181_v29  ;;  %v2195_v7 = vsel %vm2194_vm10, %v8185_v51, %v2191_v25  ;;  %v1175_v51 = vpop.xlane.xlu1 %1174  ;;  %v5358_v25 = vld [vmem:[%s5731_s24 + $0x510] sm:$0xff] }
 0x23f   : > { %vm2622_vm8 = vweird.f32 %v8105_v42  ;;  %v2600_v44 = vsub.f32 1.5, %v2599_v16  ;;  %v2608_v61 = vmul.f32 %v8306_v15, %v2607_v45  ;;  %v2447_v17 = vmul.f32 %v8320_v39, %v8265_v4  ;;  %v5360_v45 = vld [vmem:[%s5731_s24 + $0x518] sm:$0xff] }
 0x240   : > { %4061 = vperm.xlu2 %4781, %v8092_v24   ;;  %v8367_v62 = vmax.f32 %v8243_v47, 1e-24  ;;  %v2437_v20 = vmul.f32 %v8345_v19, %v8276_v49  ;;  %5004 = vrsqrt.f32 %v8343_v18  ;;  %vm2022_vm9 = vweird.f32 %v8201_v63  ;;  %v1172_v47 = vpop.xlane.xlu0 %1171  ;;  %v8384_v48 = vpop.xlane.xlu2 %1213 }
 0x241   : > { %v8373_v24 = vmax.f32 %v1220_v10, 1e-24  ;;  %vm2463_vm12 = vweird.f32 %v8191_v38  ;;  %v2021_v26 = vmul.f32 %v8271_v60, %v2020_v22  ;;  %vm2023_vm13 = vweird.f32 %v8271_v60 }
 0x242   : > { %v2816_v29 = vmul.f32 %v5357_v46, %v2185_v11  ;;  %v2818_v23 = vmul.f32 %v5358_v25, %v2195_v7  ;;  %vm2472_vm14 = vweird.f32 %v8143_v27  ;;  %vm2473_vm15 = vweird.f32 %v8217_v57  ;;  %vm2024_vm3 = vmor %vm2022_vm9, %vm2023_vm13 }
 0x243   : > { %v2031_v10 = vmul.f32 %v8267_v3, %v2030_v8  ;;  %vm2033_vm0 = vweird.f32 %v8267_v3  ;;  %v2817_v16 = vmul.f32 %v5359_v40, %v2185_v11  ;;  %v2819_v1 = vmul.f32 %v5360_v45, %v2195_v7  ;;  %v8388_v22 = vpop.eup %5002  ;;  %vm8431_vm9 = vmor %vm2632_vm11, %vm2633_vm4 }
 0x244   : > { %vm2462_vm1 = vweird.f32 %v8125_v59  ;;  %5006 = vrsqrt.f32 %v8367_v62  ;;  %v8393_v46 = vmax.f32 %v8304_v41, 1e-24  ;;  %v2992_v25 = vpack.c.bf16 %v2818_v23, %v2816_v29  ;;  %vm2624_vm4 = vmor %vm2622_vm8, %vm2623_vm7 }
 0x245   : > { %v3038_v8 = vpack.c.bf16 %v8285_v52, %v8153_v56  ;;  %v8398_v37 = vmul.f32 %v8217_v57, %v2470_v43  ;;  %vm2032_vm2 = vweird.f32 %v8199_v0  ;;  %v2993_v11 = vpack.c.bf16 %v2819_v1, %v2817_v16  ;;  %vm2464_vm7 = vmor %vm2462_vm1, %vm2463_vm12 }
 0x246   : > { %v3039_v7 = vpack.c.bf16 %v8288_v33, %v8156_v12  ;;  %v8408_v41 = vmul.f32 %v8252_v9, %v2600_v44  ;;  %v8410_v29 = vmul.f32 0.5, %v2608_v61  ;;  %v8413_v56 = vmul.f32 %v8320_v39, %v2447_v17  ;;  %vm2034_vm5 = vmor %vm2032_vm2, %vm2033_vm0  ;;  %3261 = vmatpush.bf16.xpose.msra.mxu2 %v2992_v25  ;;  %v8418_v63 = vpop.eup %5004  ;;  %v5361_v61 = vld [vmem:[%s5731_s24 + $0x400] sm:$0xff]  ;;  %v1166_v1 = vpop.xlane.xlu1 %1165 }
 0x247   : > { %v2025_v0 = vsel %vm2024_vm3, %v8271_v60, %v2021_v26  ;;  %vm2602_vm6 = vweird.f32 %v8181_v6  ;;  %vm2603_vm10 = vweird.f32 %v8252_v9  ;;  %v2438_v12 = vmul.f32 %v8345_v19, %v2437_v20  ;;  %3280 = vmatpush.bf16.xpose.msra.mxu3 %v2993_v11  ;;  %v5365_v11 = vld [vmem:[%s5731_s24 + $0x7c0] sm:$0xff]  ;;  %vm2474_vm8 = vmor %vm2472_vm14, %vm2473_vm15 }
 0x248   : > { %v2577_v52 = vmul.f32 %v8388_v22, %v8315_v34  ;;  %5008 = vrsqrt.f32 %v8373_v24  ;;  %v2035_v60 = vsel %vm2034_vm5, %v8267_v3, %v2031_v10  ;;  %v8437_v43 = vmax.f32 %v8310_v30, 1e-24  ;;  %v5362_v3 = vld [vmem:[%s5731_s24 + $0x410] sm:$0xff]  ;;  %v5363_v30 = vld [vmem:[%s5731_s24 + $0x408] sm:$0xff]  ;;  %vm8519_vm13 = vmor %vm2602_vm6, %vm2603_vm10 }
 0x249   : > { %5010 = vrsqrt.f32 %v8393_v46  ;;  %v8439_v44 = vmax.f32 %v1175_v51, 1e-24  ;;  %v2784_v17 = vmul.f32 %v5361_v61, %v2025_v0  ;;  %v10394_v20 = vmov 0   ;;  %v5364_v51 = vld [vmem:[%s5731_s24 + $0x418] sm:$0xff] }
 0x24a   : > { %4783 = vset.pattern.permute.xlu2 %v10394_v20  ;;  %v8447_v58 = vmax.f32 %v1172_v47, 1e-24  ;;  %v2786_v26 = vmul.f32 %v5362_v3, %v2035_v60  ;;  %v2785_v23 = vmul.f32 %v5363_v30, %v2025_v0  ;;  %v2787_v10 = vmul.f32 %v5364_v51, %v2035_v60  ;;  %v8452_v40 = vpop.eup %5006  ;;  %v5366_v0 = vld [vmem:[%s5731_s24 + $0x7d0] sm:$0xff] }
 0x24b   : > { %vm2612_vm11 = vweird.f32 %v8232_v55  ;;  %v3022_v16 = vpack.c.bf16 %v8326_v53, %v8299_v31  ;;  %v3023_v42 = vpack.c.bf16 %v8331_v2, %v8323_v54  ;;  %v2625_v47 = vsel %vm2624_vm4, %v8166_v28, %v8348_v35  ;;  %v1217_v54 = vpop.xlane.xlu0 %1216  ;;  %v5367_v2 = vld [vmem:[%s5731_s24 + $0x7c8] sm:$0xff]  ;;  %v5368_v28 = vld [vmem:[%s5731_s24 + $0x7d8] sm:$0xff] }
 0x24c   : > { %v2635_v45 = vsel %vm8431_vm9, %v8150_v50, %v8334_v21  ;;  %v2976_v25 = vpack.c.bf16 %v2786_v26, %v2784_v17  ;;  %v2610_v31 = vsub.f32 1.5, %v8410_v29  ;;  %v2578_v53 = vmul.f32 %v8388_v22, %v2577_v52  ;;  %v1169_v52 = vpop.xlane.xlu2 %1168 }
 0x24d   : > { %v2906_v60 = vmul.f32 %v5366_v0, %v2635_v45  ;;  %v2905_v61 = vmul.f32 %v5367_v2, %v2625_v47  ;;  %v2907_v35 = vmul.f32 %v5368_v28, %v2635_v45  ;;  %v2587_v50 = vmul.f32 %v8418_v63, %v8343_v18  ;;  %3262 = vmatmul.bf16.vlgmr.msra.gmra.mxu2 %v7358_v32 }
 0x24e   : > { %3330 = vmatpush.bf16.xpose.msrb.mxu2 %v3038_v8  ;;  %v2977_v8 = vpack.c.bf16 %v2787_v10, %v2785_v23  ;;  %v8471_v20 = vpop.eup %5008  ;;  %v2417_v21 = vmul.f32 %v8452_v40, %v8367_v62  ;;  %5012 = vrsqrt.f32 %v8437_v43  ;;  %v8483_v29 = vmax.f32 %v8384_v48, 1e-24  ;;  %3223 = vmatpush.bf16.xpose.msra.mxu0 %v2976_v25 }
 0x24f   : > { %3349 = vmatpush.bf16.xpose.msrb.mxu3 %v3039_v7  ;;  %v2904_v7 = vmul.f32 %v5365_v11, %v2625_v47  ;;  %v8486_v33 = vpop.eup %5010  ;;  %5014 = vrsqrt.f32 %v8439_v44  ;;  %v3037_v17 = vpack.c.bf16 %v2907_v35, %v2905_v61  ;;  %v2465_v48 = vsel %vm2464_vm7, %v8191_v38, %v8352_v14  ;;  %v5371_v47 = vld [vmem:[%s5731_s24 + $0x6c8] sm:$0xff]  ;;  %v5372_v11 = vld [vmem:[%s5731_s24 + $0x6d8] sm:$0xff]  ;;  %v1211_v61 = vpop.xlane.xlu1 %1210 }
 0x250   : > { %3281 = vmatmul.bf16.vlgmr.msra.gmra.mxu3 %v10379_v13  ;;  %3242 = vmatpush.bf16.xpose.msra.mxu1 %v2977_v8  ;;  %v8497_v3 = vmul.f32 0.5, %v8413_v56  ;;  %v8499_v26 = vmul.f32 0.5, %v2438_v12  ;;  %5016 = vrsqrt.f32 %v8447_v58  ;;  %v2475_v27 = vsel %vm2474_vm8, %v8217_v57, %v8398_v37  ;;  %v5369_v37 = vld [vmem:[%s5731_s24 + $0x6c0] sm:$0xff] }
 0x251   : > { %v3036_v59 = vpack.c.bf16 %v2906_v60, %v2904_v7  ;;  %v2611_v30 = vmul.f32 %v8306_v15, %v2610_v31  ;;  %vm2613_vm12 = vweird.f32 %v8306_v15  ;;  %v8506_v38 = vmul.f32 0.5, %v2578_v53 }
 0x252   : > { %v2557_v14 = vmul.f32 %v8471_v20, %v8373_v24  ;;  %v2588_v56 = vmul.f32 %v8418_v63, %v2587_v50  ;;  %5018 = vrsqrt.f32 %v8483_v29  ;;  %v8512_v12 = vmax.f32 %v1166_v1, 1e-24  ;;  %vm2614_vm15 = vmor %vm2612_vm11, %vm2613_vm12 }
 0x253   : > { %v2872_v57 = vmul.f32 %v5369_v37, %v2465_v48  ;;  %vm2443_vm14 = vweird.f32 %v8345_v19  ;;  %v2418_v51 = vmul.f32 %v8452_v40, %v2417_v21  ;;  %v2427_v10 = vmul.f32 %v8486_v33, %v8393_v46  ;;  %v1208_v21 = vpop.xlane.xlu0 %1207 }
 0x254   : > { %v2873_v45 = vmul.f32 %v5371_v47, %v2465_v48  ;;  %v8529_v1 = vpop.eup %5012  ;;  %v2450_v6 = vsub.f32 1.5, %v8497_v3  ;;  %vm2453_vm0 = vweird.f32 %v8320_v39  ;;  %v2440_v25 = vsub.f32 1.5, %v8499_v26  ;;  %v5373_v48 = vld [vmem:[%s5731_s24 + $0x7a0] sm:$0xff]  ;;  %v5374_v26 = vld [vmem:[%s5731_s24 + $0x7b0] sm:$0xff] }
 0x255   : > { %v8538_v8 = vmax.f32 %v1217_v54, 1e-24  ;;  %v2875_v7 = vmul.f32 %v5372_v11, %v2475_v27  ;;  %v8541_v0 = vpop.eup %5014  ;;  %vm2442_vm1 = vweird.f32 %v8276_v49  ;;  %v2558_v60 = vmul.f32 %v8471_v20, %v2557_v14  ;;  %3224 = vmatmul.bf16.vlgmr.msra.gmra.mxu0 %v7358_v32 }
 0x256   : > { %3292 = vmatpush.bf16.xpose.msrb.mxu0 %v3022_v16  ;;  %3331 = vmatpush.bf16.xpose.msrb.mxu2 %v3036_v59  ;;  %v5370_v16 = vld [vmem:[%s5731_s24 + $0x6d0] sm:$0xff]  ;;  %v8545_v31 = vmax.f32 %v1169_v52, 1e-24  ;;  %v2605_v55 = vsel %vm8519_vm13, %v8252_v9, %v8408_v41  ;;  %v2615_v53 = vsel %vm2614_vm15, %v8306_v15, %v2611_v30  ;;  %v8553_v54 = vpop.eup %5016  ;;  %vm2452_vm2 = vweird.f32 %v8265_v4  ;;  %vm2444_vm10 = vmor %vm2442_vm1, %vm2443_vm14 }
 0x257   : > { %3350 = vmatpush.bf16.xpose.msrb.mxu3 %v3037_v17  ;;  %v2580_v2 = vsub.f32 1.5, %v8506_v38  ;;  %5020 = vrsqrt.f32 %v8512_v12  ;;  %3243 = vmatmul.bf16.vlgmr.msra.gmra.mxu1 %v10379_v13  ;;  %v3021_v35 = vpack.c.bf16 %v2875_v7, %v2873_v45  ;;  %vm2583_vm3 = vweird.f32 %v8388_v22  ;;  %v1160_v17 = vpop.xlane.xlu2 %1159  ;;  %vm2454_vm4 = vmor %vm2452_vm2, %vm2453_vm0 }
 0x258   : > { %3311 = vmatpush.bf16.xpose.msrb.mxu1 %v3023_v42  ;;  %v2874_v42 = vmul.f32 %v5370_v16, %v2475_v27  ;;  %v2589_v9 = vmul.f32 0.5, %v2588_v56  ;;  %v2419_v41 = vmul.f32 0.5, %v2418_v51  ;;  %v2428_v15 = vmul.f32 %v8486_v33, %v2427_v10  ;;  %v8563_v52 = vpop.eup %5018  ;;  %v5376_v51 = vld [vmem:[%s5731_s24 + $0x7b8] sm:$0xff] }
 0x259   : > { %v2567_v50 = vmul.f32 %v8529_v1, %v8437_v43  ;;  %vm2592_vm5 = vweird.f32 %v8343_v18  ;;  %v2407_v59 = vmul.f32 %v8541_v0, %v8439_v44  ;;  %5022 = vrsqrt.f32 %v8538_v8 }
 0x25a   : > { %v3020_v28 = vpack.c.bf16 %v2874_v42, %v2872_v57  ;;  %v2900_v3 = vmul.f32 %v5373_v48, %v2605_v55  ;;  %v2902_v27 = vmul.f32 %v5374_v26, %v2615_v53  ;;  %vm2582_vm6 = vweird.f32 %v8315_v34  ;;  %v5375_v57 = vld [vmem:[%s5731_s24 + $0x7a8] sm:$0xff]  ;;  %v3073_v26 = vpop.f32.mrf.mxu0  ;;  %v5382_v48 = vld [vmem:[%s5731_s24 + $0x790] sm:$0xff] }
 0x25b   : > { %v2559_v30 = vmul.f32 0.5, %v2558_v60  ;;  %v2397_v38 = vmul.f32 %v8553_v54, %v8447_v58  ;;  %5024 = vrsqrt.f32 %v8545_v31  ;;  %v8575_v14 = vmax.f32 %v1211_v61, 1e-24  ;;  %vm8636_vm11 = vmor %vm2582_vm6, %vm2583_vm3 }
 0x25c   : > { %v8577_v56 = vmax.f32 %v1208_v21, 1e-24  ;;  %v3034_v37 = vpack.c.bf16 %v2902_v27, %v2900_v3  ;;  %v2901_v23 = vmul.f32 %v5375_v57, %v2605_v55  ;;  %v2903_v10 = vmul.f32 %v5376_v51, %v2615_v53  ;;  %v5378_v57 = vld [vmem:[%s5731_s24 + $0x6b0] sm:$0xff]  ;;  %v5379_v51 = vld [vmem:[%s5731_s24 + $0x6a8] sm:$0xff] }
 0x25d   : > { %v2451_v16 = vmul.f32 %v8320_v39, %v2450_v6  ;;  %v2441_v42 = vmul.f32 %v8345_v19, %v2440_v25  ;;  %v2537_v47 = vmul.f32 %v8563_v52, %v8483_v29  ;;  %v8585_v45 = vmax.f32 %v1160_v17, 1e-24  ;;  %v8587_v11 = vpop.eup %5020  ;;  %3267 = vmatmul.bf16.gmra.mxu2 %v10386_v5 }
 0x25e   : > { %3293 = vmatpush.bf16.xpose.msrb.mxu0 %v3020_v28  ;;  %v2590_v7 = vsub.f32 1.5, %v2589_v9  ;;  %v2420_v60 = vsub.f32 1.5, %v2419_v41  ;;  %v2568_v61 = vmul.f32 %v8529_v1, %v2567_v50  ;;  %3332 = vmatpush.bf16.xpose.msrb.mxu2 %v3034_v37  ;;  %v3035_v28 = vpack.c.bf16 %v2903_v10, %v2901_v23 }
 0x25f   : > { %v2560_v55 = vsub.f32 1.5, %v2559_v30  ;;  %v2408_v6 = vmul.f32 %v8541_v0, %v2407_v59  ;;  %5026 = vrsqrt.f32 %v8575_v14  ;;  %v8594_v25 = vpop.eup %5022  ;;  %v2581_v53 = vmul.f32 %v8388_v22, %v2580_v2  ;;  %v1202_v30 = vpop.xlane.xlu1 %1201 }
 0x260   : > { %3312 = vmatpush.bf16.xpose.msrb.mxu1 %v3021_v35  ;;  %v8590_v35 = vmul.f32 0.5, %v2428_v15  ;;  %vm2593_vm9 = vweird.f32 %v8418_v63  ;;  %v2398_v9 = vmul.f32 %v8553_v54, %v2397_v38  ;;  %5028 = vrsqrt.f32 %v8577_v56  ;;  %3351 = vmatpush.bf16.xpose.msrb.mxu3 %v3035_v28  ;;  %v5377_v38 = vld [vmem:[%s5731_s24 + $0x6a0] sm:$0xff] }
 0x261   : > { %v8605_v41 = vpop.eup %5024  ;;  %v2538_v49 = vmul.f32 %v8563_v52, %v2537_v47  ;;  %v2377_v2 = vmul.f32 %v8587_v11, %v8512_v12  ;;  %5030 = vrsqrt.f32 %v8585_v45  ;;  %3286 = vmatmul.bf16.gmra.mxu3 %v10387_v36  ;;  %v2445_v15 = vsel %vm2444_vm10, %v8345_v19, %v2441_v42  ;;  %vm2594_vm12 = vmor %vm2592_vm5, %vm2593_vm9 }
 0x262   : > { %v2591_v50 = vmul.f32 %v8418_v63, %v2590_v7  ;;  %v8619_v21 = vmul.f32 %v8452_v40, %v2420_v60  ;;  %v8621_v4 = vmul.f32 0.5, %v2568_v61  ;;  %v2455_v59 = vsel %vm2454_vm4, %v8320_v39, %v2451_v16  ;;  %v3092_v39 = vpop.f32.mrf.mxu1  ;;  %v5380_v16 = vld [vmem:[%s5731_s24 + $0x6b8] sm:$0xff] }
 0x263   : > { %v8625_v17 = vmul.f32 %v8471_v20, %v2560_v55  ;;  %v8628_v3 = vmul.f32 0.5, %v2408_v6  ;;  %v2547_v19 = vmul.f32 %v8594_v25, %v8538_v8  ;;  %vm2422_vm7 = vweird.f32 %v8367_v62  ;;  %v1163_v55 = vpop.xlane.xlu0 %1162 }
 0x264   : > { %vm2423_vm8 = vweird.f32 %v8452_v40  ;;  %v2868_v37 = vmul.f32 %v5377_v38, %v2445_v15  ;;  %v2870_v23 = vmul.f32 %v5378_v57, %v2455_v59  ;;  %v2869_v10 = vmul.f32 %v5379_v51, %v2445_v15  ;;  %v3111_v38 = vpop.f32.mrf.mxu2  ;;  %v3130_v57 = vpop.f32.mrf.mxu3  ;;  %v5381_v51 = vld [vmem:[%s5731_s24 + $0x780] sm:$0xff] }
 0x265   : > { %v2871_v42 = vmul.f32 %v5380_v16, %v2455_v59  ;;  %v8646_v47 = vpop.eup %5026  ;;  %vm2432_vm13 = vweird.f32 %v8393_v46  ;;  %vm2433_vm14 = vweird.f32 %v8486_v33  ;;  %v8654_v34 = vmul.f32 0.5, %v2398_v9  ;;  %3229 = vmatmul.bf16.gmra.mxu0 %v10386_v5  ;;  %vm2424_vm9 = vmor %vm2422_vm7, %vm2423_vm8 }
 0x266   : > { %v8656_v7 = vmul.f32 0.5, %v2538_v49  ;;  %v2378_v60 = vmul.f32 %v8587_v11, %v2377_v2  ;;  %v2387_v61 = vmul.f32 %v8605_v41, %v8545_v31  ;;  %v8661_v28 = vpop.eup %5028  ;;  %v3018_v18 = vpack.c.bf16 %v2870_v23, %v2868_v37  ;;  %vm2434_vm4 = vmor %vm2432_vm13, %vm2433_vm14 }
 0x267   : > { %v3019_v6 = vpack.c.bf16 %v2871_v42, %v2869_v10  ;;  %v2585_v15 = vsel %vm8636_vm11, %v8388_v22, %v2581_v53  ;;  %v2595_v9 = vsel %vm2594_vm12, %v8418_v63, %v2591_v50  ;;  %v8667_v59 = vpop.eup %5030  ;;  %v2548_v49 = vmul.f32 %v8594_v25, %v2547_v19  ;;  %v5383_v53 = vld [vmem:[%s5731_s24 + $0x788] sm:$0xff]  ;;  %v5384_v19 = vld [vmem:[%s5731_s24 + $0x798] sm:$0xff]  ;;  %3248 = vmatmul.bf16.gmra.mxu1 %v10387_v36 }
 0x268   : > { %v3093_v2 = vadd.f32 %v3092_v39, %v3073_v26  ;;  %v2896_v16 = vmul.f32 %v5381_v51, %v2585_v15  ;;  %v2898_v37 = vmul.f32 %v5382_v48, %v2595_v9  ;;  %vm2562_vm15 = vweird.f32 %v8373_v24  ;;  %3294 = vmatpush.bf16.xpose.msrb.mxu0 %v3018_v18  ;;  %v1205_v18 = vpop.xlane.xlu2 %1204  ;;  %v8710_v51 = vpop.f32.mrf.mxu0 }
 0x269   : > { %vm2563_vm0 = vweird.f32 %v8471_v20  ;;  %v3131_v22 = vadd.f32 %v3130_v57, %v3111_v38  ;;  %v8675_v63 = vmax.f32 %v1202_v30, 1e-24  ;;  %3313 = vmatpush.bf16.xpose.msrb.mxu1 %v3019_v6  ;;  %v2897_v50 = vmul.f32 %v5383_v53, %v2585_v15 }
 0x26a   : > { %v2899_v26 = vmul.f32 %v5384_v19, %v2595_v9  ;;  %vm2572_vm1 = vweird.f32 %v8437_v43  ;;  %vm2573_vm2 = vweird.f32 %v8529_v1  ;;  %v2379_v48 = vmul.f32 0.5, %v2378_v60  ;;  %vm8774_vm8 = vmor %vm2562_vm15, %vm2563_vm0 }
 0x26b   : > { %v2388_v27 = vmul.f32 %v8605_v41, %v2387_v61  ;;  %v8682_v39 = vmax.f32 %v1163_v55, 1e-24  ;;  %v3032_v23 = vpack.c.bf16 %v2898_v37, %v2896_v16  ;;  %v2527_v30 = vmul.f32 %v8646_v47, %v8575_v14  ;;  %v8719_v37 = vpop.f32.mrf.mxu1  ;;  %vm2574_vm14 = vmor %vm2572_vm1, %vm2573_vm2 }
 0x26c   : > { %v2517_v10 = vmul.f32 %v8661_v28, %v8577_v56  ;;  %v2357_v42 = vmul.f32 %v8667_v59, %v8585_v45  ;;  %v3033_v6 = vpack.c.bf16 %v2899_v26, %v2897_v50  ;;  %v2570_v60 = vsub.f32 1.5, %v8621_v4 }
 0x26d   : > { %v2410_v61 = vsub.f32 1.5, %v8628_v3  ;;  %v2400_v55 = vsub.f32 1.5, %v8654_v34  ;;  %v8694_v15 = vclamps-f32 %v3093_v2, 1.0  ;;  %3333 = vmatpush.bf16.xpose.msrb.mxu2 %v3032_v23  ;;  %vm2402_vm3 = vweird.f32 %v8447_v58  ;;  %v1154_v23 = vpop.xlane.xlu0 %1153 }
 0x26e   : > { %vm2403_vm5 = vweird.f32 %v8553_v54  ;;  %v2540_v9 = vsub.f32 1.5, %v8656_v7  ;;  %v8699_v38 = vmul.f32 0.5, %v2548_v49  ;;  %v8701_v57 = vclamps-f32 %v3131_v22, 1.0  ;;  %3352 = vmatpush.bf16.xpose.msrb.mxu3 %v3033_v6  ;;  %v1157_v22 = vpop.xlane.xlu1 %1156  ;;  %v5388_v6 = vld [vmem:[%s5731_s24 + $0x698] sm:$0xff] }
 0x26f   : > { %5032 = vrsqrt.f32 %v8675_v63  ;;  %v10400_v4 = vsub.f32 1.5, %v8590_v35  ;;  %v2380_v34 = vsub.f32 1.5, %v2379_v48  ;;  %v8708_v2 = vmax.f32 %v1205_v18, 1e-24  ;;  %vm8816_vm1 = vmor %vm2402_vm3, %vm2403_vm5 }
 0x270   : > { %10399 = vst [vmem:[#allocation13_spill] sm:$0xff] %v8701_v57  ;;  %5034 = vrsqrt.f32 %v8682_v39  ;;  %vm2412_vm6 = vweird.f32 %v8439_v44  ;;  %vm2413_vm10 = vweird.f32 %v8541_v0  ;;  %v8714_v7 = vmul.f32 0.5, %v2388_v27 }
 0x271   : > { %v2431_v3 = vmul.f32 %v8486_v33, %v10400_v4  ;;  %v2528_v49 = vmul.f32 %v8646_v47, %v2527_v30  ;;  %v2518_v16 = vmul.f32 %v8661_v28, %v2517_v10  ;;  %v2358_v35 = vmul.f32 %v8667_v59, %v2357_v42  ;;  %v8783_v4 = vpop.f32.mrf.mxu3  ;;  %vm2414_vm5 = vmor %vm2412_vm6, %vm2413_vm10 }
 0x272   : > { %v2571_v53 = vmul.f32 %v8529_v1, %v2570_v60  ;;  %v8727_v50 = vmul.f32 %v8541_v0, %v2410_v61  ;;  %v8730_v19 = vmul.f32 %v8553_v54, %v2400_v55  ;;  %v8734_v26 = vmul.f32 %v8694_v15, %v8694_v15 }
 0x273   : > { %v8741_v62 = vmul.f32 %v8563_v52, %v2540_v9  ;;  %v8746_v27 = vmul.f32 %v8701_v57, %v8701_v57  ;;  %v2425_v30 = vsel %vm2424_vm9, %v8452_v40, %v8619_v21  ;;  %v8751_v10 = vmul.f32 %v8587_v11, %v2380_v34  ;;  %v8781_v9 = vpop.f32.mrf.mxu2  ;;  %v5385_v34 = vld [vmem:[%s5731_s24 + $0x680] sm:$0xff] }
 0x274   : > { %5036 = vrsqrt.f32 %v8708_v2  ;;  %v8754_v46 = vmax.f32 %v1157_v22, 1e-24  ;;  %v2435_v42 = vsel %vm2434_vm4, %v8486_v33, %v2431_v3  ;;  %vm2542_vm11 = vweird.f32 %v8483_v29  ;;  %v5387_v22 = vld [vmem:[%s5731_s24 + $0x688] sm:$0xff]  ;;  %v5389_v57 = vld [vmem:[%s5731_s24 + $0x760] sm:$0xff] }
 0x275   : > { %v8757_v18 = vpop.eup %5032  ;;  %vm2543_vm7 = vweird.f32 %v8563_v52  ;;  %v8762_v40 = vmul.f32 0.5, %v2528_v49  ;;  %v8764_v21 = vmul.f32 0.5, %v2518_v16  ;;  %v8766_v60 = vmul.f32 0.5, %v2358_v35  ;;  %v5386_v49 = vld [vmem:[%s5731_s24 + $0x690] sm:$0xff] }
 0x276   : > { %v8768_v61 = vpop.eup %5034  ;;  %vm2552_vm12 = vweird.f32 %v8538_v8  ;;  %vm2553_vm13 = vweird.f32 %v8594_v25  ;;  %v3468_v55 = vsub.f32 1.0, %v8734_v26  ;;  %v8785_v3 = vmax.f32 %v1154_v23, 1e-24  ;;  %vm8882_vm10 = vmor %vm2542_vm11, %vm2543_vm7 }
 0x277   : > { %v2864_v24 = vmul.f32 %v5385_v34, %v2425_v30  ;;  %v2866_v16 = vmul.f32 %v5386_v49, %v2435_v42  ;;  %v3469_v35 = vsub.f32 1.0, %v8746_v27  ;;  %v2865_v26 = vmul.f32 %v5387_v22, %v2425_v30  ;;  %v8833_v22 = vpop.f32.mrf.mxu0  ;;  %vm2554_vm11 = vmor %vm2552_vm12, %vm2553_vm13 }
 0x278   : > { %v2867_v48 = vmul.f32 %v5388_v6, %v2435_v42  ;;  %v2565_v23 = vsel %vm8774_vm8, %v8471_v20, %v8625_v17  ;;  %5038 = vrsqrt.f32 %v8754_v46  ;;  %v2575_v49 = vsel %vm2574_vm14, %v8529_v1, %v2571_v53 }
 0x279   : > { %v3016_v34 = vpack.c.bf16 %v2866_v16, %v2864_v24  ;;  %v2892_v43 = vmul.f32 %v5389_v57, %v2565_v23  ;;  %vm2382_vm15 = vweird.f32 %v8512_v12  ;;  %vm2383_vm0 = vweird.f32 %v8587_v11  ;;  %v5390_v57 = vld [vmem:[%s5731_s24 + $0x770] sm:$0xff] }
 0x27a   : > { %v2530_v27 = vsub.f32 1.5, %v8762_v40  ;;  %v2497_v30 = vmul.f32 %v8757_v18, %v8675_v63  ;;  %v2367_v20 = vmul.f32 %v8768_v61, %v8682_v39  ;;  %v3017_v17 = vpack.c.bf16 %v2867_v48, %v2865_v26  ;;  %v8810_v42 = vpop.eup %5036  ;;  %v5391_v48 = vld [vmem:[%s5731_s24 + $0x768] sm:$0xff]  ;;  %v5392_v40 = vld [vmem:[%s5731_s24 + $0x778] sm:$0xff]  ;;  %v8835_v26 = vpop.f32.mrf.mxu1 }
 0x27b   : > { %vm2392_vm2 = vweird.f32 %v8545_v31  ;;  %vm2393_vm9 = vweird.f32 %v8605_v41  ;;  %5040 = vrsqrt.f32 %v8785_v3  ;;  %3295 = vmatpush.bf16.xpose.msrb.mxu0 %v3016_v34  ;;  %v2894_v53 = vmul.f32 %v5390_v57, %v2575_v49  ;;  %v8890_v57 = vpop.f32.mrf.mxu2 }
 0x27c   : > { %v2893_v6 = vmul.f32 %v5391_v48, %v2565_v23  ;;  %v2895_v33 = vmul.f32 %v5392_v40, %v2575_v49  ;;  %vm2532_vm4 = vweird.f32 %v8575_v14  ;;  %vm2533_vm3 = vweird.f32 %v8646_v47  ;;  %3314 = vmatpush.bf16.xpose.msrb.mxu1 %v3017_v17  ;;  %v5394_v48 = vld [vmem:[%s5731_s24 + $0x670] sm:$0xff]  ;;  %v5395_v40 = vld [vmem:[%s5731_s24 + $0x668] sm:$0xff] }
 0x27d   : > { %v2520_v58 = vsub.f32 1.5, %v8764_v21  ;;  %v8829_v24 = vmax.f32 %v3468_v55, 0.0  ;;  %v3095_v16 = vadd.f32 %v8719_v37, %v8710_v51  ;;  %v2405_v23 = vsel %vm8816_vm1, %v8553_v54, %v8730_v19  ;;  %vm8929_vm1 = vmor %vm2382_vm15, %vm2383_vm0 }
 0x27e   : > { %vm2522_vm8 = vweird.f32 %v8577_v56  ;;  %v2360_v51 = vsub.f32 1.5, %v8766_v60  ;;  %v8847_v37 = vmax.f32 %v3469_v35, 0.0  ;;  %v3030_v21 = vpack.c.bf16 %v2894_v53, %v2892_v43  ;;  %v8857_v17 = vpop.eup %5038  ;;  %v5393_v43 = vld [vmem:[%s5731_s24 + $0x660] sm:$0xff]  ;;  %v8892_v53 = vpop.f32.mrf.mxu3 }
 0x27f   : > { %v3031_v55 = vpack.c.bf16 %v2895_v33, %v2893_v6  ;;  %v10405_v34 = vsub.f32 1.5, %v8699_v38  ;;  %v2368_v54 = vmul.f32 %v8768_v61, %v2367_v20  ;;  %v2507_v19 = vmul.f32 %v8810_v42, %v8708_v2 }
 0x280   : > { %v2415_v44 = vsel %vm2414_vm5, %v8541_v0, %v8727_v50  ;;  %v10406_v60 = vsub.f32 1.5, %v8714_v7  ;;  %vm2523_vm6 = vweird.f32 %v8661_v28  ;;  %v2498_v38 = vmul.f32 %v8757_v18, %v2497_v30  ;;  %3334 = vmatpush.bf16.xpose.msrb.mxu2 %v3030_v21  ;;  %vm2394_vm5 = vmor %vm2392_vm2, %vm2393_vm9 }
 0x281   : > { %v2551_v49 = vmul.f32 %v8594_v25, %v10405_v34  ;;  %3353 = vmatpush.bf16.xpose.msrb.mxu3 %v3031_v55  ;;  %v2860_v20 = vmul.f32 %v5393_v43, %v2405_v23  ;;  %v8868_v1 = vmul.f32 %v8646_v47, %v2530_v27  ;;  %v8871_v0 = vmul.f32 %v8661_v28, %v2520_v58  ;;  %v8876_v50 = vpop.eup %5040  ;;  %v5399_v43 = vld [vmem:[%s5731_s24 + $0x748] sm:$0xff]  ;;  %vm8961_vm2 = vmor %vm2532_vm4, %vm2533_vm3 }
 0x282   : > { %v8862_v35 = vmul.f32 %v8605_v41, %v10406_v60  ;;  %5042 = vrsqrt.f32 %v8829_v24  ;;  %v8874_v7 = vclamps-f32 %v3095_v16, 1.0  ;;  %v8887_v27 = vmul.f32 %v8667_v59, %v2360_v51  ;;  %v5396_v51 = vld [vmem:[%s5731_s24 + $0x678] sm:$0xff] }
 0x283   : > { %5044 = vrsqrt.f32 %v8847_v37  ;;  %v2862_v6 = vmul.f32 %v5394_v48, %v2415_v44  ;;  %v2861_v33 = vmul.f32 %v5395_v40, %v2405_v23  ;;  %v8900_v29 = vmul.f32 0.5, %v2368_v54  ;;  %v8947_v40 = vpop.f32.mrf.mxu0 }
 0x284   : > { %v2508_v58 = vmul.f32 %v8810_v42, %v2507_v19  ;;  %v2347_v16 = vmul.f32 %v8857_v17, %v8754_v46  ;;  %v2863_v21 = vmul.f32 %v5396_v51, %v2415_v44  ;;  %vm2362_vm7 = vweird.f32 %v8585_v45 }
 0x285   : > { %vm2363_vm14 = vweird.f32 %v8667_v59  ;;  %v8908_v23 = vmul.f32 0.5, %v2498_v38  ;;  %v3014_v8 = vpack.c.bf16 %v2862_v6, %v2860_v20  ;;  %v2545_v55 = vsel %vm8882_vm10, %v8563_v52, %v8741_v62  ;;  %vm2524_vm10 = vmor %vm2522_vm8, %vm2523_vm6 }
 0x286   : > { %v2555_v34 = vsel %vm2554_vm11, %v8594_v25, %v2551_v49  ;;  %vm2372_vm12 = vweird.f32 %v8682_v39  ;;  %vm2373_vm13 = vweird.f32 %v8768_v61  ;;  %v8919_v54 = vmul.f32 %v8874_v7, %v8874_v7  ;;  %v5397_v25 = vld [vmem:[%s5731_s24 + $0x740] sm:$0xff]  ;;  %v5398_v49 = vld [vmem:[%s5731_s24 + $0x750] sm:$0xff]  ;;  %vm2364_vm3 = vmor %vm2362_vm7, %vm2363_vm14 }
 0x287   : > { %v3133_v19 = vadd.f32 %v8783_v4, %v8781_v9  ;;  %v2337_v44 = vmul.f32 %v8876_v50, %v8785_v3  ;;  %v3015_v60 = vpack.c.bf16 %v2863_v21, %v2861_v33  ;;  %3296 = vmatpush.bf16.xpose.msrb.mxu0 %v3014_v8  ;;  %v2888_v62 = vmul.f32 %v5397_v25, %v2545_v55  ;;  %v5400_v9 = vld [vmem:[%s5731_s24 + $0x758] sm:$0xff]  ;;  %v8949_v33 = vpop.f32.mrf.mxu1  ;;  %v5401_v8 = vld [vmem:[%s5731_s24 + $0x640] sm:$0xff]  ;;  %vm2374_vm11 = vmor %vm2372_vm12, %vm2373_vm13 }
 0x288   : > { %v2890_v38 = vmul.f32 %v5398_v49, %v2555_v34  ;;  %v2889_v20 = vmul.f32 %v5399_v43, %v2545_v55  ;;  %v2891_v4 = vmul.f32 %v5400_v9, %v2555_v34  ;;  %v8937_v30 = vpop.eup %5042  ;;  %vm2502_vm15 = vweird.f32 %v8675_v63  ;;  %v5402_v55 = vld [vmem:[%s5731_s24 + $0x650] sm:$0xff]  ;;  %v5405_v43 = vld [vmem:[%s5731_s24 + $0x720] sm:$0xff] }
 0x289   : > { %vm2503_vm0 = vweird.f32 %v8757_v18  ;;  %v2370_v12 = vsub.f32 1.5, %v8900_v29  ;;  %v2509_v48 = vmul.f32 0.5, %v2508_v58  ;;  %v2348_v6 = vmul.f32 %v8857_v17, %v2347_v16  ;;  %3315 = vmatpush.bf16.xpose.msrb.mxu1 %v3015_v60  ;;  %v8955_v51 = vpop.eup %5044  ;;  %v5403_v60 = vld [vmem:[%s5731_s24 + $0x648] sm:$0xff]  ;;  %v5406_v9 = vld [vmem:[%s5731_s24 + $0x730] sm:$0xff]  ;;  %v5409_v63 = vld [vmem:[%s5731_s24 + $0x620] sm:$0xff] }
 0x28a   : > { %v2385_v31 = vsel %vm8929_vm1, %v8587_v11, %v8751_v10  ;;  %vm2512_vm9 = vweird.f32 %v8708_v2  ;;  %v3028_v58 = vpack.c.bf16 %v2890_v38, %v2888_v62  ;;  %v3029_v16 = vpack.c.bf16 %v2891_v4, %v2889_v20  ;;  %v3137_v38 = vpop.f32.mrf.mxu3  ;;  %vm9024_vm12 = vmor %vm2502_vm15, %vm2503_vm0 }
 0x28b   : > { %v2395_v21 = vsel %vm2394_vm5, %v8605_v41, %v8862_v35  ;;  %v2856_v11 = vmul.f32 %v5401_v8, %v2385_v31  ;;  %v2338_v14 = vmul.f32 %v8876_v50, %v2337_v44  ;;  %v3098_v10 = vadd.f32 %v8835_v26, %v8833_v22  ;;  %v5404_v35 = vld [vmem:[%s5731_s24 + $0x658] sm:$0xff] }
 0x28c   : > { %v2858_v34 = vmul.f32 %v5402_v55, %v2395_v21  ;;  %v2857_v52 = vmul.f32 %v5403_v60, %v2385_v31  ;;  %v2500_v41 = vsub.f32 1.5, %v8908_v23  ;;  %3335 = vmatpush.bf16.xpose.msrb.mxu2 %v3028_v58  ;;  %3354 = vmatpush.bf16.xpose.msrb.mxu3 %v3029_v16  ;;  %v2859_v56 = vmul.f32 %v5404_v35, %v2395_v21  ;;  %v3118_v23 = vpop.f32.mrf.mxu2  ;;  %v5407_v31 = vld [vmem:[%s5731_s24 + $0x728] sm:$0xff]  ;;  %v5408_v16 = vld [vmem:[%s5731_s24 + $0x738] sm:$0xff] }
 0x28d   : > { %v2525_v44 = vsel %vm2524_vm10, %v8661_v28, %v8871_v0  ;;  %v2535_v22 = vsel %vm8961_vm2, %v8646_v47, %v8868_v1  ;;  %v2510_v26 = vsub.f32 1.5, %v2509_v48  ;;  %v8986_v25 = vclamps-f32 %v3133_v19, 1.0  ;;  %v5411_v35 = vld [vmem:[%s5731_s24 + $0x628] sm:$0xff] }
 0x28e   : > { %v2349_v62 = vmul.f32 0.5, %v2348_v6  ;;  %v3012_v49 = vpack.c.bf16 %v2858_v34, %v2856_v11  ;;  %v2884_v20 = vmul.f32 %v5405_v43, %v2525_v44  ;;  %v2886_v4 = vmul.f32 %v5406_v9, %v2535_v22 }
 0x28f   : > { %v2885_v58 = vmul.f32 %v5407_v31, %v2525_v44  ;;  %v2887_v28 = vmul.f32 %v5408_v16, %v2535_v22  ;;  %v2371_v0 = vmul.f32 %v8768_v61, %v2370_v12  ;;  %vm2513_vm4 = vweird.f32 %v8810_v42  ;;  %v5412_v44 = vld [vmem:[%s5731_s24 + $0x638] sm:$0xff]  ;;  %v5414_v31 = vld [vmem:[%s5731_s24 + $0x710] sm:$0xff]  ;;  %v5415_v16 = vld [vmem:[%s5731_s24 + $0x708] sm:$0xff] }
 0x290   : > { %v2339_v47 = vmul.f32 0.5, %v2338_v14  ;;  %v3013_v1 = vpack.c.bf16 %v2859_v56, %v2857_v52  ;;  %v2501_v19 = vmul.f32 %v8757_v18, %v2500_v41  ;;  %v3476_v48 = vsub.f32 1.0, %v8919_v54  ;;  %3297 = vmatpush.bf16.xpose.msrb.mxu0 %v3012_v49  ;;  %v3149_v14 = vpop.f32.mrf.mxu0  ;;  %vm2514_vm13 = vmor %vm2512_vm9, %vm2513_vm4  ;;  %v5410_v52 = vld [vmem:[%s5731_s24 + $0x630] sm:$0xff] }
 0x291   : > { %v8996_v6 = vclamps-f32 %v3098_v10, 1.0  ;;  %v3136_v29 = vadd.f32 %v8892_v53, %v8890_v57  ;;  %v2511_v12 = vmul.f32 %v8810_v42, %v2510_v26  ;;  %v9007_v21 = vmul.f32 %v8986_v25, %v8986_v25  ;;  %v3168_v10 = vpop.f32.mrf.mxu1 }
 0x292   : > { %vm2352_vm8 = vweird.f32 %v8754_v46  ;;  %vm2342_vm6 = vweird.f32 %v8785_v3  ;;  %3316 = vmatpush.bf16.xpose.msrb.mxu1 %v3013_v1  ;;  %v2350_v57 = vsub.f32 1.5, %v2349_v62  ;;  %v3026_v53 = vpack.c.bf16 %v2886_v4, %v2884_v20  ;;  %v3206_v4 = vpop.f32.mrf.mxu3 }
 0x293   : > { %v3027_v45 = vpack.c.bf16 %v2887_v28, %v2885_v58  ;;  %v2365_v8 = vsel %vm2364_vm3, %v8667_v59, %v8887_v27  ;;  %vm2353_vm7 = vweird.f32 %v8857_v17  ;;  %v2340_v11 = vsub.f32 1.5, %v2339_v47 }
 0x294   : > { %vm2343_vm14 = vweird.f32 %v8876_v50  ;;  %v2375_v39 = vsel %vm2374_vm11, %v8768_v61, %v2371_v0  ;;  %v9030_v59 = vmul.f32 %v8996_v6, %v8996_v6  ;;  %v9032_v27 = vclamps-f32 %v3136_v29, 1.0  ;;  %3336 = vmatpush.bf16.xpose.msrb.mxu2 %v3026_v53  ;;  %v3187_v9 = vpop.f32.mrf.mxu2  ;;  %v5416_v0 = vld [vmem:[%s5731_s24 + $0x718] sm:$0xff]  ;;  %vm2354_vm5 = vmor %vm2352_vm8, %vm2353_vm7 }
 0x295   : > { %v3100_v34 = vadd.f32 %v8949_v33, %v8947_v40  ;;  %v3138_v60 = vadd.f32 %v3137_v38, %v3118_v23  ;;  %3355 = vmatpush.bf16.xpose.msrb.mxu3 %v3027_v45  ;;  %v2852_v61 = vmul.f32 %v5409_v63, %v2365_v8  ;;  %v2854_v41 = vmul.f32 %v5410_v52, %v2375_v39  ;;  %v5413_v38 = vld [vmem:[%s5731_s24 + $0x700] sm:$0xff]  ;;  %vm2344_vm1 = vmor %vm2342_vm6, %vm2343_vm14  ;;  %v5420_v63 = vld [vmem:[%s5731_s24 + $0x618] sm:$0xff] }
 0x296   : > { %v2853_v56 = vmul.f32 %v5411_v35, %v2365_v8  ;;  %v2855_v22 = vmul.f32 %v5412_v44, %v2375_v39  ;;  %v2351_v40 = vmul.f32 %v8857_v17, %v2350_v57  ;;  %v3169_v33 = vadd.f32 %v3168_v10, %v3149_v14  ;;  %v5418_v14 = vld [vmem:[%s5731_s24 + $0x610] sm:$0xff] }
 0x297   : > { %v2505_v2 = vsel %vm9024_vm12, %v8757_v18, %v2501_v19  ;;  %v2515_v26 = vsel %vm2514_vm13, %v8810_v42, %v2511_v12  ;;  %v2341_v62 = vmul.f32 %v8876_v50, %v2340_v11  ;;  %v3010_v49 = vpack.c.bf16 %v2854_v41, %v2852_v61 }
 0x298   : > { %v3011_v23 = vpack.c.bf16 %v2855_v22, %v2853_v56  ;;  %v2880_v43 = vmul.f32 %v5413_v38, %v2505_v2  ;;  %v9051_v20 = vclamps-f32 %v3100_v34, 1.0  ;;  %v2882_v58 = vmul.f32 %v5414_v31, %v2515_v26  ;;  %v3151_v55 = vpop.f32.mrf.mxu0  ;;  %v5419_v34 = vld [vmem:[%s5731_s24 + $0x608] sm:$0xff] }
 0x299   : > { %v2881_v28 = vmul.f32 %v5415_v16, %v2505_v2  ;;  %v2883_v47 = vmul.f32 %v5416_v0, %v2515_v26  ;;  %v3453_v18 = vmul.f32 %v9032_v27, %v9032_v27  ;;  %v9058_v42 = vclamps-f32 %v3138_v60, 1.0  ;;  %3298 = vmatpush.bf16.xpose.msrb.mxu0 %v3010_v49 }
 0x29a   : > { %3317 = vmatpush.bf16.xpose.msrb.mxu1 %v3011_v23  ;;  %v3477_v1 = vsub.f32 1.0, %v9007_v21  ;;  %v9065_v19 = vclamps-f32 %v3169_v33, 1.0  ;;  %v3024_v29 = vpack.c.bf16 %v2882_v58, %v2880_v43  ;;  %v9069_v57 = vmax.f32 %v3476_v48, 0.0  ;;  %v5417_v48 = vld [vmem:[%s5731_s24 + $0x600] sm:$0xff]  ;;  %v3208_v49 = vpop.f32.mrf.mxu3  ;;  %s4673_s24 = sshll.u32 %s5571_s21, 10 }
 0x29b   : > { %v3025_v12 = vpack.c.bf16 %v2883_v47, %v2881_v28  ;;  %v3207_v21 = vadd.f32 %v3206_v4, %v3187_v9  ;;  %v2345_v53 = vsel %vm2344_vm1, %v8876_v50, %v2341_v62  ;;  %v3484_v3 = vsub.f32 1.0, %v9030_v59  ;;  %v3170_v59 = vpop.f32.mrf.mxu1  ;;  %v9120_v47 = vpop.permute.xlu2 %3918 }
 0x29c   : > { %v3460_v45 = vmul.f32 %v9051_v20, %v9051_v20  ;;  %3337 = vmatpush.bf16.xpose.msrb.mxu2 %v3024_v29  ;;  %v2355_v54 = vsel %vm2354_vm5, %v8857_v17, %v2351_v40  ;;  %v2848_v8 = vmul.f32 %v5417_v48, %v2345_v53  ;;  %v3485_v11 = vsub.f32 1.0, %v3453_v18  ;;  %v3189_v62 = vpop.f32.mrf.mxu2  ;;  %10415 = vst [vmem:[#allocation14_spill] sm:$0xff] %v9120_v47 }
 0x29d   : > { %3356 = vmatpush.bf16.xpose.msrb.mxu3 %v3025_v12  ;;  %v3461_v46 = vmul.f32 %v9058_v42, %v9058_v42  ;;  %v2850_v10 = vmul.f32 %v5418_v14, %v2355_v54  ;;  %v9084_v50 = vmax.f32 %v3477_v1, 0.0  ;;  %v3438_v39 = vmul.f32 %v9065_v19, %v9065_v19 }
 0x29e   : > { %v2849_v60 = vmul.f32 %v5419_v34, %v2345_v53  ;;  %v2851_v61 = vmul.f32 %v5420_v63, %v2355_v54  ;;  %v3533_v17 = vmul.f32 %v8937_v30, %v8829_v24  ;;  %5046 = vrsqrt.f32 %v9069_v57 }
 0x29f   : > { %v9093_v52 = vclamps-f32 %v3207_v21, 1.0  ;;  %v3008_v41 = vpack.c.bf16 %v2850_v10, %v2848_v8  ;;  %v3545_v35 = vmul.f32 %v8955_v51, %v8847_v37  ;;  %v9097_v56 = vmax.f32 %v3484_v3, 0.0 }
 0x2a0   : > { %v3492_v44 = vsub.f32 1.0, %v3460_v45  ;;  %v3009_v22 = vpack.c.bf16 %v2851_v61, %v2849_v60  ;;  %v9099_v40 = vmax.f32 %v3485_v11, 0.0  ;;  %v3493_v33 = vsub.f32 1.0, %v3461_v46  ;;  %v3154_v60 = vpop.f32.mrf.mxu0 }
 0x2a1   : > { %v3171_v2 = vadd.f32 %v3170_v59, %v3151_v55  ;;  %3299 = vmatpush.bf16.xpose.msrb.mxu0 %v3008_v41  ;;  %5048 = vrsqrt.f32 %v9084_v50  ;;  %v3470_v26 = vsub.f32 1.0, %v3438_v39  ;;  %v3534_v23 = vmul.f32 %v8937_v30, %v3533_v17 }
 0x2a2   : > { %3318 = vmatpush.bf16.xpose.msrb.mxu1 %v3009_v22  ;;  %v3439_v38 = vmul.f32 %v9093_v52, %v9093_v52  ;;  %v3546_v43 = vmul.f32 %v8955_v51, %v3545_v35  ;;  %5050 = vrsqrt.f32 %v9097_v56  ;;  %v9109_v9 = vmax.f32 %v3492_v44, 0.0 }
 0x2a3   : > { %3338 = vmatmul.bf16.vlgmr.msrb.gmra.mxu2 %v7358_v32  ;;  %5052 = vrsqrt.f32 %v9099_v40  ;;  %v9114_v31 = vmax.f32 %v3493_v33, 0.0  ;;  %v9116_v58 = vclamps-f32 %v3171_v2, 1.0  ;;  %v3209_v16 = vadd.f32 %v3208_v49, %v3189_v62  ;;  %v3173_v63 = vpop.f32.mrf.mxu1  ;;  %v9169_v2 = vpop.permute.xlu2 %3933 }
 0x2a4   : > { %3357 = vmatmul.bf16.vlgmr.msrb.gmra.mxu3 %v10379_v13  ;;  %v9111_v4 = vpop.eup %5046  ;;  %v9118_v28 = vmax.f32 %v3470_v26, 0.0  ;;  %v3535_v0 = vmul.f32 0.5, %v3534_v23  ;;  %v3471_v18 = vsub.f32 1.0, %v3439_v38  ;;  %v3547_v29 = vmul.f32 0.5, %v3546_v43  ;;  %v3192_v23 = vpop.f32.mrf.mxu2 }
 0x2a5   : > { %v3629_v12 = vmul.f32 %v9111_v4, %v9069_v57  ;;  %5054 = vrsqrt.f32 %v9109_v9  ;;  %v3446_v21 = vmul.f32 %v9116_v58, %v9116_v58  ;;  %v9131_v53 = vclamps-f32 %v3209_v16, 1.0  ;;  %v3211_v38 = vpop.f32.mrf.mxu3 }
 0x2a6   : > { %5056 = vrsqrt.f32 %v9114_v31  ;;  %v9141_v48 = vmax.f32 %v3471_v18, 0.0  ;;  %v3548_v11 = vsub.f32 1.5, %v3547_v29  ;;  %v3174_v35 = vadd.f32 %v3173_v63, %v3154_v60  ;;  %v10416_v18 = vld [vmem:[#allocation13_spill] sm:$0xff] }
 0x2a7   : > { %v9122_v1 = vpop.eup %5048  ;;  %5058 = vrsqrt.f32 %v9118_v28  ;;  %v3630_v8 = vmul.f32 %v9111_v4, %v3629_v12  ;;  %v3478_v14 = vsub.f32 1.0, %v3446_v21  ;;  %v9165_v22 = vmul.f32 %v8694_v15, %v9120_v47 }
 0x2a8   : > { %3300 = vmatmul.bf16.vlgmr.msrb.gmra.mxu0 %v7358_v32  ;;  %v9134_v3 = vpop.eup %5050  ;;  %v3641_v54 = vmul.f32 %v9122_v1, %v9084_v50  ;;  %v3536_v32 = vsub.f32 1.5, %v3535_v0  ;;  %5060 = vrsqrt.f32 %v9141_v48  ;;  %v3549_v41 = vmul.f32 %v8955_v51, %v3548_v11 }
 0x2a9   : > { %3319 = vmatmul.bf16.vlgmr.msrb.gmra.mxu1 %v10379_v13  ;;  %v9137_v45 = vpop.eup %5052  ;;  %v3725_v46 = vmul.f32 %v9134_v3, %v9097_v56  ;;  %v3447_v13 = vmul.f32 %v9131_v53, %v9131_v53  ;;  %v9159_v17 = vmul.f32 0.5, %v3630_v8  ;;  %v9167_v33 = vmax.f32 %v3478_v14, 0.0 }
 0x2aa   : > { %v3737_v39 = vmul.f32 %v9137_v45, %v9099_v40  ;;  %v3642_v59 = vmul.f32 %v9122_v1, %v3641_v54  ;;  %v3537_v34 = vmul.f32 %v8937_v30, %v3536_v32  ;;  %v9176_v49 = vclamps-f32 %v3174_v35, 1.0 }
 0x2ab   : > { %v9148_v10 = vpop.eup %5054  ;;  %v3726_v44 = vmul.f32 %v9134_v3, %v3725_v46  ;;  %v3479_v30 = vsub.f32 1.0, %v3447_v13  ;;  %v3212_v0 = vadd.f32 %v3211_v38, %v3192_v23  ;;  %v9185_v29 = vmul.f32 %v10416_v18, %v9120_v47  ;;  %v9237_v38 = vpop.permute.xlu1 %3928 }
 0x2ac   : > { %v9152_v55 = vpop.eup %5056  ;;  %v3738_v26 = vmul.f32 %v9137_v45, %v3737_v39  ;;  %v3821_v62 = vmul.f32 %v9148_v10, %v9109_v9  ;;  %v3643_v43 = vmul.f32 0.5, %v3642_v59  ;;  %v3538_v16 = vmul.f32 %v3537_v34, %v8829_v24 }
 0x2ad   : > { %v9157_v61 = vpop.eup %5058  ;;  %v3833_v51 = vmul.f32 %v9152_v55, %v9114_v31  ;;  %vm3539_vm15 = vcmp.eq.f32.partialorder %v8829_v24, inf  ;;  %v3550_v12 = vmul.f32 %v3549_v41, %v8847_v37  ;;  %vm3551_vm0 = vcmp.eq.f32.partialorder %v8847_v37, inf }
 0x2ae   : > { %v3557_v15 = vmul.f32 %v9157_v61, %v9118_v28  ;;  %v9190_v21 = vpop.eup %5060  ;;  %5062 = vrsqrt.f32 %v9167_v33  ;;  %v9193_v54 = vmax.f32 %v3479_v30, 0.0  ;;  %v3454_v32 = vmul.f32 %v9176_v49, %v9176_v49 }
 0x2af   : > { %v9197_v8 = vclamps-f32 %v3212_v0, 1.0  ;;  %v9199_v11 = vmul.f32 0.5, %v3726_v44  ;;  %v3822_v46 = vmul.f32 %v9148_v10, %v3821_v62  ;;  %v3834_v14 = vmul.f32 %v9152_v55, %v3833_v51 }
 0x2b0   : > { %v3542_v13 = vand.u32 2147483648, %v8829_v24  ;;  %v3558_v39 = vmul.f32 %v9157_v61, %v3557_v15  ;;  %v3540_v59 = vsel %vm3539_vm15, %v8829_v24, %v3538_v16  ;;  %vm3541_vm2 = vcmp.eq.f32.partialorder %v8829_v24, 0.0  ;;  %v9239_v15 = vpop.permute.xlu2 %3969  ;;  %v9245_v16 = vpop.permute.xlu0 %3923 }
 0x2b1   : > { %v3554_v34 = vand.u32 2147483648, %v8847_v37  ;;  %v3569_v60 = vmul.f32 %v9190_v21, %v9141_v48  ;;  %v3552_v63 = vsel %vm3551_vm0, %v8847_v37, %v3550_v12  ;;  %vm3553_vm9 = vcmp.eq.f32.partialorder %v8847_v37, 0.0 }
 0x2b2   : > { %v3455_v41 = vmul.f32 %v9197_v8, %v9197_v8  ;;  %v9215_v35 = vmul.f32 0.5, %v3738_v26  ;;  %v9219_v44 = vmul.f32 %v9093_v52, %v9120_v47  ;;  %5064 = vrsqrt.f32 %v9193_v54 }
 0x2b3   : > { %3343 = vmatmul.bf16.gmra.mxu2 %v10386_v5  ;;  %v3486_v24 = vsub.f32 1.0, %v3454_v32  ;;  %v9223_v30 = vmul.f32 0.5, %v3822_v46  ;;  %v9227_v37 = vmul.f32 %v9051_v20, %v9169_v2  ;;  %v3543_v26 = vsel %vm3541_vm2, %v3542_v13, %v3540_v59 }
 0x2b4   : > { %3362 = vmatmul.bf16.gmra.mxu3 %v10387_v36  ;;  %v9233_v62 = vpop.eup %5062  ;;  %v9235_v52 = vmul.f32 0.5, %v3834_v14  ;;  %v3559_v51 = vmul.f32 0.5, %v3558_v39  ;;  %v3555_v23 = vsel %vm3553_vm9, %v3554_v34, %v3552_v63  ;;  %v9243_v20 = vmul.f32 %v8996_v6, %v9237_v38  ;;  %v3156_v39 = vpop.f32.mrf.mxu0 }
 0x2b5   : > { %10417 = vst [vmem:[#allocation17_spill] sm:$0xff] %v9227_v37  ;;  %v3487_v0 = vsub.f32 1.0, %v3455_v41  ;;  %v3570_v18 = vmul.f32 %v9190_v21, %v3569_v60  ;;  %v3984_v12 = vmul.f32 %v9239_v15, %v3543_v26  ;;  %v9252_v32 = vmul.f32 %v9032_v27, %v9237_v38  ;;  %v3175_v27 = vpop.f32.mrf.mxu1 }
 0x2b6   : > { %v9258_v46 = vmax.f32 %v3486_v24, 0.0  ;;  %v3653_v6 = vmul.f32 %v9233_v62, %v9167_v33  ;;  %v9265_v14 = vmul.f32 %v8986_v25, %v9245_v16  ;;  %vm3647_vm10 = vcmp.eq.f32.partialorder %v9084_v50, inf }
 0x2b7   : > { %v3560_v34 = vsub.f32 1.5, %v3559_v51  ;;  %v3571_v60 = vmul.f32 0.5, %v3570_v18  ;;  %vm3649_vm4 = vcmp.eq.f32.partialorder %v9084_v50, 0.0  ;;  %v3650_v63 = vand.u32 2147483648, %v9084_v50  ;;  %v3213_v18 = vpop.f32.mrf.mxu3 }
 0x2b8   : > { %3305 = vmatmul.bf16.gmra.mxu0 %v10386_v5  ;;  %v9231_v5 = vmul.f32 %v9058_v42, %v9169_v2  ;;  %v3632_v42 = vsub.f32 1.5, %v9159_v17  ;;  %v3985_v17 = vmul.f32 %v9239_v15, %v3555_v23  ;;  %v9268_v59 = vpop.eup %5064  ;;  %v9275_v25 = vmax.f32 %v3487_v0, 0.0 }
 0x2b9   : > { %3324 = vmatmul.bf16.gmra.mxu1 %v10387_v36  ;;  %v3644_v36 = vsub.f32 1.5, %v3643_v43  ;;  %v9256_v43 = vmul.f32 %v8874_v7, %v9245_v16  ;;  %5066 = vrsqrt.f32 %v9258_v46  ;;  %v3176_v24 = vadd.f32 %v3175_v27, %v3156_v39 }
 0x2ba   : > { %10418 = vst [vmem:[#allocation15_spill] sm:$0xff] %v9231_v5  ;;  %v3633_v41 = vmul.f32 %v9111_v4, %v3632_v42  ;;  %v3561_v26 = vmul.f32 %v9157_v61, %v3560_v34  ;;  %v3572_v23 = vsub.f32 1.5, %v3571_v60  ;;  %v9282_v51 = vmul.f32 %v9268_v59, %v9193_v54 }
 0x2bb   : > { %v3645_v7 = vmul.f32 %v9122_v1, %v3644_v36  ;;  %v3654_v1 = vmul.f32 %v9233_v62, %v3653_v6  ;;  %v3194_v36 = vpop.f32.mrf.mxu2  ;;  %vm3563_vm3 = vcmp.eq.f32.partialorder %v9118_v28, inf  ;;  %v3566_v4 = vand.u32 2147483648, %v9118_v28 }
 0x2bc   : > { %v4097_v0 = vlaneseq  ;;  %v3562_v39 = vmul.f32 %v3561_v26, %v9118_v28  ;;  %vm3565_vm8 = vcmp.eq.f32.partialorder %v9118_v28, 0.0  ;;  %v3634_v61 = vmul.f32 %v3633_v41, %v9069_v57 }
 0x2bd   : > { %v3646_v42 = vmul.f32 %v3645_v7, %v9084_v50  ;;  %vm3635_vm6 = vcmp.eq.f32.partialorder %v9069_v57, inf  ;;  %5068 = vrsqrt.f32 %v9275_v25  ;;  %v3573_v6 = vmul.f32 %v9190_v21, %v3572_v23 }
 0x2be   : > { %v9293_v27 = vclamps-f32 %v3176_v24, 1.0  ;;  %v3214_v34 = vadd.f32 %v3213_v18, %v3194_v36  ;;  %v3564_v60 = vsel %vm3563_vm3, %v9118_v28, %v3562_v39  ;;  %vm3575_vm11 = vcmp.eq.f32.partialorder %v9141_v48, inf }
 0x2bf   : > { %vm3637_vm7 = vcmp.eq.f32.partialorder %v9069_v57, 0.0  ;;  %v3567_v7 = vsel %vm3565_vm8, %v3566_v4, %v3564_v60  ;;  %v3574_v26 = vmul.f32 %v3573_v6, %v9141_v48  ;;  %vm3577_vm14 = vcmp.eq.f32.partialorder %v9141_v48, 0.0  ;;  %v9300_v41 = vpop.eup %5066  ;;  %v9318_v6 = vpop.permute.xlu0 %4049 }
 0x2c0   : > { %v3648_v21 = vsel %vm3647_vm10, %v9084_v50, %v3646_v42  ;;  %v9306_v24 = vand.u32 127, %v4097_v0  ;;  %v3578_v28 = vand.u32 2147483648, %v9141_v48  ;;  %v3938_v23 = vmul.f32 %v9065_v19, %v9120_v47 }
 0x2c1   : > { %v3638_v36 = vand.u32 2147483648, %v9069_v57  ;;  %v3576_v18 = vsel %vm3575_vm11, %v9141_v48, %v3574_v26  ;;  %v3986_v4 = vmul.f32 %v9239_v15, %v3567_v7  ;;  %v4016_v39 = vadd.f32 %v3984_v12, %v9165_v22  ;;  %v9332_v26 = vpop.permute.xlu2 %3977 }
 0x2c2   : > { %v3636_v42 = vsel %vm3635_vm6, %v9069_v57, %v3634_v61  ;;  %v3462_v0 = vmul.f32 %v9293_v27, %v9293_v27  ;;  %v9322_v60 = vclamps-f32 %v3214_v34, 1.0  ;;  %v3579_v19 = vsel %vm3577_vm14, %v3578_v28, %v3576_v18 }
 0x2c3   : > { %v9324_v13 = vpop.eup %5068  ;;  %v3749_v48 = vmul.f32 %v9300_v41, %v9258_v46  ;;  %v9328_v7 = vstv %s4673_s24  ;;  %v3987_v22 = vmul.f32 %v9239_v15, %v3579_v19  ;;  %v4017_v12 = vadd.f32 %v3985_v17, %v9185_v29 }
 0x2c4   : > { %v3655_v61 = vmul.f32 0.5, %v3654_v1  ;;  %v3651_v5 = vsel %vm3649_vm4, %v3650_v63, %v3648_v21  ;;  %v4018_v34 = vadd.f32 %v3986_v4, %v3938_v23  ;;  %v4099_v28 = vadd.s32 128, %v9306_v24  ;;  %v9356_v23 = vpop.permute.xlu1 %3973 }
 0x2c5   : > { %v3639_v18 = vsel %vm3637_vm7, %v3638_v36, %v3636_v42  ;;  %v4019_v37 = vadd.f32 %v3987_v22, %v9219_v44  ;;  %v4064_v47 = vsub.f32 %v4016_v39, %v9318_v6  ;;  %v4100_v19 = vadd.s32 256, %v9306_v24 }
 0x2c6   : > { %v3761_v29 = vmul.f32 %v9324_v13, %v9275_v25  ;;  %v3494_v17 = vsub.f32 1.0, %v3462_v0  ;;  %v4101_v1 = vadd.s32 384, %v9306_v24  ;;  %v9347_v50 = vadd.s32 %v9328_v7, %v9306_v24 }
 0x2c7   : > { %v3750_v63 = vmul.f32 %v9300_v41, %v3749_v48  ;;  %v3463_v57 = vmul.f32 %v9322_v60, %v9322_v60  ;;  %v4065_v44 = vsub.f32 %v4017_v12, %v9318_v6  ;;  %v9354_v21 = vadd.s32 %v9328_v7, %v4099_v28 }
 0x2c8   : > { %v4066_v36 = vsub.f32 %v4018_v34, %v9318_v6  ;;  %v9360_v4 = vadd.s32 %v9328_v7, %v4100_v19  ;;  %v9363_v39 = vadd.s32 %v9328_v7, %v4101_v1  ;;  %vm4115_vm12 = vcmp.lt.s32.totalorder %v9347_v50, 2000 }
 0x2c9   : > { %v4067_v42 = vsub.f32 %v4019_v37, %v9318_v6  ;;  %vm4116_vm13 = vcmp.lt.s32.totalorder %v9354_v21, 2000  ;;  %v9370_v0 = vsel %vm4115_vm12, %v4064_v47, -1e+30  ;;  %v3656_v48 = vsub.f32 1.5, %v3655_v61 }
 0x2ca   : > { %v3762_v12 = vmul.f32 %v9324_v13, %v3761_v29  ;;  %vm4117_vm1 = vcmp.lt.s32.totalorder %v9360_v4, 2000  ;;  %vm4118_vm5 = vcmp.lt.s32.totalorder %v9363_v39, 2000  ;;  %4155 = vst [vmem:[%s5738_s23] sm:$0xff] %v9370_v0  ;;  %v3992_v37 = vmul.f32 %v9356_v23, %v3639_v18 }
 0x2cb   : > { %v3751_v34 = vmul.f32 0.5, %v3750_v63  ;;  %v3495_v28 = vsub.f32 1.0, %v3463_v57  ;;  %v9381_v47 = vsel %vm4116_vm13, %v4065_v44, -1e+30  ;;  %v3993_v61 = vmul.f32 %v9356_v23, %v3651_v5  ;;  %v9405_v57 = vpop.permute.xlu2 %4053 }
 0x2cc   : > { %v9384_v19 = vmax.f32 %v3494_v17, 0.0  ;;  %v9388_v29 = vsel %vm4117_vm1, %v4066_v36, -1e+30  ;;  %4156 = vst [vmem:[%s5738_s23 + $0x8] sm:$0xff] %v9381_v47  ;;  %v3657_v1 = vmul.f32 %v9233_v62, %v3656_v48  ;;  %v9395_v18 = vsel %vm4118_vm5, %v4067_v42, -1e+30 }
 0x2cd   : > { %10419 = vst [vmem:[#allocation16_spill] sm:$0xff] %v9388_v29  ;;  %vm3659_vm15 = vcmp.eq.f32.partialorder %v9167_v33, inf  ;;  %v3662_v5 = vand.u32 2147483648, %v9167_v33  ;;  %v3666_v17 = vmul.f32 %v9268_v59, %v9282_v51  ;;  %vm3731_vm0 = vcmp.eq.f32.partialorder %v9097_v56, inf }
 0x2ce   : > { %10420 = vst [vmem:[#allocation18_spill] sm:$0xff] %v9395_v18  ;;  %v3740_v63 = vsub.f32 1.5, %v9215_v35  ;;  %v3763_v62 = vmul.f32 0.5, %v3762_v12  ;;  %v3658_v44 = vmul.f32 %v3657_v1, %v9167_v33  ;;  %vm3661_vm2 = vcmp.eq.f32.partialorder %v9167_v33, 0.0 }
 0x2cf   : > { %4157 = vst [vmem:[%s5738_s23 + $0x10] sm:$0xff] %v9388_v29  ;;  %v3752_v36 = vsub.f32 1.5, %v3751_v34  ;;  %v9411_v42 = vmax.f32 %v3495_v28, 0.0  ;;  %v3667_v48 = vmul.f32 0.5, %v3666_v17  ;;  %v4024_v22 = vadd.f32 %v3992_v37, %v9256_v43 }
 0x2d0   : > { %4158 = vst [vmem:[%s5738_s23 + $0x18] sm:$0xff] %v9395_v18  ;;  %v10421_v51 = vsub.f32 1.5, %v9199_v11  ;;  %v3660_v35 = vsel %vm3659_vm15, %v9167_v33, %v3658_v44  ;;  %v3946_v12 = vmul.f32 %v9116_v58, %v9245_v16  ;;  %v4025_v18 = vadd.f32 %v3993_v61, %v9265_v14  ;;  %v3263_v1 = vpop.f32.mrf.mxu2 }
 0x2d1   : > { %vm3733_vm9 = vcmp.eq.f32.partialorder %v9097_v56, 0.0  ;;  %5070 = vrsqrt.f32 %v9384_v19  ;;  %v3663_v34 = vsel %vm3661_vm2, %v3662_v5, %v3660_v35  ;;  %v3668_v28 = vsub.f32 1.5, %v3667_v48 }
 0x2d2   : > { %v3729_v29 = vmul.f32 %v9134_v3, %v10421_v51  ;;  %v4072_v43 = vsub.f32 %v4024_v22, %v9405_v57  ;;  %v3741_v11 = vmul.f32 %v9137_v45, %v3740_v63  ;;  %v3764_v37 = vsub.f32 1.5, %v3763_v62 }
 0x2d3   : > { %v3994_v3 = vmul.f32 %v9356_v23, %v3663_v34  ;;  %v4073_v33 = vsub.f32 %v4025_v18, %v9405_v57  ;;  %v3753_v58 = vmul.f32 %v9300_v41, %v3752_v36  ;;  %5072 = vrsqrt.f32 %v9411_v42  ;;  %v3282_v22 = vpop.f32.mrf.mxu3 }
 0x2d4   : > { %v3669_v14 = vmul.f32 %v9268_v59, %v3668_v28  ;;  %v9432_v61 = vsel %vm4115_vm12, %v4072_v43, -1e+30  ;;  %vm3671_vm10 = vcmp.eq.f32.partialorder %v9193_v54, inf  ;;  %v3674_v45 = vand.u32 2147483648, %v9193_v54  ;;  %v3244_v34 = vpop.f32.mrf.mxu1 }
 0x2d5   : > { %v4026_v5 = vadd.f32 %v3994_v3, %v3946_v12  ;;  %v9438_v18 = vsel %vm4116_vm13, %v4073_v33, -1e+30  ;;  %4163 = vst [vmem:[%s5738_s23 + $0x40] sm:$0xff] %v9432_v61  ;;  %v3730_v41 = vmul.f32 %v3729_v29, %v9097_v56  ;;  %v3283_v59 = vadd.f32 %v3282_v22, %v3263_v1  ;;  %v3225_v12 = vpop.f32.mrf.mxu0  ;;  %v9484_v1 = vpop.permute.xlu1 %3981 }
 0x2d6   : > { %v3670_v17 = vmul.f32 %v3669_v14, %v9193_v54  ;;  %vm3673_vm4 = vcmp.eq.f32.partialorder %v9193_v54, 0.0  ;;  %4164 = vst [vmem:[%s5738_s23 + $0x48] sm:$0xff] %v9438_v18  ;;  %v3742_v63 = vmul.f32 %v3741_v11, %v9099_v40  ;;  %vm3743_vm3 = vcmp.eq.f32.partialorder %v9099_v40, inf }
 0x2d7   : > { %v3765_v62 = vmul.f32 %v9324_v13, %v3764_v37  ;;  %v4074_v44 = vsub.f32 %v4026_v5, %v9405_v57  ;;  %v9451_v36 = vpop.eup %5070  ;;  %vm3745_vm8 = vcmp.eq.f32.partialorder %v9099_v40, 0.0  ;;  %v9454_v29 = vclamps-f32 %v3283_v59, 1.0 }
 0x2d8   : > { %v3672_v48 = vsel %vm3671_vm10, %v9193_v54, %v3670_v17  ;;  %v3947_v51 = vmul.f32 %v9131_v53, %v9245_v16  ;;  %v3746_v35 = vand.u32 2147483648, %v9099_v40  ;;  %v3754_v13 = vmul.f32 %v3753_v58, %v9258_v46 }
 0x2d9   : > { %v3675_v28 = vsel %vm3673_vm4, %v3674_v45, %v3672_v48  ;;  %v9465_v43 = vsel %vm4117_vm1, %v4074_v44, -1e+30  ;;  %v9467_v11 = vpop.eup %5072  ;;  %v3732_v54 = vsel %vm3731_vm0, %v9097_v56, %v3730_v41  ;;  %vm3755_vm6 = vcmp.eq.f32.partialorder %v9258_v46, inf }
 0x2da   : > { %v3245_v53 = vadd.f32 %v3244_v34, %v3225_v12  ;;  %v3995_v37 = vmul.f32 %v9356_v23, %v3675_v28  ;;  %4165 = vst [vmem:[%s5738_s23 + $0x50] sm:$0xff] %v9465_v43  ;;  %v3744_v3 = vsel %vm3743_vm3, %v9099_v40, %v3742_v63  ;;  %v3758_v33 = vand.u32 2147483648, %v9258_v46 }
 0x2db   : > { %v3766_v58 = vmul.f32 %v3765_v62, %v9275_v25  ;;  %v3845_v14 = vmul.f32 %v9451_v36, %v9384_v19  ;;  %vm3767_vm11 = vcmp.eq.f32.partialorder %v9275_v25, inf  ;;  %v3441_v22 = vmul.f32 %v9454_v29, %v9454_v29 }
 0x2dc   : > { %v9488_v45 = vclamps-f32 %v3245_v53, 1.0  ;;  %v4027_v5 = vadd.f32 %v3995_v37, %v3947_v51  ;;  %v10422_v41 = vand.u32 2147483648, %v9097_v56  ;;  %v3756_v17 = vsel %vm3755_vm6, %v9258_v46, %v3754_v13  ;;  %v3284_v53 = vpop.f32.mrf.mxu3 }
 0x2dd   : > { %vm3757_vm7 = vcmp.eq.f32.partialorder %v9258_v46, 0.0  ;;  %v3857_v63 = vmul.f32 %v9467_v11, %v9411_v42  ;;  %v3747_v62 = vsel %vm3745_vm8, %v3746_v35, %v3744_v3  ;;  %v3770_v44 = vand.u32 2147483648, %v9275_v25 }
 0x2de   : > { %v3735_v59 = vsel %vm3733_vm9, %v10422_v41, %v3732_v54  ;;  %v3836_v48 = vsub.f32 1.5, %v9235_v52  ;;  %v3440_v51 = vmul.f32 %v9488_v45, %v9488_v45  ;;  %v3768_v56 = vsel %vm3767_vm11, %v9275_v25, %v3766_v58  ;;  %v3265_v54 = vpop.f32.mrf.mxu2 }
 0x2df   : > { %vm3769_vm14 = vcmp.eq.f32.partialorder %v9275_v25, 0.0  ;;  %v3846_v13 = vmul.f32 %v9451_v36, %v3845_v14  ;;  %v4075_v46 = vsub.f32 %v4027_v5, %v9405_v57  ;;  %v4000_v12 = vmul.f32 %v9332_v26, %v3735_v59 }
 0x2e0   : > { %v3759_v40 = vsel %vm3757_vm7, %v3758_v33, %v3756_v17  ;;  %v3824_v35 = vsub.f32 1.5, %v9223_v30  ;;  %v3473_v34 = vsub.f32 1.0, %v3441_v22  ;;  %v4001_v52 = vmul.f32 %v9332_v26, %v3747_v62  ;;  %v3246_v62 = vpop.f32.mrf.mxu1 }
 0x2e1   : > { %v3472_v28 = vsub.f32 1.0, %v3440_v51  ;;  %v9513_v37 = vsel %vm4118_vm5, %v4075_v46, -1e+30  ;;  %v3858_v25 = vmul.f32 %v9467_v11, %v3857_v63  ;;  %v3954_v3 = vmul.f32 %v9176_v49, %v9237_v38  ;;  %v3227_v63 = vpop.f32.mrf.mxu0  ;;  %v9537_v51 = vpop.permute.xlu1 %4057 }
 0x2e2   : > { %v3771_v58 = vsel %vm3769_vm14, %v3770_v44, %v3768_v56  ;;  %v3837_v33 = vmul.f32 %v9152_v55, %v3836_v48  ;;  %v3285_v14 = vadd.f32 %v3284_v53, %v3265_v54  ;;  %4166 = vst [vmem:[%s5738_s23 + $0x58] sm:$0xff] %v9513_v37  ;;  %v4002_v30 = vmul.f32 %v9332_v26, %v3759_v40 }
 0x2e3   : > { %v3847_v22 = vmul.f32 0.5, %v3846_v13  ;;  %vm3839_vm15 = vcmp.eq.f32.partialorder %v9114_v31, inf  ;;  %v9523_v5 = vmax.f32 %v3472_v28, 0.0  ;;  %vm3841_vm0 = vcmp.eq.f32.partialorder %v9114_v31, 0.0 }
 0x2e4   : > { %v3825_v41 = vmul.f32 %v9148_v10, %v3824_v35  ;;  %v9527_v59 = vmax.f32 %v3473_v34, 0.0  ;;  %v9529_v49 = vclamps-f32 %v3285_v14, 1.0  ;;  %v3955_v55 = vmul.f32 %v9197_v8, %v9237_v38 }
 0x2e5   : > { %v4003_v17 = vmul.f32 %v9332_v26, %v3771_v58  ;;  %5074 = vrsqrt.f32 %v9523_v5  ;;  %v3859_v44 = vmul.f32 0.5, %v3858_v25  ;;  %v3838_v48 = vmul.f32 %v3837_v33, %v9114_v31 }
 0x2e6   : > { %vm3827_vm2 = vcmp.eq.f32.partialorder %v9109_v9, inf  ;;  %v3449_v10 = vmul.f32 %v9529_v49, %v9529_v49  ;;  %v3247_v56 = vadd.f32 %v3246_v62, %v3227_v63  ;;  %v4034_v13 = vadd.f32 %v4002_v30, %v3954_v3 }
 0x2e7   : > { %v4032_v8 = vadd.f32 %v4000_v12, %v9243_v20  ;;  %v4033_v46 = vadd.f32 %v4001_v52, %v9252_v32  ;;  %v3848_v40 = vsub.f32 1.5, %v3847_v22  ;;  %v3826_v35 = vmul.f32 %v3825_v41, %v9109_v9 }
 0x2e8   : > { %5076 = vrsqrt.f32 %v9527_v59  ;;  %v3481_v34 = vsub.f32 1.0, %v3449_v10  ;;  %v9545_v28 = vclamps-f32 %v3247_v56, 1.0  ;;  %v4035_v54 = vadd.f32 %v4003_v17, %v3955_v55 }
 0x2e9   : > { %v4080_v53 = vsub.f32 %v4032_v8, %v9537_v51  ;;  %v4081_v25 = vsub.f32 %v4033_v46, %v9537_v51  ;;  %v3860_v58 = vsub.f32 1.5, %v3859_v44  ;;  %v3840_v20 = vsel %vm3839_vm15, %v9114_v31, %v3838_v48  ;;  %v3268_v44 = vpop.f32.mrf.mxu2 }
 0x2ea   : > { %v3842_v32 = vand.u32 2147483648, %v9114_v31  ;;  %v3830_v12 = vand.u32 2147483648, %v9109_v9  ;;  %v3448_v52 = vmul.f32 %v9545_v28, %v9545_v28  ;;  %v4082_v33 = vsub.f32 %v4034_v13, %v9537_v51 }
 0x2eb   : > { %v5075_v3 = vpop.eup %5074  ;;  %v9559_v14 = vsel %vm4115_vm12, %v4080_v53, -1e+30  ;;  %v9563_v30 = vsel %vm4116_vm13, %v4081_v25, -1e+30  ;;  %v3849_v22 = vmul.f32 %v9451_v36, %v3848_v40  ;;  %v3828_v41 = vsel %vm3827_vm2, %v9109_v9, %v3826_v35  ;;  %v3287_v36 = vpop.f32.mrf.mxu3 }
 0x2ec   : > { %10423 = vst [vmem:[#allocation19_spill] sm:$0xff] %v9559_v14  ;;  %vm3829_vm9 = vcmp.eq.f32.partialorder %v9109_v9, 0.0  ;;  %v3581_v55 = vmul.f32 %v5075_v3, %v9523_v5  ;;  %v9571_v17 = vmax.f32 %v3481_v34, 0.0  ;;  %v9577_v63 = vmul.f32 %v9293_v27, %v9169_v2  ;;  %v3230_v25 = vpop.f32.mrf.mxu0 }
 0x2ed   : > { %4172 = vst [vmem:[%s5738_s23 + $0x88] sm:$0xff] %v9563_v30  ;;  %v3480_v62 = vsub.f32 1.0, %v3448_v52  ;;  %v4083_v48 = vsub.f32 %v4035_v54, %v9537_v51  ;;  %v3861_v10 = vmul.f32 %v9467_v11, %v3860_v58  ;;  %v3843_v13 = vsel %vm3841_vm0, %v3842_v32, %v3840_v20  ;;  %v3249_v58 = vpop.f32.mrf.mxu1 }
 0x2ee   : > { %4171 = vst [vmem:[%s5738_s23 + $0x80] sm:$0xff] %v9559_v14  ;;  %v9583_v56 = vpop.eup %5076  ;;  %v3582_v8 = vmul.f32 %v5075_v3, %v3581_v55  ;;  %v3288_v46 = vadd.f32 %v3287_v36, %v3268_v44  ;;  %v9589_v27 = vsel %vm4117_vm1, %v4082_v33, -1e+30  ;;  %v3831_v40 = vsel %vm3829_vm9, %v3830_v12, %v3828_v41 }
 0x2ef   : > { %10424 = vst [vmem:[#allocation13_spill] sm:$0xff] %v9589_v27  ;;  %v9593_v35 = vmax.f32 %v3480_v62, 0.0  ;;  %v9597_v34 = vsel %vm4118_vm5, %v4083_v48, -1e+30  ;;  %v3850_v31 = vmul.f32 %v3849_v22, %v9384_v19  ;;  %5078 = vrsqrt.f32 %v9571_v17 }
 0x2f0   : > { %10425 = vst [vmem:[#allocation20_spill] sm:$0xff] %v9597_v34  ;;  %v3583_v11 = vmul.f32 0.5, %v3582_v8  ;;  %v9603_v54 = vclamps-f32 %v3288_v46, 1.0  ;;  %vm3851_vm10 = vcmp.eq.f32.partialorder %v9384_v19, inf  ;;  %v3593_v9 = vmul.f32 %v9583_v56, %v9527_v59 }
 0x2f1   : > { %4173 = vst [vmem:[%s5738_s23 + $0x90] sm:$0xff] %v9589_v27  ;;  %v4102_v53 = vadd.s32 512, %v9306_v24  ;;  %5080 = vrsqrt.f32 %v9593_v35  ;;  %v3862_v20 = vmul.f32 %v3861_v10, %v9411_v42  ;;  %v3854_v52 = vand.u32 2147483648, %v9384_v19 }
 0x2f2   : > { %4174 = vst [vmem:[%s5738_s23 + $0x98] sm:$0xff] %v9597_v34  ;;  %v3584_v32 = vsub.f32 1.5, %v3583_v11  ;;  %v3457_v12 = vmul.f32 %v9603_v54, %v9603_v54  ;;  %vm3863_vm4 = vcmp.eq.f32.partialorder %v9411_v42, inf  ;;  %vm3587_vm3 = vcmp.eq.f32.partialorder %v9523_v5, inf }
 0x2f3   : > { %v3250_v33 = vadd.f32 %v3249_v58, %v3230_v25  ;;  %v3852_v22 = vsel %vm3851_vm10, %v9384_v19, %v3850_v31  ;;  %vm3853_vm8 = vcmp.eq.f32.partialorder %v9384_v19, 0.0  ;;  %v3590_v55 = vand.u32 2147483648, %v9523_v5  ;;  %v10426_v25 = vld [vmem:[#allocation14_spill] sm:$0xff] }
 0x2f4   : > { %v3585_v41 = vmul.f32 %v5075_v3, %v3584_v32  ;;  %v3489_v62 = vsub.f32 1.0, %v3457_v12  ;;  %v3866_v44 = vand.u32 2147483648, %v9411_v42  ;;  %v3594_v36 = vmul.f32 %v9583_v56, %v3593_v9 }
 0x2f5   : > { %v9623_v48 = vclamps-f32 %v3250_v33, 1.0  ;;  %v3864_v10 = vsel %vm3863_vm4, %v9411_v42, %v3862_v20  ;;  %vm3865_vm6 = vcmp.eq.f32.partialorder %v9411_v42, 0.0  ;;  %v9627_v8 = vpop.eup %5078  ;;  %vm3589_vm11 = vcmp.eq.f32.partialorder %v9523_v5, 0.0 }
 0x2f6   : > { %v3586_v46 = vmul.f32 %v3585_v41, %v9523_v5  ;;  %v9631_v19 = vmax.f32 %v3489_v62, 0.0  ;;  %v3855_v3 = vsel %vm3853_vm8, %v3854_v52, %v3852_v22  ;;  %v4008_v11 = vmul.f32 %v9484_v1, %v3831_v40 }
 0x2f7   : > { %v5081_v31 = vpop.eup %5080  ;;  %v4009_v9 = vmul.f32 %v9484_v1, %v3843_v13  ;;  %v3940_v58 = vmul.f32 %v9488_v45, %v10426_v25  ;;  %v3456_v42 = vmul.f32 %v9623_v48, %v9623_v48  ;;  %v9643_v32 = vadd.s32 %v9328_v7, %v4102_v53 }
 0x2f8   : > { %v3588_v20 = vsel %vm3587_vm3, %v9523_v5, %v3586_v46  ;;  %v3677_v12 = vmul.f32 %v5081_v31, %v9593_v35  ;;  %v3867_v52 = vsel %vm3865_vm6, %v3866_v44, %v3864_v10  ;;  %v3595_v33 = vmul.f32 0.5, %v3594_v36  ;;  %v3270_v5 = vpop.f32.mrf.mxu2  ;;  %v3289_v46 = vpop.f32.mrf.mxu3 }
 0x2f9   : > { %v3591_v40 = vsel %vm3589_vm11, %v3590_v55, %v3588_v20  ;;  %v3689_v13 = vmul.f32 %v9627_v8, %v9571_v17  ;;  %v4010_v45 = vmul.f32 %v9484_v1, %v3855_v3  ;;  %5082 = vrsqrt.f32 %v9631_v19  ;;  %v10427_v55 = vld [vmem:[#allocation17_spill] sm:$0xff]  ;;  %v9655_v10 = vpop.permute.xlu2 %4061 }
 0x2fa   : > { %v3988_v22 = vmul.f32 %v9239_v15, %v3591_v40  ;;  %v3678_v41 = vmul.f32 %v5081_v31, %v3677_v12  ;;  %v3488_v62 = vsub.f32 1.0, %v3456_v42  ;;  %v3963_v53 = vmul.f32 %v9322_v60, %v9169_v2  ;;  %v10428_v12 = vld [vmem:[#allocation15_spill] sm:$0xff] }
 0x2fb   : > { %v3290_v34 = vadd.f32 %v3289_v46, %v3270_v5  ;;  %v4011_v44 = vmul.f32 %v9484_v1, %v3867_v52  ;;  %v4040_v36 = vadd.f32 %v4008_v11, %v10427_v55  ;;  %v4041_v40 = vadd.f32 %v4009_v9, %v10428_v12 }
 0x2fc   : > { %v4020_v20 = vadd.f32 %v3988_v22, %v3940_v58  ;;  %v3679_v3 = vmul.f32 0.5, %v3678_v41  ;;  %v9657_v27 = vmax.f32 %v3488_v62, 0.0  ;;  %v3596_v14 = vsub.f32 1.5, %v3595_v33  ;;  %v3232_v58 = vpop.f32.mrf.mxu0  ;;  %v3251_v22 = vpop.f32.mrf.mxu1 }
 0x2fd   : > { %vm4119_vm7 = vcmp.lt.s32.totalorder %v9643_v32, 2000  ;;  %v3690_v42 = vmul.f32 %v9627_v8, %v3689_v13  ;;  %v9662_v60 = vclamps-f32 %v3290_v34, 1.0  ;;  %v4042_v11 = vadd.f32 %v4010_v45, %v9577_v63 }
 0x2fe   : > { %v4068_v52 = vsub.f32 %v4020_v20, %v9318_v6  ;;  %v3680_v5 = vsub.f32 1.5, %v3679_v3  ;;  %5084 = vrsqrt.f32 %v9657_v27  ;;  %v4043_v41 = vadd.f32 %v4011_v44, %v3963_v53 }
 0x2ff   : > { %v4088_v9 = vsub.f32 %v4040_v36, %v9655_v10  ;;  %v9668_v33 = vpop.eup %5082  ;;  %v3465_v13 = vmul.f32 %v9662_v60, %v9662_v60  ;;  %v4089_v46 = vsub.f32 %v4041_v40, %v9655_v10  ;;  %v3691_v63 = vmul.f32 0.5, %v3690_v42 }
 0x300   : > { %v9672_v62 = vsel %vm4119_vm7, %v4068_v52, -1e+30  ;;  %v3681_v34 = vmul.f32 %v5081_v31, %v3680_v5  ;;  %vm3683_vm14 = vcmp.eq.f32.partialorder %v9593_v35, inf  ;;  %v3686_v45 = vand.u32 2147483648, %v9593_v35 }
 0x301   : > { %4159 = vst [vmem:[%s5738_s23 + $0x20] sm:$0xff] %v9672_v62  ;;  %v3252_v53 = vadd.f32 %v3251_v22, %v3232_v58  ;;  %v3597_v44 = vmul.f32 %v9583_v56, %v3596_v14  ;;  %v3497_v36 = vsub.f32 1.0, %v3465_v13  ;;  %v4090_v31 = vsub.f32 %v4042_v11, %v9655_v10 }
 0x302   : > { %v3682_v55 = vmul.f32 %v3681_v34, %v9593_v35  ;;  %vm3685_vm15 = vcmp.eq.f32.partialorder %v9593_v35, 0.0  ;;  %v3785_v20 = vmul.f32 %v9668_v33, %v9631_v19  ;;  %v9691_v12 = vsel %vm4115_vm12, %v4088_v9, -1e+30 }
 0x303   : > { %v9687_v3 = vclamps-f32 %v3252_v53, 1.0  ;;  %v9694_v56 = vmax.f32 %v3497_v36, 0.0  ;;  %v4091_v42 = vsub.f32 %v4043_v41, %v9655_v10  ;;  %v9699_v52 = vsel %vm4116_vm13, %v4089_v46, -1e+30  ;;  %4179 = vst [vmem:[%s5738_s23 + $0xc0] sm:$0xff] %v9691_v12 }
 0x304   : > { %v5085_v40 = vpop.eup %5084  ;;  %v3684_v14 = vsel %vm3683_vm14, %v9593_v35, %v3682_v55  ;;  %v3692_v5 = vsub.f32 1.5, %v3691_v63  ;;  %v9706_v58 = vsel %vm4117_vm1, %v4090_v31, -1e+30  ;;  %4180 = vst [vmem:[%s5738_s23 + $0xc8] sm:$0xff] %v9699_v52  ;;  %v3948_v35 = vmul.f32 %v9545_v28, %v9245_v16 }
 0x305   : > { %v3687_v11 = vsel %vm3685_vm15, %v3686_v45, %v3684_v14  ;;  %v3773_v50 = vmul.f32 %v5085_v40, %v9657_v27  ;;  %5086 = vrsqrt.f32 %v9694_v56  ;;  %4181 = vst [vmem:[%s5738_s23 + $0xd0] sm:$0xff] %v9706_v58  ;;  %v3598_v22 = vmul.f32 %v3597_v44, %v9527_v59 }
 0x306   : > { %v3996_v21 = vmul.f32 %v9356_v23, %v3687_v11  ;;  %v3786_v41 = vmul.f32 %v9668_v33, %v3785_v20  ;;  %v3464_v4 = vmul.f32 %v9687_v3, %v9687_v3  ;;  %vm3599_vm12 = vcmp.eq.f32.partialorder %v9527_v59, inf }
 0x307   : > { %v3774_v9 = vmul.f32 %v5085_v40, %v3773_v50  ;;  %v9723_v28 = vsel %vm4118_vm5, %v4091_v42, -1e+30  ;;  %v3693_v13 = vmul.f32 %v9627_v8, %v3692_v5  ;;  %vm3601_vm13 = vcmp.eq.f32.partialorder %v9527_v59, 0.0 }
 0x308   : > { %v4028_v34 = vadd.f32 %v3996_v21, %v3948_v35  ;;  %v3496_v63 = vsub.f32 1.0, %v3464_v4  ;;  %4182 = vst [vmem:[%s5738_s23 + $0xd8] sm:$0xff] %v9723_v28  ;;  %v3602_v45 = vand.u32 2147483648, %v9527_v59  ;;  %v3600_v44 = vsel %vm3599_vm12, %v9527_v59, %v3598_v22 }
 0x309   : > { %v3775_v46 = vmul.f32 0.5, %v3774_v9  ;;  %v3787_v55 = vmul.f32 0.5, %v3786_v41  ;;  %v3694_v20 = vmul.f32 %v3693_v13, %v9571_v17  ;;  %vm3695_vm1 = vcmp.eq.f32.partialorder %v9571_v17, inf }
 0x30a   : > { %v4076_v53 = vsub.f32 %v4028_v34, %v9405_v57  ;;  %v9732_v39 = vmax.f32 %v3496_v63, 0.0  ;;  %v3603_v5 = vsel %vm3601_vm13, %v3602_v45, %v3600_v44  ;;  %vm3779_vm5 = vcmp.eq.f32.partialorder %v9657_v27, inf }
 0x30b   : > { %v3776_v36 = vsub.f32 1.5, %v3775_v46  ;;  %v5087_v31 = vpop.eup %5086  ;;  %v3782_v59 = vand.u32 2147483648, %v9657_v27  ;;  %v3788_v11 = vsub.f32 1.5, %v3787_v55  ;;  %vm3781_vm0 = vcmp.eq.f32.partialorder %v9657_v27, 0.0 }
 0x30c   : > { %v9736_v8 = vsel %vm4119_vm7, %v4076_v53, -1e+30  ;;  %v3881_v42 = vmul.f32 %v5087_v31, %v9694_v56  ;;  %5088 = vrsqrt.f32 %v9732_v39  ;;  %vm3697_vm2 = vcmp.eq.f32.partialorder %v9571_v17, 0.0 }
 0x30d   : > { %4167 = vst [vmem:[%s5738_s23 + $0x60] sm:$0xff] %v9736_v8  ;;  %v3777_v14 = vmul.f32 %v5085_v40, %v3776_v36  ;;  %v3941_v40 = vmul.f32 %v9454_v29, %v10426_v25  ;;  %v3698_v21 = vand.u32 2147483648, %v9571_v17  ;;  %v3989_v22 = vmul.f32 %v9239_v15, %v3603_v5 }
 0x30e   : > { %v3882_v35 = vmul.f32 %v5087_v31, %v3881_v42  ;;  %v3696_v41 = vsel %vm3695_vm1, %v9571_v17, %v3694_v20  ;;  %v3789_v46 = vmul.f32 %v9668_v33, %v3788_v11  ;;  %v3956_v63 = vmul.f32 %v9623_v48, %v9237_v38 }
 0x30f   : > { %v3778_v50 = vmul.f32 %v3777_v14, %v9657_v27  ;;  %v3699_v45 = vsel %vm3697_vm2, %v3698_v21, %v3696_v41  ;;  %v4021_v44 = vadd.f32 %v3989_v22, %v3941_v40  ;;  %vm3791_vm9 = vcmp.eq.f32.partialorder %v9631_v19, inf }
 0x310   : > { %v3883_v4 = vmul.f32 0.5, %v3882_v35  ;;  %v3790_v20 = vmul.f32 %v3789_v46, %v9631_v19  ;;  %v4103_v48 = vadd.s32 640, %v9306_v24  ;;  %v3949_v5 = vmul.f32 %v9529_v49, %v9245_v16 }
 0x311   : > { %v3780_v9 = vsel %vm3779_vm5, %v9657_v27, %v3778_v50  ;;  %v3997_v27 = vmul.f32 %v9356_v23, %v3699_v45  ;;  %v4069_v42 = vsub.f32 %v4021_v44, %v9318_v6  ;;  %v3794_v50 = vand.u32 2147483648, %v9631_v19 }
 0x312   : > { %v3783_v34 = vsel %vm3781_vm0, %v3782_v59, %v3780_v9  ;;  %v5089_v13 = vpop.eup %5088  ;;  %v3884_v36 = vsub.f32 1.5, %v3883_v4  ;;  %v9776_v40 = vadd.s32 %v9328_v7, %v4103_v48  ;;  %v3792_v22 = vsel %vm3791_vm9, %v9631_v19, %v3790_v20 }
 0x313   : > { %v4004_v29 = vmul.f32 %v9332_v26, %v3783_v34  ;;  %v3869_v53 = vmul.f32 %v5089_v13, %v9732_v39  ;;  %v4029_v21 = vadd.f32 %v3997_v27, %v3949_v5  ;;  %vm3793_vm10 = vcmp.eq.f32.partialorder %v9631_v19, 0.0 }
 0x314   : > { %v3885_v11 = vmul.f32 %v5087_v31, %v3884_v36  ;;  %vm4120_vm4 = vcmp.lt.s32.totalorder %v9776_v40, 2000  ;;  %vm3875_vm3 = vcmp.eq.f32.partialorder %v9732_v39, inf  ;;  %v3878_v31 = vand.u32 2147483648, %v9732_v39 }
 0x315   : > { %v4036_v55 = vadd.f32 %v4004_v29, %v3956_v63  ;;  %v3870_v17 = vmul.f32 %v5089_v13, %v3869_v53  ;;  %v9786_v9 = vsel %vm4120_vm4, %v4069_v42, -1e+30  ;;  %v3795_v4 = vsel %vm3793_vm10, %v3794_v50, %v3792_v22 }
 0x316   : > { %v3886_v41 = vmul.f32 %v3885_v11, %v9694_v56  ;;  %vm3887_vm8 = vcmp.eq.f32.partialorder %v9694_v56, inf  ;;  %4160 = vst [vmem:[%s5738_s23 + $0x28] sm:$0xff] %v9786_v9  ;;  %v4077_v19 = vsub.f32 %v4029_v21, %v9405_v57  ;;  %vm3889_vm6 = vcmp.eq.f32.partialorder %v9694_v56, 0.0 }
 0x317   : > { %v4084_v14 = vsub.f32 %v4036_v55, %v9537_v51  ;;  %v3871_v33 = vmul.f32 0.5, %v3870_v17  ;;  %v3890_v46 = vand.u32 2147483648, %v9694_v56  ;;  %vm3877_vm11 = vcmp.eq.f32.partialorder %v9732_v39, 0.0 }
 0x318   : > { %v4005_v53 = vmul.f32 %v9332_v26, %v3795_v4  ;;  %v3888_v44 = vsel %vm3887_vm8, %v9694_v56, %v3886_v41  ;;  %v3965_v56 = vmul.f32 %v9662_v60, %v9169_v2 }
 0x319   : > { %v9770_v59 = vsel %vm4119_vm7, %v4084_v14, -1e+30  ;;  %v3872_v35 = vsub.f32 1.5, %v3871_v33  ;;  %v3891_v48 = vsel %vm3889_vm6, %v3890_v46, %v3888_v44  ;;  %v4191_v46 = vmax.f32 %v9370_v0, %v9381_v47  ;;  %v10429_v0 = vld [vmem:[#allocation16_spill] sm:$0xff] }
 0x31a   : > { %4175 = vst [vmem:[%s5738_s23 + $0xa0] sm:$0xff] %v9770_v59  ;;  %v4200_v44 = vmax.f32 %v9432_v61, %v9438_v18 }
 0x31b   : > { %v3873_v49 = vmul.f32 %v5089_v13, %v3872_v35  ;;  %v3957_v13 = vmul.f32 %v9603_v54, %v9237_v38  ;;  %v3964_v54 = vmul.f32 %v9687_v3, %v9169_v2  ;;  %v4013_v35 = vmul.f32 %v9484_v1, %v3891_v48 }
 0x31c   : > { %v4192_v47 = vmax.f32 %v4191_v46, %v10429_v0  ;;  %v10431_v46 = vld [vmem:[#allocation19_spill] sm:$0xff] }
 0x31d   : > { %v3874_v34 = vmul.f32 %v3873_v49, %v9732_v39  ;;  %v4037_v5 = vadd.f32 %v4005_v53, %v3957_v13 }
 0x31f   : > { %v3876_v63 = vsel %vm3875_vm3, %v9732_v39, %v3874_v34  ;;  %v9808_v39 = vsel %vm4120_vm4, %v4077_v19, -1e+30  ;;  %v4085_v4 = vsub.f32 %v4037_v5, %v9537_v51 }
 0x320   : > { %v3879_v55 = vsel %vm3877_vm11, %v3878_v31, %v3876_v63  ;;  %4168 = vst [vmem:[%s5738_s23 + $0x68] sm:$0xff] %v9808_v39  ;;  %v4045_v63 = vadd.f32 %v4013_v35, %v3965_v56 }
 0x321   : > { %v4012_v17 = vmul.f32 %v9484_v1, %v3879_v55  ;;  %v9844_v55 = vsel %vm4120_vm4, %v4085_v4, -1e+30 }
 0x322   : > { %4176 = vst [vmem:[%s5738_s23 + $0xa8] sm:$0xff] %v9844_v55 }
 0x323   : > { %v4044_v42 = vadd.f32 %v4012_v17, %v3964_v54 }
 0x325   : > { %v3301_v27 = vpop.f32.mrf.mxu0  ;;  %v4092_v50 = vsub.f32 %v4044_v42, %v9655_v10 }
 0x326   : > { %v3339_v29 = vpop.f32.mrf.mxu2  ;;  %v3320_v20 = vpop.f32.mrf.mxu1 }
 0x327   : > { %v3358_v45 = vpop.f32.mrf.mxu3  ;;  %v3321_v33 = vadd.f32 %v3320_v20, %v3301_v27  ;;  %v9826_v49 = vsel %vm4119_vm7, %v4092_v50, -1e+30  ;;  %v4201_v27 = vmax.f32 %v4200_v44, %v9465_v43 }
 0x328   : > { %v3359_v36 = vadd.f32 %v3358_v45, %v3339_v29  ;;  %4183 = vst [vmem:[%s5738_s23 + $0xe0] sm:$0xff] %v9826_v49 }
 0x329   : > { %v9816_v11 = vclamps-f32 %v3321_v33, 1.0 }
 0x32a   : > { %v9804_v14 = vclamps-f32 %v3359_v36, 1.0  ;;  %v4093_v36 = vsub.f32 %v4045_v63, %v9655_v10  ;;  %v4209_v63 = vmax.f32 %v10431_v46, %v9563_v30 }
 0x32b   : > { %v3442_v22 = vmul.f32 %v9816_v11, %v9816_v11 }
 0x32c   : > { %v3443_v3 = vmul.f32 %v9804_v14, %v9804_v14  ;;  %v9865_v43 = vsel %vm4120_vm4, %v4093_v36, -1e+30  ;;  %v10432_v36 = vld [vmem:[#allocation13_spill] sm:$0xff] }
 0x32d   : > { %v3474_v19 = vsub.f32 1.0, %v3442_v22  ;;  %v3303_v29 = vpop.f32.mrf.mxu0  ;;  %v4202_v22 = vmax.f32 %v4201_v27, %v9513_v37  ;;  %4184 = vst [vmem:[%s5738_s23 + $0xe8] sm:$0xff] %v9865_v43  ;;  %v9893_v27 = vmul.f32 %v9804_v14, %v10426_v25 }
 0x32e   : > { %v3475_v21 = vsub.f32 1.0, %v3443_v3  ;;  %v3341_v41 = vpop.f32.mrf.mxu2  ;;  %v3322_v45 = vpop.f32.mrf.mxu1  ;;  %v10430_v3 = vld [vmem:[#allocation18_spill] sm:$0xff] }
 0x32f   : > { %v3360_v31 = vpop.f32.mrf.mxu3  ;;  %v9836_v32 = vmax.f32 %v3474_v19, 0.0  ;;  %v3323_v53 = vadd.f32 %v3322_v45, %v3303_v29  ;;  %v4193_v50 = vmax.f32 %v4192_v47, %v10430_v3 }
 0x330   : > { %v9831_v34 = vmax.f32 %v3475_v21, 0.0  ;;  %v3361_v13 = vadd.f32 %v3360_v31, %v3341_v41 }
 0x331   : > { %v9853_v17 = vclamps-f32 %v3323_v53, 1.0  ;;  %v9883_v53 = vmax.f32 %v4202_v22, %v9736_v8  ;;  %vm3611_vm15 = vcmp.eq.f32.partialorder %v9836_v32, inf  ;;  %vm3613_vm12 = vcmp.eq.f32.partialorder %v9836_v32, 0.0 }
 0x332   : > { %5090 = vrsqrt.f32 %v9831_v34  ;;  %v9838_v60 = vclamps-f32 %v3361_v13, 1.0  ;;  %v9870_v13 = vmax.f32 %v4193_v50, %v9672_v62  ;;  %vm3623_vm7 = vcmp.eq.f32.partialorder %v9831_v34, inf }
 0x333   : > { %5092 = vrsqrt.f32 %v9836_v32  ;;  %v3450_v20 = vmul.f32 %v9853_v17, %v9853_v17  ;;  %vm3625_vm14 = vcmp.eq.f32.partialorder %v9831_v34, 0.0 }
 0x334   : > { %v3451_v54 = vmul.f32 %v9838_v60, %v9838_v60  ;;  %v4195_v30 = vmax.f32 %v9870_v13, %v9786_v9 }
 0x335   : > { %v3482_v21 = vsub.f32 1.0, %v3450_v20  ;;  %v3306_v4 = vpop.f32.mrf.mxu0 }
 0x336   : > { %v3483_v18 = vsub.f32 1.0, %v3451_v54  ;;  %v3344_v33 = vpop.f32.mrf.mxu2  ;;  %v3325_v19 = vpop.f32.mrf.mxu1  ;;  %v9889_v54 = vmax.f32 %v4209_v63, %v10432_v36  ;;  %v3614_v63 = vand.u32 2147483648, %v9836_v32 }
 0x337   : > { %v3363_v48 = vpop.f32.mrf.mxu3  ;;  %v9878_v29 = vmax.f32 %v3482_v21, 0.0  ;;  %v3326_v0 = vadd.f32 %v3325_v19, %v3306_v4  ;;  %v3626_v4 = vand.u32 2147483648, %v9831_v34 }
 0x338   : > { %v5091_v61 = vpop.eup %5090  ;;  %v3364_v5 = vadd.f32 %v3363_v48, %v3344_v33  ;;  %v9860_v35 = vmax.f32 %v3483_v18, 0.0 }
 0x339   : > { %v3617_v42 = vmul.f32 %v5091_v61, %v9831_v34  ;;  %v5093_v56 = vpop.eup %5092  ;;  %v9895_v33 = vclamps-f32 %v3326_v0, 1.0  ;;  %vm3707_vm5 = vcmp.eq.f32.partialorder %v9878_v29, inf  ;;  %vm3709_vm0 = vcmp.eq.f32.partialorder %v9878_v29, 0.0 }
 0x33a   : > { %v9867_v31 = vclamps-f32 %v3364_v5, 1.0  ;;  %v3605_v37 = vmul.f32 %v5093_v56, %v9836_v32  ;;  %5094 = vrsqrt.f32 %v9860_v35  ;;  %v4204_v5 = vmax.f32 %v9883_v53, %v9808_v39 }
 0x33b   : > { %v3618_v41 = vmul.f32 %v5091_v61, %v3617_v42  ;;  %5096 = vrsqrt.f32 %v9878_v29  ;;  %v9900_v42 = vmul.f32 %v9816_v11, %v10426_v25  ;;  %v3458_v21 = vmul.f32 %v9895_v33, %v9895_v33 }
 0x33c   : > { %v3459_v45 = vmul.f32 %v9867_v31, %v9867_v31  ;;  %v3606_v44 = vmul.f32 %v5093_v56, %v3605_v37  ;;  %vm3719_vm13 = vcmp.eq.f32.partialorder %v9860_v35, inf  ;;  %vm3721_vm1 = vcmp.eq.f32.partialorder %v9860_v35, 0.0 }
 0x33d   : > { %v3619_v40 = vmul.f32 0.5, %v3618_v41  ;;  %v3308_v36 = vpop.f32.mrf.mxu0 }
 0x33e   : > { %v3607_v18 = vmul.f32 0.5, %v3606_v44  ;;  %v3491_v20 = vsub.f32 1.0, %v3459_v45  ;;  %v3346_v22 = vpop.f32.mrf.mxu2  ;;  %v3490_v45 = vsub.f32 1.0, %v3458_v21 }
 0x33f   : > { %v3620_v47 = vsub.f32 1.5, %v3619_v40  ;;  %v3951_v40 = vmul.f32 %v9838_v60, %v9245_v16 }
 0x340   : > { %v5095_v3 = vpop.eup %5094  ;;  %v3608_v50 = vsub.f32 1.5, %v3607_v18  ;;  %v9905_v14 = vmax.f32 %v3491_v20, 0.0  ;;  %v3327_v18 = vpop.f32.mrf.mxu1  ;;  %v9930_v60 = vmax.f32 %v3490_v45, 0.0 }
 0x341   : > { %v3621_v48 = vmul.f32 %v5091_v61, %v3620_v47  ;;  %v3365_v61 = vpop.f32.mrf.mxu3  ;;  %v3713_v25 = vmul.f32 %v5095_v3, %v9860_v35  ;;  %v5097_v46 = vpop.eup %5096 }
 0x342   : > { %v3366_v11 = vadd.f32 %v3365_v61, %v3346_v22  ;;  %v3609_v19 = vmul.f32 %v5093_v56, %v3608_v50  ;;  %5098 = vrsqrt.f32 %v9905_v14  ;;  %v3701_v0 = vmul.f32 %v5097_v46, %v9878_v29 }
 0x343   : > { %v3622_v41 = vmul.f32 %v3621_v48, %v9831_v34  ;;  %v3714_v37 = vmul.f32 %v5095_v3, %v3713_v25  ;;  %v9922_v56 = vmul.f32 %v9853_v17, %v9245_v16  ;;  %v3328_v17 = vadd.f32 %v3327_v18, %v3308_v36 }
 0x344   : > { %v3610_v44 = vmul.f32 %v3609_v19, %v9836_v32  ;;  %v9924_v47 = vclamps-f32 %v3366_v11, 1.0  ;;  %v3702_v21 = vmul.f32 %v5097_v46, %v3701_v0  ;;  %v3722_v61 = vand.u32 2147483648, %v9860_v35 }
 0x345   : > { %v3624_v20 = vsel %vm3623_vm7, %v9831_v34, %v3622_v41  ;;  %v3715_v48 = vmul.f32 0.5, %v3714_v37  ;;  %5100 = vrsqrt.f32 %v9930_v60  ;;  %v9945_v19 = vmul.f32 %v9867_v31, %v9237_v38 }
 0x346   : > { %v3612_v50 = vsel %vm3611_vm15, %v9836_v32, %v3610_v44  ;;  %v3467_v16 = vmul.f32 %v9924_v47, %v9924_v47  ;;  %v3703_v11 = vmul.f32 0.5, %v3702_v21  ;;  %v3627_v37 = vsel %vm3625_vm14, %v3626_v4, %v3624_v20 }
 0x347   : > { %v3716_v22 = vsub.f32 1.5, %v3715_v48  ;;  %v3615_v25 = vsel %vm3613_vm12, %v3614_v63, %v3612_v50  ;;  %v3710_v32 = vand.u32 2147483648, %v9878_v29  ;;  %v9952_v63 = vclamps-f32 %v3328_v17, 1.0 }
 0x348   : > { %v5099_v41 = vpop.eup %5098  ;;  %v3499_v0 = vsub.f32 1.0, %v3467_v16  ;;  %v3704_v36 = vsub.f32 1.5, %v3703_v11  ;;  %v3990_v18 = vmul.f32 %v9239_v15, %v3615_v25  ;;  %v3991_v34 = vmul.f32 %v9239_v15, %v3627_v37 }
 0x349   : > { %v3717_v45 = vmul.f32 %v5095_v3, %v3716_v22  ;;  %v3809_v44 = vmul.f32 %v5099_v41, %v9905_v14  ;;  %vm3815_vm2 = vcmp.eq.f32.partialorder %v9905_v14, inf  ;;  %v3466_v4 = vmul.f32 %v9952_v63, %v9952_v63 }
 0x34a   : > { %v9956_v50 = vmax.f32 %v3499_v0, 0.0  ;;  %v3705_v3 = vmul.f32 %v5097_v46, %v3704_v36  ;;  %vm3817_vm9 = vcmp.eq.f32.partialorder %v9905_v14, 0.0  ;;  %v3818_v46 = vand.u32 2147483648, %v9905_v14 }
 0x34b   : > { %v3718_v48 = vmul.f32 %v3717_v45, %v9860_v35  ;;  %v3810_v31 = vmul.f32 %v5099_v41, %v3809_v44  ;;  %v5101_v20 = vpop.eup %5100  ;;  %v4022_v25 = vadd.f32 %v3990_v18, %v9900_v42  ;;  %v3498_v45 = vsub.f32 1.0, %v3466_v4 }
 0x34c   : > { %5102 = vrsqrt.f32 %v9956_v50  ;;  %v3706_v15 = vmul.f32 %v3705_v3, %v9878_v29  ;;  %v3797_v22 = vmul.f32 %v5101_v20, %v9930_v60  ;;  %v4023_v44 = vadd.f32 %v3991_v34, %v9893_v27 }
 0x34d   : > { %v3720_v21 = vsel %vm3719_vm13, %v9860_v35, %v3718_v48  ;;  %v3811_v16 = vmul.f32 0.5, %v3810_v31  ;;  %v9981_v3 = vmax.f32 %v3498_v45, 0.0  ;;  %v4105_v4 = vadd.s32 896, %v9306_v24 }
 0x34e   : > { %v3723_v17 = vsel %vm3721_vm1, %v3722_v61, %v3720_v21  ;;  %v3708_v0 = vsel %vm3707_vm5, %v9878_v29, %v3706_v15  ;;  %v3798_v35 = vmul.f32 %v5101_v20, %v3797_v22  ;;  %v4104_v61 = vadd.s32 768, %v9306_v24 }
 0x34f   : > { %v3999_v11 = vmul.f32 %v9356_v23, %v3723_v17  ;;  %v3812_v37 = vsub.f32 1.5, %v3811_v16  ;;  %v3711_v48 = vsel %vm3709_vm0, %v3710_v32, %v3708_v0  ;;  %v4070_v21 = vsub.f32 %v4022_v25, %v9318_v6 }
 0x350   : > { %v3998_v42 = vmul.f32 %v9356_v23, %v3711_v48  ;;  %v3799_v18 = vmul.f32 0.5, %v3798_v35  ;;  %v9986_v27 = vadd.s32 %v9328_v7, %v4104_v61  ;;  %vm3803_vm10 = vcmp.eq.f32.partialorder %v9930_v60, inf }
 0x351   : > { %v4031_v36 = vadd.f32 %v3999_v11, %v3951_v40  ;;  %v3813_v31 = vmul.f32 %v5099_v41, %v3812_v37  ;;  %5104 = vrsqrt.f32 %v9981_v3  ;;  %v4071_v41 = vsub.f32 %v4023_v44, %v9318_v6 }
 0x352   : > { %v5103_v34 = vpop.eup %5102  ;;  %v4030_v29 = vadd.f32 %v3998_v42, %v9922_v56  ;;  %v3800_v40 = vsub.f32 1.5, %v3799_v18  ;;  %v9999_v32 = vadd.s32 %v9328_v7, %v4105_v4  ;;  %vm4121_vm4 = vcmp.lt.s32.totalorder %v9986_v27, 2000  ;;  %v10124_v27 = vld [vmem:[%s10312_s4 + $0x8] sm:$0xff] }
 0x353   : > { %v3814_v16 = vmul.f32 %v3813_v31, %v9905_v14  ;;  %v3905_v23 = vmul.f32 %v5103_v34, %v9956_v50  ;;  %v4079_v17 = vsub.f32 %v4031_v36, %v9405_v57  ;;  %vm3805_vm3 = vcmp.eq.f32.partialorder %v9930_v60, 0.0  ;;  %v10433_v31 = vld [vmem:[#allocation20_spill] sm:$0xff] }
 0x354   : > { %v4078_v15 = vsub.f32 %v4030_v29, %v9405_v57  ;;  %v3801_v22 = vmul.f32 %v5101_v20, %v3800_v40  ;;  %vm4122_vm8 = vcmp.lt.s32.totalorder %v9999_v32, 2000  ;;  %v10011_v7 = vsel %vm4121_vm4, %v4070_v21, -1e+30 }
 0x355   : > { %v3816_v24 = vsel %vm3815_vm2, %v9905_v14, %v3814_v16  ;;  %v3906_v6 = vmul.f32 %v5103_v34, %v3905_v23  ;;  %v10016_v14 = vsel %vm4122_vm8, %v4071_v41, -1e+30  ;;  %4161 = vst [vmem:[%s5738_s23 + $0x30] sm:$0xff] %v10011_v7  ;;  %v4196_v20 = vmax.f32 %v4195_v30, %v10011_v7 }
 0x356   : > { %v3819_v56 = vsel %vm3817_vm9, %v3818_v46, %v3816_v24  ;;  %v3802_v11 = vmul.f32 %v3801_v22, %v9930_v60  ;;  %v3806_v45 = vand.u32 2147483648, %v9930_v60  ;;  %4162 = vst [vmem:[%s5738_s23 + $0x38] sm:$0xff] %v10016_v14  ;;  %v10030_v44 = vsel %vm4121_vm4, %v4078_v15, -1e+30 }
 0x357   : > { %v4007_v25 = vmul.f32 %v9332_v26, %v3819_v56  ;;  %v3907_v57 = vmul.f32 0.5, %v3906_v6  ;;  %v5105_v46 = vpop.eup %5104  ;;  %v10034_v0 = vsel %vm4122_vm8, %v4079_v17, -1e+30  ;;  %4169 = vst [vmem:[%s5738_s23 + $0x70] sm:$0xff] %v10030_v44  ;;  %v4205_v36 = vmax.f32 %v4204_v5, %v10030_v44 }
 0x358   : > { %v3804_v13 = vsel %vm3803_vm10, %v9930_v60, %v3802_v11  ;;  %v3893_v35 = vmul.f32 %v5105_v46, %v9981_v3  ;;  %4170 = vst [vmem:[%s5738_s23 + $0x78] sm:$0xff] %v10034_v0  ;;  %v4211_v42 = vmax.f32 %v9889_v54, %v10433_v31  ;;  %v3958_v18 = vmul.f32 %v9895_v33, %v9237_v38 }
 0x359   : > { %v4039_v37 = vadd.f32 %v4007_v25, %v9945_v19  ;;  %v3908_v30 = vsub.f32 1.5, %v3907_v57  ;;  %v4197_v19 = vmax.f32 %v4196_v20, %v10016_v14  ;;  %v3807_v61 = vsel %vm3805_vm3, %v3806_v45, %v3804_v13 }
 0x35a   : > { %v4006_v4 = vmul.f32 %v9332_v26, %v3807_v61  ;;  %v3894_v21 = vmul.f32 %v5105_v46, %v3893_v35  ;;  %v4206_v16 = vmax.f32 %v4205_v36, %v10034_v0  ;;  %v4212_v53 = vmax.f32 %v4211_v42, %v9770_v59 }
 0x35b   : > { %v4087_v48 = vsub.f32 %v4039_v37, %v9537_v51  ;;  %v3909_v60 = vmul.f32 %v5103_v34, %v3908_v30  ;;  %4198 = vmax.xlane.f32.xlu1 %v4197_v19  ;;  %vm3911_vm6 = vcmp.eq.f32.partialorder %v9956_v50, inf  ;;  %v3914_v38 = vand.u32 2147483648, %v9956_v50 }
 0x35c   : > { %v4038_v5 = vadd.f32 %v4006_v4, %v3958_v18  ;;  %v3895_v54 = vmul.f32 0.5, %v3894_v21  ;;  %4207 = vmax.xlane.f32.xlu0 %v4206_v16  ;;  %v4218_v26 = vmax.f32 %v9691_v12, %v9699_v52  ;;  %vm3913_vm11 = vcmp.eq.f32.partialorder %v9956_v50, 0.0  ;;  %v10148_v4 = vld [vmem:[%s10312_s4 + $0x10] sm:$0xff] }
 0x35d   : > { %v10060_v29 = vsel %vm4122_vm8, %v4087_v48, -1e+30  ;;  %v3910_v40 = vmul.f32 %v3909_v60, %v9956_v50  ;;  %v4213_v24 = vmax.f32 %v4212_v53, %v9844_v55  ;;  %v3967_v17 = vmul.f32 %v9924_v47, %v9169_v2  ;;  %v10164_v53 = vld [vmem:[%s10312_s4 + $0x18] sm:$0xff] }
 0x35e   : > { %4178 = vst [vmem:[%s5738_s23 + $0xb8] sm:$0xff] %v10060_v29  ;;  %v4086_v33 = vsub.f32 %v4038_v5, %v9537_v51  ;;  %v3896_v23 = vsub.f32 1.5, %v3895_v54  ;;  %vm3899_vm7 = vcmp.eq.f32.partialorder %v9981_v3, inf  ;;  %v3902_v47 = vand.u32 2147483648, %v9981_v3 }
 0x35f   : > { %v3912_v34 = vsel %vm3911_vm6, %v9956_v50, %v3910_v40  ;;  %v4219_v50 = vmax.f32 %v4218_v26, %v9706_v58  ;;  %vm3901_vm14 = vcmp.eq.f32.partialorder %v9981_v3, 0.0  ;;  %v3966_v45 = vmul.f32 %v9952_v63, %v9169_v2  ;;  %v10116_v63 = vld [vmem:[%s10312_s4] sm:$0xff] }
 0x360   : > { %v3915_v41 = vsel %vm3913_vm11, %v3914_v38, %v3912_v34  ;;  %v3897_v56 = vmul.f32 %v5105_v46, %v3896_v23  ;;  %v10079_v22 = vsel %vm4121_vm4, %v4086_v33, -1e+30  ;;  %vm4407_vm15 = vcmask 7168   ;;  %v5421_v26 = vld [vmem:[%s5738_s23] sm:$0xff]  ;;  %v5422_v34 = vld [vmem:[%s5738_s23 + $0x8] sm:$0xff] }
 0x361   : > { %v4015_v15 = vmul.f32 %v9484_v1, %v3915_v41  ;;  %4177 = vst [vmem:[%s5738_s23 + $0xb0] sm:$0xff] %v10079_v22  ;;  %v4214_v51 = vmax.f32 %v4213_v24, %v10079_v22  ;;  %v4220_v37 = vmax.f32 %v4219_v50, %v9723_v28  ;;  %v5423_v41 = vld [vmem:[%s5738_s23 + $0x10] sm:$0xff] }
 0x362   : > { %v3898_v25 = vmul.f32 %v3897_v56, %v9981_v3 }
 0x363   : > { %v4047_v6 = vadd.f32 %v4015_v15, %v3967_v17  ;;  %v4215_v11 = vmax.f32 %v4214_v51, %v10060_v29  ;;  %v4221_v35 = vmax.f32 %v4220_v37, %v9826_v49  ;;  %v5424_v17 = vld [vmem:[%s5738_s23 + $0x18] sm:$0xff] }
 0x364   : > { %v3900_v57 = vsel %vm3899_vm7, %v9981_v3, %v3898_v25 }
 0x365   : > { %v4095_v20 = vsub.f32 %v4047_v6, %v9655_v10  ;;  %v3903_v46 = vsel %vm3901_vm14, %v3902_v47, %v3900_v57  ;;  %4216 = vmax.xlane.f32.xlu2 %v4215_v11  ;;  %v4222_v61 = vmax.f32 %v4221_v35, %v9865_v43 }
 0x366   : > { %v4014_v13 = vmul.f32 %v9484_v1, %v3903_v46 }
 0x367   : > { %v10098_v30 = vsel %vm4122_vm8, %v4095_v20, -1e+30 }
 0x368   : > { %4186 = vst [vmem:[%s5738_s23 + $0xf8] sm:$0xff] %v10098_v30  ;;  %v4046_v3 = vadd.f32 %v4014_v13, %v3966_v45 }
 0x36a   : > { %v4094_v19 = vsub.f32 %v4046_v3, %v9655_v10 }
 0x36c   : > { %v10107_v36 = vsel %vm4121_vm4, %v4094_v19, -1e+30 }
 0x36d   : > { %4185 = vst [vmem:[%s5738_s23 + $0xf0] sm:$0xff] %v10107_v36  ;;  %v4223_v2 = vmax.f32 %v4222_v61, %v10107_v36 }
 0x36f   : > { %v4224_v1 = vmax.f32 %v4223_v2, %v10098_v30 }
 0x371   : > { %4225 = vmax.xlane.f32.xlu1 %v4224_v1 }
 0x3ce   : > { %v4199_v10 = vpop.xlane.xlu1 %4198 }
 0x3cf   : > { %v10119_v32 = vmax.f32 %v10116_v63, %v4199_v10  ;;  %v4208_v31 = vpop.xlane.xlu0 %4207 }
 0x3d0   : > { %v10135_v42 = vmax.f32 %v10124_v27, %v4208_v31 }
 0x3d1   : > { %v4231_v48 = vsub.f32 %v10116_v63, %v10119_v32  ;;  %4412 = vst.msk [vmem:[%s10312_s4] sm:$0xff] %vm4407_vm15, %v10119_v32  ;;  %4253 = vperm.xlu2 %4783, %v10119_v32  }
 0x3d2   : > { %v4232_v18 = vsub.f32 %v10124_v27, %v10135_v42  ;;  %4413 = vst.msk [vmem:[%s10312_s4 + $0x8] sm:$0xff] %vm4407_vm15, %v10135_v42  ;;  %4258 = vperm.xlu0 %4784, %v10135_v42  }
 0x3d8   : > { %v4217_v60 = vpop.xlane.xlu2 %4216 }
 0x3d9   : > { %v10151_v21 = vmax.f32 %v10148_v4, %v4217_v60 }
 0x3db   : > { %v4233_v16 = vsub.f32 %v10148_v4, %v10151_v21  ;;  %4414 = vst.msk [vmem:[%s10312_s4 + $0x10] sm:$0xff] %vm4407_vm15, %v10151_v21  ;;  %4263 = vperm.xlu1 %4785, %v10151_v21  }
 0x3e4   : > { %v4226_v5 = vpop.xlane.xlu1 %4225 }
 0x3e5   : > { %v10167_v40 = vmax.f32 %v10164_v53, %v4226_v5 }
 0x3e7   : > { %v4234_v54 = vsub.f32 %v10164_v53, %v10167_v40  ;;  %4415 = vst.msk [vmem:[%s10312_s4 + $0x18] sm:$0xff] %vm4407_vm15, %v10167_v40  ;;  %4268 = vperm.xlu2 %4783, %v10167_v40  }
 0x42b   : > { %v4254_v38 = vpop.permute.xlu2 %4253 }
 0x42c   : > { %v4271_v33 = vsub.f32 %v5421_v26, %v4254_v38  ;;  %v4272_v23 = vsub.f32 %v5422_v34, %v4254_v38  ;;  %v4273_v24 = vsub.f32 %v5423_v41, %v4254_v38  ;;  %v4274_v15 = vsub.f32 %v5424_v17, %v4254_v38 }
 0x42d   : > { %v4275_v6 = vsub.f32 %v9672_v62, %v4254_v38  ;;  %v4276_v25 = vsub.f32 %v9786_v9, %v4254_v38  ;;  %v4277_v11 = vsub.f32 %v10011_v7, %v4254_v38  ;;  %v4278_v20 = vsub.f32 %v10016_v14, %v4254_v38 }
 0x42e   : > { %v4303_v56 = vmul.f32 1.442695, %v4271_v33  ;;  %v4305_v51 = vmul.f32 1.442695, %v4272_v23  ;;  %v4307_v50 = vmul.f32 1.442695, %v4273_v24 }
 0x42f   : > { %v4309_v47 = vmul.f32 1.442695, %v4274_v15  ;;  %v4311_v57 = vmul.f32 1.442695, %v4275_v6  ;;  %v4313_v46 = vmul.f32 1.442695, %v4276_v25 }
 0x430   : > { %5106 = vpow2.f32 %v4303_v56  ;;  %v4315_v13 = vmul.f32 1.442695, %v4277_v11  ;;  %v4317_v62 = vmul.f32 1.442695, %v4278_v20  ;;  %v5427_v6 = vld [vmem:[%s5738_s23 + $0x50] sm:$0xff]  ;;  %v5428_v20 = vld [vmem:[%s5738_s23 + $0x58] sm:$0xff] }
 0x431   : > { %5108 = vpow2.f32 %v4305_v51 }
 0x432   : > { %5110 = vpow2.f32 %v4307_v50  ;;  %v5426_v50 = vld [vmem:[%s5738_s23 + $0x48] sm:$0xff] }
 0x433   : > { %5112 = vpow2.f32 %v4309_v47 }
 0x434   : > { %5114 = vpow2.f32 %v4311_v57 }
 0x435   : > { %5116 = vpow2.f32 %v4313_v46 }
 0x436   : > { %v5107_v37 = vpop.eup %5106  ;;  %5118 = vpow2.f32 %v4315_v13 }
 0x437   : > { %v5109_v45 = vpop.eup %5108  ;;  %5120 = vpow2.f32 %v4317_v62 }
 0x438   : > { %v4367_v35 = vadd.f32 %v5109_v45, %v5107_v37  ;;  %v5111_v3 = vpop.eup %5110 }
 0x439   : > { %v5113_v61 = vpop.eup %5112 }
 0x43a   : > { %v4368_v19 = vadd.f32 %v5111_v3, %v4367_v35  ;;  %v5115_v2 = vpop.eup %5114 }
 0x43b   : > { %v5117_v1 = vpop.eup %5116 }
 0x43c   : > { %v4369_v9 = vadd.f32 %v5113_v61, %v4368_v19  ;;  %v5119_v14 = vpop.eup %5118 }
 0x43d   : > { %v5121_v5 = vpop.eup %5120 }
 0x43e   : > { %v4370_v7 = vadd.f32 %v5115_v2, %v4369_v9  ;;  %v5429_v2 = vld [vmem:[%s5738_s23 + $0x80] sm:$0xff] }
 0x440   : > { %v4371_v10 = vadd.f32 %v5117_v1, %v4370_v7 }
 0x441   : > { %v4269_v31 = vpop.permute.xlu2 %4268 }
 0x442   : > { %v4372_v60 = vadd.f32 %v5119_v14, %v4371_v10  ;;  %v4295_v38 = vsub.f32 %v9691_v12, %v4269_v31  ;;  %v4296_v26 = vsub.f32 %v9699_v52, %v4269_v31  ;;  %v4297_v33 = vsub.f32 %v9706_v58, %v4269_v31  ;;  %v5425_v12 = vld [vmem:[%s5738_s23 + $0x40] sm:$0xff]  ;;  %v5430_v14 = vld [vmem:[%s5738_s23 + $0x88] sm:$0xff] }
 0x443   : > { %v4298_v34 = vsub.f32 %v9723_v28, %v4269_v31  ;;  %v4299_v56 = vsub.f32 %v9826_v49, %v4269_v31  ;;  %v4300_v25 = vsub.f32 %v9865_v43, %v4269_v31  ;;  %v4301_v47 = vsub.f32 %v10107_v36, %v4269_v31 }
 0x444   : > { %v4373_v23 = vadd.f32 %v5121_v5, %v4372_v60  ;;  %v4351_v41 = vmul.f32 1.442695, %v4295_v38  ;;  %v4353_v24 = vmul.f32 1.442695, %v4296_v26  ;;  %v4355_v17 = vmul.f32 1.442695, %v4297_v33  ;;  %v10189_v15 = vpop.permute.xlu0 %4258 }
 0x445   : > { %v4357_v51 = vmul.f32 1.442695, %v4298_v34  ;;  %v4279_v52 = vsub.f32 %v5425_v12, %v10189_v15  ;;  %v4280_v58 = vsub.f32 %v5426_v50, %v10189_v15  ;;  %v4281_v28 = vsub.f32 %v5427_v6, %v10189_v15  ;;  %v5431_v34 = vld [vmem:[%s5738_s23 + $0x90] sm:$0xff] }
 0x446   : > { %4374 = vadd.xlane.f32.xlu1 %v4373_v23  ;;  %5122 = vpow2.f32 %v4351_v41  ;;  %v4282_v46 = vsub.f32 %v5428_v20, %v10189_v15  ;;  %v4359_v37 = vmul.f32 1.442695, %v4299_v56  ;;  %v4302_v45 = vsub.f32 %v10098_v30, %v4269_v31 }
 0x447   : > { %5124 = vpow2.f32 %v4353_v24  ;;  %v4319_v11 = vmul.f32 1.442695, %v4279_v52  ;;  %v4321_v49 = vmul.f32 1.442695, %v4280_v58  ;;  %v4323_v57 = vmul.f32 1.442695, %v4281_v28 }
 0x448   : > { %5126 = vpow2.f32 %v4355_v17  ;;  %v4361_v13 = vmul.f32 1.442695, %v4300_v25  ;;  %v4283_v43 = vsub.f32 %v9736_v8, %v10189_v15  ;;  %v4363_v35 = vmul.f32 1.442695, %v4301_v47  ;;  %v5432_v52 = vld [vmem:[%s5738_s23 + $0x98] sm:$0xff] }
 0x449   : > { %5128 = vpow2.f32 %v4357_v51  ;;  %v4284_v3 = vsub.f32 %v9808_v39, %v10189_v15  ;;  %v4285_v61 = vsub.f32 %v10030_v44, %v10189_v15  ;;  %v4325_v30 = vmul.f32 1.442695, %v4282_v46 }
 0x44a   : > { %5130 = vpow2.f32 %v4319_v11  ;;  %v4365_v8 = vmul.f32 1.442695, %v4302_v45  ;;  %v4327_v39 = vmul.f32 1.442695, %v4283_v43  ;;  %v4286_v44 = vsub.f32 %v10034_v0, %v10189_v15 }
 0x44b   : > { %5132 = vpow2.f32 %v4321_v49  ;;  %v4329_v38 = vmul.f32 1.442695, %v4284_v3  ;;  %v4331_v33 = vmul.f32 1.442695, %v4285_v61 }
 0x44c   : > { %v5123_v36 = vpop.eup %5122  ;;  %5134 = vpow2.f32 %v4323_v57  ;;  %v4333_v0 = vmul.f32 1.442695, %v4286_v44 }
 0x44d   : > { %v5125_v62 = vpop.eup %5124  ;;  %v10207_v19 = vpop.permute.xlu1 %4263  ;;  %5136 = vpow2.f32 %v4359_v37 }
 0x44e   : > { %v5127_v9 = vpop.eup %5126  ;;  %v4287_v7 = vsub.f32 %v5429_v2, %v10207_v19  ;;  %v4394_v1 = vadd.f32 %v5125_v62, %v5123_v36  ;;  %v4288_v31 = vsub.f32 %v5430_v14, %v10207_v19  ;;  %5138 = vpow2.f32 %v4361_v13 }
 0x44f   : > { %v5129_v10 = vpop.eup %5128  ;;  %5140 = vpow2.f32 %v4363_v35  ;;  %v4289_v23 = vsub.f32 %v5431_v34, %v10207_v19  ;;  %v4290_v50 = vsub.f32 %v5432_v52, %v10207_v19  ;;  %v4291_v28 = vsub.f32 %v9770_v59, %v10207_v19 }
 0x450   : > { %v5131_v60 = vpop.eup %5130  ;;  %v4395_v5 = vadd.f32 %v5127_v9, %v4394_v1  ;;  %5142 = vpow2.f32 %v4325_v30  ;;  %v4335_v24 = vmul.f32 1.442695, %v4287_v7  ;;  %v4337_v12 = vmul.f32 1.442695, %v4288_v31 }
 0x451   : > { %v5133_v26 = vpop.eup %5132  ;;  %5144 = vpow2.f32 %v4365_v8  ;;  %v4339_v25 = vmul.f32 1.442695, %v4289_v23  ;;  %v4292_v57 = vsub.f32 %v9844_v55, %v10207_v19  ;;  %v4341_v20 = vmul.f32 1.442695, %v4290_v50 }
 0x452   : > { %v5135_v41 = vpop.eup %5134  ;;  %v4396_v17 = vadd.f32 %v5129_v10, %v4395_v5  ;;  %v4376_v56 = vadd.f32 %v5133_v26, %v5131_v60  ;;  %5146 = vpow2.f32 %v4327_v39  ;;  %v4293_v43 = vsub.f32 %v10079_v22, %v10207_v19 }
 0x453   : > { %v5137_v51 = vpop.eup %5136  ;;  %5148 = vpow2.f32 %v4329_v38  ;;  %v4343_v59 = vmul.f32 1.442695, %v4291_v28  ;;  %v4294_v61 = vsub.f32 %v10060_v29, %v10207_v19  ;;  %v4345_v55 = vmul.f32 1.442695, %v4292_v57 }
 0x454   : > { %v4397_v58 = vadd.f32 %v5137_v51, %v4396_v17  ;;  %v4377_v15 = vadd.f32 %v5135_v41, %v4376_v56  ;;  %v5139_v6 = vpop.eup %5138  ;;  %5150 = vpow2.f32 %v4331_v33  ;;  %v4347_v7 = vmul.f32 1.442695, %v4293_v43 }
 0x455   : > { %v5141_v47 = vpop.eup %5140  ;;  %5152 = vpow2.f32 %v4335_v24  ;;  %v4349_v14 = vmul.f32 1.442695, %v4294_v61 }
 0x456   : > { %v4398_v11 = vadd.f32 %v5139_v6, %v4397_v58  ;;  %v5143_v49 = vpop.eup %5142  ;;  %5154 = vpow2.f32 %v4337_v12 }
 0x457   : > { %v5145_v46 = vpop.eup %5144  ;;  %5156 = vpow2.f32 %v4333_v0  ;;  %v4378_v45 = vadd.f32 %v5143_v49, %v4377_v15 }
 0x458   : > { %v4399_v37 = vadd.f32 %v5141_v47, %v4398_v11  ;;  %v5147_v13 = vpop.eup %5146  ;;  %5158 = vpow2.f32 %v4339_v25 }
 0x459   : > { %v5149_v36 = vpop.eup %5148  ;;  %v4379_v3 = vadd.f32 %v5147_v13, %v4378_v45  ;;  %5160 = vpow2.f32 %v4341_v20 }
 0x45a   : > { %v4400_v35 = vadd.f32 %v5145_v46, %v4399_v37  ;;  %v5151_v62 = vpop.eup %5150  ;;  %5162 = vpow2.f32 %v4343_v59 }
 0x45b   : > { %v5153_v30 = vpop.eup %5152  ;;  %v4380_v9 = vadd.f32 %v5149_v36, %v4379_v3  ;;  %5164 = vpow2.f32 %v4345_v55 }
 0x45c   : > { %4401 = vadd.xlane.f32.xlu1 %v4400_v35  ;;  %v5155_v2 = vpop.eup %5154  ;;  %5166 = vpow2.f32 %v4347_v7 }
 0x45d   : > { %v5157_v8 = vpop.eup %5156  ;;  %v4381_v22 = vadd.f32 %v5151_v62, %v4380_v9  ;;  %v4385_v1 = vadd.f32 %v5155_v2, %v5153_v30  ;;  %5168 = vpow2.f32 %v4349_v14 }
 0x45e   : > { %v5159_v10 = vpop.eup %5158 }
 0x45f   : > { %v4382_v31 = vadd.f32 %v5157_v8, %v4381_v22  ;;  %v4386_v39 = vadd.f32 %v5159_v10, %v4385_v1  ;;  %v5161_v60 = vpop.eup %5160 }
 0x460   : > { %v5163_v19 = vpop.eup %5162 }
 0x461   : > { %4383 = vadd.xlane.f32.xlu2 %v4382_v31  ;;  %v4387_v29 = vadd.f32 %v5161_v60, %v4386_v39  ;;  %v5165_v44 = vpop.eup %5164 }
 0x462   : > { %v5167_v26 = vpop.eup %5166 }
 0x463   : > { %v4388_v5 = vadd.f32 %v5163_v19, %v4387_v29 }
 0x465   : > { %v4389_v38 = vadd.f32 %v5165_v44, %v4388_v5 }
 0x466   : > { %5520 = shalt.err (!%p5517_p3)
}
 0x467   : > { %s5591_s14 = smov 1024   ;;  %s5592_s7 = smov 2048   ;;  %v4390_v33 = vadd.f32 %v5167_v26, %v4389_v38  ;;  %v5169_v34 = vpop.eup %5168  ;;  %v4235_v41 = vmul.f32 1.442695, %v4231_v48  ;;  %v4243_v17 = vld [vmem:[%s10313_s5] sm:$0xff]  ;;  %v4246_v48 = vld [vmem:[%s10313_s5 + $0x18] sm:$0xff] }
 0x468   : > { %s5593_s9 = smov 64   ;;  %v4241_v52 = vmul.f32 1.442695, %v4234_v54  ;;  %v4237_v63 = vmul.f32 1.442695, %v4232_v18  ;;  %v4244_v40 = vld [vmem:[%s10313_s5 + $0x8] sm:$0xff] }
 0x469   : > { %4696 = dma.vmem_to_hbm [thread:$0]  (%p5703_p5), %s4443_s17, 4096, %s4445_s0, %s4417_s26, %s5591_s14, %s5592_s7, %s5593_s9   ;;  %v4391_v23 = vadd.f32 %v5169_v34, %v4390_v33  ;;  %5170 = vpow2.f32 %v4235_v41  ;;  %v4239_v53 = vmul.f32 1.442695, %v4233_v16 }
 0x46a   : > { %5172 = vpow2.f32 %v4241_v52  ;;  %v4245_v21 = vld [vmem:[%s10313_s5 + $0x10] sm:$0xff] }
 0x46b   : > { %4392 = vadd.xlane.f32.xlu0 %v4391_v23  ;;  %5174 = vpow2.f32 %v4237_v63 }
 0x46c   : > { %5176 = vpow2.f32 %v4239_v53 }
 0x46f   : > { %v5171_v24 = vpop.eup %5170 }
 0x470   : > { %v4247_v56 = vmul.f32 %v5171_v24, %v4243_v17  ;;  %v5173_v32 = vpop.eup %5172 }
 0x471   : > { %v4250_v50 = vmul.f32 %v5173_v32, %v4246_v48  ;;  %v5175_v15 = vpop.eup %5174 }
 0x472   : > { %v4248_v27 = vmul.f32 %v5175_v15, %v4244_v40  ;;  %v5177_v4 = vpop.eup %5176 }
 0x473   : > { %v4249_v16 = vmul.f32 %v5177_v4, %v4245_v21 }
 0x4b9   : > { %v4375_v51 = vpop.xlane.xlu1 %4374 }
 0x4ba   : > { %v4403_v12 = vadd.f32 %v4375_v51, %v4247_v56 }
 0x4bc   : > { %4408 = vst.msk [vmem:[%s10313_s5] sm:$0xff] %vm4407_vm15, %v4403_v12 }
 0x4cf   : > { %v4402_v58 = vpop.xlane.xlu1 %4401 }
 0x4d0   : > { %v4406_v0 = vadd.f32 %v4402_v58, %v4250_v50 }
 0x4d2   : > { %4411 = vst.msk [vmem:[%s10313_s5 + $0x18] sm:$0xff] %vm4407_vm15, %v4406_v0 }
 0x4d4   : > { %v4384_v42 = vpop.xlane.xlu2 %4383 }
 0x4d5   : > { %v4404_v18 = vadd.f32 %v4384_v42, %v4248_v27 }
 0x4d7   : > { %4409 = vst.msk [vmem:[%s10313_s5 + $0x8] sm:$0xff] %vm4407_vm15, %v4404_v18 }
 0x4de   : > { %v4393_v54 = vpop.xlane.xlu0 %4392 }
 0x4df   : > { %v4405_v6 = vadd.f32 %v4393_v54, %v4249_v16 }
 0x4e1   : > { %4410 = vst.msk [vmem:[%s10313_s5 + $0x10] sm:$0xff] %vm4407_vm15, %v4405_v6 }
 0x4e2 PF: > { %s10434_s28 = sld [smem:[#allocation11_spill]]  ;;  %s4483_s14 = sand.u32 1, %s5559_s18  }
 0x4e3   : > { %p4707_p5 = pnand %p4615_p11, %p5673_p6  ;;  %s4484_s7 = scalar_lea.sflag [#allocation4], %s4483_s14 }
 0x4e5   : > { %p4708_p7 = pneg %p4707_p5 }
 0x4e7   : > { %5554 = dma.done.wait (%p4708_p7), %s4484_s7, 4096  }
 0x4e8   : > { %5556 = vsyncadd (%p4708_p7), %s4484_s7, 4294963200  ;;  %s23_s23 = sadd.s32 1, %s10434_s28   ;;  %s10435_s9 = sld [smem:[#allocation12_spill]] }
 0x4e9   : > { %p20_p9 = scmp.ge.s32.totalorder %s23_s23, 4   ;;  %s10436_s18 = smov %s5563_s19 }
 0x4ea   : > { %s10437_s19 = smov %s5567_s20  ;;  %s10438_s20 = smov %s5712_s30 }
 0x4eb   : > { %s10439_s21 = smov %s5575_s22  ;;  %22 = sbr.rel (!%p20_p9) target bundleno = 9 (0x9), region = 114 }
 0x4ee   : > { %s10440_s22 = smov %s10435_s9 }
 0x4f0   :  { %4490 = vsyncpa [#allocation3], 1 }
 0x4f1   :  { %4492 = vsyncpa [#allocation3 + $0x1], 1 }
 0x4f2   :  { %4493 = vsyncpa [#allocation6], 1 }
 0x4f3   :  { %4495 = vsyncpa [#allocation6 + $0x1], 1 }
 0x4f4   :  { %4496 = vsyncpa [#allocation4], 1 }
 0x4f5   :  { %4498 = vsyncpa [#allocation4 + $0x1], 1 }

</bundles_post_ra>
